<compile_context>
chip_gen: v6e
topology: v6e:2x2x1
jax: 0.10.0
libtpu: 0.0.40
codegen_flags: <defaults>
</compile_context>

<pallas_src>
import math
from functools import partial

import numpy as np
import jax
import jax.numpy as jnp
from jax.experimental import pallas as pl
from jax.experimental.pallas import tpu as pltpu

EPS = 1e-5          # PyTorch BatchNorm2d default eps
F32 = jnp.float32
BF16 = jnp.bfloat16


def _pad8(n):
    return ((n + 7) // 8) * 8


# ------------------------------ fused kernel ------------------------------- #

def dqn_fused_kernel(
    # conv1-stage operands (auto-DMA'd into VMEM before the body runs)
    x_ref, s1_ref, w1_ref, gc1_ref, gt1_ref,
    pr_ref,
    s2_ref, gc2_ref, gt2_ref,
    s3_ref, gc3_ref, gt3_ref,
    sh_ref, prm_ref,
    # late-stage constants left in HBM; prefetched manually below
    pc_hbm, w2_hbm, w3_hbm, wh_hbm,
    # output
    o_ref,
    # scratch: prefetch landing buffers + DMA semaphores
    pc_vm, w2_vm, w3_vm, wh_vm, dma_sem,
    *, bn_counts,
):
    n1, n2, n3 = bn_counts

    # Kick off the DMAs for everything that is only needed after conv1, so the
    # HBM traffic streams in behind the conv1 / pool MXU work.
    pc_cp = pltpu.make_async_copy(pc_hbm, pc_vm, dma_sem.at[0]); pc_cp.start()
    w2_cp = pltpu.make_async_copy(w2_hbm, w2_vm, dma_sem.at[1]); w2_cp.start()
    w3_cp = pltpu.make_async_copy(w3_hbm, w3_vm, dma_sem.at[2]); w3_cp.start()
    wh_cp = pltpu.make_async_copy(wh_hbm, wh_vm, dma_sem.at[3]); wh_cp.start()

    def mm(a, b):
        return jnp.dot(a, b, preferred_element_type=F32)

    def mm_hi(a, b):   # accurate multi-pass matmul for the BN statistics
        return jnp.dot(a, b, precision=jax.lax.Precision.HIGHEST,
                       preferred_element_type=F32)

    def conv_bn_relu(act, s_ref_, w_ref_, gc_ref_, gt_ref_, gamma, beta, n):
        k = w_ref_.shape[0]
        rp = s_ref_.shape[0] // k
        # im2col row gather: ONE stacked matmul over all kernel rows ki.
        r = mm(s_ref_[...], act.astype(BF16))                  # [k*rp, Win*Cin]
        # kron-expanded weights fold kj / stride / channel mixing per ki.
        y = mm(r[0:rp].astype(BF16), w_ref_[0])
        for ki in range(1, k):
            y = y + mm(r[ki * rp:(ki + 1) * rp].astype(BF16), w_ref_[ki])
        # Training-mode BatchNorm (batch statistics).  Padded rows of y are
        # exactly zero, so sums are unaffected; n is the logical count.
        stats = jnp.concatenate(
            [jnp.sum(y, axis=0, keepdims=True),
             jnp.sum(y * y, axis=0, keepdims=True)], axis=0)   # [2, Wo*C]
        stats = mm_hi(stats, gc_ref_[...]) * (1.0 / n)         # [2, C]
        mean = stats[0:1]
        var = stats[1:2] - mean * mean
        scale = gamma * jax.lax.rsqrt(var + EPS)               # [1, C]
        shift = beta - mean * scale
        ss = mm(jnp.concatenate([scale, shift], axis=0), gt_ref_[...])  # [2, Wo*C]
        return jnp.maximum(y * ss[0:1] + ss[1:2], 0.0)

    prm = prm_ref[...]

    # conv1 + bn1 + relu : [B*80, 80] -> [80, 312]   (rows padded 78 -> 80)
    y = conv_bn_relu(x_ref[...], s1_ref, w1_ref, gc1_ref, gt1_ref,
                     prm[0:1, 0:8], prm[1:2, 0:8], n1)

    # 2x2 / stride-2 max pool : [80, 312] -> [40, 152]
    rp_p = pr_ref.shape[0] // 2
    rsel = mm(pr_ref[...], y.astype(BF16))                     # [2*rp_p, 312]
    rmax = jnp.maximum(rsel[0:rp_p], rsel[rp_p:2 * rp_p]).astype(BF16)
    pc_cp.wait()
    pooled = jnp.maximum(mm(rmax, pc_vm[0]), mm(rmax, pc_vm[1]))   # [40, 152]

    # conv2 + bn2 + relu : [40, 152] -> [16, 128]
    w2_cp.wait()
    y = conv_bn_relu(pooled, s2_ref, w2_vm, gc2_ref, gt2_ref,
                     prm[2:3, 0:16], prm[3:4, 0:16], n2)

    # conv3 + bn3 + relu : [16, 128] -> [8, 48]      (rows padded 6 -> 8)
    w3_cp.wait()
    y = conv_bn_relu(y, s3_ref, w3_vm, gc3_ref, gt3_ref,
                     prm[4:5, 0:16], prm[5:6, 0:16], n3)

    # head: PyTorch NCHW flatten folded into permuted, lane-padded head weights.
    wh_cp.wait()
    nblk = wh_vm.shape[0]
    blk = sh_ref.shape[0] // nblk
    z = mm(sh_ref[...], y.astype(BF16))                        # [nblk*blk, 48]
    out = mm(z[0:blk].astype(BF16), wh_vm[0])
    for i in range(1, nblk):
        out = out + mm(z[i * blk:(i + 1) * blk].astype(BF16), wh_vm[i])
    o_ref[...] = out + prm[6:7, :]                             # [blk, 128]


# ------------------- host-side constant / weight preparation ---------------- #

def _row_select_stacked(B, h_in, h_out, k, stride, rows_in):
    """Stacked-over-ki row-gather matrix [k*rp, rows_in], rp = pad8(B*h_out).
    Row (ki, b, ho) selects activation row b*h_in + stride*ho + ki.  Padded
    rows (beyond B*h_out in each ki block) are all zero."""
    rp = _pad8(B * h_out)
    s = np.zeros((k * rp, rows_in), np.float32)
    for ki in range(k):
        for b in range(B):
            for ho in range(h_out):
                s[ki * rp + b * h_out + ho, b * h_in + stride * ho + ki] = 1.0
    return jnp.asarray(s, BF16)


def _col_conv_weights(w, w_in, w_out, stride):
    """Conv weights [kH,kW,Cin,Cout] -> per-ki matrices [k, w_in*Cin, w_out*Cout]
    acting on the lane-dense [.., W*C] layout (kj / stride / channels folded)."""
    w = np.asarray(w, np.float32)
    k, _, cin, cout = w.shape
    mats = np.zeros((k, w_in * cin, w_out * cout), np.float32)
    for ki in range(k):
        for kj in range(k):
            g = np.zeros((w_in, w_out), np.float32)
            for wo in range(w_out):
                g[stride * wo + kj, wo] = 1.0
            mats[ki] += np.kron(g, w[ki, kj])
    return jnp.asarray(mats, BF16)


def _bn_group(w_out, c):
    """gc [w_out*c, c]: per-channel column reduce; gt = gc.T: broadcast back."""
    gc = np.zeros((w_out * c, c), np.float32)
    for wo in range(w_out):
        for ch in range(c):
            gc[wo * c + ch, ch] = 1.0
    return jnp.asarray(gc), jnp.asarray(gc.T.copy())


def _pool_row_select(B, h_conv, h_pool, rows_in, rows_out):
    pr = np.zeros((2 * rows_out, rows_in), np.float32)
    for d in range(2):
        for b in range(B):
            for r in range(h_pool):
                pr[d * rows_out + b * h_pool + r, b * h_conv + 2 * r + d] = 1.0
    return jnp.asarray(pr, BF16)


def _pool_col_select(w_conv, w_pool, c):
    pc = np.zeros((2, w_conv * c, w_pool * c), np.float32)
    for d in range(2):
        for q in range(w_pool):
            for ch in range(c):
                pc[d, (2 * q + d) * c + ch, q * c + ch] = 1.0
    return jnp.asarray(pc, BF16)


def _head_mats(wh, B, h3, w3, c3, rows_in, out_lanes=128):
    """Row selector [h3*blk, rows_in] (blk = pad8(B)) plus NCHW-flatten-permuted,
    lane-padded head weights [h3, w3*c3, out_lanes]."""
    blk = _pad8(B)
    sh = np.zeros((h3 * blk, rows_in), np.float32)
    for i in range(h3):
        for b in range(B):
            sh[i * blk + b, b * h3 + i] = 1.0
    wh = np.asarray(wh, np.float32)                     # [c3*h3*w3, 2]
    whp = np.zeros((h3, w3 * c3, out_lanes), np.float32)
    for i in range(h3):
        for j in range(w3):
            for c in range(c3):
                whp[i, j * c3 + c, :wh.shape[1]] = wh[c * (h3 * w3) + i * w3 + j]
    return jnp.asarray(sh, BF16), jnp.asarray(whp, BF16)


def _pack_small_params(p):
    """Pack BN gamma/beta (x3) and the head bias into one [8,128] f32 tile."""
    prm = np.zeros((8, 128), np.float32)
    prm[0, :8] = np.asarray(p["g1"]).reshape(-1)
    prm[1, :8] = np.asarray(p["be1"]).reshape(-1)
    prm[2, :16] = np.asarray(p["g2"]).reshape(-1)
    prm[3, :16] = np.asarray(p["be2"]).reshape(-1)
    prm[4, :16] = np.asarray(p["g3"]).reshape(-1)
    prm[5, :16] = np.asarray(p["be3"]).reshape(-1)
    prm[6, :2] = np.asarray(p["bh"]).reshape(-1)
    return jnp.asarray(prm)


def init_params(key):
    """PyTorch-like init. Conv weights stored [kH, kW, Cin, Cout]; head [144, 2].
    (Real PyTorch weights [Cout,Cin,kH,kW] would be permuted to [kH,kW,Cin,Cout].)"""
    ks = jax.random.split(key, 5)

    def u(k, shape, fan_in):
        bound = 1.0 / math.sqrt(fan_in)
        return jax.random.uniform(k, shape, F32, -bound, bound)

    p = {}
    p["w1"] = u(ks[0], (4, 4, 1, 8), 1 * 4 * 4)
    p["w2"] = u(ks[1], (4, 4, 8, 16), 8 * 4 * 4)
    p["w3"] = u(ks[2], (4, 4, 16, 16), 16 * 4 * 4)
    # Conv biases omitted on purpose: under training-mode BatchNorm they cancel
    # exactly in (y - mean(y)), so the forward output is unchanged.
    p["g1"], p["be1"] = jnp.ones((1, 8), F32), jnp.zeros((1, 8), F32)
    p["g2"], p["be2"] = jnp.ones((1, 16), F32), jnp.zeros((1, 16), F32)
    p["g3"], p["be3"] = jnp.ones((1, 16), F32), jnp.zeros((1, 16), F32)
    p["wh"] = u(ks[3], (144, 2), 144)     # Linear(144, 2), stored transposed
    p["bh"] = u(ks[4], (1, 2), 144)
    return p


def prepare_fused(params, B):
    """One-time host prep: fold im2col / pooling / flatten into bf16 constants."""
    rp1 = _pad8(B * 39)
    rp_p = _pad8(B * 19)
    rp2 = _pad8(B * 8)
    rp3 = _pad8(B * 3)
    f = {}
    # conv1 stage (front-loaded VMEM operands)
    f["s1"] = _row_select_stacked(B, 80, 39, 4, 2, rows_in=B * 80)
    f["w1"] = _col_conv_weights(params["w1"], 80, 39, 2)
    f["gc1"], f["gt1"] = _bn_group(39, 8)
    # max pool
    f["pr"] = _pool_row_select(B, 39, 19, rows_in=rp1, rows_out=rp_p)
    f["pc"] = _pool_col_select(39, 19, 8)                 # prefetched from HBM
    # conv2
    f["s2"] = _row_select_stacked(B, 19, 8, 4, 2, rows_in=rp_p)
    f["w2"] = _col_conv_weights(params["w2"], 19, 8, 2)   # prefetched from HBM
    f["gc2"], f["gt2"] = _bn_group(8, 16)
    # conv3
    f["s3"] = _row_select_stacked(B, 8, 3, 4, 2, rows_in=rp2)
    f["w3"] = _col_conv_weights(params["w3"], 8, 3, 2)    # prefetched from HBM
    f["gc3"], f["gt3"] = _bn_group(3, 16)
    # head
    f["sh"], f["whp"] = _head_mats(params["wh"], B, 3, 3, 16, rows_in=rp3)
    # packed tiny per-channel params (BN affine + head bias)
    f["prm"] = _pack_small_params(params)
    return f


# --------------------------------- wrapper ---------------------------------- #

def dqn_forward(fused, x_nchw):
    B, C, H, W = x_nchw.shape
    blk = _pad8(B)
    # NCHW -> lane-dense [B*H, W*C] (C == 1, so effectively a reshape); bf16.
    x2d = jnp.transpose(x_nchw, (0, 2, 3, 1)).reshape(B * H, W * C).astype(BF16)

    bn_counts = (float(B * 39 * 39), float(B * 8 * 8), float(B * 3 * 3))

    vmem = pl.BlockSpec(memory_space=pltpu.MemorySpace.VMEM)
    hbm = pl.BlockSpec(memory_space=pl.ANY)

    operands = (
        x2d,
        fused["s1"], fused["w1"], fused["gc1"], fused["gt1"],
        fused["pr"],
        fused["s2"], fused["gc2"], fused["gt2"],
        fused["s3"], fused["gc3"], fused["gt3"],
        fused["sh"], fused["prm"],
        # late-stage constants: stay in HBM, prefetched inside the kernel
        fused["pc"], fused["w2"], fused["w3"], fused["whp"],
    )

    out = pl.pallas_call(
        partial(dqn_fused_kernel, bn_counts=bn_counts),
        out_shape=jax.ShapeDtypeStruct((blk, 128), F32),
        in_specs=[vmem] * 14 + [hbm] * 4,
        out_specs=vmem,
        scratch_shapes=[
            pltpu.VMEM(fused["pc"].shape, BF16),
            pltpu.VMEM(fused["w2"].shape, BF16),
            pltpu.VMEM(fused["w3"].shape, BF16),
            pltpu.VMEM(fused["whp"].shape, BF16),
            pltpu.SemaphoreType.DMA((4,)),
        ],
    )(*operands)
    # TODO(synk): for many independent states on v7x, add a leading "parallel"
    # grid axis over batches so work shards across both TensorCores.
    return out[:B, :2]


# ----------------------------- pure-JAX reference --------------------------- #

def dqn_reference(params, x_nchw):
    """Pure-JAX reference (same math as the PyTorch module in training mode)."""
    x = jnp.transpose(x_nchw, (0, 2, 3, 1)).astype(F32)

    def conv(v, w):
        return jax.lax.conv_general_dilated(
            v, w, window_strides=(2, 2), padding="VALID",
            dimension_numbers=("NHWC", "HWIO", "NHWC"))

    def bn_relu(v, gamma, beta):
        mean = jnp.mean(v, axis=(0, 1, 2), keepdims=True)
        var = jnp.mean((v - mean) ** 2, axis=(0, 1, 2), keepdims=True)
        vhat = (v - mean) * jax.lax.rsqrt(var + EPS)
        return jnp.maximum(vhat * gamma.reshape(1, 1, 1, -1)
                           + beta.reshape(1, 1, 1, -1), 0.0)

    y = bn_relu(conv(x, params["w1"]), params["g1"], params["be1"])
    y = jax.lax.reduce_window(y, -jnp.inf, jax.lax.max,
                              (1, 2, 2, 1), (1, 2, 2, 1), "VALID")
    y = bn_relu(conv(y, params["w2"]), params["g2"], params["be2"])
    y = bn_relu(conv(y, params["w3"]), params["g3"], params["be3"])
    flat = jnp.transpose(y, (0, 3, 1, 2)).reshape(y.shape[0], -1)
    return flat @ params["wh"] + params["bh"]


if __name__ == "__main__":
    root = jax.random.PRNGKey(0)
    pkey, xkey = jax.random.split(root)
    params = init_params(pkey)
    fused = prepare_fused(params, B=2)
    # Batch of 2 single-channel 80x80 "screens" (the spatial size implied by
    # head = Linear(144, 2)).
    x = jax.random.uniform(xkey, (2, 1, 80, 80), F32)

    out = jax.jit(dqn_forward)(fused, x)
    out = jax.block_until_ready(out)
    assert out.shape == (2, 2) and out.dtype == F32

    # Correctness check against a plain-JAX reference (tolerance generous
    # enough for the bf16 MXU operand rounding used throughout the kernel).
    ref = dqn_reference(params, x)
    assert jnp.allclose(out, ref, atol=3e-2, rtol=3e-2), (out, ref)

    print("KERNEL_OK")
</pallas_src>

<mosaic_0001>
module attributes {stable_mosaic.version = 11 : i64} {
  func.func @dqn_fused_kernel(%arg0: memref<160x80xbf16, #tpu.memory_space<vmem>>, %arg1: memref<320x160xbf16, #tpu.memory_space<vmem>>, %arg2: memref<4x80x312xbf16, #tpu.memory_space<vmem>>, %arg3: memref<312x8xf32, #tpu.memory_space<vmem>>, %arg4: memref<8x312xf32, #tpu.memory_space<vmem>>, %arg5: memref<80x80xbf16, #tpu.memory_space<vmem>>, %arg6: memref<64x40xbf16, #tpu.memory_space<vmem>>, %arg7: memref<128x16xf32, #tpu.memory_space<vmem>>, %arg8: memref<16x128xf32, #tpu.memory_space<vmem>>, %arg9: memref<32x16xbf16, #tpu.memory_space<vmem>>, %arg10: memref<48x16xf32, #tpu.memory_space<vmem>>, %arg11: memref<16x48xf32, #tpu.memory_space<vmem>>, %arg12: memref<24x8xbf16, #tpu.memory_space<vmem>>, %arg13: memref<8x128xf32, #tpu.memory_space<vmem>>, %arg14: memref<2x312x152xbf16, #tpu.memory_space<any>>, %arg15: memref<4x152x128xbf16, #tpu.memory_space<any>>, %arg16: memref<4x128x48xbf16, #tpu.memory_space<any>>, %arg17: memref<3x48x128xbf16, #tpu.memory_space<any>>, %arg18: memref<8x128xf32, #tpu.memory_space<vmem>>, %arg19: memref<2x312x152xbf16, #tpu.memory_space<vmem>>, %arg20: memref<4x152x128xbf16, #tpu.memory_space<vmem>>, %arg21: memref<4x128x48xbf16, #tpu.memory_space<vmem>>, %arg22: memref<3x48x128xbf16, #tpu.memory_space<vmem>>, %arg23: memref<4x!tpu.dma_semaphore, #tpu.memory_space<semaphore_mem>>) attributes {dimension_semantics = [], scalar_prefetch = 0 : i64, scratch_operands = 5 : i64, tpu.core_type = #tpu.core_type<tc>} {
    %c0_i32 = arith.constant 0 : i32
    %0 = tpu.memref_slice %arg23[%c0_i32] : memref<4x!tpu.dma_semaphore, #tpu.memory_space<semaphore_mem>> -> memref<1x!tpu.dma_semaphore, #tpu.memory_space<semaphore_mem>>
    %1 = tpu.memref_squeeze %0 : memref<1x!tpu.dma_semaphore, #tpu.memory_space<semaphore_mem>> -> memref<!tpu.dma_semaphore, #tpu.memory_space<semaphore_mem>>
    tpu.enqueue_dma source(%arg14 : memref<2x312x152xbf16, #tpu.memory_space<any>>) target(%arg19 : memref<2x312x152xbf16, #tpu.memory_space<vmem>>) target_semaphore(%1 : memref<!tpu.dma_semaphore, #tpu.memory_space<semaphore_mem>>)
    %c1_i32 = arith.constant 1 : i32
    %2 = tpu.memref_slice %arg23[%c1_i32] : memref<4x!tpu.dma_semaphore, #tpu.memory_space<semaphore_mem>> -> memref<1x!tpu.dma_semaphore, #tpu.memory_space<semaphore_mem>>
    %3 = tpu.memref_squeeze %2 : memref<1x!tpu.dma_semaphore, #tpu.memory_space<semaphore_mem>> -> memref<!tpu.dma_semaphore, #tpu.memory_space<semaphore_mem>>
    tpu.enqueue_dma source(%arg15 : memref<4x152x128xbf16, #tpu.memory_space<any>>) target(%arg20 : memref<4x152x128xbf16, #tpu.memory_space<vmem>>) target_semaphore(%3 : memref<!tpu.dma_semaphore, #tpu.memory_space<semaphore_mem>>)
    %c2_i32 = arith.constant 2 : i32
    %4 = tpu.memref_slice %arg23[%c2_i32] : memref<4x!tpu.dma_semaphore, #tpu.memory_space<semaphore_mem>> -> memref<1x!tpu.dma_semaphore, #tpu.memory_space<semaphore_mem>>
    %5 = tpu.memref_squeeze %4 : memref<1x!tpu.dma_semaphore, #tpu.memory_space<semaphore_mem>> -> memref<!tpu.dma_semaphore, #tpu.memory_space<semaphore_mem>>
    tpu.enqueue_dma source(%arg16 : memref<4x128x48xbf16, #tpu.memory_space<any>>) target(%arg21 : memref<4x128x48xbf16, #tpu.memory_space<vmem>>) target_semaphore(%5 : memref<!tpu.dma_semaphore, #tpu.memory_space<semaphore_mem>>)
    %c3_i32 = arith.constant 3 : i32
    %6 = tpu.memref_slice %arg23[%c3_i32] : memref<4x!tpu.dma_semaphore, #tpu.memory_space<semaphore_mem>> -> memref<1x!tpu.dma_semaphore, #tpu.memory_space<semaphore_mem>>
    %7 = tpu.memref_squeeze %6 : memref<1x!tpu.dma_semaphore, #tpu.memory_space<semaphore_mem>> -> memref<!tpu.dma_semaphore, #tpu.memory_space<semaphore_mem>>
    tpu.enqueue_dma source(%arg17 : memref<3x48x128xbf16, #tpu.memory_space<any>>) target(%arg22 : memref<3x48x128xbf16, #tpu.memory_space<vmem>>) target_semaphore(%7 : memref<!tpu.dma_semaphore, #tpu.memory_space<semaphore_mem>>)
    %c0 = arith.constant 0 : index
    %c0_0 = arith.constant 0 : index
    %8 = vector.load %arg13[%c0, %c0_0] : memref<8x128xf32, #tpu.memory_space<vmem>>, vector<8x128xf32>
    %c0_1 = arith.constant 0 : index
    %c0_2 = arith.constant 0 : index
    %9 = vector.load %arg0[%c0_1, %c0_2] : memref<160x80xbf16, #tpu.memory_space<vmem>>, vector<160x80xbf16>
    %10 = vector.extract_strided_slice %8 {offsets = [0, 0], sizes = [1, 8], strides = [1, 1]} : vector<8x128xf32> to vector<1x8xf32>
    %11 = vector.extract_strided_slice %8 {offsets = [1, 0], sizes = [1, 8], strides = [1, 1]} : vector<8x128xf32> to vector<1x8xf32>
    %c0_3 = arith.constant 0 : index
    %c0_4 = arith.constant 0 : index
    %12 = vector.load %arg1[%c0_3, %c0_4] : memref<320x160xbf16, #tpu.memory_space<vmem>>, vector<320x160xbf16>
    %cst = arith.constant dense<0.000000e+00> : vector<320x80xf32>
    %13 = tpu.matmul %12, %9, %cst {dimension_numbers = #tpu.dot_dimension_numbers<[1], [0], [0], [1], [0, 0, 1, 1], [], []>} : vector<320x160xbf16>, vector<160x80xbf16>, vector<320x80xf32> -> vector<320x80xf32>
    %14 = vector.extract_strided_slice %13 {offsets = [0, 0], sizes = [80, 80], strides = [1, 1]} : vector<320x80xf32> to vector<80x80xf32>
    %15 = arith.truncf %14 : vector<80x80xf32> to vector<80x80xbf16>
    %c0_5 = arith.constant 0 : index
    %c0_6 = arith.constant 0 : index
    %c0_7 = arith.constant 0 : index
    %16 = vector.load %arg2[%c0_5, %c0_6, %c0_7] : memref<4x80x312xbf16, #tpu.memory_space<vmem>>, vector<1x80x312xbf16>
    %17 = vector.shape_cast %16 : vector<1x80x312xbf16> to vector<80x312xbf16>
    %cst_8 = arith.constant dense<0.000000e+00> : vector<80x312xf32>
    %18 = tpu.matmul %15, %17, %cst_8 {dimension_numbers = #tpu.dot_dimension_numbers<[1], [0], [0], [1], [0, 0, 1, 1], [], []>} : vector<80x80xbf16>, vector<80x312xbf16>, vector<80x312xf32> -> vector<80x312xf32>
    %19 = vector.extract_strided_slice %13 {offsets = [80, 0], sizes = [80, 80], strides = [1, 1]} : vector<320x80xf32> to vector<80x80xf32>
    %20 = arith.truncf %19 : vector<80x80xf32> to vector<80x80xbf16>
    %c1 = arith.constant 1 : index
    %c0_9 = arith.constant 0 : index
    %c0_10 = arith.constant 0 : index
    %21 = vector.load %arg2[%c1, %c0_9, %c0_10] : memref<4x80x312xbf16, #tpu.memory_space<vmem>>, vector<1x80x312xbf16>
    %22 = vector.shape_cast %21 : vector<1x80x312xbf16> to vector<80x312xbf16>
    %cst_11 = arith.constant dense<0.000000e+00> : vector<80x312xf32>
    %23 = tpu.matmul %20, %22, %cst_11 {dimension_numbers = #tpu.dot_dimension_numbers<[1], [0], [0], [1], [0, 0, 1, 1], [], []>} : vector<80x80xbf16>, vector<80x312xbf16>, vector<80x312xf32> -> vector<80x312xf32>
    %24 = arith.addf %18, %23 : vector<80x312xf32>
    %25 = vector.extract_strided_slice %13 {offsets = [160, 0], sizes = [80, 80], strides = [1, 1]} : vector<320x80xf32> to vector<80x80xf32>
    %26 = arith.truncf %25 : vector<80x80xf32> to vector<80x80xbf16>
    %c2 = arith.constant 2 : index
    %c0_12 = arith.constant 0 : index
    %c0_13 = arith.constant 0 : index
    %27 = vector.load %arg2[%c2, %c0_12, %c0_13] : memref<4x80x312xbf16, #tpu.memory_space<vmem>>, vector<1x80x312xbf16>
    %28 = vector.shape_cast %27 : vector<1x80x312xbf16> to vector<80x312xbf16>
    %cst_14 = arith.constant dense<0.000000e+00> : vector<80x312xf32>
    %29 = tpu.matmul %26, %28, %cst_14 {dimension_numbers = #tpu.dot_dimension_numbers<[1], [0], [0], [1], [0, 0, 1, 1], [], []>} : vector<80x80xbf16>, vector<80x312xbf16>, vector<80x312xf32> -> vector<80x312xf32>
    %30 = arith.addf %24, %29 : vector<80x312xf32>
    %31 = vector.extract_strided_slice %13 {offsets = [240, 0], sizes = [80, 80], strides = [1, 1]} : vector<320x80xf32> to vector<80x80xf32>
    %32 = arith.truncf %31 : vector<80x80xf32> to vector<80x80xbf16>
    %c3 = arith.constant 3 : index
    %c0_15 = arith.constant 0 : index
    %c0_16 = arith.constant 0 : index
    %33 = vector.load %arg2[%c3, %c0_15, %c0_16] : memref<4x80x312xbf16, #tpu.memory_space<vmem>>, vector<1x80x312xbf16>
    %34 = vector.shape_cast %33 : vector<1x80x312xbf16> to vector<80x312xbf16>
    %cst_17 = arith.constant dense<0.000000e+00> : vector<80x312xf32>
    %35 = tpu.matmul %32, %34, %cst_17 {dimension_numbers = #tpu.dot_dimension_numbers<[1], [0], [0], [1], [0, 0, 1, 1], [], []>} : vector<80x80xbf16>, vector<80x312xbf16>, vector<80x312xf32> -> vector<80x312xf32>
    %36 = arith.addf %30, %35 : vector<80x312xf32>
    %cst_18 = arith.constant dense<0.000000e+00> : vector<312xf32>
    %37 = vector.multi_reduction <add>, %36, %cst_18 [0] : vector<80x312xf32> to vector<312xf32>
    %38 = vector.shape_cast %37 : vector<312xf32> to vector<1x312xf32>
    %39 = arith.mulf %36, %36 : vector<80x312xf32>
    %cst_19 = arith.constant dense<0.000000e+00> : vector<312xf32>
    %40 = vector.multi_reduction <add>, %39, %cst_19 [0] : vector<80x312xf32> to vector<312xf32>
    %41 = vector.shape_cast %40 : vector<312xf32> to vector<1x312xf32>
    %42 = tpu.concatenate %38, %41 in 0 : vector<1x312xf32>, vector<1x312xf32> -> vector<2x312xf32>
    %c0_20 = arith.constant 0 : index
    %c0_21 = arith.constant 0 : index
    %43 = vector.load %arg3[%c0_20, %c0_21] : memref<312x8xf32, #tpu.memory_space<vmem>>, vector<312x8xf32>
    %cst_22 = arith.constant dense<0.000000e+00> : vector<2x8xf32>
    %44 = tpu.matmul %42, %43, %cst_22 {dimension_numbers = #tpu.dot_dimension_numbers<[1], [0], [0], [1], [0, 0, 1, 1], [], []>, precision = #tpu.contract_precision<fp32>} : vector<2x312xf32>, vector<312x8xf32>, vector<2x8xf32> -> vector<2x8xf32>
    %cst_23 = arith.constant 3.28731112E-4 : f32
    %45 = vector.broadcast %cst_23 : f32 to vector<2x8xf32>
    %46 = arith.mulf %44, %45 : vector<2x8xf32>
    %47 = vector.extract_strided_slice %46 {offsets = [0, 0], sizes = [1, 8], strides = [1, 1]} : vector<2x8xf32> to vector<1x8xf32>
    %48 = vector.extract_strided_slice %46 {offsets = [1, 0], sizes = [1, 8], strides = [1, 1]} : vector<2x8xf32> to vector<1x8xf32>
    %49 = arith.mulf %47, %47 : vector<1x8xf32>
    %50 = arith.subf %48, %49 : vector<1x8xf32>
    %cst_24 = arith.constant 9.99999974E-6 : f32
    %51 = vector.broadcast %cst_24 : f32 to vector<1x8xf32>
    %52 = arith.addf %50, %51 : vector<1x8xf32>
    %53 = math.rsqrt %52 : vector<1x8xf32>
    %54 = arith.mulf %10, %53 : vector<1x8xf32>
    %55 = arith.mulf %47, %54 : vector<1x8xf32>
    %56 = arith.subf %11, %55 : vector<1x8xf32>
    %57 = tpu.concatenate %54, %56 in 0 : vector<1x8xf32>, vector<1x8xf32> -> vector<2x8xf32>
    %c0_25 = arith.constant 0 : index
    %c0_26 = arith.constant 0 : index
    %58 = vector.load %arg4[%c0_25, %c0_26] : memref<8x312xf32, #tpu.memory_space<vmem>>, vector<8x312xf32>
    %cst_27 = arith.constant dense<0.000000e+00> : vector<2x312xf32>
    %59 = tpu.matmul %57, %58, %cst_27 {dimension_numbers = #tpu.dot_dimension_numbers<[1], [0], [0], [1], [0, 0, 1, 1], [], []>} : vector<2x8xf32>, vector<8x312xf32>, vector<2x312xf32> -> vector<2x312xf32>
    %60 = vector.extract_strided_slice %59 {offsets = [0, 0], sizes = [1, 312], strides = [1, 1]} : vector<2x312xf32> to vector<1x312xf32>
    %61 = vector.broadcast %60 : vector<1x312xf32> to vector<80x312xf32>
    %62 = arith.mulf %36, %61 : vector<80x312xf32>
    %63 = vector.extract_strided_slice %59 {offsets = [1, 0], sizes = [1, 312], strides = [1, 1]} : vector<2x312xf32> to vector<1x312xf32>
    %64 = vector.broadcast %63 : vector<1x312xf32> to vector<80x312xf32>
    %65 = arith.addf %62, %64 : vector<80x312xf32>
    %cst_28 = arith.constant 0.000000e+00 : f32
    %66 = vector.broadcast %cst_28 : f32 to vector<80x312xf32>
    %67 = arith.maximumf %65, %66 : vector<80x312xf32>
    %c0_29 = arith.constant 0 : index
    %c0_30 = arith.constant 0 : index
    %68 = vector.load %arg5[%c0_29, %c0_30] : memref<80x80xbf16, #tpu.memory_space<vmem>>, vector<80x80xbf16>
    %69 = arith.truncf %67 : vector<80x312xf32> to vector<80x312xbf16>
    %cst_31 = arith.constant dense<0.000000e+00> : vector<80x312xf32>
    %70 = tpu.matmul %68, %69, %cst_31 {dimension_numbers = #tpu.dot_dimension_numbers<[1], [0], [0], [1], [0, 0, 1, 1], [], []>} : vector<80x80xbf16>, vector<80x312xbf16>, vector<80x312xf32> -> vector<80x312xf32>
    %71 = vector.extract_strided_slice %70 {offsets = [0, 0], sizes = [40, 312], strides = [1, 1]} : vector<80x312xf32> to vector<40x312xf32>
    %72 = vector.extract_strided_slice %70 {offsets = [40, 0], sizes = [40, 312], strides = [1, 1]} : vector<80x312xf32> to vector<40x312xf32>
    %73 = arith.maximumf %71, %72 : vector<40x312xf32>
    %74 = arith.truncf %73 : vector<40x312xf32> to vector<40x312xbf16>
    %c0_i32_32 = arith.constant 0 : i32
    %75 = tpu.memref_slice %arg23[%c0_i32_32] : memref<4x!tpu.dma_semaphore, #tpu.memory_space<semaphore_mem>> -> memref<1x!tpu.dma_semaphore, #tpu.memory_space<semaphore_mem>>
    %76 = tpu.memref_squeeze %75 : memref<1x!tpu.dma_semaphore, #tpu.memory_space<semaphore_mem>> -> memref<!tpu.dma_semaphore, #tpu.memory_space<semaphore_mem>>
    tpu.wait_dma2 semaphore(%76 : memref<!tpu.dma_semaphore, #tpu.memory_space<semaphore_mem>>) src(%arg14 : memref<2x312x152xbf16, #tpu.memory_space<any>>) dst(%arg19 : memref<2x312x152xbf16, #tpu.memory_space<vmem>>)
    %c0_33 = arith.constant 0 : index
    %c0_34 = arith.constant 0 : index
    %c0_35 = arith.constant 0 : index
    %77 = vector.load %arg19[%c0_33, %c0_34, %c0_35] : memref<2x312x152xbf16, #tpu.memory_space<vmem>>, vector<1x312x152xbf16>
    %78 = vector.shape_cast %77 : vector<1x312x152xbf16> to vector<312x152xbf16>
    %cst_36 = arith.constant dense<0.000000e+00> : vector<40x152xf32>
    %79 = tpu.matmul %74, %78, %cst_36 {dimension_numbers = #tpu.dot_dimension_numbers<[1], [0], [0], [1], [0, 0, 1, 1], [], []>} : vector<40x312xbf16>, vector<312x152xbf16>, vector<40x152xf32> -> vector<40x152xf32>
    %c1_37 = arith.constant 1 : index
    %c0_38 = arith.constant 0 : index
    %c0_39 = arith.constant 0 : index
    %80 = vector.load %arg19[%c1_37, %c0_38, %c0_39] : memref<2x312x152xbf16, #tpu.memory_space<vmem>>, vector<1x312x152xbf16>
    %81 = vector.shape_cast %80 : vector<1x312x152xbf16> to vector<312x152xbf16>
    %cst_40 = arith.constant dense<0.000000e+00> : vector<40x152xf32>
    %82 = tpu.matmul %74, %81, %cst_40 {dimension_numbers = #tpu.dot_dimension_numbers<[1], [0], [0], [1], [0, 0, 1, 1], [], []>} : vector<40x312xbf16>, vector<312x152xbf16>, vector<40x152xf32> -> vector<40x152xf32>
    %83 = arith.maximumf %79, %82 : vector<40x152xf32>
    %c1_i32_41 = arith.constant 1 : i32
    %84 = tpu.memref_slice %arg23[%c1_i32_41] : memref<4x!tpu.dma_semaphore, #tpu.memory_space<semaphore_mem>> -> memref<1x!tpu.dma_semaphore, #tpu.memory_space<semaphore_mem>>
    %85 = tpu.memref_squeeze %84 : memref<1x!tpu.dma_semaphore, #tpu.memory_space<semaphore_mem>> -> memref<!tpu.dma_semaphore, #tpu.memory_space<semaphore_mem>>
    tpu.wait_dma2 semaphore(%85 : memref<!tpu.dma_semaphore, #tpu.memory_space<semaphore_mem>>) src(%arg15 : memref<4x152x128xbf16, #tpu.memory_space<any>>) dst(%arg20 : memref<4x152x128xbf16, #tpu.memory_space<vmem>>)
    %86 = vector.extract_strided_slice %8 {offsets = [2, 0], sizes = [1, 16], strides = [1, 1]} : vector<8x128xf32> to vector<1x16xf32>
    %87 = vector.extract_strided_slice %8 {offsets = [3, 0], sizes = [1, 16], strides = [1, 1]} : vector<8x128xf32> to vector<1x16xf32>
    %c0_42 = arith.constant 0 : index
    %c0_43 = arith.constant 0 : index
    %88 = vector.load %arg6[%c0_42, %c0_43] : memref<64x40xbf16, #tpu.memory_space<vmem>>, vector<64x40xbf16>
    %89 = arith.truncf %83 : vector<40x152xf32> to vector<40x152xbf16>
    %cst_44 = arith.constant dense<0.000000e+00> : vector<64x152xf32>
    %90 = tpu.matmul %88, %89, %cst_44 {dimension_numbers = #tpu.dot_dimension_numbers<[1], [0], [0], [1], [0, 0, 1, 1], [], []>} : vector<64x40xbf16>, vector<40x152xbf16>, vector<64x152xf32> -> vector<64x152xf32>
    %91 = vector.extract_strided_slice %90 {offsets = [0, 0], sizes = [16, 152], strides = [1, 1]} : vector<64x152xf32> to vector<16x152xf32>
    %92 = arith.truncf %91 : vector<16x152xf32> to vector<16x152xbf16>
    %c0_45 = arith.constant 0 : index
    %c0_46 = arith.constant 0 : index
    %c0_47 = arith.constant 0 : index
    %93 = vector.load %arg20[%c0_45, %c0_46, %c0_47] : memref<4x152x128xbf16, #tpu.memory_space<vmem>>, vector<1x152x128xbf16>
    %94 = vector.shape_cast %93 : vector<1x152x128xbf16> to vector<152x128xbf16>
    %cst_48 = arith.constant dense<0.000000e+00> : vector<16x128xf32>
    %95 = tpu.matmul %92, %94, %cst_48 {dimension_numbers = #tpu.dot_dimension_numbers<[1], [0], [0], [1], [0, 0, 1, 1], [], []>} : vector<16x152xbf16>, vector<152x128xbf16>, vector<16x128xf32> -> vector<16x128xf32>
    %96 = vector.extract_strided_slice %90 {offsets = [16, 0], sizes = [16, 152], strides = [1, 1]} : vector<64x152xf32> to vector<16x152xf32>
    %97 = arith.truncf %96 : vector<16x152xf32> to vector<16x152xbf16>
    %c1_49 = arith.constant 1 : index
    %c0_50 = arith.constant 0 : index
    %c0_51 = arith.constant 0 : index
    %98 = vector.load %arg20[%c1_49, %c0_50, %c0_51] : memref<4x152x128xbf16, #tpu.memory_space<vmem>>, vector<1x152x128xbf16>
    %99 = vector.shape_cast %98 : vector<1x152x128xbf16> to vector<152x128xbf16>
    %cst_52 = arith.constant dense<0.000000e+00> : vector<16x128xf32>
    %100 = tpu.matmul %97, %99, %cst_52 {dimension_numbers = #tpu.dot_dimension_numbers<[1], [0], [0], [1], [0, 0, 1, 1], [], []>} : vector<16x152xbf16>, vector<152x128xbf16>, vector<16x128xf32> -> vector<16x128xf32>
    %101 = arith.addf %95, %100 : vector<16x128xf32>
    %102 = vector.extract_strided_slice %90 {offsets = [32, 0], sizes = [16, 152], strides = [1, 1]} : vector<64x152xf32> to vector<16x152xf32>
    %103 = arith.truncf %102 : vector<16x152xf32> to vector<16x152xbf16>
    %c2_53 = arith.constant 2 : index
    %c0_54 = arith.constant 0 : index
    %c0_55 = arith.constant 0 : index
    %104 = vector.load %arg20[%c2_53, %c0_54, %c0_55] : memref<4x152x128xbf16, #tpu.memory_space<vmem>>, vector<1x152x128xbf16>
    %105 = vector.shape_cast %104 : vector<1x152x128xbf16> to vector<152x128xbf16>
    %cst_56 = arith.constant dense<0.000000e+00> : vector<16x128xf32>
    %106 = tpu.matmul %103, %105, %cst_56 {dimension_numbers = #tpu.dot_dimension_numbers<[1], [0], [0], [1], [0, 0, 1, 1], [], []>} : vector<16x152xbf16>, vector<152x128xbf16>, vector<16x128xf32> -> vector<16x128xf32>
    %107 = arith.addf %101, %106 : vector<16x128xf32>
    %108 = vector.extract_strided_slice %90 {offsets = [48, 0], sizes = [16, 152], strides = [1, 1]} : vector<64x152xf32> to vector<16x152xf32>
    %109 = arith.truncf %108 : vector<16x152xf32> to vector<16x152xbf16>
    %c3_57 = arith.constant 3 : index
    %c0_58 = arith.constant 0 : index
    %c0_59 = arith.constant 0 : index
    %110 = vector.load %arg20[%c3_57, %c0_58, %c0_59] : memref<4x152x128xbf16, #tpu.memory_space<vmem>>, vector<1x152x128xbf16>
    %111 = vector.shape_cast %110 : vector<1x152x128xbf16> to vector<152x128xbf16>
    %cst_60 = arith.constant dense<0.000000e+00> : vector<16x128xf32>
    %112 = tpu.matmul %109, %111, %cst_60 {dimension_numbers = #tpu.dot_dimension_numbers<[1], [0], [0], [1], [0, 0, 1, 1], [], []>} : vector<16x152xbf16>, vector<152x128xbf16>, vector<16x128xf32> -> vector<16x128xf32>
    %113 = arith.addf %107, %112 : vector<16x128xf32>
    %cst_61 = arith.constant dense<0.000000e+00> : vector<128xf32>
    %114 = vector.multi_reduction <add>, %113, %cst_61 [0] : vector<16x128xf32> to vector<128xf32>
    %115 = vector.shape_cast %114 : vector<128xf32> to vector<1x128xf32>
    %116 = arith.mulf %113, %113 : vector<16x128xf32>
    %cst_62 = arith.constant dense<0.000000e+00> : vector<128xf32>
    %117 = vector.multi_reduction <add>, %116, %cst_62 [0] : vector<16x128xf32> to vector<128xf32>
    %118 = vector.shape_cast %117 : vector<128xf32> to vector<1x128xf32>
    %119 = tpu.concatenate %115, %118 in 0 : vector<1x128xf32>, vector<1x128xf32> -> vector<2x128xf32>
    %c0_63 = arith.constant 0 : index
    %c0_64 = arith.constant 0 : index
    %120 = vector.load %arg7[%c0_63, %c0_64] : memref<128x16xf32, #tpu.memory_space<vmem>>, vector<128x16xf32>
    %cst_65 = arith.constant dense<0.000000e+00> : vector<2x16xf32>
    %121 = tpu.matmul %119, %120, %cst_65 {dimension_numbers = #tpu.dot_dimension_numbers<[1], [0], [0], [1], [0, 0, 1, 1], [], []>, precision = #tpu.contract_precision<fp32>} : vector<2x128xf32>, vector<128x16xf32>, vector<2x16xf32> -> vector<2x16xf32>
    %cst_66 = arith.constant 7.812500e-03 : f32
    %122 = vector.broadcast %cst_66 : f32 to vector<2x16xf32>
    %123 = arith.mulf %121, %122 : vector<2x16xf32>
    %124 = vector.extract_strided_slice %123 {offsets = [0, 0], sizes = [1, 16], strides = [1, 1]} : vector<2x16xf32> to vector<1x16xf32>
    %125 = vector.extract_strided_slice %123 {offsets = [1, 0], sizes = [1, 16], strides = [1, 1]} : vector<2x16xf32> to vector<1x16xf32>
    %126 = arith.mulf %124, %124 : vector<1x16xf32>
    %127 = arith.subf %125, %126 : vector<1x16xf32>
    %cst_67 = arith.constant 9.99999974E-6 : f32
    %128 = vector.broadcast %cst_67 : f32 to vector<1x16xf32>
    %129 = arith.addf %127, %128 : vector<1x16xf32>
    %130 = math.rsqrt %129 : vector<1x16xf32>
    %131 = arith.mulf %86, %130 : vector<1x16xf32>
    %132 = arith.mulf %124, %131 : vector<1x16xf32>
    %133 = arith.subf %87, %132 : vector<1x16xf32>
    %134 = tpu.concatenate %131, %133 in 0 : vector<1x16xf32>, vector<1x16xf32> -> vector<2x16xf32>
    %c0_68 = arith.constant 0 : index
    %c0_69 = arith.constant 0 : index
    %135 = vector.load %arg8[%c0_68, %c0_69] : memref<16x128xf32, #tpu.memory_space<vmem>>, vector<16x128xf32>
    %cst_70 = arith.constant dense<0.000000e+00> : vector<2x128xf32>
    %136 = tpu.matmul %134, %135, %cst_70 {dimension_numbers = #tpu.dot_dimension_numbers<[1], [0], [0], [1], [0, 0, 1, 1], [], []>} : vector<2x16xf32>, vector<16x128xf32>, vector<2x128xf32> -> vector<2x128xf32>
    %137 = vector.extract_strided_slice %136 {offsets = [0, 0], sizes = [1, 128], strides = [1, 1]} : vector<2x128xf32> to vector<1x128xf32>
    %138 = vector.broadcast %137 : vector<1x128xf32> to vector<16x128xf32>
    %139 = arith.mulf %113, %138 : vector<16x128xf32>
    %140 = vector.extract_strided_slice %136 {offsets = [1, 0], sizes = [1, 128], strides = [1, 1]} : vector<2x128xf32> to vector<1x128xf32>
    %141 = vector.broadcast %140 : vector<1x128xf32> to vector<16x128xf32>
    %142 = arith.addf %139, %141 : vector<16x128xf32>
    %cst_71 = arith.constant 0.000000e+00 : f32
    %143 = vector.broadcast %cst_71 : f32 to vector<16x128xf32>
    %144 = arith.maximumf %142, %143 : vector<16x128xf32>
    %c2_i32_72 = arith.constant 2 : i32
    %145 = tpu.memref_slice %arg23[%c2_i32_72] : memref<4x!tpu.dma_semaphore, #tpu.memory_space<semaphore_mem>> -> memref<1x!tpu.dma_semaphore, #tpu.memory_space<semaphore_mem>>
    %146 = tpu.memref_squeeze %145 : memref<1x!tpu.dma_semaphore, #tpu.memory_space<semaphore_mem>> -> memref<!tpu.dma_semaphore, #tpu.memory_space<semaphore_mem>>
    tpu.wait_dma2 semaphore(%146 : memref<!tpu.dma_semaphore, #tpu.memory_space<semaphore_mem>>) src(%arg16 : memref<4x128x48xbf16, #tpu.memory_space<any>>) dst(%arg21 : memref<4x128x48xbf16, #tpu.memory_space<vmem>>)
    %147 = vector.extract_strided_slice %8 {offsets = [4, 0], sizes = [1, 16], strides = [1, 1]} : vector<8x128xf32> to vector<1x16xf32>
    %148 = vector.extract_strided_slice %8 {offsets = [5, 0], sizes = [1, 16], strides = [1, 1]} : vector<8x128xf32> to vector<1x16xf32>
    %c0_73 = arith.constant 0 : index
    %c0_74 = arith.constant 0 : index
    %149 = vector.load %arg9[%c0_73, %c0_74] : memref<32x16xbf16, #tpu.memory_space<vmem>>, vector<32x16xbf16>
    %150 = arith.truncf %144 : vector<16x128xf32> to vector<16x128xbf16>
    %cst_75 = arith.constant dense<0.000000e+00> : vector<32x128xf32>
    %151 = tpu.matmul %149, %150, %cst_75 {dimension_numbers = #tpu.dot_dimension_numbers<[1], [0], [0], [1], [0, 0, 1, 1], [], []>} : vector<32x16xbf16>, vector<16x128xbf16>, vector<32x128xf32> -> vector<32x128xf32>
    %152 = vector.extract_strided_slice %151 {offsets = [0, 0], sizes = [8, 128], strides = [1, 1]} : vector<32x128xf32> to vector<8x128xf32>
    %153 = arith.truncf %152 : vector<8x128xf32> to vector<8x128xbf16>
    %c0_76 = arith.constant 0 : index
    %c0_77 = arith.constant 0 : index
    %c0_78 = arith.constant 0 : index
    %154 = vector.load %arg21[%c0_76, %c0_77, %c0_78] : memref<4x128x48xbf16, #tpu.memory_space<vmem>>, vector<1x128x48xbf16>
    %155 = vector.shape_cast %154 : vector<1x128x48xbf16> to vector<128x48xbf16>
    %cst_79 = arith.constant dense<0.000000e+00> : vector<8x48xf32>
    %156 = tpu.matmul %153, %155, %cst_79 {dimension_numbers = #tpu.dot_dimension_numbers<[1], [0], [0], [1], [0, 0, 1, 1], [], []>} : vector<8x128xbf16>, vector<128x48xbf16>, vector<8x48xf32> -> vector<8x48xf32>
    %157 = vector.extract_strided_slice %151 {offsets = [8, 0], sizes = [8, 128], strides = [1, 1]} : vector<32x128xf32> to vector<8x128xf32>
    %158 = arith.truncf %157 : vector<8x128xf32> to vector<8x128xbf16>
    %c1_80 = arith.constant 1 : index
    %c0_81 = arith.constant 0 : index
    %c0_82 = arith.constant 0 : index
    %159 = vector.load %arg21[%c1_80, %c0_81, %c0_82] : memref<4x128x48xbf16, #tpu.memory_space<vmem>>, vector<1x128x48xbf16>
    %160 = vector.shape_cast %159 : vector<1x128x48xbf16> to vector<128x48xbf16>
    %cst_83 = arith.constant dense<0.000000e+00> : vector<8x48xf32>
    %161 = tpu.matmul %158, %160, %cst_83 {dimension_numbers = #tpu.dot_dimension_numbers<[1], [0], [0], [1], [0, 0, 1, 1], [], []>} : vector<8x128xbf16>, vector<128x48xbf16>, vector<8x48xf32> -> vector<8x48xf32>
    %162 = arith.addf %156, %161 : vector<8x48xf32>
    %163 = vector.extract_strided_slice %151 {offsets = [16, 0], sizes = [8, 128], strides = [1, 1]} : vector<32x128xf32> to vector<8x128xf32>
    %164 = arith.truncf %163 : vector<8x128xf32> to vector<8x128xbf16>
    %c2_84 = arith.constant 2 : index
    %c0_85 = arith.constant 0 : index
    %c0_86 = arith.constant 0 : index
    %165 = vector.load %arg21[%c2_84, %c0_85, %c0_86] : memref<4x128x48xbf16, #tpu.memory_space<vmem>>, vector<1x128x48xbf16>
    %166 = vector.shape_cast %165 : vector<1x128x48xbf16> to vector<128x48xbf16>
    %cst_87 = arith.constant dense<0.000000e+00> : vector<8x48xf32>
    %167 = tpu.matmul %164, %166, %cst_87 {dimension_numbers = #tpu.dot_dimension_numbers<[1], [0], [0], [1], [0, 0, 1, 1], [], []>} : vector<8x128xbf16>, vector<128x48xbf16>, vector<8x48xf32> -> vector<8x48xf32>
    %168 = arith.addf %162, %167 : vector<8x48xf32>
    %169 = vector.extract_strided_slice %151 {offsets = [24, 0], sizes = [8, 128], strides = [1, 1]} : vector<32x128xf32> to vector<8x128xf32>
    %170 = arith.truncf %169 : vector<8x128xf32> to vector<8x128xbf16>
    %c3_88 = arith.constant 3 : index
    %c0_89 = arith.constant 0 : index
    %c0_90 = arith.constant 0 : index
    %171 = vector.load %arg21[%c3_88, %c0_89, %c0_90] : memref<4x128x48xbf16, #tpu.memory_space<vmem>>, vector<1x128x48xbf16>
    %172 = vector.shape_cast %171 : vector<1x128x48xbf16> to vector<128x48xbf16>
    %cst_91 = arith.constant dense<0.000000e+00> : vector<8x48xf32>
    %173 = tpu.matmul %170, %172, %cst_91 {dimension_numbers = #tpu.dot_dimension_numbers<[1], [0], [0], [1], [0, 0, 1, 1], [], []>} : vector<8x128xbf16>, vector<128x48xbf16>, vector<8x48xf32> -> vector<8x48xf32>
    %174 = arith.addf %168, %173 : vector<8x48xf32>
    %cst_92 = arith.constant dense<0.000000e+00> : vector<48xf32>
    %175 = vector.multi_reduction <add>, %174, %cst_92 [0] : vector<8x48xf32> to vector<48xf32>
    %176 = vector.shape_cast %175 : vector<48xf32> to vector<1x48xf32>
    %177 = arith.mulf %174, %174 : vector<8x48xf32>
    %cst_93 = arith.constant dense<0.000000e+00> : vector<48xf32>
    %178 = vector.multi_reduction <add>, %177, %cst_93 [0] : vector<8x48xf32> to vector<48xf32>
    %179 = vector.shape_cast %178 : vector<48xf32> to vector<1x48xf32>
    %180 = tpu.concatenate %176, %179 in 0 : vector<1x48xf32>, vector<1x48xf32> -> vector<2x48xf32>
    %c0_94 = arith.constant 0 : index
    %c0_95 = arith.constant 0 : index
    %181 = vector.load %arg10[%c0_94, %c0_95] : memref<48x16xf32, #tpu.memory_space<vmem>>, vector<48x16xf32>
    %cst_96 = arith.constant dense<0.000000e+00> : vector<2x16xf32>
    %182 = tpu.matmul %180, %181, %cst_96 {dimension_numbers = #tpu.dot_dimension_numbers<[1], [0], [0], [1], [0, 0, 1, 1], [], []>, precision = #tpu.contract_precision<fp32>} : vector<2x48xf32>, vector<48x16xf32>, vector<2x16xf32> -> vector<2x16xf32>
    %cst_97 = arith.constant 0.055555556 : f32
    %183 = vector.broadcast %cst_97 : f32 to vector<2x16xf32>
    %184 = arith.mulf %182, %183 : vector<2x16xf32>
    %185 = vector.extract_strided_slice %184 {offsets = [0, 0], sizes = [1, 16], strides = [1, 1]} : vector<2x16xf32> to vector<1x16xf32>
    %186 = vector.extract_strided_slice %184 {offsets = [1, 0], sizes = [1, 16], strides = [1, 1]} : vector<2x16xf32> to vector<1x16xf32>
    %187 = arith.mulf %185, %185 : vector<1x16xf32>
    %188 = arith.subf %186, %187 : vector<1x16xf32>
    %cst_98 = arith.constant 9.99999974E-6 : f32
    %189 = vector.broadcast %cst_98 : f32 to vector<1x16xf32>
    %190 = arith.addf %188, %189 : vector<1x16xf32>
    %191 = math.rsqrt %190 : vector<1x16xf32>
    %192 = arith.mulf %147, %191 : vector<1x16xf32>
    %193 = arith.mulf %185, %192 : vector<1x16xf32>
    %194 = arith.subf %148, %193 : vector<1x16xf32>
    %195 = tpu.concatenate %192, %194 in 0 : vector<1x16xf32>, vector<1x16xf32> -> vector<2x16xf32>
    %c0_99 = arith.constant 0 : index
    %c0_100 = arith.constant 0 : index
    %196 = vector.load %arg11[%c0_99, %c0_100] : memref<16x48xf32, #tpu.memory_space<vmem>>, vector<16x48xf32>
    %cst_101 = arith.constant dense<0.000000e+00> : vector<2x48xf32>
    %197 = tpu.matmul %195, %196, %cst_101 {dimension_numbers = #tpu.dot_dimension_numbers<[1], [0], [0], [1], [0, 0, 1, 1], [], []>} : vector<2x16xf32>, vector<16x48xf32>, vector<2x48xf32> -> vector<2x48xf32>
    %198 = vector.extract_strided_slice %197 {offsets = [0, 0], sizes = [1, 48], strides = [1, 1]} : vector<2x48xf32> to vector<1x48xf32>
    %199 = vector.broadcast %198 : vector<1x48xf32> to vector<8x48xf32>
    %200 = arith.mulf %174, %199 : vector<8x48xf32>
    %201 = vector.extract_strided_slice %197 {offsets = [1, 0], sizes = [1, 48], strides = [1, 1]} : vector<2x48xf32> to vector<1x48xf32>
    %202 = vector.broadcast %201 : vector<1x48xf32> to vector<8x48xf32>
    %203 = arith.addf %200, %202 : vector<8x48xf32>
    %cst_102 = arith.constant 0.000000e+00 : f32
    %204 = vector.broadcast %cst_102 : f32 to vector<8x48xf32>
    %205 = arith.maximumf %203, %204 : vector<8x48xf32>
    %c3_i32_103 = arith.constant 3 : i32
    %206 = tpu.memref_slice %arg23[%c3_i32_103] : memref<4x!tpu.dma_semaphore, #tpu.memory_space<semaphore_mem>> -> memref<1x!tpu.dma_semaphore, #tpu.memory_space<semaphore_mem>>
    %207 = tpu.memref_squeeze %206 : memref<1x!tpu.dma_semaphore, #tpu.memory_space<semaphore_mem>> -> memref<!tpu.dma_semaphore, #tpu.memory_space<semaphore_mem>>
    tpu.wait_dma2 semaphore(%207 : memref<!tpu.dma_semaphore, #tpu.memory_space<semaphore_mem>>) src(%arg17 : memref<3x48x128xbf16, #tpu.memory_space<any>>) dst(%arg22 : memref<3x48x128xbf16, #tpu.memory_space<vmem>>)
    %c0_104 = arith.constant 0 : index
    %c0_105 = arith.constant 0 : index
    %208 = vector.load %arg12[%c0_104, %c0_105] : memref<24x8xbf16, #tpu.memory_space<vmem>>, vector<24x8xbf16>
    %209 = arith.truncf %205 : vector<8x48xf32> to vector<8x48xbf16>
    %cst_106 = arith.constant dense<0.000000e+00> : vector<24x48xf32>
    %210 = tpu.matmul %208, %209, %cst_106 {dimension_numbers = #tpu.dot_dimension_numbers<[1], [0], [0], [1], [0, 0, 1, 1], [], []>} : vector<24x8xbf16>, vector<8x48xbf16>, vector<24x48xf32> -> vector<24x48xf32>
    %211 = vector.extract_strided_slice %210 {offsets = [0, 0], sizes = [8, 48], strides = [1, 1]} : vector<24x48xf32> to vector<8x48xf32>
    %212 = arith.truncf %211 : vector<8x48xf32> to vector<8x48xbf16>
    %c0_107 = arith.constant 0 : index
    %c0_108 = arith.constant 0 : index
    %c0_109 = arith.constant 0 : index
    %213 = vector.load %arg22[%c0_107, %c0_108, %c0_109] : memref<3x48x128xbf16, #tpu.memory_space<vmem>>, vector<1x48x128xbf16>
    %214 = vector.shape_cast %213 : vector<1x48x128xbf16> to vector<48x128xbf16>
    %cst_110 = arith.constant dense<0.000000e+00> : vector<8x128xf32>
    %215 = tpu.matmul %212, %214, %cst_110 {dimension_numbers = #tpu.dot_dimension_numbers<[1], [0], [0], [1], [0, 0, 1, 1], [], []>} : vector<8x48xbf16>, vector<48x128xbf16>, vector<8x128xf32> -> vector<8x128xf32>
    %216 = vector.extract_strided_slice %210 {offsets = [8, 0], sizes = [8, 48], strides = [1, 1]} : vector<24x48xf32> to vector<8x48xf32>
    %217 = arith.truncf %216 : vector<8x48xf32> to vector<8x48xbf16>
    %c1_111 = arith.constant 1 : index
    %c0_112 = arith.constant 0 : index
    %c0_113 = arith.constant 0 : index
    %218 = vector.load %arg22[%c1_111, %c0_112, %c0_113] : memref<3x48x128xbf16, #tpu.memory_space<vmem>>, vector<1x48x128xbf16>
    %219 = vector.shape_cast %218 : vector<1x48x128xbf16> to vector<48x128xbf16>
    %cst_114 = arith.constant dense<0.000000e+00> : vector<8x128xf32>
    %220 = tpu.matmul %217, %219, %cst_114 {dimension_numbers = #tpu.dot_dimension_numbers<[1], [0], [0], [1], [0, 0, 1, 1], [], []>} : vector<8x48xbf16>, vector<48x128xbf16>, vector<8x128xf32> -> vector<8x128xf32>
    %221 = arith.addf %215, %220 : vector<8x128xf32>
    %222 = vector.extract_strided_slice %210 {offsets = [16, 0], sizes = [8, 48], strides = [1, 1]} : vector<24x48xf32> to vector<8x48xf32>
    %223 = arith.truncf %222 : vector<8x48xf32> to vector<8x48xbf16>
    %c2_115 = arith.constant 2 : index
    %c0_116 = arith.constant 0 : index
    %c0_117 = arith.constant 0 : index
    %224 = vector.load %arg22[%c2_115, %c0_116, %c0_117] : memref<3x48x128xbf16, #tpu.memory_space<vmem>>, vector<1x48x128xbf16>
    %225 = vector.shape_cast %224 : vector<1x48x128xbf16> to vector<48x128xbf16>
    %cst_118 = arith.constant dense<0.000000e+00> : vector<8x128xf32>
    %226 = tpu.matmul %223, %225, %cst_118 {dimension_numbers = #tpu.dot_dimension_numbers<[1], [0], [0], [1], [0, 0, 1, 1], [], []>} : vector<8x48xbf16>, vector<48x128xbf16>, vector<8x128xf32> -> vector<8x128xf32>
    %227 = arith.addf %221, %226 : vector<8x128xf32>
    %228 = vector.extract_strided_slice %8 {offsets = [6, 0], sizes = [1, 128], strides = [1, 1]} : vector<8x128xf32> to vector<1x128xf32>
    %229 = vector.broadcast %228 : vector<1x128xf32> to vector<8x128xf32>
    %230 = arith.addf %227, %229 : vector<8x128xf32>
    %c0_119 = arith.constant 0 : index
    %c0_120 = arith.constant 0 : index
    %231 = vector.load %arg18[%c0_119, %c0_120] : memref<8x128xf32, #tpu.memory_space<vmem>>, vector<8x128xf32>
    tpu.vector_store %arg18[%c0_119, %c0_120], %230 {strides = array<i32>} : memref<8x128xf32, #tpu.memory_space<vmem>>, vector<8x128xf32>,
    return
  }
}

</mosaic_0001>

<bundles_post_ra>
// kernel: dqn_forward.1
= control target key start
LH: loop header
LB: loop body
LE: loop exit
PB: predicated region body
PF: predicated region fallthrough
CT: control target
= control target key end

     0   :  { %s13568_s0 = inlined_call_operand.vmem [shape: bf16[160,80], index: 0, kind: input, shape index: {}]   ;;  %s13569_s1 = inlined_call_operand.vmem [shape: bf16[320,160], index: 1, kind: input, shape index: {}]   ;;  %s13570_s2 = inlined_call_operand.vmem [shape: bf16[4,80,312], index: 2, kind: input, shape index: {}]   ;;  %s13571_s3 = inlined_call_operand.vmem [shape: f32[312,8], index: 3, kind: input, shape index: {}]   ;;  %s13572_s4 = inlined_call_operand.vmem [shape: f32[8,312], index: 4, kind: input, shape index: {}]   ;;  %s13573_s5 = inlined_call_operand.vmem [shape: bf16[80,80], index: 5, kind: input, shape index: {}]   ;;  %s13574_s6 = inlined_call_operand.vmem [shape: bf16[64,40], index: 6, kind: input, shape index: {}]   ;;  %s13575_s7 = inlined_call_operand.vmem [shape: f32[128,16], index: 7, kind: input, shape index: {}]   ;;  %s13576_s8 = inlined_call_operand.vmem [shape: f32[16,128], index: 8, kind: input, shape index: {}]   ;;  %s13577_s9 = inlined_call_operand.vmem [shape: bf16[32,16], index: 9, kind: input, shape index: {}]   ;;  %s13578_s10 = inlined_call_operand.vmem [shape: f32[48,16], index: 10, kind: input, shape index: {}]   ;;  %s13579_s11 = inlined_call_operand.vmem [shape: f32[16,48], index: 11, kind: input, shape index: {}]   ;;  %s13580_s12 = inlined_call_operand.vmem [shape: bf16[24,8], index: 12, kind: input, shape index: {}]   ;;  %s13581_s13 = inlined_call_operand.vmem [shape: f32[8,128], index: 13, kind: input, shape index: {}]   ;;  %s13582_s14 = inlined_call_operand.vmem [shape: bf16[2,312,152], index: 14, kind: input, shape index: {}]   ;;  %s13583_s15 = inlined_call_operand.vmem [shape: bf16[4,152,128], index: 15, kind: input, shape index: {}]   ;;  %s13584_s16 = inlined_call_operand.vmem [shape: bf16[4,128,48], index: 16, kind: input, shape index: {}]   ;;  %s13585_s17 = inlined_call_operand.vmem [shape: bf16[3,48,128], index: 17, kind: input, shape index: {}]   ;;  %s13586_s18 = inlined_call_operand.vmem [shape: f32[8,128], index: 18, kind: output, shape index: {}]  }
   0x1   :  { %13859 = sst [smem:[#allocation197_spill]] %s13568_s0  ;;  %v10043_v0 = vld [vmem:[%s13582_s14] sm:$0xff]  ;;  %v10048_v1 = vld [vmem:[%s13582_s14 + $0x8] sm:$0xff]  ;;  %v10053_v2 = vld [vmem:[%s13582_s14 + $0x10] sm:$0xff] }
   0x2   :  { %13860 = sst [smem:[#allocation198_spill]] %s13569_s1  ;;  %13862 = vst [vmem:[#allocation15_spill] sm:$0xff] %v10043_v0  ;;  %13863 = vst [vmem:[#allocation16_spill] sm:$0xff] %v10048_v1  ;;  %v10058_v3 = vld [vmem:[%s13582_s14 + $0x18] sm:$0xff]  ;;  %v10063_v4 = vld [vmem:[%s13582_s14 + $0x20] sm:$0xff] }
   0x3   :  { %13861 = sst [smem:[#allocation199_spill]] %s13570_s2  ;;  %13864 = vst [vmem:[#allocation17_spill] sm:$0xff] %v10053_v2  ;;  %13865 = vst [vmem:[#allocation18_spill] sm:$0xff] %v10058_v3  ;;  %v10068_v5 = vld [vmem:[%s13582_s14 + $0x28] sm:$0xff]  ;;  %v10073_v6 = vld [vmem:[%s13582_s14 + $0x30] sm:$0xff] }
   0x4   :  { %13866 = vst [vmem:[#allocation19_spill] sm:$0xff] %v10063_v4  ;;  %13867 = vst [vmem:[#allocation20_spill] sm:$0xff] %v10068_v5  ;;  %v10078_v7 = vld [vmem:[%s13582_s14 + $0x38] sm:$0xff]  ;;  %v10083_v8 = vld [vmem:[%s13582_s14 + $0x40] sm:$0xff] }
   0x5   :  { %13868 = vst [vmem:[#allocation21_spill] sm:$0xff] %v10073_v6  ;;  %13869 = vst [vmem:[#allocation22_spill] sm:$0xff] %v10078_v7  ;;  %v10088_v9 = vld [vmem:[%s13582_s14 + $0x48] sm:$0xff]  ;;  %v10093_v10 = vld [vmem:[%s13582_s14 + $0x50] sm:$0xff] }
   0x6   :  { %13870 = vst [vmem:[#allocation23_spill] sm:$0xff] %v10083_v8  ;;  %13871 = vst [vmem:[#allocation24_spill] sm:$0xff] %v10088_v9  ;;  %v10098_v11 = vld [vmem:[%s13582_s14 + $0x58] sm:$0xff]  ;;  %v10103_v12 = vld [vmem:[%s13582_s14 + $0x60] sm:$0xff] }
   0x7   :  { %13872 = vst [vmem:[#allocation25_spill] sm:$0xff] %v10093_v10  ;;  %13873 = vst [vmem:[#allocation26_spill] sm:$0xff] %v10098_v11  ;;  %v10108_v13 = vld [vmem:[%s13582_s14 + $0x68] sm:$0xff]  ;;  %v10113_v14 = vld [vmem:[%s13582_s14 + $0x70] sm:$0xff] }
   0x8   :  { %13874 = vst [vmem:[#allocation27_spill] sm:$0xff] %v10103_v12  ;;  %13875 = vst [vmem:[#allocation28_spill] sm:$0xff] %v10108_v13  ;;  %v10118_v15 = vld [vmem:[%s13582_s14 + $0x78] sm:$0xff]  ;;  %v10123_v16 = vld [vmem:[%s13582_s14 + $0x80] sm:$0xff] }
   0x9   :  { %13876 = vst [vmem:[#allocation29_spill] sm:$0xff] %v10113_v14  ;;  %13877 = vst [vmem:[#allocation30_spill] sm:$0xff] %v10118_v15  ;;  %v10128_v17 = vld [vmem:[%s13582_s14 + $0x88] sm:$0xff]  ;;  %v10133_v18 = vld [vmem:[%s13582_s14 + $0x90] sm:$0xff] }
   0xa   :  { %13878 = vst [vmem:[#allocation31_spill] sm:$0xff] %v10123_v16  ;;  %13879 = vst [vmem:[#allocation32_spill] sm:$0xff] %v10128_v17  ;;  %v10138_v19 = vld [vmem:[%s13582_s14 + $0x98] sm:$0xff]  ;;  %v10143_v20 = vld [vmem:[%s13582_s14 + $0xa0] sm:$0xff] }
   0xb   :  { %13880 = vst [vmem:[#allocation33_spill] sm:$0xff] %v10133_v18  ;;  %13881 = vst [vmem:[#allocation34_spill] sm:$0xff] %v10138_v19  ;;  %v10148_v21 = vld [vmem:[%s13582_s14 + $0xa8] sm:$0xff]  ;;  %v10153_v22 = vld [vmem:[%s13582_s14 + $0xb0] sm:$0xff] }
   0xc   :  { %13882 = vst [vmem:[#allocation35_spill] sm:$0xff] %v10143_v20  ;;  %13883 = vst [vmem:[#allocation36_spill] sm:$0xff] %v10148_v21  ;;  %v10158_v23 = vld [vmem:[%s13582_s14 + $0xb8] sm:$0xff]  ;;  %v10163_v24 = vld [vmem:[%s13582_s14 + $0xc0] sm:$0xff] }
   0xd   :  { %13884 = vst [vmem:[#allocation37_spill] sm:$0xff] %v10153_v22  ;;  %13885 = vst [vmem:[#allocation38_spill] sm:$0xff] %v10158_v23  ;;  %v10168_v25 = vld [vmem:[%s13582_s14 + $0xc8] sm:$0xff]  ;;  %v10173_v26 = vld [vmem:[%s13582_s14 + $0xd0] sm:$0xff] }
   0xe   :  { %13886 = vst [vmem:[#allocation39_spill] sm:$0xff] %v10163_v24  ;;  %13887 = vst [vmem:[#allocation40_spill] sm:$0xff] %v10168_v25  ;;  %v10178_v27 = vld [vmem:[%s13582_s14 + $0xd8] sm:$0xff]  ;;  %v10183_v28 = vld [vmem:[%s13582_s14 + $0xe0] sm:$0xff] }
   0xf   :  { %13888 = vst [vmem:[#allocation41_spill] sm:$0xff] %v10173_v26  ;;  %13889 = vst [vmem:[#allocation42_spill] sm:$0xff] %v10178_v27  ;;  %v10188_v29 = vld [vmem:[%s13582_s14 + $0xe8] sm:$0xff]  ;;  %v10193_v30 = vld [vmem:[%s13582_s14 + $0xf0] sm:$0xff] }
  0x10   :  { %13890 = vst [vmem:[#allocation43_spill] sm:$0xff] %v10183_v28  ;;  %13891 = vst [vmem:[#allocation44_spill] sm:$0xff] %v10188_v29  ;;  %v10198_v31 = vld [vmem:[%s13582_s14 + $0xf8] sm:$0xff]  ;;  %v10203_v32 = vld [vmem:[%s13582_s14 + $0x100] sm:$0xff] }
  0x11   :  { %13892 = vst [vmem:[#allocation45_spill] sm:$0xff] %v10193_v30  ;;  %13893 = vst [vmem:[#allocation46_spill] sm:$0xff] %v10198_v31  ;;  %v10208_v33 = vld [vmem:[%s13582_s14 + $0x108] sm:$0xff]  ;;  %v10213_v34 = vld [vmem:[%s13582_s14 + $0x110] sm:$0xff] }
  0x12   :  { %13894 = vst [vmem:[#allocation47_spill] sm:$0xff] %v10203_v32  ;;  %13895 = vst [vmem:[#allocation48_spill] sm:$0xff] %v10208_v33  ;;  %v10218_v35 = vld [vmem:[%s13582_s14 + $0x118] sm:$0xff]  ;;  %v10223_v36 = vld [vmem:[%s13582_s14 + $0x120] sm:$0xff] }
  0x13   :  { %13896 = vst [vmem:[#allocation49_spill] sm:$0xff] %v10213_v34  ;;  %13897 = vst [vmem:[#allocation50_spill] sm:$0xff] %v10218_v35  ;;  %v10228_v37 = vld [vmem:[%s13582_s14 + $0x128] sm:$0xff]  ;;  %v10233_v38 = vld [vmem:[%s13582_s14 + $0x130] sm:$0xff] }
  0x14   :  { %13898 = vst [vmem:[#allocation51_spill] sm:$0xff] %v10223_v36  ;;  %13899 = vst [vmem:[#allocation52_spill] sm:$0xff] %v10228_v37  ;;  %v10238_v39 = vld [vmem:[%s13582_s14 + $0x138] sm:$0xff]  ;;  %v10243_v40 = vld [vmem:[%s13582_s14 + $0x140] sm:$0xff] }
  0x15   :  { %13900 = vst [vmem:[#allocation53_spill] sm:$0xff] %v10233_v38  ;;  %13901 = vst [vmem:[#allocation54_spill] sm:$0xff] %v10238_v39  ;;  %v10248_v41 = vld [vmem:[%s13582_s14 + $0x148] sm:$0xff]  ;;  %v10253_v42 = vld [vmem:[%s13582_s14 + $0x150] sm:$0xff] }
  0x16   :  { %13902 = vst [vmem:[#allocation55_spill] sm:$0xff] %v10243_v40  ;;  %13903 = vst [vmem:[#allocation56_spill] sm:$0xff] %v10248_v41  ;;  %v10258_v43 = vld [vmem:[%s13582_s14 + $0x158] sm:$0xff]  ;;  %v10263_v44 = vld [vmem:[%s13582_s14 + $0x160] sm:$0xff] }
  0x17   :  { %13904 = vst [vmem:[#allocation57_spill] sm:$0xff] %v10253_v42  ;;  %13905 = vst [vmem:[#allocation58_spill] sm:$0xff] %v10258_v43  ;;  %v10268_v45 = vld [vmem:[%s13582_s14 + $0x168] sm:$0xff]  ;;  %v10273_v46 = vld [vmem:[%s13582_s14 + $0x170] sm:$0xff] }
  0x18   :  { %13906 = vst [vmem:[#allocation59_spill] sm:$0xff] %v10263_v44  ;;  %13907 = vst [vmem:[#allocation60_spill] sm:$0xff] %v10268_v45  ;;  %v10278_v47 = vld [vmem:[%s13582_s14 + $0x178] sm:$0xff]  ;;  %v10283_v48 = vld [vmem:[%s13582_s14 + $0x180] sm:$0xff] }
  0x19   :  { %13908 = vst [vmem:[#allocation61_spill] sm:$0xff] %v10273_v46  ;;  %13909 = vst [vmem:[#allocation62_spill] sm:$0xff] %v10278_v47  ;;  %v10288_v49 = vld [vmem:[%s13582_s14 + $0x188] sm:$0xff]  ;;  %v10293_v50 = vld [vmem:[%s13582_s14 + $0x190] sm:$0xff] }
  0x1a   :  { %13910 = vst [vmem:[#allocation63_spill] sm:$0xff] %v10283_v48  ;;  %13911 = vst [vmem:[#allocation64_spill] sm:$0xff] %v10288_v49  ;;  %v10298_v51 = vld [vmem:[%s13582_s14 + $0x198] sm:$0xff]  ;;  %v10303_v52 = vld [vmem:[%s13582_s14 + $0x1a0] sm:$0xff] }
  0x1b   :  { %13912 = vst [vmem:[#allocation65_spill] sm:$0xff] %v10293_v50  ;;  %13913 = vst [vmem:[#allocation66_spill] sm:$0xff] %v10298_v51  ;;  %v10308_v53 = vld [vmem:[%s13582_s14 + $0x1a8] sm:$0xff]  ;;  %v10313_v54 = vld [vmem:[%s13582_s14 + $0x1b0] sm:$0xff] }
  0x1c   :  { %13914 = vst [vmem:[#allocation67_spill] sm:$0xff] %v10303_v52  ;;  %13915 = vst [vmem:[#allocation68_spill] sm:$0xff] %v10308_v53  ;;  %v10318_v55 = vld [vmem:[%s13582_s14 + $0x1b8] sm:$0xff]  ;;  %v10323_v56 = vld [vmem:[%s13582_s14 + $0x1c0] sm:$0xff] }
  0x1d   :  { %13916 = vst [vmem:[#allocation69_spill] sm:$0xff] %v10313_v54  ;;  %13917 = vst [vmem:[#allocation70_spill] sm:$0xff] %v10318_v55  ;;  %v10328_v57 = vld [vmem:[%s13582_s14 + $0x1c8] sm:$0xff]  ;;  %v10333_v58 = vld [vmem:[%s13582_s14 + $0x1d0] sm:$0xff] }
  0x1e   :  { %13918 = vst [vmem:[#allocation71_spill] sm:$0xff] %v10323_v56  ;;  %13919 = vst [vmem:[#allocation72_spill] sm:$0xff] %v10328_v57  ;;  %v10338_v59 = vld [vmem:[%s13582_s14 + $0x1d8] sm:$0xff]  ;;  %v10343_v60 = vld [vmem:[%s13582_s14 + $0x1e0] sm:$0xff] }
  0x1f   :  { %13920 = vst [vmem:[#allocation73_spill] sm:$0xff] %v10333_v58  ;;  %13921 = vst [vmem:[#allocation74_spill] sm:$0xff] %v10338_v59  ;;  %v10348_v61 = vld [vmem:[%s13582_s14 + $0x1e8] sm:$0xff]  ;;  %v10353_v62 = vld [vmem:[%s13582_s14 + $0x1f0] sm:$0xff] }
  0x20   :  { %13922 = vst [vmem:[#allocation75_spill] sm:$0xff] %v10343_v60  ;;  %13923 = vst [vmem:[#allocation76_spill] sm:$0xff] %v10348_v61  ;;  %v10358_v63 = vld [vmem:[%s13582_s14 + $0x1f8] sm:$0xff]  ;;  %v10363_v55 = vld [vmem:[%s13582_s14 + $0x200] sm:$0xff] }
  0x21   :  { %13924 = vst [vmem:[#allocation77_spill] sm:$0xff] %v10353_v62  ;;  %13925 = vst [vmem:[#allocation78_spill] sm:$0xff] %v10358_v63  ;;  %v10368_v56 = vld [vmem:[%s13582_s14 + $0x208] sm:$0xff]  ;;  %v10373_v57 = vld [vmem:[%s13582_s14 + $0x210] sm:$0xff] }
  0x22   :  { %13926 = vst [vmem:[#allocation79_spill] sm:$0xff] %v10363_v55  ;;  %13927 = vst [vmem:[#allocation80_spill] sm:$0xff] %v10368_v56  ;;  %v10378_v58 = vld [vmem:[%s13582_s14 + $0x218] sm:$0xff]  ;;  %v10383_v59 = vld [vmem:[%s13582_s14 + $0x220] sm:$0xff] }
  0x23   :  { %13928 = vst [vmem:[#allocation81_spill] sm:$0xff] %v10373_v57  ;;  %13929 = vst [vmem:[#allocation82_spill] sm:$0xff] %v10378_v58  ;;  %v10388_v60 = vld [vmem:[%s13582_s14 + $0x228] sm:$0xff]  ;;  %v10393_v61 = vld [vmem:[%s13582_s14 + $0x230] sm:$0xff] }
  0x24   :  { %13930 = vst [vmem:[#allocation83_spill] sm:$0xff] %v10383_v59  ;;  %13931 = vst [vmem:[#allocation84_spill] sm:$0xff] %v10388_v60  ;;  %v10398_v62 = vld [vmem:[%s13582_s14 + $0x238] sm:$0xff]  ;;  %v10403_v63 = vld [vmem:[%s13582_s14 + $0x240] sm:$0xff] }
  0x25   :  { %13932 = vst [vmem:[#allocation85_spill] sm:$0xff] %v10393_v61  ;;  %13933 = vst [vmem:[#allocation86_spill] sm:$0xff] %v10398_v62  ;;  %v10408_v55 = vld [vmem:[%s13582_s14 + $0x248] sm:$0xff]  ;;  %v10413_v16 = vld [vmem:[%s13582_s14 + $0x250] sm:$0xff] }
  0x26   :  { %13934 = vst [vmem:[#allocation87_spill] sm:$0xff] %v10403_v63  ;;  %13935 = vst [vmem:[#allocation88_spill] sm:$0xff] %v10408_v55  ;;  %v10418_v17 = vld [vmem:[%s13582_s14 + $0x258] sm:$0xff]  ;;  %v10423_v62 = vld [vmem:[%s13582_s14 + $0x260] sm:$0xff] }
  0x27   :  { %13936 = vst [vmem:[#allocation89_spill] sm:$0xff] %v10413_v16  ;;  %13937 = vst [vmem:[#allocation90_spill] sm:$0xff] %v10418_v17  ;;  %v10428_v63 = vld [vmem:[%s13582_s14 + $0x268] sm:$0xff] }
  0x28   :  { %13938 = vst [vmem:[#allocation91_spill] sm:$0xff] %v10423_v62  ;;  %13939 = vst [vmem:[#allocation92_spill] sm:$0xff] %v10428_v63 }
  0x29   :  { %248 = vsyncadd [#allocation6], 9984  ;;  %v283_v55 = vld [vmem:[%s13583_s15] sm:$0xff]  ;;  %v285_v16 = vld [vmem:[%s13583_s15 + $0x8] sm:$0xff] }
  0x2a   :  { %284 = vst [vmem:[#allocation3] sm:$0xff] %v283_v55  ;;  %286 = vst [vmem:[#allocation3 + $0x8] sm:$0xff] %v285_v16  ;;  %v287_v17 = vld [vmem:[%s13583_s15 + $0x10] sm:$0xff]  ;;  %v289_v62 = vld [vmem:[%s13583_s15 + $0x18] sm:$0xff] }
  0x2b   :  { %v291_v63 = vld [vmem:[%s13583_s15 + $0x20] sm:$0xff]  ;;  %288 = vst [vmem:[#allocation3 + $0x10] sm:$0xff] %v287_v17  ;;  %290 = vst [vmem:[#allocation3 + $0x18] sm:$0xff] %v289_v62  ;;  %v293_v55 = vld [vmem:[%s13583_s15 + $0x28] sm:$0xff] }
  0x2c   :  { %292 = vst [vmem:[#allocation3 + $0x20] sm:$0xff] %v291_v63  ;;  %v295_v16 = vld [vmem:[%s13583_s15 + $0x30] sm:$0xff]  ;;  %v297_v56 = vld [vmem:[%s13583_s15 + $0x38] sm:$0xff]  ;;  %294 = vst [vmem:[#allocation3 + $0x28] sm:$0xff] %v293_v55 }
  0x2d   :  { %296 = vst [vmem:[#allocation3 + $0x30] sm:$0xff] %v295_v16  ;;  %298 = vst [vmem:[#allocation3 + $0x38] sm:$0xff] %v297_v56  ;;  %v299_v17 = vld [vmem:[%s13583_s15 + $0x40] sm:$0xff]  ;;  %v301_v62 = vld [vmem:[%s13583_s15 + $0x48] sm:$0xff] }
  0x2e   :  { %v303_v63 = vld [vmem:[%s13583_s15 + $0x50] sm:$0xff]  ;;  %300 = vst [vmem:[#allocation3 + $0x40] sm:$0xff] %v299_v17  ;;  %302 = vst [vmem:[#allocation3 + $0x48] sm:$0xff] %v301_v62  ;;  %v305_v55 = vld [vmem:[%s13583_s15 + $0x58] sm:$0xff] }
  0x2f   :  { %304 = vst [vmem:[#allocation3 + $0x50] sm:$0xff] %v303_v63  ;;  %v307_v56 = vld [vmem:[%s13583_s15 + $0x60] sm:$0xff]  ;;  %v309_v16 = vld [vmem:[%s13583_s15 + $0x68] sm:$0xff]  ;;  %306 = vst [vmem:[#allocation3 + $0x58] sm:$0xff] %v305_v55 }
  0x30   :  { %308 = vst [vmem:[#allocation3 + $0x60] sm:$0xff] %v307_v56  ;;  %310 = vst [vmem:[#allocation3 + $0x68] sm:$0xff] %v309_v16  ;;  %v311_v17 = vld [vmem:[%s13583_s15 + $0x70] sm:$0xff]  ;;  %v313_v62 = vld [vmem:[%s13583_s15 + $0x78] sm:$0xff] }
  0x31   :  { %v315_v63 = vld [vmem:[%s13583_s15 + $0x80] sm:$0xff]  ;;  %312 = vst [vmem:[#allocation3 + $0x70] sm:$0xff] %v311_v17  ;;  %314 = vst [vmem:[#allocation3 + $0x78] sm:$0xff] %v313_v62  ;;  %v317_v55 = vld [vmem:[%s13583_s15 + $0x88] sm:$0xff] }
  0x32   :  { %316 = vst [vmem:[#allocation3 + $0x80] sm:$0xff] %v315_v63  ;;  %v319_v56 = vld [vmem:[%s13583_s15 + $0x90] sm:$0xff]  ;;  %v321_v16 = vld [vmem:[%s13583_s15 + $0x98] sm:$0xff]  ;;  %318 = vst [vmem:[#allocation3 + $0x88] sm:$0xff] %v317_v55 }
  0x33   :  { %320 = vst [vmem:[#allocation3 + $0x90] sm:$0xff] %v319_v56  ;;  %322 = vst [vmem:[#allocation3 + $0x98] sm:$0xff] %v321_v16  ;;  %v323_v17 = vld [vmem:[%s13583_s15 + $0xa0] sm:$0xff]  ;;  %v325_v62 = vld [vmem:[%s13583_s15 + $0xa8] sm:$0xff] }
  0x34   :  { %v327_v63 = vld [vmem:[%s13583_s15 + $0xb0] sm:$0xff]  ;;  %324 = vst [vmem:[#allocation3 + $0xa0] sm:$0xff] %v323_v17  ;;  %326 = vst [vmem:[#allocation3 + $0xa8] sm:$0xff] %v325_v62  ;;  %v329_v55 = vld [vmem:[%s13583_s15 + $0xb8] sm:$0xff] }
  0x35   :  { %328 = vst [vmem:[#allocation3 + $0xb0] sm:$0xff] %v327_v63  ;;  %v331_v56 = vld [vmem:[%s13583_s15 + $0xc0] sm:$0xff]  ;;  %v333_v16 = vld [vmem:[%s13583_s15 + $0xc8] sm:$0xff]  ;;  %330 = vst [vmem:[#allocation3 + $0xb8] sm:$0xff] %v329_v55 }
  0x36   :  { %332 = vst [vmem:[#allocation3 + $0xc0] sm:$0xff] %v331_v56  ;;  %334 = vst [vmem:[#allocation3 + $0xc8] sm:$0xff] %v333_v16  ;;  %v335_v17 = vld [vmem:[%s13583_s15 + $0xd0] sm:$0xff]  ;;  %v337_v62 = vld [vmem:[%s13583_s15 + $0xd8] sm:$0xff] }
  0x37   :  { %v339_v63 = vld [vmem:[%s13583_s15 + $0xe0] sm:$0xff]  ;;  %336 = vst [vmem:[#allocation3 + $0xd0] sm:$0xff] %v335_v17  ;;  %338 = vst [vmem:[#allocation3 + $0xd8] sm:$0xff] %v337_v62  ;;  %v341_v55 = vld [vmem:[%s13583_s15 + $0xe8] sm:$0xff] }
  0x38   :  { %340 = vst [vmem:[#allocation3 + $0xe0] sm:$0xff] %v339_v63  ;;  %v343_v56 = vld [vmem:[%s13583_s15 + $0xf0] sm:$0xff]  ;;  %v345_v16 = vld [vmem:[%s13583_s15 + $0xf8] sm:$0xff]  ;;  %342 = vst [vmem:[#allocation3 + $0xe8] sm:$0xff] %v341_v55 }
  0x39   :  { %344 = vst [vmem:[#allocation3 + $0xf0] sm:$0xff] %v343_v56  ;;  %346 = vst [vmem:[#allocation3 + $0xf8] sm:$0xff] %v345_v16  ;;  %v347_v17 = vld [vmem:[%s13583_s15 + $0x100] sm:$0xff]  ;;  %v349_v62 = vld [vmem:[%s13583_s15 + $0x108] sm:$0xff] }
  0x3a   :  { %v351_v63 = vld [vmem:[%s13583_s15 + $0x110] sm:$0xff]  ;;  %348 = vst [vmem:[#allocation3 + $0x100] sm:$0xff] %v347_v17  ;;  %350 = vst [vmem:[#allocation3 + $0x108] sm:$0xff] %v349_v62  ;;  %v353_v55 = vld [vmem:[%s13583_s15 + $0x118] sm:$0xff] }
  0x3b   :  { %352 = vst [vmem:[#allocation3 + $0x110] sm:$0xff] %v351_v63  ;;  %v355_v56 = vld [vmem:[%s13583_s15 + $0x120] sm:$0xff]  ;;  %v357_v16 = vld [vmem:[%s13583_s15 + $0x128] sm:$0xff]  ;;  %354 = vst [vmem:[#allocation3 + $0x118] sm:$0xff] %v353_v55 }
  0x3c   :  { %356 = vst [vmem:[#allocation3 + $0x120] sm:$0xff] %v355_v56  ;;  %358 = vst [vmem:[#allocation3 + $0x128] sm:$0xff] %v357_v16 }
  0x3d   :  { %366 = vsyncadd [#allocation6 + $0x1], 4864  ;;  %v401_v17 = vld [vmem:[%s13584_s16] sm:$0xff]  ;;  %v403_v62 = vld [vmem:[%s13584_s16 + $0x8] sm:$0xff] }
  0x3e   :  { %402 = vst [vmem:[#allocation4] sm:$0xff] %v401_v17  ;;  %404 = vst [vmem:[#allocation4 + $0x8] sm:$0xff] %v403_v62  ;;  %v405_v63 = vld [vmem:[%s13584_s16 + $0x10] sm:$0xff]  ;;  %v407_v55 = vld [vmem:[%s13584_s16 + $0x18] sm:$0xff] }
  0x3f   :  { %v409_v56 = vld [vmem:[%s13584_s16 + $0x20] sm:$0xff]  ;;  %406 = vst [vmem:[#allocation4 + $0x10] sm:$0xff] %v405_v63  ;;  %408 = vst [vmem:[#allocation4 + $0x18] sm:$0xff] %v407_v55  ;;  %v411_v16 = vld [vmem:[%s13584_s16 + $0x28] sm:$0xff] }
  0x40   :  { %410 = vst [vmem:[#allocation4 + $0x20] sm:$0xff] %v409_v56  ;;  %v413_v17 = vld [vmem:[%s13584_s16 + $0x30] sm:$0xff]  ;;  %v415_v62 = vld [vmem:[%s13584_s16 + $0x38] sm:$0xff]  ;;  %412 = vst [vmem:[#allocation4 + $0x28] sm:$0xff] %v411_v16 }
  0x41   :  { %414 = vst [vmem:[#allocation4 + $0x30] sm:$0xff] %v413_v17  ;;  %416 = vst [vmem:[#allocation4 + $0x38] sm:$0xff] %v415_v62  ;;  %v417_v63 = vld [vmem:[%s13584_s16 + $0x40] sm:$0xff]  ;;  %v419_v55 = vld [vmem:[%s13584_s16 + $0x48] sm:$0xff] }
  0x42   :  { %v421_v56 = vld [vmem:[%s13584_s16 + $0x50] sm:$0xff]  ;;  %418 = vst [vmem:[#allocation4 + $0x40] sm:$0xff] %v417_v63  ;;  %420 = vst [vmem:[#allocation4 + $0x48] sm:$0xff] %v419_v55  ;;  %v423_v16 = vld [vmem:[%s13584_s16 + $0x58] sm:$0xff] }
  0x43   :  { %422 = vst [vmem:[#allocation4 + $0x50] sm:$0xff] %v421_v56  ;;  %v425_v17 = vld [vmem:[%s13584_s16 + $0x60] sm:$0xff]  ;;  %v427_v62 = vld [vmem:[%s13584_s16 + $0x68] sm:$0xff]  ;;  %424 = vst [vmem:[#allocation4 + $0x58] sm:$0xff] %v423_v16 }
  0x44   :  { %426 = vst [vmem:[#allocation4 + $0x60] sm:$0xff] %v425_v17  ;;  %428 = vst [vmem:[#allocation4 + $0x68] sm:$0xff] %v427_v62  ;;  %v429_v63 = vld [vmem:[%s13584_s16 + $0x70] sm:$0xff]  ;;  %v431_v55 = vld [vmem:[%s13584_s16 + $0x78] sm:$0xff] }
  0x45   :  { %v433_v56 = vld [vmem:[%s13584_s16 + $0x80] sm:$0xff]  ;;  %430 = vst [vmem:[#allocation4 + $0x70] sm:$0xff] %v429_v63  ;;  %432 = vst [vmem:[#allocation4 + $0x78] sm:$0xff] %v431_v55  ;;  %v435_v16 = vld [vmem:[%s13584_s16 + $0x88] sm:$0xff] }
  0x46   :  { %434 = vst [vmem:[#allocation4 + $0x80] sm:$0xff] %v433_v56  ;;  %v437_v17 = vld [vmem:[%s13584_s16 + $0x90] sm:$0xff]  ;;  %v439_v62 = vld [vmem:[%s13584_s16 + $0x98] sm:$0xff]  ;;  %436 = vst [vmem:[#allocation4 + $0x88] sm:$0xff] %v435_v16 }
  0x47   :  { %438 = vst [vmem:[#allocation4 + $0x90] sm:$0xff] %v437_v17  ;;  %440 = vst [vmem:[#allocation4 + $0x98] sm:$0xff] %v439_v62  ;;  %v441_v63 = vld [vmem:[%s13584_s16 + $0xa0] sm:$0xff]  ;;  %v443_v55 = vld [vmem:[%s13584_s16 + $0xa8] sm:$0xff] }
  0x48   :  { %v445_v56 = vld [vmem:[%s13584_s16 + $0xb0] sm:$0xff]  ;;  %442 = vst [vmem:[#allocation4 + $0xa0] sm:$0xff] %v441_v63  ;;  %444 = vst [vmem:[#allocation4 + $0xa8] sm:$0xff] %v443_v55  ;;  %v447_v16 = vld [vmem:[%s13584_s16 + $0xb8] sm:$0xff] }
  0x49   :  { %446 = vst [vmem:[#allocation4 + $0xb0] sm:$0xff] %v445_v56  ;;  %v449_v17 = vld [vmem:[%s13584_s16 + $0xc0] sm:$0xff]  ;;  %v451_v62 = vld [vmem:[%s13584_s16 + $0xc8] sm:$0xff]  ;;  %448 = vst [vmem:[#allocation4 + $0xb8] sm:$0xff] %v447_v16 }
  0x4a   :  { %450 = vst [vmem:[#allocation4 + $0xc0] sm:$0xff] %v449_v17  ;;  %452 = vst [vmem:[#allocation4 + $0xc8] sm:$0xff] %v451_v62  ;;  %v453_v63 = vld [vmem:[%s13584_s16 + $0xd0] sm:$0xff]  ;;  %v455_v55 = vld [vmem:[%s13584_s16 + $0xd8] sm:$0xff] }
  0x4b   :  { %v457_v56 = vld [vmem:[%s13584_s16 + $0xe0] sm:$0xff]  ;;  %454 = vst [vmem:[#allocation4 + $0xd0] sm:$0xff] %v453_v63  ;;  %456 = vst [vmem:[#allocation4 + $0xd8] sm:$0xff] %v455_v55  ;;  %v459_v16 = vld [vmem:[%s13584_s16 + $0xe8] sm:$0xff] }
  0x4c   :  { %458 = vst [vmem:[#allocation4 + $0xe0] sm:$0xff] %v457_v56  ;;  %v461_v17 = vld [vmem:[%s13584_s16 + $0xf0] sm:$0xff]  ;;  %v463_v62 = vld [vmem:[%s13584_s16 + $0xf8] sm:$0xff]  ;;  %460 = vst [vmem:[#allocation4 + $0xe8] sm:$0xff] %v459_v16 }
  0x4d   :  { %462 = vst [vmem:[#allocation4 + $0xf0] sm:$0xff] %v461_v17  ;;  %464 = vst [vmem:[#allocation4 + $0xf8] sm:$0xff] %v463_v62 }
  0x4e   :  { %472 = vsyncadd [#allocation6 + $0x2], 4096  ;;  %v507_v63 = vld [vmem:[%s13585_s17] sm:$0xff]  ;;  %v509_v55 = vld [vmem:[%s13585_s17 + $0x8] sm:$0xff] }
  0x4f   :  { %508 = vst [vmem:[#allocation5] sm:$0xff] %v507_v63  ;;  %510 = vst [vmem:[#allocation5 + $0x8] sm:$0xff] %v509_v55  ;;  %v511_v56 = vld [vmem:[%s13585_s17 + $0x10] sm:$0xff]  ;;  %v513_v16 = vld [vmem:[%s13585_s17 + $0x18] sm:$0xff] }
  0x50   :  { %v515_v17 = vld [vmem:[%s13585_s17 + $0x20] sm:$0xff]  ;;  %512 = vst [vmem:[#allocation5 + $0x10] sm:$0xff] %v511_v56  ;;  %514 = vst [vmem:[#allocation5 + $0x18] sm:$0xff] %v513_v16  ;;  %v517_v62 = vld [vmem:[%s13585_s17 + $0x28] sm:$0xff] }
  0x51   :  { %516 = vst [vmem:[#allocation5 + $0x20] sm:$0xff] %v515_v17  ;;  %v519_v63 = vld [vmem:[%s13585_s17 + $0x30] sm:$0xff]  ;;  %v521_v55 = vld [vmem:[%s13585_s17 + $0x38] sm:$0xff]  ;;  %518 = vst [vmem:[#allocation5 + $0x28] sm:$0xff] %v517_v62 }
  0x52   :  { %520 = vst [vmem:[#allocation5 + $0x30] sm:$0xff] %v519_v63  ;;  %522 = vst [vmem:[#allocation5 + $0x38] sm:$0xff] %v521_v55  ;;  %v523_v56 = vld [vmem:[%s13585_s17 + $0x40] sm:$0xff] }
  0x53   :  { %524 = vst [vmem:[#allocation5 + $0x40] sm:$0xff] %v523_v56 }
  0x54   :  { %532 = vsyncadd [#allocation6 + $0x3], 1152  ;;  %s13940_s27 = sld [smem:[#allocation197_spill]]  ;;  %v13610_v17 = vmov 0   ;;  %vm834_vm0 = vcmask 261120   ;;  %vm9944_vm1 = vmmov 0  }
  0x55   :  { %895 = vmatprep.subr.bf16.mxu0 %v13610_v17  ;;  %1267 = vmatprep.mubr.bf16.mxu1 %v13610_v17  ;;  %s13941_s20 = sld [smem:[#allocation198_spill]]  ;;  %vm1219_vm2 = vcmask 654336   ;;  %v2415_v13 = vld [vmem:[%s13571_s3 + $0x70] sm:$0xff]  ;;  %v2430_v15 = vld [vmem:[%s13571_s3 + $0xe8] sm:$0xff]  ;;  %vm2397_vm3 = vcmask 1040384   ;;  %vm2286_vm4 = vcmask 457728  }
  0x56   :  { %s13942_s26 = sld [smem:[#allocation199_spill]]  ;;  %v11351_v14 = vand.u32 4294901760, %v2415_v13  ;;  %vm3850_vm5 = vcmask 64512   ;;  %vm4602_vm6 = vcmask 1043456  }
  0x58   :  { %13967 = vst [vmem:[#allocation115_spill] sm:$0xff] %v11351_v14 }
  0x5a   :  { %v9684_v16 = vld [vmem:[%s13940_s27 + $0x38] sm:$0xff]   ;;  %v9685_v62 = vld [vmem:[%s13940_s27 + $0x30] sm:$0xff]   ;;  %v9686_v63 = vld [vmem:[%s13940_s27 + $0x28] sm:$0xff]  }
  0x5b   :  { %896 = vmatpush1.bf16.msra.mxu0 %v9684_v16  ;;  %v9687_v55 = vld [vmem:[%s13940_s27 + $0x20] sm:$0xff]   ;;  %v9688_v16 = vld [vmem:[%s13940_s27 + $0x18] sm:$0xff]  }
  0x5c   :  { %897 = vmatprep.subr.bf16.mxu0 %v13610_v17  ;;  %v9696_v56 = vld [vmem:[%s13941_s20 + $0x4] ss:$8 sps:$4 sm:$0xff]   ;;  %v9735_v57 = vld [vmem:[%s13941_s20 + $0xd0] ss:$8 sps:$4 sm:$0xff]  }
  0x5d   :  { %8077 = vmatprep.mubr.msk.bf16.mxu0 %vm834_vm0, %v9696_v56  ;;  %v9692_v56 = vld [vmem:[%s13940_s27 + $0x48] sm:$0xff]  }
  0x5f   :  { %898 = vmatpush1.bf16.msra.mxu0 %v9685_v62  ;;  %v9689_v62 = vld [vmem:[%s13940_s27 + $0x10] sm:$0xff]  }
  0x60   :  { %899 = vmatprep.subr.bf16.mxu0 %v13610_v17 }
  0x63   :  { %900 = vmatpush1.bf16.msra.mxu0 %v9686_v63  ;;  %v9690_v63 = vld [vmem:[%s13940_s27 + $0x8] sm:$0xff]  }
  0x64   :  { %901 = vmatprep.subr.bf16.mxu0 %v13610_v17 }
  0x67   :  { %902 = vmatpush1.bf16.msra.mxu0 %v9687_v55  ;;  %v9691_v55 = vld [vmem:[%s13940_s27] sm:$0xff]  }
  0x68   :  { %903 = vmatprep.subr.bf16.mxu0 %v13610_v17 }
  0x6b   :  { %904 = vmatpush1.bf16.msra.mxu0 %v9688_v16  ;;  %v9693_v16 = vld [vmem:[%s13940_s27 + $0x40] sm:$0xff]  }
  0x6c   :  { %905 = vmatprep.subr.bf16.mxu0 %v13610_v17 }
  0x6f   :  { %906 = vmatpush1.bf16.msra.mxu0 %v9689_v62  ;;  %v9694_v62 = vld [vmem:[%s13941_s20] ss:$8 sps:$4 sm:$0xff]  }
  0x70   :  { %907 = vmatprep.subr.bf16.mxu0 %v13610_v17 }
  0x73   :  { %908 = vmatpush1.bf16.msra.mxu0 %v9690_v63  ;;  %v9697_v63 = vld [vmem:[%s13941_s20 + $0x14] ss:$8 sps:$4 sm:$0xff]  }
  0x74   :  { %909 = vmatprep.subr.bf16.mxu0 %v13610_v17 }
  0x77   :  { %910 = vmatpush1.bf16.msra.mxu0 %v9691_v55  ;;  %v9699_v55 = vld [vmem:[%s13941_s20 + $0x10] ss:$8 sps:$4 sm:$0xff]  }
  0x78   :  { %923 = vmatprep.subr.bf16.mxu0 %v13610_v17 }
  0x7b   :  { %924 = vmatpush2.bf16.msra.mxu0 %v9692_v56  ;;  %v9700_v56 = vld [vmem:[%s13941_s20 + $0x24] ss:$8 sps:$4 sm:$0xff]  }
  0x7c   :  { %925 = vmatprep.subr.bf16.mxu0 %v13610_v17  ;;  %v9702_v17 = vld [vmem:[%s13941_s20 + $0x20] ss:$8 sps:$4 sm:$0xff]  }
  0x7f   :  { %926 = vmatpush2.bf16.msra.mxu0 %v9693_v16  ;;  %v9703_v16 = vld [vmem:[%s13941_s20 + $0x34] ss:$8 sps:$4 sm:$0xff]  }
  0x82   :  { %928 = vmatmul.mubr.bf16.vlgmr.msra.gmra.mxu0 %v9694_v62  ;;  %v9705_v62 = vld [vmem:[%s13941_s20 + $0x30] ss:$8 sps:$4 sm:$0xff]  }
  0x83   :  { %8078 = vmatprep.mubr.msk.bf16.mxu0 %vm834_vm0, %v9697_v63  ;;  %v9706_v63 = vld [vmem:[%s13941_s20 + $0x44] ss:$8 sps:$4 sm:$0xff]  }
  0x8a   :  { %936 = vmatmul.mubr.bf16.gmra.mxu0 %v9699_v55  ;;  %v9708_v55 = vld [vmem:[%s13941_s20 + $0x40] ss:$8 sps:$4 sm:$0xff]  }
  0x8b   :  { %8079 = vmatprep.mubr.msk.bf16.mxu0 %vm834_vm0, %v9700_v56  ;;  %v9711_v56 = vld [vmem:[%s13941_s20 + $0x50] ss:$8 sps:$4 sm:$0xff]  }
  0x92   :  { %944 = vmatmul.mubr.bf16.gmra.mxu0 %v9702_v17  ;;  %v9709_v17 = vld [vmem:[%s13941_s20 + $0x54] ss:$8 sps:$4 sm:$0xff]  }
  0x93   :  { %8080 = vmatprep.mubr.msk.bf16.mxu0 %vm834_vm0, %v9703_v16  ;;  %v9712_v16 = vld [vmem:[%s13941_s20 + $0x64] ss:$8 sps:$4 sm:$0xff]  }
  0x9a   :  { %952 = vmatmul.mubr.bf16.gmra.mxu0 %v9705_v62  ;;  %v9714_v62 = vld [vmem:[%s13941_s20 + $0x60] ss:$8 sps:$4 sm:$0xff]  }
  0x9b   :  { %8081 = vmatprep.mubr.msk.bf16.mxu0 %vm834_vm0, %v9706_v63  ;;  %v9715_v63 = vld [vmem:[%s13941_s20 + $0x74] ss:$8 sps:$4 sm:$0xff]  }
  0xa2   :  { %960 = vmatmul.mubr.bf16.gmra.mxu0 %v9708_v55  ;;  %v9717_v55 = vld [vmem:[%s13941_s20 + $0x70] ss:$8 sps:$4 sm:$0xff]  }
  0xa3   :  { %8082 = vmatprep.mubr.msk.bf16.mxu0 %vm834_vm0, %v9709_v17  ;;  %v9718_v17 = vld [vmem:[%s13941_s20 + $0x84] ss:$8 sps:$4 sm:$0xff]  }
  0xaa   :  { %968 = vmatmul.mubr.bf16.gmra.mxu0 %v9711_v56  ;;  %v9720_v56 = vld [vmem:[%s13941_s20 + $0x80] ss:$8 sps:$4 sm:$0xff]  }
  0xab   :  { %8083 = vmatprep.mubr.msk.bf16.mxu0 %vm834_vm0, %v9712_v16  ;;  %v9721_v16 = vld [vmem:[%s13941_s20 + $0x94] ss:$8 sps:$4 sm:$0xff]  }
  0xb2   :  { %976 = vmatmul.mubr.bf16.gmra.mxu0 %v9714_v62  ;;  %v9723_v62 = vld [vmem:[%s13941_s20 + $0x90] ss:$8 sps:$4 sm:$0xff]  }
  0xb3   :  { %8084 = vmatprep.mubr.msk.bf16.mxu0 %vm834_vm0, %v9715_v63  ;;  %v9724_v63 = vld [vmem:[%s13941_s20 + $0xa4] ss:$8 sps:$4 sm:$0xff]  }
  0xba   :  { %984 = vmatmul.mubr.bf16.gmra.mxu0 %v9717_v55  ;;  %v9726_v55 = vld [vmem:[%s13941_s20 + $0xa0] ss:$8 sps:$4 sm:$0xff]  }
  0xbb   :  { %8085 = vmatprep.mubr.msk.bf16.mxu0 %vm834_vm0, %v9718_v17  ;;  %v9727_v17 = vld [vmem:[%s13941_s20 + $0xb4] ss:$8 sps:$4 sm:$0xff]  }
  0xc2   :  { %992 = vmatmul.mubr.bf16.gmra.mxu0 %v9720_v56  ;;  %v9729_v56 = vld [vmem:[%s13941_s20 + $0xb0] ss:$8 sps:$4 sm:$0xff]  }
  0xc3   :  { %8086 = vmatprep.mubr.msk.bf16.mxu0 %vm834_vm0, %v9721_v16  ;;  %v9730_v16 = vld [vmem:[%s13941_s20 + $0xc4] ss:$8 sps:$4 sm:$0xff]  }
  0xca   :  { %1000 = vmatmul.mubr.bf16.gmra.mxu0 %v9723_v62  ;;  %v9754_v62 = vld [vmem:[%s13942_s26 + $0xdc] ss:$12 sps:$4 sm:$0xff]  }
  0xcb   :  { %8087 = vmatprep.mubr.msk.bf16.mxu0 %vm834_vm0, %v9724_v63  ;;  %v9756_v63 = vld [vmem:[%s13942_s26 + $0xd8] ss:$12 sps:$4 sm:$0xff]   ;;  %1241 = vmatprep.subr.bf16.mxu1 %v9754_v62 }
  0xcc   :  { %1242 = vmatpush1.bf16.msra.mxu1 %v9756_v63  ;;  %v9760_v62 = vld [vmem:[%s13942_s26 + $0xac] ss:$12 sps:$4 sm:$0xff]   ;;  %v9762_v63 = vld [vmem:[%s13942_s26 + $0xa8] ss:$12 sps:$4 sm:$0xff]  }
  0xd2   :  { %1008 = vmatmul.mubr.bf16.gmra.mxu0 %v9726_v55  ;;  %v9732_v55 = vld [vmem:[%s13941_s20 + $0xc0] ss:$8 sps:$4 sm:$0xff]  }
  0xd3   :  { %8088 = vmatprep.mubr.msk.bf16.mxu0 %vm834_vm0, %v9727_v17  ;;  %v9733_v17 = vld [vmem:[%s13941_s20 + $0xd4] ss:$8 sps:$4 sm:$0xff]  }
  0xda   :  { %1016 = vmatmul.mubr.bf16.gmra.mxu0 %v9729_v56  ;;  %v9757_v56 = vld [vmem:[%s13942_s26 + $0xc4] ss:$12 sps:$4 sm:$0xff]  }
  0xdb   :  { %8089 = vmatprep.mubr.msk.bf16.mxu0 %vm834_vm0, %v9730_v16  ;;  %v9759_v16 = vld [vmem:[%s13942_s26 + $0xc0] ss:$12 sps:$4 sm:$0xff]   ;;  %1243 = vmatprep.subr.bf16.mxu1 %v9757_v56  ;;  %v9765_v56 = vld [vmem:[%s13942_s26 + $0x90] ss:$12 sps:$4 sm:$0xff]  }
  0xdc   :  { %1244 = vmatpush1.bf16.msra.mxu1 %v9759_v16  ;;  %v9766_v16 = vld [vmem:[%s13942_s26 + $0x7c] ss:$12 sps:$4 sm:$0xff]  }
  0xdd   :  { %1245 = vmatprep.subr.bf16.mxu1 %v9760_v62  ;;  %v9768_v62 = vld [vmem:[%s13942_s26 + $0x78] ss:$12 sps:$4 sm:$0xff]  }
  0xe0   :  { %1246 = vmatpush1.bf16.msra.mxu1 %v9762_v63  ;;  %v9738_v63 = vld [vmem:[%s13941_s20 + $0xe0] ss:$8 sps:$4 sm:$0xff]  }
  0xe2   :  { %1024 = vmatmul.mubr.bf16.gmra.mxu0 %v9732_v55  ;;  %v9736_v55 = vld [vmem:[%s13941_s20 + $0xe4] ss:$8 sps:$4 sm:$0xff]  }
  0xe3   :  { %8090 = vmatprep.mubr.msk.bf16.mxu0 %vm834_vm0, %v9733_v17  ;;  %v9763_v17 = vld [vmem:[%s13942_s26 + $0x94] ss:$12 sps:$4 sm:$0xff]  }
  0xe4   :  { %1247 = vmatprep.subr.bf16.mxu1 %v9763_v17  ;;  %v13624_v17 = vmov 0.0  }
  0xe5   :  { %1248 = vmatpush1.bf16.msra.mxu1 %v9765_v56  ;;  %9047 = vmatprep.subr.bf16.mxu0 %v13624_v17  ;;  %v9742_v56 = vld [vmem:[%s13941_s20 + $0x104] ss:$8 sps:$4 sm:$0xff]  }
  0xe6   :  { %1249 = vmatprep.subr.bf16.mxu1 %v9766_v16  ;;  %v9744_v16 = vld [vmem:[%s13941_s20 + $0x100] ss:$8 sps:$4 sm:$0xff]  }
  0xe9   :  { %1250 = vmatpush1.bf16.msra.mxu1 %v9768_v62  ;;  %v9745_v62 = vld [vmem:[%s13941_s20 + $0x114] ss:$8 sps:$4 sm:$0xff]  }
  0xea   :  { %1032 = vmatmul.mubr.bf16.gmra.mxu0 %v9735_v57  ;;  %v9739_v57 = vld [vmem:[%s13941_s20 + $0xf4] ss:$8 sps:$4 sm:$0xff]   ;;  %8987 = vmatprep.subr.bf16.mxu1 %v13624_v17 }
  0xeb   :  { %8091 = vmatprep.mubr.msk.bf16.mxu0 %vm834_vm0, %v9736_v55  ;;  %v9741_v55 = vld [vmem:[%s13941_s20 + $0xf0] ss:$8 sps:$4 sm:$0xff]  }
  0xf2   :  { %1040 = vmatmul.mubr.bf16.gmra.mxu0 %v9738_v63  ;;  %v9747_v63 = vld [vmem:[%s13941_s20 + $0x110] ss:$8 sps:$4 sm:$0xff]  }
  0xf3   :  { %8092 = vmatprep.mubr.msk.bf16.mxu0 %vm834_vm0, %v9739_v57  ;;  %v9748_v57 = vld [vmem:[%s13941_s20 + $0x124] ss:$8 sps:$4 sm:$0xff]  }
  0xfa   :  { %1048 = vmatmul.mubr.bf16.gmra.mxu0 %v9741_v55  ;;  %v9750_v55 = vld [vmem:[%s13941_s20 + $0x120] ss:$8 sps:$4 sm:$0xff]  }
  0xfb   :  { %8093 = vmatprep.mubr.msk.bf16.mxu0 %vm834_vm0, %v9742_v56  ;;  %v9751_v56 = vld [vmem:[%s13941_s20 + $0x134] ss:$8 sps:$4 sm:$0xff]  }
 0x102   :  { %1056 = vmatmul.mubr.bf16.gmra.mxu0 %v9744_v16  ;;  %v9753_v16 = vld [vmem:[%s13941_s20 + $0x130] ss:$8 sps:$4 sm:$0xff]  }
 0x103   :  { %8094 = vmatprep.mubr.msk.bf16.mxu0 %vm834_vm0, %v9745_v62  ;;  %v9786_v62 = vld [vmem:[%s13942_s26 + $0x158] ss:$12 sps:$4 sm:$0xff]  }
 0x104   :  { %9048 = vmatpush3.bf16.msra.mxu0 %v9786_v62 }
 0x105   :  { %9049 = vmatprep.subr.bf16.mxu0 %v13624_v17 }
 0x10a   :  { %1064 = vmatmul.mubr.bf16.gmra.mxu0 %v9747_v63  ;;  %v9787_v63 = vld [vmem:[%s13942_s26 + $0x140] ss:$12 sps:$4 sm:$0xff]  }
 0x10b   :  { %8095 = vmatprep.mubr.msk.bf16.mxu0 %vm834_vm0, %v9748_v57  ;;  %9050 = vmatpush3.bf16.msra.mxu0 %v9787_v63  ;;  %v9791_v57 = vld [vmem:[%s13942_s26 + $0x128] ss:$12 sps:$4 sm:$0xff]  }
 0x10c   :  { %9051 = vmatprep.subr.bf16.mxu0 %v13624_v17 }
 0x10f   :  { %9052 = vmatpush3.bf16.msra.mxu0 %v9791_v57 }
 0x110   :  { %9053 = vmatprep.subr.bf16.mxu0 %v13624_v17 }
 0x112   :  { %1072 = vmatmul.mubr.bf16.gmra.mxu0 %v9750_v55  ;;  %v9792_v55 = vld [vmem:[%s13942_s26 + $0x110] ss:$12 sps:$4 sm:$0xff]  }
 0x113   :  { %8096 = vmatprep.mubr.msk.bf16.mxu0 %vm834_vm0, %v9751_v56  ;;  %9054 = vmatpush3.bf16.msra.mxu0 %v9792_v55  ;;  %v9794_v56 = vld [vmem:[%s13942_s26 + $0xf8] ss:$12 sps:$4 sm:$0xff]  }
 0x114   :  { %9055 = vmatprep.subr.bf16.mxu0 %v13624_v17 }
 0x117   :  { %9056 = vmatpush3.bf16.msra.mxu0 %v9794_v56 }
 0x118   :  { %9077 = vmatprep.subr.bf16.mxu0 %v13624_v17 }
 0x11a   :  { %1080 = vmatmul.mubr.bf16.gmra.mxu0 %v9753_v16 }
 0x11b   :  { %9057 = vmatprep.mubr.msk.bf16.mxu0 %vm9944_vm1, %v13624_v17 }
 0x142   :  { %v929_v16 = vpop.f32.mrf.mxu0 }
 0x144   :  { %v931_v62 = vpop.f32.mrf.mxu0 }
 0x146   :  { %v932_v63 = vpop.f32.mrf.mxu0 }
 0x147   :  { %v10902_v57 = vpack.c.bf16 %v932_v63, %v929_v16 }
 0x148   :  { %v934_v18 = vpop.f32.mrf.mxu0 }
 0x14a   :  { %v937_v19 = vpop.f32.mrf.mxu0 }
 0x14c   :  { %v939_v58 = vpop.f32.mrf.mxu0 }
 0x14e   :  { %v940_v59 = vpop.f32.mrf.mxu0 }
 0x14f   :  { %v10904_v20 = vpack.c.bf16 %v940_v59, %v937_v19 }
 0x150   :  { %v942_v55 = vpop.f32.mrf.mxu0 }
 0x152   :  { %v945_v21 = vpop.f32.mrf.mxu0 }
 0x154   :  { %v947_v60 = vpop.f32.mrf.mxu0 }
 0x156   :  { %v948_v61 = vpop.f32.mrf.mxu0 }
 0x157   :  { %v10906_v22 = vpack.c.bf16 %v948_v61, %v945_v21  ;;  %v9769_v21 = vld [vmem:[%s13942_s26 + $0xe0] ss:$12 sps:$4 sm:$0xff]   ;;  %v13943_v61 = vmov 0  }
 0x158   :  { %v950_v23 = vpop.f32.mrf.mxu0 }
 0x15a   :  { %v953_v56 = vpop.f32.mrf.mxu0 }
 0x15c   :  { %v955_v39 = vpop.f32.mrf.mxu0 }
 0x15e   :  { %v956_v17 = vpop.f32.mrf.mxu0 }
 0x15f   :  { %v10908_v62 = vpack.c.bf16 %v956_v17, %v953_v56  ;;  %v13944_v17 = vmov 0.0  }
 0x160   :  { %v958_v16 = vpop.f32.mrf.mxu0 }
 0x162   :  { %v961_v63 = vpop.f32.mrf.mxu0 }
 0x164   :  { %v963_v18 = vpop.f32.mrf.mxu0 }
 0x166   :  { %v964_v40 = vpop.f32.mrf.mxu0 }
 0x167   :  { %v10910_v58 = vpack.c.bf16 %v964_v40, %v961_v63  ;;  %v9770_v40 = vld [vmem:[%s13942_s26 + $0xc8] ss:$12 sps:$4 sm:$0xff]  }
 0x168   :  { %v966_v19 = vpop.f32.mrf.mxu0 }
 0x16a   :  { %v969_v59 = vpop.f32.mrf.mxu0 }
 0x16c   :  { %v971_v55 = vpop.f32.mrf.mxu0 }
 0x16e   :  { %v972_v24 = vpop.f32.mrf.mxu0 }
 0x16f   :  { %v1113_v23 = vpack.c.bf16 %v972_v24, %v969_v59  ;;  %v9771_v24 = vld [vmem:[%s13942_s26 + $0xb0] ss:$12 sps:$4 sm:$0xff]   ;;  %v9772_v59 = vld [vmem:[%s13942_s26 + $0x98] ss:$12 sps:$4 sm:$0xff]  }
 0x170   :  { %v974_v39 = vpop.f32.mrf.mxu0 }
 0x171   :  { %8132 = vmatmul.mubr.msk.bf16.vlgmr.msra.gmra.mxu1 %vm1219_vm2, %v1113_v23  ;;  %v9773_v39 = vld [vmem:[%s13942_s26 + $0x80] ss:$12 sps:$4 sm:$0xff]  }
 0x172   :  { %8988 = vmatpush3.bf16.msra.mxu1 %v9769_v21  ;;  %v977_v60 = vpop.f32.mrf.mxu0  ;;  %1277 = vmatprep.mubr.bf16.mxu1 %v13943_v61 }
 0x173   :  { %8989 = vmatprep.subr.bf16.mxu1 %v13944_v17 }
 0x174   :  { %v979_v56 = vpop.f32.mrf.mxu0 }
 0x176   :  { %v980_v16 = vpop.f32.mrf.mxu0  ;;  %8990 = vmatpush3.bf16.msra.mxu1 %v9770_v40  ;;  %v9776_v40 = vld [vmem:[%s13942_s26 + $0x64] ss:$12 sps:$4 sm:$0xff]  }
 0x177   :  { %v10924_v63 = vpack.c.bf16 %v980_v16, %v977_v60  ;;  %8991 = vmatprep.subr.bf16.mxu1 %v13944_v17 }
 0x178   :  { %v982_v18 = vpop.f32.mrf.mxu0 }
 0x179   :  { %8133 = vmatmul.mubr.msk.bf16.gmra.mxu1 %vm1219_vm2, %v10924_v63 }
 0x17a   :  { %v985_v19 = vpop.f32.mrf.mxu0  ;;  %1287 = vmatprep.mubr.bf16.mxu1 %v13943_v61  ;;  %8992 = vmatpush3.bf16.msra.mxu1 %v9771_v24 }
 0x17b   :  { %8993 = vmatprep.subr.bf16.mxu1 %v13944_v17 }
 0x17c   :  { %v987_v55 = vpop.f32.mrf.mxu0 }
 0x17e   :  { %v988_v21 = vpop.f32.mrf.mxu0  ;;  %8994 = vmatpush3.bf16.msra.mxu1 %v9772_v59 }
 0x17f   :  { %v10937_v60 = vpack.c.bf16 %v988_v21, %v985_v19  ;;  %8995 = vmatprep.subr.bf16.mxu1 %v13944_v17 }
 0x180   :  { %v990_v56 = vpop.f32.mrf.mxu0 }
 0x181   :  { %8134 = vmatmul.mubr.msk.bf16.gmra.mxu1 %vm1219_vm2, %v10937_v60 }
 0x182   :  { %v993_v16 = vpop.f32.mrf.mxu0  ;;  %1297 = vmatprep.mubr.bf16.mxu1 %v13943_v61  ;;  %8996 = vmatpush3.bf16.msra.mxu1 %v9773_v39 }
 0x183   :  { %1492 = vmatprep.subr.bf16.mxu1 %v9776_v40 }
 0x184   :  { %v995_v24 = vpop.f32.mrf.mxu0 }
 0x186   :  { %v996_v18 = vpop.f32.mrf.mxu0 }
 0x187   :  { %v10946_v59 = vpack.c.bf16 %v996_v18, %v993_v16  ;;  %v9774_v16 = vld [vmem:[%s13942_s26 + $0x60] ss:$12 sps:$4 sm:$0xff]  }
 0x188   :  { %v998_v19 = vpop.f32.mrf.mxu0  ;;  %v9779_v18 = vld [vmem:[%s13942_s26 + $0x4c] ss:$12 sps:$4 sm:$0xff]  }
 0x189   :  { %8135 = vmatmul.mubr.msk.bf16.gmra.mxu1 %vm1219_vm2, %v10946_v59 }
 0x18a   :  { %v1001_v55 = vpop.f32.mrf.mxu0  ;;  %1307 = vmatprep.mubr.bf16.mxu1 %v13943_v61 }
 0x18c   :  { %v1003_v21 = vpop.f32.mrf.mxu0 }
 0x18d   :  { %v9777_v21 = vld [vmem:[%s13942_s26 + $0x48] ss:$12 sps:$4 sm:$0xff]  }
 0x18e   :  { %v1004_v56 = vpop.f32.mrf.mxu0 }
 0x18f   :  { %v10951_v25 = vpack.c.bf16 %v1004_v56, %v1001_v55  ;;  %v9798_v55 = vld [vmem:[%s13942_s26 + $0x1d0] ss:$12 sps:$4 sm:$0xff]  }
 0x190   :  { %v1006_v41 = vpop.f32.mrf.mxu0 }
 0x191   :  { %8136 = vmatmul.mubr.msk.bf16.gmra.mxu1 %vm1219_vm2, %v10951_v25 }
 0x192   :  { %8997 = vmatprep.mubr.msk.bf16.mxu1 %vm9944_vm1, %v13944_v17  ;;  %v1009_v39 = vpop.f32.mrf.mxu0 }
 0x194   :  { %v1011_v40 = vpop.f32.mrf.mxu0 }
 0x195   :  { %v9799_v40 = vld [vmem:[%s13942_s26 + $0x1b8] ss:$12 sps:$4 sm:$0xff]  }
 0x196   :  { %v1012_v24 = vpop.f32.mrf.mxu0 }
 0x197   :  { %v10963_v19 = vpack.c.bf16 %v1012_v24, %v1009_v39  ;;  %v9782_v39 = vld [vmem:[%s13942_s26 + $0x34] ss:$12 sps:$4 sm:$0xff]  }
 0x198   :  { %v1014_v41 = vpop.f32.mrf.mxu0 }
 0x199   :  { %8998 = vmatmul.mubr.msk.bf16.vlgmr.msra.gmra.mxu1 %vm1219_vm2, %v1113_v23  ;;  %9058 = vmatmul.mubr.msk.bf16.vlgmr.msra.gmra.mxu0 %vm1219_vm2, %v10963_v19 }
 0x19a   :  { %1493 = vmatpush1.bf16.msra.mxu1 %v9774_v16  ;;  %9001 = vmatprep.mubr.msk.bf16.mxu1 %vm9944_vm1, %v13944_v17  ;;  %v1017_v56 = vpop.f32.mrf.mxu0  ;;  %v9780_v16 = vld [vmem:[%s13942_s26 + $0x30] ss:$12 sps:$4 sm:$0xff]  }
 0x19b   :  { %1494 = vmatprep.subr.bf16.mxu1 %v9779_v18  ;;  %9061 = vmatprep.mubr.msk.bf16.mxu0 %vm9944_vm1, %v13944_v17  ;;  %v9785_v18 = vld [vmem:[%s13942_s26 + $0x1c] ss:$12 sps:$4 sm:$0xff]  }
 0x19c   :  { %v1019_v23 = vpop.f32.mrf.mxu0  ;;  %9078 = vmatpush3.bf16.msra.mxu0 %v9798_v55 }
 0x19d   :  { %9079 = vmatprep.subr.bf16.mxu0 %v13944_v17 }
 0x19e   :  { %1495 = vmatpush1.bf16.msra.mxu1 %v9777_v21  ;;  %v1020_v24 = vpop.f32.mrf.mxu0  ;;  %v9801_v21 = vld [vmem:[%s13942_s26 + $0x1a0] ss:$12 sps:$4 sm:$0xff]  }
 0x19f   :  { %1496 = vmatprep.subr.bf16.mxu1 %v9782_v39  ;;  %v10991_v41 = vpack.c.bf16 %v1020_v24, %v1017_v56  ;;  %v9783_v56 = vld [vmem:[%s13942_s26 + $0x18] ss:$12 sps:$4 sm:$0xff]  }
 0x1a0   :  { %v1022_v55 = vpop.f32.mrf.mxu0  ;;  %9080 = vmatpush3.bf16.msra.mxu0 %v9799_v40  ;;  %v9788_v40 = vld [vmem:[%s13942_s26] ss:$12 sps:$4 sm:$0xff]  }
 0x1a1   :  { %9002 = vmatmul.mubr.msk.bf16.gmra.mxu1 %vm1219_vm2, %v10924_v63  ;;  %9062 = vmatmul.mubr.msk.bf16.gmra.mxu0 %vm1219_vm2, %v10991_v41  ;;  %v9790_v63 = vld [vmem:[%s13942_s26 + $0x4] ss:$12 sps:$4 sm:$0xff]   ;;  %v9802_v55 = vld [vmem:[%s13942_s26 + $0x188] ss:$12 sps:$4 sm:$0xff]  }
 0x1a2   :  { %9005 = vmatprep.mubr.msk.bf16.mxu1 %vm9944_vm1, %v13944_v17  ;;  %1497 = vmatpush1.bf16.msra.mxu1 %v9780_v16  ;;  %v1025_v39 = vpop.f32.mrf.mxu0 }
 0x1a3   :  { %1498 = vmatprep.subr.bf16.mxu1 %v9785_v18  ;;  %9065 = vmatprep.mubr.msk.bf16.mxu0 %vm9944_vm1, %v13944_v17 }
 0x1a4   :  { %v1027_v23 = vpop.f32.mrf.mxu0  ;;  %9081 = vmatprep.subr.bf16.mxu0 %v13944_v17 }
 0x1a5   :  { %9082 = vmatpush3.bf16.msra.mxu0 %v9801_v21 }
 0x1a6   :  { %1499 = vmatpush1.bf16.msra.mxu1 %v9783_v56  ;;  %v1028_v16 = vpop.f32.mrf.mxu0  ;;  %9083 = vmatprep.subr.bf16.mxu0 %v13944_v17 }
 0x1a7   :  { %1500 = vmatprep.subr.bf16.mxu1 %v9790_v63  ;;  %v11015_v24 = vpack.c.bf16 %v1028_v16, %v1025_v39  ;;  %v9806_v39 = vld [vmem:[%s13942_s26 + $0x170] ss:$12 sps:$4 sm:$0xff]  }
 0x1a8   :  { %v1030_v18 = vpop.f32.mrf.mxu0 }
 0x1a9   :  { %9006 = vmatmul.mubr.msk.bf16.gmra.mxu1 %vm1219_vm2, %v10937_v60  ;;  %9066 = vmatmul.mubr.msk.bf16.gmra.mxu0 %vm1219_vm2, %v11015_v24 }
 0x1aa   :  { %9009 = vmatprep.mubr.msk.bf16.mxu1 %vm9944_vm1, %v13944_v17  ;;  %1501 = vmatpush1.bf16.msra.mxu1 %v9788_v40  ;;  %v1033_v21 = vpop.f32.mrf.mxu0 }
 0x1ab   :  { %9017 = vmatprep.subr.bf16.mxu1 %v13944_v17  ;;  %9069 = vmatprep.mubr.msk.bf16.mxu0 %vm9944_vm1, %v13944_v17 }
 0x1ac   :  { %v1035_v56 = vpop.f32.mrf.mxu0  ;;  %9084 = vmatpush3.bf16.msra.mxu0 %v9802_v55 }
 0x1ad   :  { %9085 = vmatprep.subr.bf16.mxu0 %v13944_v17 }
 0x1ae   :  { %v1036_v60 = vpop.f32.mrf.mxu0 }
 0x1af   :  { %v11033_v63 = vpack.c.bf16 %v1036_v60, %v1033_v21 }
 0x1b0   :  { %v1038_v23 = vpop.f32.mrf.mxu0  ;;  %9086 = vmatpush3.bf16.msra.mxu0 %v9806_v39  ;;  %v9793_v39 = vld [vmem:[%s13942_s26 + $0x68] ss:$12 sps:$4 sm:$0xff]  }
 0x1b1   :  { %9010 = vmatmul.mubr.msk.bf16.gmra.mxu1 %vm1219_vm2, %v10946_v59  ;;  %9070 = vmatmul.mubr.msk.bf16.gmra.mxu0 %vm1219_vm2, %v11033_v63 }
 0x1b2   :  { %9013 = vmatprep.mubr.msk.bf16.mxu1 %vm9944_vm1, %v13944_v17  ;;  %v1041_v40 = vpop.f32.mrf.mxu0  ;;  %9073 = vmatprep.mubr.msk.bf16.mxu0 %vm9944_vm1, %v13944_v17 }
 0x1b4   :  { %v1043_v16 = vpop.f32.mrf.mxu0 }
 0x1b6   :  { %v1044_v18 = vpop.f32.mrf.mxu0 }
 0x1b7   :  { %v11043_v55 = vpack.c.bf16 %v1044_v18, %v1041_v40 }
 0x1b8   :  { %v1046_v21 = vpop.f32.mrf.mxu0 }
 0x1b9   :  { %9014 = vmatmul.mubr.msk.bf16.gmra.mxu1 %vm1219_vm2, %v10951_v25  ;;  %9074 = vmatmul.mubr.msk.bf16.gmra.mxu0 %vm1219_vm2, %v11043_v55  ;;  %v9795_v25 = vld [vmem:[%s13942_s26 + $0x50] ss:$12 sps:$4 sm:$0xff]   ;;  %v9796_v21 = vld [vmem:[%s13942_s26 + $0x38] ss:$12 sps:$4 sm:$0xff]  }
 0x1ba   :  { %1518 = vmatprep.mubr.bf16.mxu1 %v13943_v61  ;;  %v1049_v59 = vpop.f32.mrf.mxu0  ;;  %9087 = vmatprep.mubr.msk.bf16.mxu0 %vm9944_vm1, %v13944_v17 }
 0x1bc   :  { %v1051_v56 = vpop.f32.mrf.mxu0 }
 0x1be   :  { %v1052_v60 = vpop.f32.mrf.mxu0 }
 0x1bf   :  { %v11055_v23 = vpack.c.bf16 %v1052_v60, %v1049_v59  ;;  %v9797_v60 = vld [vmem:[%s13942_s26 + $0x20] ss:$12 sps:$4 sm:$0xff]  }
 0x1c0   :  { %v1054_v40 = vpop.f32.mrf.mxu0 }
 0x1c1   :  { %8157 = vmatmul.mubr.msk.bf16.vlgmr.msra.gmra.mxu1 %vm1219_vm2, %v10902_v57  ;;  %9088 = vmatmul.mubr.msk.bf16.vlgmr.msra.gmra.mxu0 %vm1219_vm2, %v11055_v23 }
 0x1c2   :  { %9018 = vmatpush3.bf16.msra.mxu1 %v9793_v39  ;;  %1528 = vmatprep.mubr.bf16.mxu1 %v13943_v61  ;;  %v1057_v16 = vpop.f32.mrf.mxu0 }
 0x1c3   :  { %9019 = vmatprep.subr.bf16.mxu1 %v13944_v17  ;;  %9091 = vmatprep.mubr.msk.bf16.mxu0 %vm9944_vm1, %v13944_v17 }
 0x1c4   :  { %v1059_v18 = vpop.f32.mrf.mxu0 }
 0x1c6   :  { %9020 = vmatpush3.bf16.msra.mxu1 %v9795_v25  ;;  %v1060_v59 = vpop.f32.mrf.mxu0 }
 0x1c7   :  { %9021 = vmatprep.subr.bf16.mxu1 %v13944_v17  ;;  %v11072_v56 = vpack.c.bf16 %v1060_v59, %v1057_v16  ;;  %v9800_v16 = vld [vmem:[%s13942_s26 + $0x8] ss:$12 sps:$4 sm:$0xff]  }
 0x1c8   :  { %v1062_v39 = vpop.f32.mrf.mxu0 }
 0x1c9   :  { %8158 = vmatmul.mubr.msk.bf16.gmra.mxu1 %vm1219_vm2, %v10904_v20  ;;  %9092 = vmatmul.mubr.msk.bf16.gmra.mxu0 %vm1219_vm2, %v11072_v56 }
 0x1ca   :  { %1538 = vmatprep.mubr.bf16.mxu1 %v13943_v61  ;;  %9022 = vmatpush3.bf16.msra.mxu1 %v9796_v21  ;;  %v1065_v40 = vpop.f32.mrf.mxu0  ;;  %v9805_v21 = vld [vmem:[%s13942_s26 + $0x154] ss:$12 sps:$4 sm:$0xff]  }
 0x1cb   :  { %9023 = vmatprep.subr.bf16.mxu1 %v13944_v17  ;;  %9095 = vmatprep.mubr.msk.bf16.mxu0 %vm9944_vm1, %v13944_v17 }
 0x1cc   :  { %v1067_v25 = vpop.f32.mrf.mxu0 }
 0x1ce   :  { %9024 = vmatpush3.bf16.msra.mxu1 %v9797_v60  ;;  %v1068_v18 = vpop.f32.mrf.mxu0 }
 0x1cf   :  { %9025 = vmatprep.subr.bf16.mxu1 %v13944_v17  ;;  %v11092_v59 = vpack.c.bf16 %v1068_v18, %v1065_v40 }
 0x1d0   :  { %v1070_v39 = vpop.f32.mrf.mxu0 }
 0x1d1   :  { %8159 = vmatmul.mubr.msk.bf16.gmra.mxu1 %vm1219_vm2, %v10906_v22  ;;  %9096 = vmatmul.mubr.msk.bf16.gmra.mxu0 %vm1219_vm2, %v11092_v59 }
 0x1d2   :  { %1548 = vmatprep.mubr.bf16.mxu1 %v13943_v61  ;;  %9026 = vmatpush3.bf16.msra.mxu1 %v9800_v16  ;;  %v1073_v60 = vpop.f32.mrf.mxu0 }
 0x1d3   :  { %1769 = vmatprep.subr.bf16.mxu1 %v9805_v21  ;;  %9099 = vmatprep.mubr.msk.bf16.mxu0 %vm9944_vm1, %v13944_v17 }
 0x1d4   :  { %v1075_v25 = vpop.f32.mrf.mxu0 }
 0x1d6   :  { %v1076_v42 = vpop.f32.mrf.mxu0 }
 0x1d7   :  { %v11101_v26 = vpack.c.bf16 %v1076_v42, %v1073_v60  ;;  %v9803_v42 = vld [vmem:[%s13942_s26 + $0x150] ss:$12 sps:$4 sm:$0xff]  }
 0x1d8   :  { %v1078_v40 = vpop.f32.mrf.mxu0  ;;  %v9809_v60 = vld [vmem:[%s13942_s26 + $0x13c] ss:$12 sps:$4 sm:$0xff]  }
 0x1d9   :  { %8160 = vmatmul.mubr.msk.bf16.gmra.mxu1 %vm1219_vm2, %v10908_v62  ;;  %9100 = vmatmul.mubr.msk.bf16.gmra.mxu0 %vm1219_vm2, %v11101_v26  ;;  %v9807_v40 = vld [vmem:[%s13942_s26 + $0x138] ss:$12 sps:$4 sm:$0xff]  }
 0x1da   :  { %1558 = vmatprep.mubr.bf16.mxu1 %v13943_v61  ;;  %v1081_v18 = vpop.f32.mrf.mxu0  ;;  %9103 = vmatprep.mubr.msk.bf16.mxu0 %vm9944_vm1, %v13944_v17 }
 0x1dc   :  { %v1083_v16 = vpop.f32.mrf.mxu0 }
 0x1dd   :  { %v9810_v16 = vld [vmem:[%s13942_s26 + $0x120] ss:$12 sps:$4 sm:$0xff]  }
 0x1de   :  { %v1084_v21 = vpop.f32.mrf.mxu0 }
 0x1df   :  { %v11110_v39 = vpack.c.bf16 %v1084_v21, %v1081_v18  ;;  %v9812_v18 = vld [vmem:[%s13942_s26 + $0x124] ss:$12 sps:$4 sm:$0xff]   ;;  %v9813_v21 = vld [vmem:[%s13942_s26 + $0x108] ss:$12 sps:$4 sm:$0xff]  }
 0x1e0   :  { %v1086_v25 = vpop.f32.mrf.mxu0 }
 0x1e1   :  { %8161 = vmatmul.mubr.msk.bf16.gmra.mxu1 %vm1219_vm2, %v10910_v58  ;;  %9104 = vmatmul.mubr.msk.bf16.gmra.mxu0 %vm1219_vm2, %v11110_v39  ;;  %v9818_v25 = vld [vmem:[%s13942_s26 + $0xf4] ss:$12 sps:$4 sm:$0xff]  }
 0x1e2   :  { %9027 = vmatprep.mubr.msk.bf16.mxu1 %vm9944_vm1, %v13944_v17 }
 0x1e9   :  { %9028 = vmatmul.mubr.msk.bf16.vlgmr.msra.gmra.mxu1 %vm1219_vm2, %v10902_v57  ;;  %v9815_v57 = vld [vmem:[%s13942_s26 + $0x10c] ss:$12 sps:$4 sm:$0xff]  }
 0x1ea   :  { %1770 = vmatpush1.bf16.msra.mxu1 %v9803_v42  ;;  %9031 = vmatprep.mubr.msk.bf16.mxu1 %vm9944_vm1, %v13944_v17  ;;  %v9816_v42 = vld [vmem:[%s13942_s26 + $0xf0] ss:$12 sps:$4 sm:$0xff]  }
 0x1eb   :  { %1771 = vmatprep.subr.bf16.mxu1 %v9809_v60  ;;  %v9824_v60 = vld [vmem:[%s13942_s26 + $0x1b4] ss:$12 sps:$4 sm:$0xff]  }
 0x1ee   :  { %1772 = vmatpush1.bf16.msra.mxu1 %v9807_v40  ;;  %v9825_v40 = vld [vmem:[%s13942_s26 + $0x198] ss:$12 sps:$4 sm:$0xff]  }
 0x1ef   :  { %1773 = vmatprep.subr.bf16.mxu1 %v9812_v18  ;;  %v9828_v18 = vld [vmem:[%s13942_s26 + $0x180] ss:$12 sps:$4 sm:$0xff]  }
 0x1f1   :  { %9032 = vmatmul.mubr.msk.bf16.gmra.mxu1 %vm1219_vm2, %v10904_v20  ;;  %v9821_v20 = vld [vmem:[%s13942_s26 + $0x1cc] ss:$12 sps:$4 sm:$0xff]  }
 0x1f2   :  { %9035 = vmatprep.mubr.msk.bf16.mxu1 %vm9944_vm1, %v13944_v17  ;;  %1774 = vmatpush1.bf16.msra.mxu1 %v9810_v16  ;;  %v9833_v16 = vld [vmem:[%s13942_s26 + $0x16c] ss:$12 sps:$4 sm:$0xff]  }
 0x1f3   :  { %1775 = vmatprep.subr.bf16.mxu1 %v9815_v57  ;;  %v9831_v57 = vld [vmem:[%s13942_s26 + $0x168] ss:$12 sps:$4 sm:$0xff]  }
 0x1f6   :  { %1776 = vmatpush1.bf16.msra.mxu1 %v9813_v21 }
 0x1f7   :  { %1777 = vmatprep.subr.bf16.mxu1 %v9818_v25 }
 0x1f9   :  { %9036 = vmatmul.mubr.msk.bf16.gmra.mxu1 %vm1219_vm2, %v10906_v22  ;;  %v9819_v22 = vld [vmem:[%s13942_s26 + $0x1c8] ss:$12 sps:$4 sm:$0xff]  }
 0x1fa   :  { %9039 = vmatprep.mubr.msk.bf16.mxu1 %vm9944_vm1, %v13944_v17  ;;  %1778 = vmatpush1.bf16.msra.mxu1 %v9816_v42 }
 0x1fb   :  { %2076 = vmatprep.subr.bf16.mxu1 %v9821_v20 }
 0x201   :  { %9040 = vmatmul.mubr.msk.bf16.gmra.mxu1 %vm1219_vm2, %v10908_v62  ;;  %v9822_v62 = vld [vmem:[%s13942_s26 + $0x1b0] ss:$12 sps:$4 sm:$0xff]  }
 0x202   :  { %9043 = vmatprep.mubr.msk.bf16.mxu1 %vm9944_vm1, %v13944_v17 }
 0x209   :  { %9044 = vmatmul.mubr.msk.bf16.gmra.mxu1 %vm1219_vm2, %v10910_v58  ;;  %v9827_v58 = vld [vmem:[%s13942_s26 + $0x19c] ss:$12 sps:$4 sm:$0xff]  }
 0x20a   :  { %1795 = vmatprep.mubr.bf16.mxu1 %v13943_v61 }
 0x211   :  { %8202 = vmatmul.mubr.msk.bf16.vlgmr.msra.gmra.mxu1 %vm1219_vm2, %v10963_v19  ;;  %v9830_v19 = vld [vmem:[%s13942_s26 + $0x184] ss:$12 sps:$4 sm:$0xff]  }
 0x212   :  { %2077 = vmatpush1.bf16.msra.mxu1 %v9819_v22  ;;  %1805 = vmatprep.mubr.bf16.mxu1 %v13943_v61 }
 0x213   :  { %2078 = vmatprep.subr.bf16.mxu1 %v9824_v60 }
 0x216   :  { %2079 = vmatpush1.bf16.msra.mxu1 %v9822_v62 }
 0x217   :  { %2080 = vmatprep.subr.bf16.mxu1 %v9827_v58 }
 0x219   :  { %8203 = vmatmul.mubr.msk.bf16.gmra.mxu1 %vm1219_vm2, %v10991_v41 }
 0x21a   :  { %1815 = vmatprep.mubr.bf16.mxu1 %v13943_v61  ;;  %2081 = vmatpush1.bf16.msra.mxu1 %v9825_v40 }
 0x21b   :  { %2082 = vmatprep.subr.bf16.mxu1 %v9830_v19 }
 0x21e   :  { %2083 = vmatpush1.bf16.msra.mxu1 %v9828_v18 }
 0x21f   :  { %2084 = vmatprep.subr.bf16.mxu1 %v9833_v16 }
 0x221   :  { %8204 = vmatmul.mubr.msk.bf16.gmra.mxu1 %vm1219_vm2, %v11015_v24 }
 0x222   :  { %1825 = vmatprep.mubr.bf16.mxu1 %v13943_v61  ;;  %2085 = vmatpush1.bf16.msra.mxu1 %v9831_v57 }
 0x229   :  { %8205 = vmatmul.mubr.msk.bf16.gmra.mxu1 %vm1219_vm2, %v11033_v63 }
 0x22a   :  { %1835 = vmatprep.mubr.bf16.mxu1 %v13943_v61 }
 0x231   :  { %v11206_v41 = vpop.f32.mrf.mxu1  ;;  %8206 = vmatmul.mubr.msk.bf16.gmra.mxu1 %vm1219_vm2, %v11043_v55 }
 0x232   :  { %2102 = vmatprep.mubr.bf16.mxu1 %v13943_v61 }
 0x233   :  { %v11211_v21 = vpop.f32.mrf.mxu1 }
 0x235   :  { %v11213_v25 = vpop.f32.mrf.mxu1 }
 0x237   :  { %v11215_v24 = vpop.f32.mrf.mxu1 }
 0x239   :  { %v11217_v42 = vpop.f32.mrf.mxu1  ;;  %8247 = vmatmul.mubr.msk.bf16.vlgmr.msra.gmra.mxu1 %vm1219_vm2, %v11055_v23 }
 0x23a   :  { %2112 = vmatprep.mubr.bf16.mxu1 %v13943_v61 }
 0x23b   :  { %v11222_v63 = vpop.f32.mrf.mxu1 }
 0x23c   :  { %13945 = vst [vmem:[#allocation93_spill] sm:$0xff] %v11222_v63 }
 0x23d   :  { %v11224_v20 = vpop.f32.mrf.mxu1 }
 0x23e   :  { %13946 = vst [vmem:[#allocation94_spill] sm:$0xff] %v11224_v20 }
 0x23f   :  { %v11226_v55 = vpop.f32.mrf.mxu1 }
 0x240   :  { %13947 = vst [vmem:[#allocation95_spill] sm:$0xff] %v11226_v55 }
 0x241   :  { %v11228_v22 = vpop.f32.mrf.mxu1  ;;  %8248 = vmatmul.mubr.msk.bf16.gmra.mxu1 %vm1219_vm2, %v11072_v56 }
 0x242   :  { %13948 = vst [vmem:[#allocation96_spill] sm:$0xff] %v11228_v22  ;;  %2122 = vmatprep.mubr.bf16.mxu1 %v13943_v61 }
 0x243   :  { %v11233_v60 = vpop.f32.mrf.mxu1 }
 0x244   :  { %13949 = vst [vmem:[#allocation97_spill] sm:$0xff] %v11233_v60 }
 0x245   :  { %v11235_v62 = vpop.f32.mrf.mxu1 }
 0x246   :  { %13950 = vst [vmem:[#allocation98_spill] sm:$0xff] %v11235_v62 }
 0x247   :  { %v11237_v23 = vpop.f32.mrf.mxu1 }
 0x248   :  { %13951 = vst [vmem:[#allocation99_spill] sm:$0xff] %v11237_v23 }
 0x249   :  { %v11239_v58 = vpop.f32.mrf.mxu1  ;;  %8249 = vmatmul.mubr.msk.bf16.gmra.mxu1 %vm1219_vm2, %v11092_v59 }
 0x24a   :  { %13952 = vst [vmem:[#allocation100_spill] sm:$0xff] %v11239_v58  ;;  %2132 = vmatprep.mubr.bf16.mxu1 %v13943_v61 }
 0x24b   :  { %v11244_v40 = vpop.f32.mrf.mxu1 }
 0x24c   :  { %13953 = vst [vmem:[#allocation101_spill] sm:$0xff] %v11244_v40 }
 0x24d   :  { %v11246_v19 = vpop.f32.mrf.mxu1 }
 0x24e   :  { %13954 = vst [vmem:[#allocation102_spill] sm:$0xff] %v11246_v19 }
 0x24f   :  { %v11248_v56 = vpop.f32.mrf.mxu1 }
 0x250   :  { %13955 = vst [vmem:[#allocation103_spill] sm:$0xff] %v11248_v56 }
 0x251   :  { %v11250_v18 = vpop.f32.mrf.mxu1  ;;  %8250 = vmatmul.mubr.msk.bf16.gmra.mxu1 %vm1219_vm2, %v11101_v26 }
 0x252   :  { %13956 = vst [vmem:[#allocation104_spill] sm:$0xff] %v11250_v18  ;;  %2142 = vmatprep.mubr.bf16.mxu1 %v13943_v61 }
 0x253   :  { %v11255_v16 = vpop.f32.mrf.mxu1 }
 0x254   :  { %13957 = vst [vmem:[#allocation105_spill] sm:$0xff] %v11255_v16  ;;  %v11370_v16 = vsub.f32 %v2415_v13, %v11351_v14 }
 0x255   :  { %v11257_v57 = vpop.f32.mrf.mxu1 }
 0x256   :  { %13958 = vst [vmem:[#allocation106_spill] sm:$0xff] %v11257_v57  ;;  %v11363_v57 = vand.u32 4294901760, %v2430_v15  ;;  %13971 = vst [vmem:[#allocation119_spill] sm:$0xff] %v11370_v16 }
 0x257   :  { %v11259_v59 = vpop.f32.mrf.mxu1 }
 0x258   :  { %13959 = vst [vmem:[#allocation107_spill] sm:$0xff] %v11259_v59  ;;  %13970 = vst [vmem:[#allocation118_spill] sm:$0xff] %v11363_v57  ;;  %v11387_v13 = vsub.f32 %v2430_v15, %v11363_v57  ;;  %v2413_v15 = vld [vmem:[%s13571_s3 + $0x60] sm:$0xff] }
 0x259   :  { %v11261_v27 = vpop.f32.mrf.mxu1  ;;  %8251 = vmatmul.mubr.msk.bf16.gmra.mxu1 %vm1219_vm2, %v11110_v39  ;;  %v11265_v43 = vpop.f32.mrf.mxu0 }
 0x25a   :  { %13975 = vst [vmem:[#allocation122_spill] sm:$0xff] %v11387_v13 }
 0x25b   :  { %v8999_v44 = vpop.f32.mrf.mxu1  ;;  %v9059_v28 = vpop.f32.mrf.mxu0 }
 0x25d   :  { %v11267_v29 = vpop.f32.mrf.mxu1  ;;  %v11269_v26 = vpop.f32.mrf.mxu0 }
 0x25f   :  { %v9000_v45 = vpop.f32.mrf.mxu1  ;;  %v9060_v46 = vpop.f32.mrf.mxu0 }
 0x261   :  { %v11271_v30 = vpop.f32.mrf.mxu1  ;;  %v11273_v31 = vpop.f32.mrf.mxu0 }
 0x263   :  { %v9003_v47 = vpop.f32.mrf.mxu1  ;;  %v9063_v48 = vpop.f32.mrf.mxu0 }
 0x265   :  { %v11275_v0 = vpop.f32.mrf.mxu1  ;;  %v11277_v1 = vpop.f32.mrf.mxu0 }
 0x267   :  { %v9004_v39 = vpop.f32.mrf.mxu1  ;;  %v9064_v49 = vpop.f32.mrf.mxu0 }
 0x269   :  { %v11279_v44 = vpop.f32.mrf.mxu1  ;;  %v11281_v28 = vpop.f32.mrf.mxu0 }
 0x26b   :  { %v9007_v50 = vpop.f32.mrf.mxu1  ;;  %v9067_v2 = vpop.f32.mrf.mxu0 }
 0x26d   :  { %v11283_v45 = vpop.f32.mrf.mxu1  ;;  %v11285_v46 = vpop.f32.mrf.mxu0 }
 0x26f   :  { %v9008_v3 = vpop.f32.mrf.mxu1  ;;  %v9068_v51 = vpop.f32.mrf.mxu0 }
 0x271   :  { %v11287_v47 = vpop.f32.mrf.mxu1  ;;  %v11289_v48 = vpop.f32.mrf.mxu0 }
 0x273   :  { %v9011_v52 = vpop.f32.mrf.mxu1  ;;  %v9071_v4 = vpop.f32.mrf.mxu0 }
 0x275   :  { %v11291_v39 = vpop.f32.mrf.mxu1  ;;  %v11293_v49 = vpop.f32.mrf.mxu0 }
 0x277   :  { %v9012_v5 = vpop.f32.mrf.mxu1  ;;  %v9072_v53 = vpop.f32.mrf.mxu0 }
 0x279   :  { %v11295_v50 = vpop.f32.mrf.mxu1  ;;  %v11297_v2 = vpop.f32.mrf.mxu0 }
 0x27b   :  { %v9015_v54 = vpop.f32.mrf.mxu1  ;;  %v9075_v6 = vpop.f32.mrf.mxu0 }
 0x27d   :  { %v11299_v3 = vpop.f32.mrf.mxu1  ;;  %v11301_v51 = vpop.f32.mrf.mxu0 }
 0x27f   :  { %v9016_v7 = vpop.f32.mrf.mxu1  ;;  %v9076_v32 = vpop.f32.mrf.mxu0 }
 0x280   :  { %v2432_v7 = vld [vmem:[%s13571_s3 + $0xf8] sm:$0xff] }
 0x281   :  { %v11303_v52 = vpop.f32.mrf.mxu1  ;;  %v11305_v4 = vpop.f32.mrf.mxu0  ;;  %v11324_v10 = vand.u32 4294901760, %v2432_v7 }
 0x283   :  { %v11307_v33 = vpop.f32.mrf.mxu1  ;;  %v9089_v5 = vpop.f32.mrf.mxu0  ;;  %13961 = vst [vmem:[#allocation109_spill] sm:$0xff] %v11324_v10  ;;  %8513 = vmatprep.subr.mxu1 %v11324_v10 }
 0x284   :  { %v2416_v5 = vld [vmem:[%s13571_s3 + $0x78] sm:$0xff] }
 0x285   :  { %v11309_v53 = vpop.f32.mrf.mxu1  ;;  %v11311_v8 = vpop.f32.mrf.mxu0  ;;  %v11329_v11 = vand.u32 4294901760, %v2416_v5 }
 0x287   :  { %v11313_v9 = vpop.f32.mrf.mxu1  ;;  %v9090_v6 = vpop.f32.mrf.mxu0  ;;  %13962 = vst [vmem:[#allocation110_spill] sm:$0xff] %v11329_v11  ;;  %8514 = vmatpush3.msra.mxu1 %v11329_v11  ;;  %v11349_v38 = vsub.f32 %v2416_v5, %v11329_v11  ;;  %v2414_v5 = vld [vmem:[%s13571_s3 + $0x68] sm:$0xff] }
 0x288   :  { %v2431_v6 = vld [vmem:[%s13571_s3 + $0xf0] sm:$0xff] }
 0x289   :  { %v11315_v54 = vpop.f32.mrf.mxu1  ;;  %v11317_v34 = vpop.f32.mrf.mxu0  ;;  %v11342_v12 = vand.u32 4294901760, %v2431_v6  ;;  %13966 = vst [vmem:[#allocation114_spill] sm:$0xff] %v11349_v38  ;;  %v13977_v19 = vand.u32 4294901760, %v11349_v38 }
 0x28b   :  { %v11322_v32 = vpop.f32.mrf.mxu1  ;;  %v9093_v35 = vpop.f32.mrf.mxu0  ;;  %13965 = vst [vmem:[#allocation113_spill] sm:$0xff] %v11342_v12  ;;  %v11360_v59 = vsub.f32 %v2431_v6, %v11342_v12  ;;  %8515 = vmatprep.subr.mxu1 %v11342_v12  ;;  %v2429_v6 = vld [vmem:[%s13571_s3 + $0xe0] sm:$0xff]  ;;  %v2559_v40 = vsub.f32 %v11349_v38, %v13977_v19 }
 0x28c   :  { %13960 = vst [vmem:[#allocation108_spill] sm:$0xff] %v11322_v32  ;;  %v11340_v35 = vsub.f32 %v2432_v7, %v11324_v10  ;;  %8516 = vmatpush3.msra.mxu1 %v11351_v14  ;;  %v11390_v14 = vand.u32 4294901760, %v2429_v6 }
 0x28d   :  { %v11334_v36 = vpop.f32.mrf.mxu1  ;;  %v11336_v37 = vpop.f32.mrf.mxu0  ;;  %13969 = vst [vmem:[#allocation117_spill] sm:$0xff] %v11360_v59  ;;  %8517 = vmatprep.subr.mxu1 %v11363_v57  ;;  %v13980_v62 = vand.u32 4294901760, %v11360_v59  ;;  %v2560_v38 = vand.u32 4294901760, %v2559_v40 }
 0x28e   :  { %13963 = vst [vmem:[#allocation111_spill] sm:$0xff] %v11334_v36  ;;  %13964 = vst [vmem:[#allocation112_spill] sm:$0xff] %v11340_v35  ;;  %v13974_v18 = vand.u32 4294901760, %v11340_v35  ;;  %v11410_v58 = vsub.f32 %v2429_v6, %v11390_v14 }
 0x28f   :  { %v11356_v61 = vpop.f32.mrf.mxu1  ;;  %v9094_v7 = vpop.f32.mrf.mxu0  ;;  %13976 = vst [vmem:[#allocation123_spill] sm:$0xff] %v11390_v14  ;;  %v2678_v60 = vsub.f32 %v11360_v59, %v13980_v62  ;;  %v2412_v62 = vld [vmem:[%s13571_s3 + $0x58] sm:$0xff] }
 0x290   :  { %13968 = vst [vmem:[#allocation116_spill] sm:$0xff] %v11356_v61  ;;  %v11373_v7 = vand.u32 4294901760, %v2414_v5  ;;  %v2671_v56 = vsub.f32 %v11340_v35, %v13974_v18  ;;  %13981 = vst [vmem:[#allocation126_spill] sm:$0xff] %v11410_v58  ;;  %v13989_v22 = vand.u32 4294901760, %v11410_v58 }
 0x291   :  { %v11378_v17 = vpop.f32.mrf.mxu1  ;;  %v11380_v12 = vpop.f32.mrf.mxu0  ;;  %v2679_v59 = vand.u32 4294901760, %v2678_v60 }
 0x292   :  { %13972 = vst [vmem:[#allocation120_spill] sm:$0xff] %v11373_v7  ;;  %13973 = vst [vmem:[#allocation121_spill] sm:$0xff] %v11378_v17  ;;  %v11397_v23 = vsub.f32 %v2414_v5, %v11373_v7  ;;  %8518 = vmatpush3.msra.mxu1 %v11373_v7  ;;  %v2672_v57 = vand.u32 4294901760, %v2671_v56  ;;  %v2428_v5 = vld [vmem:[%s13571_s3 + $0xd8] sm:$0xff]  ;;  %v13982_v7 = vand.u32 4294901760, %v11370_v16  ;;  %v11431_v17 = vand.u32 4294901760, %v2413_v15 }
 0x293   :  { %v11403_v18 = vpop.f32.mrf.mxu1  ;;  %v9097_v11 = vpop.f32.mrf.mxu0  ;;  %8519 = vmatprep.subr.mxu1 %v11390_v14  ;;  %v13984_v14 = vand.u32 4294901760, %v11387_v13 }
 0x294   :  { %13978 = vst [vmem:[#allocation124_spill] sm:$0xff] %v11397_v23  ;;  %13979 = vst [vmem:[#allocation125_spill] sm:$0xff] %v11403_v18  ;;  %v2566_v11 = vsub.f32 %v11370_v16, %v13982_v7  ;;  %8548 = vmatprep.subr.mxu0 %v2672_v57  ;;  %v2427_v7 = vld [vmem:[%s13571_s3 + $0xd0] sm:$0xff]  ;;  %v13986_v16 = vand.u32 4294901760, %v11397_v23  ;;  %v11439_v57 = vand.u32 4294901760, %v2428_v5  ;;  %8520 = vmatpush3.msra.mxu1 %v11431_v17 }
 0x295   :  { %v11423_v19 = vpop.f32.mrf.mxu1  ;;  %v11425_v6 = vpop.f32.mrf.mxu0  ;;  %v2685_v40 = vsub.f32 %v11387_v13, %v13984_v14  ;;  %13985 = vst [vmem:[#allocation128_spill] sm:$0xff] %v11431_v17  ;;  %8549 = vmatpush3.msra.mxu0 %v2560_v38  ;;  %v2411_v14 = vld [vmem:[%s13571_s3 + $0x50] sm:$0xff]  ;;  %v2692_v38 = vsub.f32 %v11410_v58, %v13989_v22  ;;  %v2410_v22 = vld [vmem:[%s13571_s3 + $0x48] sm:$0xff] }
 0x296   :  { %13983 = vst [vmem:[#allocation127_spill] sm:$0xff] %v11423_v19  ;;  %v2567_v56 = vand.u32 4294901760, %v2566_v11  ;;  %v2573_v19 = vsub.f32 %v11397_v23, %v13986_v16  ;;  %13987 = vst [vmem:[#allocation129_spill] sm:$0xff] %v11439_v57  ;;  %8550 = vmatprep.subr.mxu0 %v2679_v59  ;;  %v11450_v11 = vsub.f32 %v2413_v15, %v11431_v17  ;;  %v11453_v16 = vand.u32 4294901760, %v2412_v62  ;;  %v2426_v23 = vld [vmem:[%s13571_s3 + $0xc8] sm:$0xff] }
 0x297   :  { %v11444_v60 = vpop.f32.mrf.mxu1  ;;  %v9098_v18 = vpop.f32.mrf.mxu0  ;;  %v2686_v13 = vand.u32 4294901760, %v2685_v40  ;;  %v11459_v59 = vsub.f32 %v2428_v5, %v11439_v57  ;;  %8521 = vmatprep.subr.mxu1 %v11439_v57  ;;  %v2693_v58 = vand.u32 4294901760, %v2692_v38  ;;  %v11476_v5 = vand.u32 4294901760, %v2411_v14 }
 0x298   :  { %13988 = vst [vmem:[#allocation130_spill] sm:$0xff] %v11444_v60  ;;  %13990 = vst [vmem:[#allocation131_spill] sm:$0xff] %v11450_v11  ;;  %8551 = vmatpush3.msra.mxu0 %v2567_v56  ;;  %v2574_v60 = vand.u32 4294901760, %v2573_v19  ;;  %v11462_v18 = vand.u32 4294901760, %v2427_v7  ;;  %v13706_v56 = vand.u32 4294901760, %v11450_v11  ;;  %v11473_v19 = vsub.f32 %v2412_v62, %v11453_v16  ;;  %8522 = vmatpush3.msra.mxu1 %v11453_v16 }
 0x299   :  { %13991 = vst [vmem:[#allocation132_spill] sm:$0xff] %v11453_v16  ;;  %13992 = vst [vmem:[#allocation133_spill] sm:$0xff] %v11459_v59  ;;  %v11467_v15 = vpop.f32.mrf.mxu1  ;;  %v11469_v40 = vpop.f32.mrf.mxu0  ;;  %8552 = vmatprep.subr.mxu0 %v2686_v13  ;;  %v11494_v57 = vand.u32 4294901760, %v2410_v22 }
 0x29a   :  { %13993 = vst [vmem:[#allocation134_spill] sm:$0xff] %v11462_v18  ;;  %13994 = vst [vmem:[#allocation135_spill] sm:$0xff] %v11467_v15  ;;  %8553 = vmatpush3.msra.mxu0 %v2574_v60  ;;  %v11480_v17 = vsub.f32 %v2427_v7, %v11462_v18  ;;  %v11482_v15 = vand.u32 4294901760, %v2426_v23  ;;  %8523 = vmatprep.subr.mxu1 %v11462_v18  ;;  %v2580_v62 = vsub.f32 %v11450_v11, %v13706_v56  ;;  %v2425_v56 = vld [vmem:[%s13571_s3 + $0xc0] sm:$0xff] }
 0x29b   :  { %13995 = vst [vmem:[#allocation136_spill] sm:$0xff] %v11473_v19  ;;  %13996 = vst [vmem:[#allocation137_spill] sm:$0xff] %v11476_v5  ;;  %v11485_v13 = vpop.f32.mrf.mxu1  ;;  %v9101_v38 = vpop.f32.mrf.mxu0  ;;  %8554 = vmatprep.subr.mxu0 %v2693_v58  ;;  %v11492_v60 = vsub.f32 %v2411_v14, %v11476_v5  ;;  %8524 = vmatpush3.msra.mxu1 %v11476_v5  ;;  %v14002_v7 = vand.u32 4294901760, %v11459_v59  ;;  %v14005_v5 = vand.u32 4294901760, %v11473_v19  ;;  %v11536_v55 = vand.u32 4294901760, %v2425_v56 }
 0x29c   :  { %13997 = vst [vmem:[#allocation138_spill] sm:$0xff] %v11480_v17  ;;  %13998 = vst [vmem:[#allocation139_spill] sm:$0xff] %v11482_v15  ;;  %v11502_v58 = vsub.f32 %v2426_v23, %v11482_v15  ;;  %8525 = vmatprep.subr.mxu1 %v11482_v15  ;;  %v2581_v11 = vand.u32 4294901760, %v2580_v62  ;;  %v11517_v23 = vsub.f32 %v2410_v22, %v11494_v57 }
 0x29d   :  { %13999 = vst [vmem:[#allocation140_spill] sm:$0xff] %v11485_v13  ;;  %14000 = vst [vmem:[#allocation141_spill] sm:$0xff] %v11492_v60  ;;  %v2699_v18 = vsub.f32 %v11459_v59, %v14002_v7  ;;  %v11508_v14 = vpop.f32.mrf.mxu1  ;;  %v11510_v16 = vpop.f32.mrf.mxu0  ;;  %v2587_v7 = vsub.f32 %v11473_v19, %v14005_v5  ;;  %v2409_v59 = vld [vmem:[%s13571_s3 + $0x40] sm:$0xff]  ;;  %8526 = vmatpush3.msra.mxu1 %v11494_v57  ;;  %v2424_v5 = vld [vmem:[%s13571_s3 + $0xb8] sm:$0xff]  ;;  %v14009_v61 = vand.u32 4294901760, %v11492_v60 }
 0x29e   :  { %14001 = vst [vmem:[#allocation142_spill] sm:$0xff] %v11494_v57  ;;  %14003 = vst [vmem:[#allocation143_spill] sm:$0xff] %v11502_v58  ;;  %8555 = vmatpush3.msra.mxu0 %v2581_v11  ;;  %v11544_v11 = vand.u32 4294901760, %v2409_v59  ;;  %8527 = vmatprep.subr.mxu1 %v11536_v55 }
 0x29f   :  { %14004 = vst [vmem:[#allocation144_spill] sm:$0xff] %v11508_v14  ;;  %14006 = vst [vmem:[#allocation145_spill] sm:$0xff] %v11517_v23  ;;  %v2700_v15 = vand.u32 4294901760, %v2699_v18  ;;  %v14007_v14 = vand.u32 4294901760, %v11480_v17  ;;  %v11530_v38 = vpop.f32.mrf.mxu1  ;;  %v9102_v22 = vpop.f32.mrf.mxu0  ;;  %v2588_v19 = vand.u32 4294901760, %v2587_v7  ;;  %v2594_v57 = vsub.f32 %v11492_v60, %v14009_v61  ;;  %v2423_v61 = vld [vmem:[%s13571_s3 + $0xb0] sm:$0xff] }
 0x2a0   :  { %14008 = vst [vmem:[#allocation146_spill] sm:$0xff] %v11530_v38  ;;  %14010 = vst [vmem:[#allocation147_spill] sm:$0xff] %v11536_v55  ;;  %v14014_v38 = vand.u32 4294901760, %v11517_v23  ;;  %8528 = vmatpush3.msra.mxu1 %v11544_v11 }
 0x2a1   :  { %v2706_v62 = vsub.f32 %v11480_v17, %v14007_v14  ;;  %v2408_v14 = vld [vmem:[%s13571_s3 + $0x38] sm:$0xff]  ;;  %8556 = vmatprep.subr.mxu0 %v2700_v15  ;;  %v14011_v17 = vand.u32 4294901760, %v11502_v58  ;;  %14012 = vst [vmem:[#allocation148_spill] sm:$0xff] %v11544_v11  ;;  %v11549_v7 = vpop.f32.mrf.mxu1  ;;  %v11551_v18 = vpop.f32.mrf.mxu0  ;;  %v2595_v60 = vand.u32 4294901760, %v2594_v57 }
 0x2a2   :  { %14013 = vst [vmem:[#allocation149_spill] sm:$0xff] %v11549_v7  ;;  %8557 = vmatpush3.msra.mxu0 %v2588_v19  ;;  %v2601_v15 = vsub.f32 %v11517_v23, %v14014_v38  ;;  %v11566_v19 = vsub.f32 %v2409_v59, %v11544_v11  ;;  %v11568_v57 = vand.u32 4294901760, %v2408_v14  ;;  %v11580_v59 = vand.u32 4294901760, %v2423_v61 }
 0x2a3   :  { %v2707_v13 = vand.u32 4294901760, %v2706_v62  ;;  %v2713_v22 = vsub.f32 %v11502_v58, %v14011_v17  ;;  %v11557_v62 = vsub.f32 %v2425_v56, %v11536_v55  ;;  %v11559_v17 = vand.u32 4294901760, %v2424_v5  ;;  %v2407_v58 = vld [vmem:[%s13571_s3 + $0x30] sm:$0xff]  ;;  %v2422_v56 = vld [vmem:[%s13571_s3 + $0xa8] sm:$0xff]  ;;  %v11574_v38 = vpop.f32.mrf.mxu1  ;;  %v9105_v23 = vpop.f32.mrf.mxu0 }
 0x2a4   :  { %14017 = vst [vmem:[#allocation152_spill] sm:$0xff] %v11566_v19  ;;  %14018 = vst [vmem:[#allocation153_spill] sm:$0xff] %v11568_v57  ;;  %v2602_v55 = vand.u32 4294901760, %v2601_v15  ;;  %v11585_v11 = vsub.f32 %v2408_v14, %v11568_v57  ;;  %v11587_v20 = vand.u32 4294901760, %v2407_v58  ;;  %v11599_v15 = vsub.f32 %v2423_v61, %v11580_v59 }
 0x2a5   :  { %14015 = vst [vmem:[#allocation150_spill] sm:$0xff] %v11557_v62  ;;  %14016 = vst [vmem:[#allocation151_spill] sm:$0xff] %v11559_v17  ;;  %8558 = vmatprep.subr.mxu0 %v2707_v13  ;;  %v2714_v7 = vand.u32 4294901760, %v2713_v22  ;;  %v13735_v36 = vand.u32 4294901760, %v11557_v62  ;;  %v11578_v13 = vsub.f32 %v2424_v5, %v11559_v17  ;;  %8529 = vmatprep.subr.mxu1 %v11559_v17  ;;  %v13740_v22 = vand.u32 4294901760, %v11566_v19  ;;  %v11592_v23 = vpop.f32.mrf.mxu0 }
 0x2a6   :  { %14019 = vst [vmem:[#allocation154_spill] sm:$0xff] %v11574_v38  ;;  %8559 = vmatpush3.msra.mxu0 %v2595_v60  ;;  %14021 = vst [vmem:[#allocation156_spill] sm:$0xff] %v11580_v59  ;;  %8530 = vmatpush3.msra.mxu1 %v11568_v57  ;;  %v11590_v60 = vpop.f32.mrf.mxu1  ;;  %v11601_v14 = vand.u32 4294901760, %v2422_v56 }
 0x2a7   :  { %14020 = vst [vmem:[#allocation155_spill] sm:$0xff] %v11578_v13  ;;  %8560 = vmatprep.subr.mxu0 %v2714_v7  ;;  %14022 = vst [vmem:[#allocation157_spill] sm:$0xff] %v11585_v11  ;;  %v2720_v5 = vsub.f32 %v11557_v62, %v13735_v36  ;;  %8531 = vmatprep.subr.mxu1 %v11580_v59  ;;  %v2608_v57 = vsub.f32 %v11566_v19, %v13740_v22  ;;  %v2406_v36 = vld [vmem:[%s13571_s3 + $0x28] sm:$0xff]  ;;  %v9106_v7 = vpop.f32.mrf.mxu0  ;;  %v14029_v59 = vand.u32 4294901760, %v11578_v13 }
 0x2a8   :  { %14023 = vst [vmem:[#allocation158_spill] sm:$0xff] %v11587_v20  ;;  %14024 = vst [vmem:[#allocation159_spill] sm:$0xff] %v11590_v60  ;;  %8561 = vmatpush3.msra.mxu0 %v2602_v55  ;;  %v11609_v55 = vsub.f32 %v2407_v58, %v11587_v20  ;;  %8532 = vmatpush3.msra.mxu1 %v11587_v20  ;;  %v11615_v61 = vpop.f32.mrf.mxu1  ;;  %v11622_v17 = vsub.f32 %v2422_v56, %v11601_v14  ;;  %v2421_v58 = vld [vmem:[%s13571_s3 + $0xa0] sm:$0xff]  ;;  %v14031_v20 = vand.u32 4294901760, %v11585_v11 }
 0x2a9   :  { %14025 = vst [vmem:[#allocation160_spill] sm:$0xff] %v11599_v15  ;;  %14026 = vst [vmem:[#allocation161_spill] sm:$0xff] %v11601_v14  ;;  %v2721_v62 = vand.u32 4294901760, %v2720_v5  ;;  %v2727_v60 = vsub.f32 %v11578_v13, %v14029_v59  ;;  %8533 = vmatprep.subr.mxu1 %v11601_v14  ;;  %v2609_v19 = vand.u32 4294901760, %v2608_v57  ;;  %v2405_v59 = vld [vmem:[%s13571_s3 + $0x20] sm:$0xff]  ;;  %v14032_v13 = vand.u32 4294901760, %v11599_v15 }
 0x2aa   :  { %14027 = vst [vmem:[#allocation162_spill] sm:$0xff] %v11609_v55  ;;  %14028 = vst [vmem:[#allocation163_spill] sm:$0xff] %v11615_v61  ;;  %v2615_v5 = vsub.f32 %v11585_v11, %v14031_v20  ;;  %v1603_v22 = vpop.f32.mrf.mxu1  ;;  %v11639_v57 = vand.u32 4294901760, %v2406_v36  ;;  %v2420_v20 = vld [vmem:[%s13571_s3 + $0x98] sm:$0xff]  ;;  %v14034_v38 = vand.u32 4294901760, %v11609_v55  ;;  %v14036_v32 = vand.u32 4294901760, %v11622_v17 }
 0x2ab   :  { %14030 = vst [vmem:[#allocation164_spill] sm:$0xff] %v11622_v17  ;;  %8562 = vmatprep.subr.mxu0 %v2721_v62  ;;  %v2728_v56 = vand.u32 4294901760, %v2727_v60  ;;  %v2734_v61 = vsub.f32 %v11599_v15, %v14032_v13  ;;  %v1604_v7 = vadd.f32 %v1603_v22, %v11261_v27  ;;  %v11648_v60 = vand.u32 4294901760, %v2421_v58  ;;  %v2404_v13 = vld [vmem:[%s13571_s3 + $0x18] sm:$0xff] }
 0x2ac   :  { %14033 = vst [vmem:[#allocation165_spill] sm:$0xff] %v11639_v57  ;;  %8563 = vmatpush3.msra.mxu0 %v2609_v19  ;;  %v2616_v11 = vand.u32 4294901760, %v2615_v5  ;;  %v2622_v62 = vsub.f32 %v11609_v55, %v14034_v38  ;;  %v9029_v14 = vpop.f32.mrf.mxu1  ;;  %v2741_v63 = vsub.f32 %v11622_v17, %v14036_v32  ;;  %v11657_v27 = vsub.f32 %v2406_v36, %v11639_v57  ;;  %v2419_v32 = vld [vmem:[%s13571_s3 + $0x90] sm:$0xff]  ;;  %v14076_v55 = vld [vmem:[#allocation125_spill] sm:$0xff] }
 0x2ad   :  { %14035 = vst [vmem:[#allocation166_spill] sm:$0xff] %v11648_v60  ;;  %8564 = vmatprep.subr.mxu0 %v2728_v56  ;;  %v2735_v15 = vand.u32 4294901760, %v2734_v61  ;;  %v11659_v19 = vand.u32 4294901760, %v2405_v59  ;;  %8534 = vmatpush3.msra.mxu1 %v11639_v57  ;;  %v1921_v38 = vadd.f32 %v11265_v43, %v1604_v7  ;;  %v11664_v5 = vsub.f32 %v2421_v58, %v11648_v60 }
 0x2ae   :  { %14037 = vst [vmem:[#allocation167_spill] sm:$0xff] %v11657_v27  ;;  %8565 = vmatpush3.msra.mxu0 %v2616_v11  ;;  %v2623_v22 = vand.u32 4294901760, %v2622_v62  ;;  %v11666_v14 = vand.u32 4294901760, %v2420_v20  ;;  %8535 = vmatprep.subr.mxu1 %v11648_v60  ;;  %v1606_v36 = vpop.f32.mrf.mxu1  ;;  %v2742_v61 = vand.u32 4294901760, %v2741_v63  ;;  %v13755_v56 = vand.u32 4294901760, %v11657_v27 }
 0x2af   :  { %14038 = vst [vmem:[#allocation168_spill] sm:$0xff] %v11659_v19  ;;  %14039 = vst [vmem:[#allocation169_spill] sm:$0xff] %v11664_v5  ;;  %8566 = vmatprep.subr.mxu0 %v2735_v15  ;;  %v11674_v43 = vsub.f32 %v2405_v59, %v11659_v19  ;;  %v11676_v11 = vand.u32 4294901760, %v2404_v13  ;;  %8536 = vmatpush3.msra.mxu1 %v11659_v19  ;;  %v1607_v58 = vadd.f32 %v1606_v36, %v11267_v29 }
 0x2b0   :  { %14040 = vst [vmem:[#allocation170_spill] sm:$0xff] %v11666_v14  ;;  %v11681_v7 = vadd.f32 %v11305_v4, %v1921_v38  ;;  %8567 = vmatpush3.msra.mxu0 %v2623_v22  ;;  %v13756_v62 = vand.u32 4294901760, %v11664_v5  ;;  %v11685_v15 = vsub.f32 %v2420_v20, %v11666_v14  ;;  %8537 = vmatprep.subr.mxu1 %v11666_v14  ;;  %v9030_v63 = vpop.f32.mrf.mxu1  ;;  %v11695_v4 = vand.u32 4294901760, %v2419_v32 }
 0x2b1   :  { %14041 = vst [vmem:[#allocation171_spill] sm:$0xff] %v11674_v43  ;;  %14042 = vst [vmem:[#allocation172_spill] sm:$0xff] %v11676_v11  ;;  %8568 = vmatprep.subr.mxu0 %v2742_v61  ;;  %v2629_v59 = vsub.f32 %v11657_v27, %v13755_v56  ;;  %v13759_v17 = vand.u32 4294901760, %v11674_v43  ;;  %v11693_v29 = vsub.f32 %v2404_v13, %v11676_v11  ;;  %8538 = vmatpush3.msra.mxu1 %v11676_v11  ;;  %v2403_v56 = vld [vmem:[%s13571_s3 + $0x10] sm:$0xff] }
 0x2b2   :  { %14043 = vst [vmem:[#allocation173_spill] sm:$0xff] %v11681_v7  ;;  %14044 = vst [vmem:[#allocation174_spill] sm:$0xff] %v11685_v15  ;;  %v1924_v20 = vadd.f32 %v11269_v26, %v1607_v58  ;;  %v2748_v38 = vsub.f32 %v11664_v5, %v13756_v62  ;;  %v1611_v22 = vpop.f32.mrf.mxu1  ;;  %v13767_v63 = vand.u32 4294901760, %v11685_v15  ;;  %8539 = vmatprep.subr.mxu1 %v11695_v4  ;;  %v14080_v11 = vld [vmem:[#allocation130_spill] sm:$0xff] }
 0x2b3   :  { %14045 = vst [vmem:[#allocation175_spill] sm:$0xff] %v11693_v29  ;;  %14046 = vst [vmem:[#allocation176_spill] sm:$0xff] %v11695_v4  ;;  %v2630_v36 = vand.u32 4294901760, %v2629_v59  ;;  %v2636_v61 = vsub.f32 %v11674_v43, %v13759_v17  ;;  %v13766_v13 = vand.u32 4294901760, %v11693_v29  ;;  %v1612_v26 = vadd.f32 %v1611_v22, %v11271_v30 }
 0x2b4   :  { %v11713_v58 = vadd.f32 %v11311_v8, %v1924_v20  ;;  %v2749_v59 = vand.u32 4294901760, %v2748_v38  ;;  %v9033_v62 = vpop.f32.mrf.mxu1  ;;  %v2755_v17 = vsub.f32 %v11685_v15, %v13767_v63  ;;  %v11722_v27 = vsub.f32 %v2419_v32, %v11695_v4  ;;  %v2402_v20 = vld [vmem:[%s13571_s3 + $0x8] sm:$0xff]  ;;  %v14078_v4 = vld [vmem:[#allocation127_spill] sm:$0xff] }
 0x2b5   :  { %8569 = vmatpush3.msra.mxu0 %v2630_v36  ;;  %v2637_v5 = vand.u32 4294901760, %v2636_v61  ;;  %v2643_v43 = vsub.f32 %v11693_v29, %v13766_v13  ;;  %v1927_v30 = vadd.f32 %v11273_v31, %v1612_v26  ;;  %v11725_v8 = vand.u32 4294901760, %v2403_v56  ;;  %v2418_v62 = vld [vmem:[%s13571_s3 + $0x88] sm:$0xff] }
 0x2b6   :  { %14047 = vst [vmem:[#allocation177_spill] sm:$0xff] %v11713_v58  ;;  %14048 = vst [vmem:[#allocation178_spill] sm:$0xff] %v11722_v27  ;;  %8570 = vmatprep.subr.mxu0 %v2749_v59  ;;  %v1614_v38 = vpop.f32.mrf.mxu1  ;;  %v2756_v22 = vand.u32 4294901760, %v2755_v17  ;;  %v13764_v32 = vand.u32 4294901760, %v11722_v27  ;;  %v11745_v17 = vand.u32 4294901760, %v2418_v62  ;;  %v1527_v29 = vadd.f32 %v11313_v9, %v11215_v24  ;;  %v14067_v15 = vld [vmem:[#allocation93_spill] sm:$0xff] }
 0x2b7   :  { %14049 = vst [vmem:[#allocation179_spill] sm:$0xff] %v11725_v8  ;;  %8571 = vmatpush3.msra.mxu0 %v2637_v5  ;;  %v2644_v36 = vand.u32 4294901760, %v2643_v43  ;;  %v1615_v61 = vadd.f32 %v1614_v38, %v11275_v0  ;;  %v11736_v31 = vadd.f32 %v11317_v34, %v1927_v30  ;;  %v11739_v26 = vsub.f32 %v2403_v56, %v11725_v8  ;;  %v2417_v56 = vld [vmem:[%s13571_s3 + $0x80] sm:$0xff]  ;;  %v14077_v24 = vld [vmem:[#allocation98_spill] sm:$0xff] }
 0x2b8   :  { %8540 = vmatpush3.msra.mxu1 %v11725_v8  ;;  %v9034_v59 = vpop.f32.mrf.mxu1  ;;  %8572 = vmatprep.subr.mxu0 %v2756_v22  ;;  %v2762_v5 = vsub.f32 %v11722_v27, %v13764_v32  ;;  %14052 = vst [vmem:[#allocation182_spill] sm:$0xff] %v11745_v17  ;;  %v11747_v43 = vand.u32 4294901760, %v2402_v20  ;;  %v11755_v22 = vsub.f32 %v2418_v62, %v11745_v17 }
 0x2b9   :  { %14050 = vst [vmem:[#allocation180_spill] sm:$0xff] %v11736_v31  ;;  %14051 = vst [vmem:[#allocation181_spill] sm:$0xff] %v11739_v26  ;;  %v1930_v0 = vadd.f32 %v11277_v1, %v1615_v61  ;;  %8573 = vmatpush3.msra.mxu0 %v2644_v36  ;;  %v13765_v34 = vand.u32 4294901760, %v11739_v26  ;;  %8541 = vmatprep.subr.mxu1 %v11745_v17  ;;  %v1523_v27 = vadd.f32 %v11307_v33, %v11211_v21  ;;  %v14075_v21 = vld [vmem:[#allocation97_spill] sm:$0xff] }
 0x2ba   :  { %14053 = vst [vmem:[#allocation183_spill] sm:$0xff] %v11747_v43  ;;  %v1619_v30 = vpop.f32.mrf.mxu1  ;;  %v2763_v38 = vand.u32 4294901760, %v2762_v5  ;;  %14054 = vst [vmem:[#allocation184_spill] sm:$0xff] %v11755_v22  ;;  %v11758_v59 = vsub.f32 %v2402_v20, %v11747_v43  ;;  %8542 = vmatpush3.msra.mxu1 %v11747_v43  ;;  %v13768_v62 = vand.u32 4294901760, %v11755_v22  ;;  %v11771_v5 = vand.u32 4294901760, %v2417_v56  ;;  %v14069_v43 = vld [vmem:[#allocation94_spill] sm:$0xff] }
 0x2bb   :  { %v1620_v32 = vadd.f32 %v1619_v30, %v11279_v44  ;;  %v11763_v1 = vadd.f32 %v11336_v37, %v1930_v0  ;;  %v2650_v36 = vsub.f32 %v11739_v26, %v13765_v34  ;;  %v2401_v44 = vld [vmem:[%s13571_s3] sm:$0xff]  ;;  %v1525_v26 = vadd.f32 %v11309_v53, %v11213_v25  ;;  %v14074_v53 = vld [vmem:[#allocation121_spill] sm:$0xff] }
 0x2bc   :  { %14055 = vst [vmem:[#allocation185_spill] sm:$0xff] %v11758_v59  ;;  %v9037_v61 = vpop.f32.mrf.mxu1  ;;  %8574 = vmatprep.subr.mxu0 %v2763_v38  ;;  %v13771_v20 = vand.u32 4294901760, %v11758_v59  ;;  %14057 = vst [vmem:[#allocation187_spill] sm:$0xff] %v11771_v5  ;;  %v2769_v34 = vsub.f32 %v11755_v22, %v13768_v62  ;;  %8543 = vmatprep.subr.mxu1 %v11771_v5  ;;  %v14073_v25 = vld [vmem:[#allocation96_spill] sm:$0xff]  ;;  %v1543_v9 = vadd.f32 %v14076_v55, %v14075_v21 }
 0x2bd   :  { %14056 = vst [vmem:[#allocation186_spill] sm:$0xff] %v11763_v1  ;;  %v1933_v37 = vadd.f32 %v11281_v28, %v1620_v32  ;;  %v2651_v0 = vand.u32 4294901760, %v2650_v36  ;;  %v11784_v61 = vsub.f32 %v2417_v56, %v11771_v5  ;;  %v11791_v28 = vand.u32 4294901760, %v2401_v44  ;;  %v14087_v55 = vld [vmem:[#allocation144_spill] sm:$0xff] }
 0x2be   :  { %v1622_v30 = vpop.f32.mrf.mxu1  ;;  %v2657_v38 = vsub.f32 %v11758_v59, %v13771_v20  ;;  %v2770_v36 = vand.u32 4294901760, %v2769_v34 }
 0x2bf   :  { %14058 = vst [vmem:[#allocation188_spill] sm:$0xff] %v11784_v61  ;;  %v1623_v13 = vadd.f32 %v1622_v30, %v11283_v45  ;;  %v11789_v63 = vadd.f32 %v11380_v12, %v1933_v37  ;;  %8575 = vmatpush3.msra.mxu0 %v2651_v0  ;;  %14060 = vst [vmem:[#allocation190_spill] sm:$0xff] %v11791_v28  ;;  %v13775_v22 = vand.u32 4294901760, %v11784_v61  ;;  %8544 = vmatpush3.msra.mxu1 %v11791_v28 }
 0x2c0   :  { %v9038_v32 = vpop.f32.mrf.mxu1  ;;  %v2658_v62 = vand.u32 4294901760, %v2657_v38  ;;  %v11796_v56 = vsub.f32 %v2401_v44, %v11791_v28  ;;  %8576 = vmatprep.subr.mxu0 %v2770_v36  ;;  %8583 = vmatprep.subr.mxu1 %v11340_v35  ;;  %v14068_v28 = vld [vmem:[#allocation108_spill] sm:$0xff] }
 0x2c1   :  { %14059 = vst [vmem:[#allocation189_spill] sm:$0xff] %v11789_v63  ;;  %v1936_v20 = vadd.f32 %v11285_v46, %v1623_v13  ;;  %v2776_v12 = vsub.f32 %v11784_v61, %v13775_v22  ;;  %v1521_v61 = vadd.f32 %v11303_v52, %v11206_v41  ;;  %v14071_v41 = vld [vmem:[#allocation95_spill] sm:$0xff]  ;;  %v14072_v52 = vld [vmem:[#allocation116_spill] sm:$0xff] }
 0x2c2   :  { %14061 = vst [vmem:[#allocation191_spill] sm:$0xff] %v11796_v56  ;;  %v1627_v59 = vpop.f32.mrf.mxu1  ;;  %8577 = vmatpush3.msra.mxu0 %v2658_v62  ;;  %v13774_v46 = vand.u32 4294901760, %v11796_v56  ;;  %v1537_v8 = vadd.f32 %v14072_v52, %v14071_v41 }
 0x2c3   :  { %v1628_v45 = vadd.f32 %v1627_v59, %v11287_v47  ;;  %v11805_v34 = vadd.f32 %v11425_v6, %v1936_v20  ;;  %v2777_v44 = vand.u32 4294901760, %v2776_v12 }
 0x2c4   :  { %v9041_v13 = vpop.f32.mrf.mxu1  ;;  %v2664_v0 = vsub.f32 %v11796_v56, %v13774_v46 }
 0x2c5   :  { %14062 = vst [vmem:[#allocation192_spill] sm:$0xff] %v11805_v34  ;;  %v1939_v37 = vadd.f32 %v11289_v48, %v1628_v45  ;;  %8578 = vmatprep.subr.mxu0 %v2777_v44  ;;  %v14088_v34 = vld [vmem:[#allocation103_spill] sm:$0xff] }
 0x2c6   :  { %v1630_v30 = vpop.f32.mrf.mxu1  ;;  %v2665_v6 = vand.u32 4294901760, %v2664_v0 }
 0x2c7   :  { %v1631_v38 = vadd.f32 %v1630_v30, %v11291_v39  ;;  %v11814_v47 = vadd.f32 %v11469_v40, %v1939_v37 }
 0x2c8   :  { %v9042_v59 = vpop.f32.mrf.mxu1  ;;  %8579 = vmatpush3.msra.mxu0 %v2665_v6 }
 0x2c9   :  { %14063 = vst [vmem:[#allocation193_spill] sm:$0xff] %v11814_v47  ;;  %v1942_v62 = vadd.f32 %v11293_v49, %v1631_v38  ;;  %8618 = vmatprep.subr.mxu0 %v11324_v10  ;;  %v1531_v10 = vadd.f32 %v11315_v54, %v11217_v42  ;;  %v1545_v42 = vadd.f32 %v14078_v4, %v14077_v24  ;;  %v14079_v54 = vld [vmem:[#allocation99_spill] sm:$0xff]  ;;  %v14089_v4 = vld [vmem:[#allocation146_spill] sm:$0xff] }
 0x2ca   :  { %v1635_v20 = vpop.f32.mrf.mxu1  ;;  %v14082_v47 = vld [vmem:[#allocation135_spill] sm:$0xff]  ;;  %v1557_v24 = vadd.f32 %v14089_v4, %v14088_v34 }
 0x2cb   :  { %v1636_v48 = vadd.f32 %v1635_v20, %v11295_v50  ;;  %v11820_v32 = vadd.f32 %v11510_v16, %v1942_v62 }
 0x2cc   :  { %v9045_v36 = vpop.f32.mrf.mxu1 }
 0x2cd   :  { %14064 = vst [vmem:[#allocation194_spill] sm:$0xff] %v11820_v32  ;;  %v1945_v12 = vadd.f32 %v11297_v2, %v1636_v48  ;;  %v1541_v32 = vadd.f32 %v14074_v53, %v14073_v25  ;;  %v14084_v25 = vld [vmem:[#allocation101_spill] sm:$0xff]  ;;  %v14086_v53 = vld [vmem:[#allocation102_spill] sm:$0xff] }
 0x2ce   :  { %v1638_v39 = vpop.f32.mrf.mxu1  ;;  %v1555_v21 = vadd.f32 %v14087_v55, %v14086_v53 }
 0x2cf   :  { %v1639_v40 = vadd.f32 %v1638_v39, %v11299_v3  ;;  %v11825_v45 = vadd.f32 %v11551_v18, %v1945_v12 }
 0x2d0   :  { %v9046_v13 = vpop.f32.mrf.mxu1 }
 0x2d1   :  { %14065 = vst [vmem:[#allocation195_spill] sm:$0xff] %v11825_v45  ;;  %v1948_v49 = vadd.f32 %v11301_v51, %v1639_v40  ;;  %v14070_v45 = vld [vmem:[#allocation111_spill] sm:$0xff] }
 0x2d2   :  { %v1797_v44 = vpop.f32.mrf.mxu1  ;;  %v1535_v17 = vadd.f32 %v14070_v45, %v14069_v43 }
 0x2d3   :  { %v11829_v37 = vadd.f32 %v11592_v23, %v1948_v49  ;;  %v1919_v45 = vadd.f32 %v1797_v44, %v1521_v61  ;;  %v14094_v61 = vld [vmem:[#allocation149_spill] sm:$0xff] }
 0x2d4   :  { %v1799_v50 = vpop.f32.mrf.mxu1  ;;  %v14095_v44 = vld [vmem:[#allocation105_spill] sm:$0xff] }
 0x2d5   :  { %14066 = vst [vmem:[#allocation196_spill] sm:$0xff] %v11829_v37  ;;  %v1533_v37 = vadd.f32 %v14068_v28, %v14067_v15  ;;  %v1547_v15 = vadd.f32 %v14080_v11, %v14079_v54  ;;  %v14081_v28 = vld [vmem:[#allocation100_spill] sm:$0xff]  ;;  %v1920_v60 = vadd.f32 %v1799_v50, %v1523_v27  ;;  %v14100_v50 = vld [vmem:[#allocation163_spill] sm:$0xff] }
 0x2d6   :  { %v1801_v0 = vpop.f32.mrf.mxu1  ;;  %v1551_v14 = vadd.f32 %v14082_v47, %v14081_v28  ;;  %v14098_v28 = vld [vmem:[#allocation159_spill] sm:$0xff] }
 0x2d7   :  { %v1922_v33 = vadd.f32 %v1801_v0, %v1525_v26  ;;  %v14085_v26 = vld [vmem:[#allocation140_spill] sm:$0xff] }
 0x2d8   :  { %v1803_v16 = vpop.f32.mrf.mxu1  ;;  %v1553_v0 = vadd.f32 %v14085_v26, %v14084_v25 }
 0x2d9   :  { %v1923_v19 = vadd.f32 %v1803_v16, %v1527_v29  ;;  %v14096_v16 = vld [vmem:[#allocation154_spill] sm:$0xff] }
 0x2da   :  { %v1807_v30 = vpop.f32.mrf.mxu1 }
 0x2db   :  { %v1925_v41 = vadd.f32 %v1807_v30, %v1531_v10  ;;  %v14093_v10 = vld [vmem:[#allocation104_spill] sm:$0xff]  ;;  %v11889_v30 = vadd.f32 %v14096_v16, %v14095_v44 }
 0x2dc   :  { %v1809_v38 = vpop.f32.mrf.mxu1 }
 0x2dd   :  { %v1926_v54 = vadd.f32 %v1809_v38, %v1533_v37  ;;  %v14099_v37 = vld [vmem:[#allocation107_spill] sm:$0xff] }
 0x2de   :  { %v1811_v6 = vpop.f32.mrf.mxu1  ;;  %v11897_v38 = vadd.f32 %v14100_v50, %v14099_v37 }
 0x2df   :  { %v1928_v27 = vadd.f32 %v1811_v6, %v1535_v17 }
 0x2e0   :  { %v1813_v2 = vpop.f32.mrf.mxu1 }
 0x2e2   :  { %v1817_v59 = vpop.f32.mrf.mxu1 }
 0x2e4   :  { %v1819_v62 = vpop.f32.mrf.mxu1 }
 0x2e6   :  { %v1821_v3 = vpop.f32.mrf.mxu1 }
 0x2e7   :  { %v1934_v55 = vadd.f32 %v1821_v3, %v1545_v42 }
 0x2e8   :  { %v1823_v20 = vpop.f32.mrf.mxu1 }
 0x2ea   :  { %v1827_v18 = vpop.f32.mrf.mxu1 }
 0x2eb   :  { %v1937_v4 = vadd.f32 %v1827_v18, %v1551_v14 }
 0x2ec   :  { %v11831_v48 = vpop.f32.mrf.mxu1 }
 0x2ed   :  { %v1938_v3 = vadd.f32 %v11831_v48, %v1553_v0 }
 0x2ee   :  { %v11833_v36 = vpop.f32.mrf.mxu1 }
 0x2ef   :  { %v1940_v44 = vadd.f32 %v11833_v36, %v1555_v21 }
 0x2f0   :  { %v11835_v51 = vpop.f32.mrf.mxu1 }
 0x2f2   :  { %v11837_v23 = vpop.f32.mrf.mxu1 }
 0x2f4   :  { %v11839_v12 = vpop.f32.mrf.mxu1 }
 0x2f6   :  { %v11841_v39 = vpop.f32.mrf.mxu1 }
 0x2f8   :  { %v11843_v40 = vpop.f32.mrf.mxu1 }
 0x2fa   :  { %v2104_v13 = vpop.f32.mrf.mxu1 }
 0x2fb   :  { %v11879_v57 = vadd.f32 %v2104_v13, %v1919_v45  ;;  %v1929_v13 = vadd.f32 %v1813_v2, %v1537_v8  ;;  %v1931_v45 = vadd.f32 %v1817_v59, %v1541_v32 }
 0x2fc   :  { %v2106_v49 = vpop.f32.mrf.mxu1 }
 0x2fd   :  { %14090 = vst [vmem:[#allocation108_spill] sm:$0xff] %v11879_v57  ;;  %v2312_v17 = vmul.f32 %v11879_v57, %v11879_v57 }
 0x2fe   :  { %v2108_v46 = vpop.f32.mrf.mxu1 }
 0x2ff   :  { %v11871_v52 = vadd.f32 %v2108_v46, %v1922_v33  ;;  %v1561_v46 = vadd.f32 %v14094_v61, %v14093_v10  ;;  %v14097_v33 = vld [vmem:[#allocation106_spill] sm:$0xff] }
 0x300   :  { %v2110_v22 = vpop.f32.mrf.mxu1  ;;  %v11893_v25 = vadd.f32 %v14098_v28, %v14097_v33 }
 0x301   :  { %14083 = vst [vmem:[#allocation93_spill] sm:$0xff] %v11871_v52  ;;  %v11881_v47 = vadd.f32 %v2110_v22, %v1923_v19  ;;  %v11899_v19 = vadd.f32 %v2106_v49, %v1920_v60  ;;  %v1935_v49 = vadd.f32 %v1823_v20, %v1547_v15  ;;  %v2256_v2 = vadd.f32 %v11871_v52, %v11879_v57  ;;  %v14150_v57 = vld [vmem:[#allocation145_spill] sm:$0xff] }
 0x302   :  { %v2114_v35 = vpop.f32.mrf.mxu1 }
 0x303   :  { %14091 = vst [vmem:[#allocation94_spill] sm:$0xff] %v11881_v47  ;;  %v11883_v29 = vadd.f32 %v2114_v35, %v1925_v41  ;;  %14101 = vst [vmem:[#allocation95_spill] sm:$0xff] %v11899_v19  ;;  %v2315_v35 = vmul.f32 %v11871_v52, %v11871_v52  ;;  %v1932_v41 = vadd.f32 %v1819_v62, %v1543_v9  ;;  %v14149_v52 = vld [vmem:[#allocation161_spill] sm:$0xff] }
 0x304   :  { %v2116_v56 = vpop.f32.mrf.mxu1  ;;  %v2316_v6 = vmul.f32 %v11881_v47, %v11881_v47  ;;  %v2271_v42 = vadd.f32 %v11881_v47, %v11899_v19 }
 0x305   :  { %14092 = vst [vmem:[#allocation111_spill] sm:$0xff] %v11883_v29  ;;  %v11903_v22 = vadd.f32 %v2116_v56, %v1926_v54  ;;  %v2318_v60 = vmul.f32 %v11883_v29, %v11883_v29  ;;  %v2342_v59 = vadd.f32 %v2315_v35, %v2312_v17 }
 0x306   :  { %v2118_v5 = vpop.f32.mrf.mxu1 }
 0x307   :  { %14102 = vst [vmem:[#allocation116_spill] sm:$0xff] %v11903_v22  ;;  %v11905_v26 = vadd.f32 %v2118_v5, %v1928_v27  ;;  %v2313_v5 = vmul.f32 %v11899_v19, %v11899_v19  ;;  %v2319_v62 = vmul.f32 %v11903_v22, %v11903_v22  ;;  %v2272_v16 = vadd.f32 %v2271_v42, %v11903_v22 }
 0x308   :  { %v2120_v43 = vpop.f32.mrf.mxu1  ;;  %v2288_v19 = vsel %vm2286_vm4, %v11713_v58, 0.0 }
 0x309   :  { %14103 = vst [vmem:[#allocation96_spill] sm:$0xff] %v11905_v26  ;;  %v11913_v56 = vadd.f32 %v2120_v43, %v1929_v13  ;;  %v2321_v14 = vmul.f32 %v11905_v26, %v11905_v26  ;;  %v2357_v15 = vadd.f32 %v2316_v6, %v2313_v5  ;;  %v2257_v43 = vadd.f32 %v2256_v2, %v11883_v29  ;;  %v14151_v29 = vld [vmem:[#allocation165_spill] sm:$0xff] }
 0x30a   :  { %v2124_v11 = vpop.f32.mrf.mxu1  ;;  %v1941_v13 = vadd.f32 %v11835_v51, %v1557_v24 }
 0x30b   :  { %14104 = vst [vmem:[#allocation121_spill] sm:$0xff] %v11913_v56  ;;  %v11915_v8 = vadd.f32 %v2124_v11, %v1931_v45  ;;  %v2343_v11 = vadd.f32 %v2342_v59, %v2318_v60  ;;  %v2322_v54 = vmul.f32 %v11913_v56, %v11913_v56  ;;  %v2358_v33 = vadd.f32 %v2357_v15, %v2319_v62 }
 0x30c   :  { %v2126_v34 = vpop.f32.mrf.mxu1  ;;  %v2258_v28 = vadd.f32 %v2257_v43, %v11905_v26  ;;  %v2273_v45 = vadd.f32 %v2272_v16, %v11913_v56  ;;  %v1943_v60 = vadd.f32 %v11837_v23, %v1561_v46  ;;  %v1944_v62 = vadd.f32 %v11839_v12, %v11889_v30  ;;  %v14152_v56 = vld [vmem:[#allocation150_spill] sm:$0xff] }
 0x30d   :  { %14105 = vst [vmem:[#allocation97_spill] sm:$0xff] %v11915_v8  ;;  %v11926_v20 = vadd.f32 %v2126_v34, %v1932_v41  ;;  %v2324_v48 = vmul.f32 %v11915_v8, %v11915_v8  ;;  %v2344_v27 = vadd.f32 %v2343_v11, %v2321_v14  ;;  %v2359_v41 = vadd.f32 %v2358_v33, %v2322_v54 }
 0x30e   :  { %v2128_v53 = vpop.f32.mrf.mxu1  ;;  %v2259_v36 = vadd.f32 %v2258_v28, %v11915_v8  ;;  %v1946_v14 = vadd.f32 %v11841_v39, %v11893_v25  ;;  %v14154_v8 = vld [vmem:[#allocation152_spill] sm:$0xff] }
 0x30f   :  { %14106 = vst [vmem:[#allocation125_spill] sm:$0xff] %v11926_v20  ;;  %v11928_v18 = vadd.f32 %v2128_v53, %v1934_v55  ;;  %v2325_v34 = vmul.f32 %v11926_v20, %v11926_v20  ;;  %v2345_v53 = vadd.f32 %v2344_v27, %v2324_v48  ;;  %v1947_v48 = vadd.f32 %v11843_v40, %v11897_v38 }
 0x310   :  { %v2130_v32 = vpop.f32.mrf.mxu1 }
 0x311   :  { %14107 = vst [vmem:[#allocation98_spill] sm:$0xff] %v11928_v18  ;;  %v11937_v0 = vadd.f32 %v2130_v32, %v1935_v49  ;;  %v2327_v37 = vmul.f32 %v11928_v18, %v11928_v18  ;;  %v2274_v49 = vadd.f32 %v2273_v45, %v11926_v20  ;;  %v2260_v51 = vadd.f32 %v2259_v36, %v11928_v18  ;;  %v14153_v18 = vld [vmem:[#allocation166_spill] sm:$0xff] }
 0x312   :  { %v2134_v9 = vpop.f32.mrf.mxu1 }
 0x313   :  { %14108 = vst [vmem:[#allocation127_spill] sm:$0xff] %v11937_v0  ;;  %v11939_v10 = vadd.f32 %v2134_v9, %v1937_v4  ;;  %v2328_v55 = vmul.f32 %v11937_v0, %v11937_v0  ;;  %v2360_v4 = vadd.f32 %v2359_v41, %v2325_v34  ;;  %v2346_v32 = vadd.f32 %v2345_v53, %v2327_v37 }
 0x314   :  { %v2136_v61 = vpop.f32.mrf.mxu1  ;;  %v2275_v23 = vadd.f32 %v2274_v49, %v11937_v0  ;;  %v14155_v0 = vld [vmem:[#allocation192_spill] sm:$0xff] }
 0x315   :  { %14109 = vst [vmem:[#allocation99_spill] sm:$0xff] %v11939_v10  ;;  %v11948_v50 = vadd.f32 %v2136_v61, %v1938_v3  ;;  %v2330_v17 = vmul.f32 %v11939_v10, %v11939_v10  ;;  %v2261_v46 = vadd.f32 %v2260_v51, %v11939_v10  ;;  %v2361_v9 = vadd.f32 %v2360_v4, %v2328_v55  ;;  %v14157_v10 = vld [vmem:[#allocation155_spill] sm:$0xff] }
 0x316   :  { %v2138_v35 = vpop.f32.mrf.mxu1  ;;  %v2329_v20 = vmul.f32 %v14155_v0, %v14155_v0 }
 0x317   :  { %14110 = vst [vmem:[#allocation130_spill] sm:$0xff] %v11948_v50  ;;  %v11953_v21 = vadd.f32 %v2138_v35, %v1940_v44  ;;  %v2331_v5 = vmul.f32 %v11948_v50, %v11948_v50  ;;  %v2347_v42 = vadd.f32 %v2346_v32, %v2330_v17  ;;  %v2276_v11 = vadd.f32 %v2275_v23, %v11948_v50  ;;  %v14159_v50 = vld [vmem:[#allocation157_spill] sm:$0xff] }
 0x318   :  { %v2140_v6 = vpop.f32.mrf.mxu1 }
 0x319   :  { %14111 = vst [vmem:[#allocation100_spill] sm:$0xff] %v11953_v21  ;;  %v11962_v24 = vadd.f32 %v2140_v6, %v1941_v13  ;;  %v2333_v2 = vmul.f32 %v11953_v21, %v11953_v21  ;;  %v2262_v54 = vadd.f32 %v2261_v46, %v11953_v21  ;;  %v2362_v61 = vadd.f32 %v2361_v9, %v2331_v5  ;;  %v14156_v21 = vld [vmem:[#allocation168_spill] sm:$0xff] }
 0x31a   :  { %v2144_v59 = vpop.f32.mrf.mxu1 }
 0x31b   :  { %14112 = vst [vmem:[#allocation135_spill] sm:$0xff] %v11962_v24  ;;  %v11972_v3 = vadd.f32 %v2144_v59, %v1943_v60  ;;  %v2334_v15 = vmul.f32 %v11962_v24, %v11962_v24  ;;  %v2348_v39 = vadd.f32 %v2347_v42, %v2333_v2  ;;  %v2277_v44 = vadd.f32 %v2276_v11, %v11962_v24  ;;  %v14158_v24 = vld [vmem:[#allocation170_spill] sm:$0xff] }
 0x31c   :  { %v2146_v43 = vpop.f32.mrf.mxu1 }
 0x31d   :  { %14113 = vst [vmem:[#allocation101_spill] sm:$0xff] %v11972_v3  ;;  %v2336_v12 = vmul.f32 %v11972_v3, %v11972_v3  ;;  %v11982_v30 = vadd.f32 %v2146_v43, %v1944_v62  ;;  %v2263_v16 = vadd.f32 %v2262_v54, %v11972_v3  ;;  %v2363_v27 = vadd.f32 %v2362_v61, %v2334_v15 }
 0x31e   :  { %v2148_v25 = vpop.f32.mrf.mxu1 }
 0x31f   :  { %14114 = vst [vmem:[#allocation140_spill] sm:$0xff] %v11982_v30  ;;  %v2337_v33 = vmul.f32 %v11982_v30, %v11982_v30  ;;  %v11990_v28 = vadd.f32 %v2148_v25, %v1946_v14  ;;  %v2349_v34 = vadd.f32 %v2348_v39, %v2336_v12  ;;  %v2278_v35 = vadd.f32 %v2277_v44, %v11982_v30  ;;  %v14161_v30 = vld [vmem:[#allocation172_spill] sm:$0xff] }
 0x320   :  { %v2150_v37 = vpop.f32.mrf.mxu1 }
 0x321   :  { %14115 = vst [vmem:[#allocation102_spill] sm:$0xff] %v11990_v28  ;;  %v2264_v13 = vadd.f32 %v2263_v16, %v11990_v28  ;;  %v2339_v40 = vmul.f32 %v11990_v28, %v11990_v28  ;;  %v11996_v38 = vadd.f32 %v2150_v37, %v1947_v48  ;;  %v2364_v45 = vadd.f32 %v2363_v27, %v2337_v33  ;;  %v14162_v28 = vld [vmem:[#allocation160_spill] sm:$0xff] }
 0x323   :  { %14116 = vst [vmem:[#allocation144_spill] sm:$0xff] %v11996_v38  ;;  %v2265_v36 = vrot.slane %v2264_v13, 4  ;;  %v2350_v41 = vadd.f32 %v2349_v34, %v2339_v40  ;;  %v2279_v53 = vadd.f32 %v2278_v35, %v11996_v38  ;;  %v2340_v55 = vmul.f32 %v11996_v38, %v11996_v38  ;;  %v14118_v35 = vld [vmem:[#allocation110_spill] sm:$0xff]  ;;  %v14119_v40 = vld [vmem:[#allocation113_spill] sm:$0xff] }
 0x324   :  { %v14160_v38 = vld [vmem:[#allocation193_spill] sm:$0xff] }
 0x325   :  { %v2266_v17 = vadd.f32 %v2265_v36, %v2264_v13  ;;  %v2351_v6 = vrot.slane %v2350_v41, 4  ;;  %v2280_v60 = vrot.slane %v2279_v53, 4  ;;  %v2365_v49 = vadd.f32 %v2364_v45, %v2340_v55  ;;  %v14120_v36 = vld [vmem:[#allocation115_spill] sm:$0xff]  ;;  %v14122_v55 = vld [vmem:[#allocation120_spill] sm:$0xff] }
 0x327   :  { %v2267_v51 = vrot.slane %v2266_v17, 2  ;;  %v2352_v4 = vadd.f32 %v2351_v6, %v2350_v41  ;;  %v2281_v32 = vadd.f32 %v2280_v60, %v2279_v53  ;;  %v2366_v5 = vrot.slane %v2365_v49, 4  ;;  %v14121_v53 = vld [vmem:[#allocation118_spill] sm:$0xff]  ;;  %v14123_v6 = vld [vmem:[#allocation123_spill] sm:$0xff] }
 0x329   :  { %v2268_v2 = vadd.f32 %v2267_v51, %v2266_v17  ;;  %v2353_v59 = vrot.slane %v2352_v4, 2  ;;  %v2282_v62 = vrot.slane %v2281_v32, 2  ;;  %v2367_v23 = vadd.f32 %v2366_v5, %v2365_v49  ;;  %v14124_v49 = vld [vmem:[#allocation128_spill] sm:$0xff]  ;;  %v14125_v51 = vld [vmem:[#allocation129_spill] sm:$0xff] }
 0x32a   :  { %v14128_v5 = vld [vmem:[#allocation117_spill] sm:$0xff] }
 0x32b   :  { %v2269_v46 = vrot.slane %v2268_v2, 1  ;;  %v2354_v14 = vadd.f32 %v2353_v59, %v2352_v4  ;;  %v2283_v9 = vadd.f32 %v2282_v62, %v2281_v32  ;;  %v2368_v42 = vrot.slane %v2367_v23, 2  ;;  %v14126_v4 = vld [vmem:[#allocation114_spill] sm:$0xff]  ;;  %v14127_v32 = vld [vmem:[#allocation132_spill] sm:$0xff]  ;;  %v14130_v59 = vld [vmem:[#allocation119_spill] sm:$0xff] }
 0x32c   :  { %v14131_v62 = vld [vmem:[#allocation137_spill] sm:$0xff] }
 0x32d   :  { %v2355_v15 = vrot.slane %v2354_v14, 1  ;;  %v2284_v43 = vrot.slane %v2283_v9, 1  ;;  %v2369_v11 = vadd.f32 %v2368_v42, %v2367_v23  ;;  %v2270_v54 = vadd.f32 %v2269_v46, %v2268_v2  ;;  %v14129_v2 = vld [vmem:[#allocation134_spill] sm:$0xff]  ;;  %v14133_v46 = vld [vmem:[#allocation139_spill] sm:$0xff] }
 0x32e   :  { %v14132_v23 = vld [vmem:[#allocation122_spill] sm:$0xff] }
 0x32f   :  { %v2356_v12 = vadd.f32 %v2355_v15, %v2354_v14  ;;  %v2370_v48 = vrot.slane %v2369_v11, 1  ;;  %v2285_v61 = vadd.f32 %v2284_v43, %v2283_v9  ;;  %v14134_v14 = vld [vmem:[#allocation124_spill] sm:$0xff]  ;;  %v14135_v9 = vld [vmem:[#allocation142_spill] sm:$0xff]  ;;  %v14137_v15 = vld [vmem:[#allocation147_spill] sm:$0xff] }
 0x330   :  { %v14136_v42 = vld [vmem:[#allocation126_spill] sm:$0xff]  ;;  %v14138_v43 = vld [vmem:[#allocation131_spill] sm:$0xff] }
 0x331   :  { %v2371_v39 = vadd.f32 %v2370_v48, %v2369_v11  ;;  %v2398_v25 = vsel %vm2397_vm3, %v2270_v54, %v2356_v12  ;;  %v2317_v11 = vmul.f32 %v11713_v58, %v11713_v58  ;;  %v14139_v54 = vld [vmem:[#allocation148_spill] sm:$0xff]  ;;  %v14140_v12 = vld [vmem:[#allocation133_spill] sm:$0xff]  ;;  %v14141_v48 = vld [vmem:[#allocation151_spill] sm:$0xff]  ;;  %v2290_v58 = vsel %vm2286_vm4, %v11736_v31, 0.0 }
 0x332   :  { %v12002_v44 = vand.u32 4294901760, %v2398_v25 }
 0x333   :  { %v2399_v16 = vsel %vm2397_vm3, %v2285_v61, %v2371_v39  ;;  %v14142_v61 = vld [vmem:[#allocation136_spill] sm:$0xff]  ;;  %v2314_v39 = vmul.f32 %v11681_v7, %v11681_v7 }
 0x334   :  { %14117 = vst [vmem:[#allocation103_spill] sm:$0xff] %v12002_v44  ;;  %v12005_v33 = vand.u32 4294901760, %v2399_v16  ;;  %v12008_v27 = vsub.f32 %v2398_v25, %v12002_v44  ;;  %v2320_v25 = vmul.f32 %v11736_v31, %v11736_v31 }
 0x335   :  { %v2372_v47 = vsel %vm2286_vm4, %v2314_v39, 0.0  ;;  %v2287_v39 = vsel %vm2286_vm4, %v11681_v7, 0.0  ;;  %v2292_v7 = vsel %vm2286_vm4, %v11763_v1, 0.0 }
 0x336   :  { %2780 = vmatprep.mubr.f32.mxu0 %v12005_v33  ;;  %v2540_v34 = vsub.f32 %v2399_v16, %v12005_v33  ;;  %v13819_v37 = vand.u32 4294901760, %v12008_v27  ;;  %v14143_v16 = vld [vmem:[#allocation153_spill] sm:$0xff]  ;;  %v2375_v26 = vsel %vm2286_vm4, %v2320_v25, 0.0 }
 0x337   :  { %2782 = vmatmul.mubr.f32.vlgmr.msra.gmra.mxu0 %v12002_v44 }
 0x338   :  { %8619 = vmatpush3.msra.mxu0 %v14118_v35  ;;  %v2541_v13 = vand.u32 4294901760, %v2540_v34  ;;  %v2548_v45 = vsub.f32 %v12008_v27, %v13819_v37  ;;  %v14148_v37 = vld [vmem:[#allocation143_spill] sm:$0xff] }
 0x339   :  { %8620 = vmatprep.subr.mxu0 %v14119_v40 }
 0x33a   :  { %8621 = vmatpush3.msra.mxu0 %v14120_v36  ;;  %3024 = vmatprep.mubr.f32.mxu0 %v2541_v13  ;;  %v2542_v41 = vsub.f32 %v2540_v34, %v2541_v13  ;;  %v2549_v60 = vand.u32 4294901760, %v2548_v45  ;;  %v14145_v13 = vld [vmem:[#allocation156_spill] sm:$0xff]  ;;  %v14146_v45 = vld [vmem:[#allocation141_spill] sm:$0xff] }
 0x33b   :  { %8622 = vmatprep.subr.mxu0 %v14121_v53 }
 0x33c   :  { %8623 = vmatpush3.msra.mxu0 %v14122_v55  ;;  %v2543_v17 = vand.u32 4294901760, %v2542_v41  ;;  %v2373_v41 = vsel %vm2286_vm4, %v2317_v11, 0.0  ;;  %v2326_v11 = vmul.f32 %v11789_v63, %v11789_v63 }
 0x33d   :  { %8624 = vmatprep.subr.mxu0 %v14123_v6  ;;  %v2374_v22 = vadd.f32 %v2373_v41, %v2372_v47  ;;  %v2289_v47 = vadd.f32 %v2288_v19, %v2287_v39  ;;  %v14163_v19 = vld [vmem:[#allocation176_spill] sm:$0xff]  ;;  %v2381_v39 = vsel %vm2286_vm4, %v2329_v20, 0.0 }
 0x33e   :  { %8625 = vmatpush3.msra.mxu0 %v14124_v49  ;;  %2544 = vmatprep.mubr.f32.mxu1 %v2543_v17  ;;  %v2323_v17 = vmul.f32 %v11763_v1, %v11763_v1  ;;  %v2379_v31 = vsel %vm2286_vm4, %v2326_v11, 0.0  ;;  %v14165_v1 = vld [vmem:[#allocation194_spill] sm:$0xff] }
 0x33f   :  { %8626 = vmatprep.subr.mxu0 %v14125_v51  ;;  %2550 = vmatmul.mubr.f32.vlgmr.msra.gmra.mxu1 %v2549_v60  ;;  %v14147_v60 = vld [vmem:[#allocation158_spill] sm:$0xff]  ;;  %v2376_v41 = vadd.f32 %v2375_v26, %v2374_v22  ;;  %v2291_v3 = vadd.f32 %v2290_v58, %v2289_v47  ;;  %v2294_v26 = vsel %vm2286_vm4, %v11789_v63, 0.0  ;;  %v2335_v11 = vmul.f32 %v14165_v1, %v14165_v1  ;;  %v14170_v63 = vld [vmem:[#allocation195_spill] sm:$0xff] }
 0x340   :  { %8584 = vmatpush3.msra.mxu1 %v14126_v4  ;;  %8627 = vmatpush3.msra.mxu0 %v14127_v32  ;;  %v2377_v25 = vsel %vm2286_vm4, %v2323_v17, 0.0  ;;  %v2332_v17 = vmul.f32 %v14160_v38, %v14160_v38  ;;  %v14164_v22 = vld [vmem:[#allocation162_spill] sm:$0xff]  ;;  %v2296_v47 = vsel %vm2286_vm4, %v14155_v0, 0.0  ;;  %v2338_v20 = vmul.f32 %v14170_v63, %v14170_v63  ;;  %v14175_v0 = vld [vmem:[#allocation196_spill] sm:$0xff] }
 0x341   :  { %8585 = vmatprep.subr.mxu1 %v14128_v5  ;;  %2917 = vmatprep.mubr.f32.mxu1 %v2540_v34  ;;  %v14144_v34 = vld [vmem:[#allocation138_spill] sm:$0xff]  ;;  %v2378_v44 = vadd.f32 %v2377_v25, %v2376_v41  ;;  %v14169_v25 = vld [vmem:[#allocation167_spill] sm:$0xff] }
 0x342   :  { %8628 = vmatprep.subr.mxu0 %v14129_v2  ;;  %8586 = vmatpush3.msra.mxu1 %v14130_v59  ;;  %v14168_v58 = vld [vmem:[#allocation182_spill] sm:$0xff]  ;;  %v2383_v41 = vsel %vm2286_vm4, %v2332_v17, 0.0  ;;  %v2341_v17 = vmul.f32 %v14175_v0, %v14175_v0 }
 0x343   :  { %8629 = vmatpush3.msra.mxu0 %v14131_v62  ;;  %8587 = vmatprep.subr.mxu1 %v14132_v23 }
 0x344   :  { %8630 = vmatprep.subr.mxu0 %v14133_v46  ;;  %8588 = vmatpush3.msra.mxu1 %v14134_v14 }
 0x345   :  { %8631 = vmatpush3.msra.mxu0 %v14135_v9  ;;  %8589 = vmatprep.subr.mxu1 %v14136_v42 }
 0x346   :  { %8632 = vmatprep.subr.mxu0 %v14137_v15  ;;  %8590 = vmatpush3.msra.mxu1 %v14138_v43 }
 0x347   :  { %8633 = vmatpush3.msra.mxu0 %v14139_v54  ;;  %8591 = vmatprep.subr.mxu1 %v14140_v12 }
 0x348   :  { %8634 = vmatprep.subr.mxu0 %v14141_v48  ;;  %8592 = vmatpush3.msra.mxu1 %v14142_v61 }
 0x349   :  { %8635 = vmatpush3.msra.mxu0 %v14143_v16  ;;  %8593 = vmatprep.subr.mxu1 %v14144_v34 }
 0x34a   :  { %8636 = vmatprep.subr.mxu0 %v14145_v13  ;;  %8594 = vmatpush3.msra.mxu1 %v14146_v45 }
 0x34b   :  { %8637 = vmatpush3.msra.mxu0 %v14147_v60  ;;  %8595 = vmatprep.subr.mxu1 %v14148_v37 }
 0x34c   :  { %8638 = vmatprep.subr.mxu0 %v14149_v52  ;;  %8596 = vmatpush3.msra.mxu1 %v14150_v57 }
 0x34d   :  { %8639 = vmatpush3.msra.mxu0 %v14151_v29  ;;  %8597 = vmatprep.subr.mxu1 %v14152_v56 }
 0x34e   :  { %8640 = vmatprep.subr.mxu0 %v14153_v18  ;;  %8598 = vmatpush3.msra.mxu1 %v14154_v8 }
 0x34f   :  { %8641 = vmatpush3.msra.mxu0 %v14156_v21  ;;  %8599 = vmatprep.subr.mxu1 %v14157_v10 }
 0x350   :  { %8642 = vmatprep.subr.mxu0 %v14158_v24  ;;  %8600 = vmatpush3.msra.mxu1 %v14159_v50  ;;  %v14166_v50 = vld [vmem:[#allocation179_spill] sm:$0xff]  ;;  %v14167_v24 = vld [vmem:[#allocation164_spill] sm:$0xff] }
 0x351   :  { %8643 = vmatpush3.msra.mxu0 %v14161_v30  ;;  %8601 = vmatprep.subr.mxu1 %v14162_v28  ;;  %v2293_v30 = vadd.f32 %v2292_v7, %v2291_v3  ;;  %v2380_v28 = vadd.f32 %v2379_v31, %v2378_v44  ;;  %v14173_v7 = vld [vmem:[#allocation187_spill] sm:$0xff]  ;;  %v2298_v3 = vsel %vm2286_vm4, %v14160_v38, 0.0  ;;  %v2385_v44 = vsel %vm2286_vm4, %v2335_v11, 0.0 }
 0x352   :  { %8644 = vmatprep.subr.mxu0 %v14163_v19  ;;  %8602 = vmatpush3.msra.mxu1 %v14164_v22  ;;  %v14171_v22 = vld [vmem:[#allocation183_spill] sm:$0xff]  ;;  %v14172_v19 = vld [vmem:[#allocation169_spill] sm:$0xff] }
 0x353   :  { %8645 = vmatpush3.msra.mxu0 %v14166_v50  ;;  %8603 = vmatprep.subr.mxu1 %v14167_v24  ;;  %v2295_v50 = vadd.f32 %v2294_v26, %v2293_v30  ;;  %v2382_v24 = vadd.f32 %v2381_v39, %v2380_v28  ;;  %v14174_v31 = vld [vmem:[#allocation171_spill] sm:$0xff]  ;;  %v14178_v30 = vand.u32 4294901760, %v12008_v27  ;;  %v14179_v28 = vld [vmem:[#allocation109_spill] sm:$0xff]  ;;  %v2300_v26 = vsel %vm2286_vm4, %v14165_v1, 0.0 }
 0x354   :  { %8646 = vmatprep.subr.mxu0 %v14168_v58  ;;  %8604 = vmatpush3.msra.mxu1 %v14169_v25  ;;  %v14176_v25 = vld [vmem:[#allocation190_spill] sm:$0xff]  ;;  %v2387_v39 = vsel %vm2286_vm4, %v2338_v20, 0.0  ;;  %v14180_v11 = vld [vmem:[#allocation175_spill] sm:$0xff] }
 0x355   :  { %8647 = vmatpush3.msra.mxu0 %v14171_v22  ;;  %8605 = vmatprep.subr.mxu1 %v14172_v19  ;;  %v14177_v58 = vld [vmem:[#allocation174_spill] sm:$0xff]  ;;  %v2297_v22 = vadd.f32 %v2296_v47, %v2295_v50  ;;  %v2384_v19 = vadd.f32 %v2383_v41, %v2382_v24  ;;  %v2302_v24 = vsel %vm2286_vm4, %v14170_v63, 0.0  ;;  %v2389_v47 = vsel %vm2286_vm4, %v2341_v17, 0.0  ;;  %v14182_v41 = vld [vmem:[#allocation181_spill] sm:$0xff] }
 0x356   :  { %8648 = vmatprep.subr.mxu0 %v14173_v7  ;;  %8606 = vmatpush3.msra.mxu1 %v14174_v31  ;;  %v14181_v50 = vld [vmem:[#allocation178_spill] sm:$0xff] }
 0x357   :  { %8649 = vmatpush3.msra.mxu0 %v14176_v25  ;;  %8607 = vmatprep.subr.mxu1 %v14177_v58  ;;  %v2299_v38 = vadd.f32 %v2298_v3, %v2297_v22  ;;  %v2386_v25 = vadd.f32 %v2385_v44, %v2384_v19  ;;  %v2304_v19 = vsel %vm2286_vm4, %v14175_v0, 0.0  ;;  %v14184_v22 = vld [vmem:[#allocation185_spill] sm:$0xff] }
 0x358   :  { %3028 = vmatmul.mubr.f32.vlgmr.msra.gmra.mxu0 %v14178_v30  ;;  %8688 = vmatprep.subr.mxu0 %v14179_v28  ;;  %v14189_v28 = vand.u32 4294901760, %v14126_v4  ;;  %v14194_v4 = vand.u32 4294901760, %v14136_v42 }
 0x359   :  { %8608 = vmatpush3.msra.mxu1 %v14180_v11  ;;  %8689 = vmatpush3.msra.mxu0 %v14118_v35  ;;  %v2301_v20 = vadd.f32 %v2300_v26, %v2299_v38  ;;  %v2388_v30 = vadd.f32 %v2387_v39, %v2386_v25  ;;  %v14183_v35 = vld [vmem:[#allocation184_spill] sm:$0xff]  ;;  %v14186_v38 = vld [vmem:[#allocation191_spill] sm:$0xff] }
 0x35a   :  { %3298 = vmatprep.mubr.f32.mxu0 %v12005_v33  ;;  %8609 = vmatprep.subr.mxu1 %v14181_v50  ;;  %v14187_v25 = vld [vmem:[#allocation112_spill] sm:$0xff]  ;;  %v14214_v26 = vld [vmem:[#allocation179_spill] sm:$0xff] }
 0x35b   :  { %8690 = vmatprep.subr.mxu0 %v14119_v40  ;;  %8610 = vmatpush3.msra.mxu1 %v14182_v41  ;;  %v2303_v3 = vadd.f32 %v2302_v24, %v2301_v20  ;;  %v2390_v44 = vadd.f32 %v2389_v47, %v2388_v30  ;;  %v14185_v40 = vld [vmem:[#allocation188_spill] sm:$0xff]  ;;  %v14188_v17 = vand.u32 4294901760, %v14187_v25  ;;  %v14217_v30 = vld [vmem:[#allocation182_spill] sm:$0xff]  ;;  %v14221_v25 = vld [vmem:[#allocation169_spill] sm:$0xff] }
 0x35c   :  { %8691 = vmatpush3.msra.mxu0 %v14120_v36  ;;  %8611 = vmatprep.subr.mxu1 %v14183_v35  ;;  %v14215_v39 = vld [vmem:[#allocation164_spill] sm:$0xff] }
 0x35d   :  { %8692 = vmatprep.subr.mxu0 %v14121_v53  ;;  %8612 = vmatpush3.msra.mxu1 %v14184_v22  ;;  %v2305_v36 = vadd.f32 %v2304_v19, %v2303_v3  ;;  %v2391_v53 = vrot.slane %v2390_v44, 4  ;;  %v14216_v24 = vand.u32 4294901760, %v14215_v39  ;;  %v14218_v19 = vld [vmem:[#allocation167_spill] sm:$0xff] }
 0x35e   :  { %8693 = vmatpush3.msra.mxu0 %v14122_v55  ;;  %8613 = vmatprep.subr.mxu1 %v14185_v40  ;;  %v14190_v55 = vand.u32 4294901760, %v14128_v5  ;;  %v14195_v5 = vand.u32 4294901760, %v14138_v43  ;;  %v14202_v43 = vand.u32 4294901760, %v14152_v56  ;;  %v14206_v56 = vld [vmem:[#allocation157_spill] sm:$0xff]  ;;  %v14219_v3 = vand.u32 4294901760, %v14218_v19 }
 0x35f   :  { %8694 = vmatprep.subr.mxu0 %v14123_v6  ;;  %8614 = vmatpush3.msra.mxu1 %v14186_v38  ;;  %v2306_v6 = vrot.slane %v2305_v36, 4 }
 0x360   :  { %8695 = vmatpush3.msra.mxu0 %v14124_v49  ;;  %2920 = vmatmul.mubr.f32.vlgmr.msra.gmra.mxu1 %v12008_v27  ;;  %v14191_v27 = vand.u32 4294901760, %v14130_v59  ;;  %v14192_v49 = vand.u32 4294901760, %v14132_v23  ;;  %v14198_v23 = vand.u32 4294901760, %v14144_v34 }
 0x361   :  { %8653 = vmatprep.subr.mxu1 %v14188_v17  ;;  %8696 = vmatprep.subr.mxu0 %v14125_v51  ;;  %v2392_v51 = vadd.f32 %v2391_v53, %v2390_v44  ;;  %v2436_v44 = vld [vmem:[%s13571_s3 + $0x118] sm:$0xff]  ;;  %v14222_v17 = vand.u32 4294901760, %v14221_v25 }
 0x362   :  { %8654 = vmatpush3.msra.mxu1 %v14189_v28  ;;  %3194 = vmatprep.mubr.f32.mxu1 %v12005_v33  ;;  %v14193_v33 = vand.u32 4294901760, %v14134_v14  ;;  %v14199_v14 = vand.u32 4294901760, %v14146_v45 }
 0x363   :  { %8697 = vmatpush3.msra.mxu0 %v14127_v32  ;;  %8655 = vmatprep.subr.mxu1 %v14190_v55  ;;  %v2307_v32 = vadd.f32 %v2306_v6, %v2305_v36  ;;  %v2393_v59 = vrot.slane %v2392_v51, 2  ;;  %v14220_v36 = vld [vmem:[#allocation183_spill] sm:$0xff]  ;;  %v14223_v6 = vand.u32 4294901760, %v14174_v31 }
 0x364   :  { %8698 = vmatprep.subr.mxu0 %v14129_v2  ;;  %8656 = vmatpush3.msra.mxu1 %v14191_v27  ;;  %v14196_v2 = vand.u32 4294901760, %v14140_v12  ;;  %v14203_v12 = vand.u32 4294901760, %v14154_v8  ;;  %v2438_v8 = vld [vmem:[%s13571_s3 + $0x128] sm:$0xff]  ;;  %v14224_v27 = vld [vmem:[#allocation190_spill] sm:$0xff] }
 0x365   :  { %8699 = vmatpush3.msra.mxu0 %v14131_v62  ;;  %8657 = vmatprep.subr.mxu1 %v14192_v49  ;;  %v14197_v62 = vand.u32 4294901760, %v14142_v61  ;;  %v2394_v42 = vadd.f32 %v2393_v59, %v2392_v51  ;;  %v14209_v61 = vld [vmem:[#allocation160_spill] sm:$0xff]  ;;  %v12215_v47 = vand.u32 4294901760, %v2438_v8  ;;  %v14225_v49 = vand.u32 4294901760, %v14177_v58 }
 0x366   :  { %8700 = vmatprep.subr.mxu0 %v14133_v46  ;;  %8658 = vmatpush3.msra.mxu1 %v14193_v33  ;;  %v2308_v46 = vrot.slane %v2307_v32, 2  ;;  %v12240_v33 = vand.u32 4294901760, %v2436_v44  ;;  %v14229_v59 = vand.u32 4294901760, %v14181_v50  ;;  %v14231_v50 = vand.u32 4294901760, %v14183_v35 }
 0x367   :  { %8701 = vmatpush3.msra.mxu0 %v14135_v9  ;;  %8659 = vmatprep.subr.mxu1 %v14194_v4  ;;  %v14200_v9 = vand.u32 4294901760, %v14148_v37  ;;  %v2439_v37 = vld [vmem:[%s13571_s3 + $0x130] sm:$0xff]  ;;  %v12238_v51 = vsub.f32 %v2438_v8, %v12215_v47 }
 0x368   :  { %8702 = vmatprep.subr.mxu0 %v14137_v15  ;;  %8660 = vmatpush3.msra.mxu1 %v14195_v5  ;;  %v14201_v15 = vand.u32 4294901760, %v14150_v57  ;;  %v14204_v57 = vand.u32 4294901760, %v14157_v10  ;;  %v12204_v34 = vand.u32 4294901760, %v2439_v37  ;;  %v14211_v10 = vld [vmem:[#allocation176_spill] sm:$0xff]  ;;  %v2435_v4 = vld [vmem:[%s13571_s3 + $0x110] sm:$0xff]  ;;  %v14228_v5 = vand.u32 4294901760, %v14180_v11 }
 0x369   :  { %8703 = vmatpush3.msra.mxu0 %v14139_v54  ;;  %8661 = vmatprep.subr.mxu1 %v14196_v2  ;;  %v2309_v54 = vadd.f32 %v2308_v46, %v2307_v32  ;;  %v14226_v32 = vld [vmem:[#allocation103_spill] sm:$0xff]  ;;  %v2434_v2 = vld [vmem:[%s13571_s3 + $0x108] sm:$0xff]  ;;  %v12264_v11 = vsub.f32 %v2436_v44, %v12240_v33  ;;  %v2433_v46 = vld [vmem:[%s13571_s3 + $0x100] sm:$0xff] }
 0x36a   :  { %8704 = vmatprep.subr.mxu0 %v14141_v48  ;;  %8662 = vmatpush3.msra.mxu1 %v14197_v62  ;;  %v14207_v48 = vand.u32 4294901760, %v14206_v56  ;;  %v12227_v53 = vsub.f32 %v2439_v37, %v12204_v34  ;;  %v12258_v62 = vand.u32 4294901760, %v2435_v4 }
 0x36b   :  { %8705 = vmatpush3.msra.mxu0 %v14143_v16  ;;  %8663 = vmatprep.subr.mxu1 %v14198_v23  ;;  %v14210_v16 = vand.u32 4294901760, %v14209_v61  ;;  %v14230_v23 = vand.u32 4294901760, %v14182_v41  ;;  %v14232_v41 = vand.u32 4294901760, %v14184_v22 }
 0x36c   :  { %8706 = vmatprep.subr.mxu0 %v14145_v13  ;;  %8664 = vmatpush3.msra.mxu1 %v14199_v14  ;;  %v14212_v13 = vld [vmem:[#allocation162_spill] sm:$0xff] }
 0x36d   :  { %8707 = vmatpush3.msra.mxu0 %v14147_v60  ;;  %8665 = vmatprep.subr.mxu1 %v14200_v9  ;;  %v14213_v45 = vand.u32 4294901760, %v14212_v13  ;;  %v2437_v60 = vld [vmem:[%s13571_s3 + $0x120] sm:$0xff]  ;;  %v12273_v9 = vand.u32 4294901760, %v2434_v2 }
 0x36e   :  { %8708 = vmatprep.subr.mxu0 %v14149_v52  ;;  %8666 = vmatpush3.msra.mxu1 %v14201_v15  ;;  %v2395_v52 = vrot.slane %v2394_v42, 1  ;;  %v12229_v28 = vand.u32 4294901760, %v2437_v60  ;;  %v12281_v15 = vsub.f32 %v2435_v4, %v12258_v62 }
 0x36f   :  { %8709 = vmatpush3.msra.mxu0 %v14151_v29  ;;  %8667 = vmatprep.subr.mxu1 %v14202_v43  ;;  %v14205_v29 = vld [vmem:[#allocation170_spill] sm:$0xff]  ;;  %v12283_v43 = vand.u32 4294901760, %v2433_v46  ;;  %v3442_v22 = vsub.f32 %v2434_v2, %v12273_v9 }
 0x370   :  { %8710 = vmatprep.subr.mxu0 %v14153_v18  ;;  %8668 = vmatpush3.msra.mxu1 %v14203_v12  ;;  %v14208_v18 = vld [vmem:[#allocation172_spill] sm:$0xff]  ;;  %v2396_v20 = vadd.f32 %v2395_v52, %v2394_v42  ;;  %v3421_v58 = vsub.f32 %v2437_v60, %v12229_v28  ;;  %v14233_v42 = vand.u32 4294901760, %v14185_v40  ;;  %v3408_v12 = vand.u32 4294901760, %v12227_v53 }
 0x371   :  { %8711 = vmatpush3.msra.mxu0 %v14156_v21  ;;  %8669 = vmatprep.subr.mxu1 %v14204_v57  ;;  %v2310_v21 = vrot.slane %v2309_v54, 1  ;;  %v12298_v40 = vsub.f32 %v2433_v46, %v12283_v43  ;;  %v3415_v57 = vand.u32 4294901760, %v12238_v51  ;;  %v3443_v13 = vand.u32 4294901760, %v3442_v22 }
 0x372   :  { %8712 = vmatprep.subr.mxu0 %v14205_v29  ;;  %8670 = vmatpush3.msra.mxu1 %v14207_v48  ;;  %v3422_v52 = vand.u32 4294901760, %v3421_v58  ;;  %v3409_v29 = vsub.f32 %v12227_v53, %v3408_v12  ;;  %v3429_v48 = vand.u32 4294901760, %v12264_v11 }
 0x373   :  { %8713 = vmatpush3.msra.mxu0 %v14208_v18  ;;  %8671 = vmatprep.subr.mxu1 %v14210_v16  ;;  %v2311_v55 = vadd.f32 %v2310_v21, %v2309_v54  ;;  %v14234_v54 = vand.u32 4294901760, %v14186_v38  ;;  %v3416_v8 = vsub.f32 %v12238_v51, %v3415_v57  ;;  %v3436_v21 = vand.u32 4294901760, %v12281_v15 }
 0x374   :  { %8714 = vmatprep.subr.mxu0 %v14211_v10  ;;  %8672 = vmatpush3.msra.mxu1 %v14213_v45  ;;  %v3410_v18 = vand.u32 4294901760, %v3409_v29  ;;  %v3423_v61 = vsub.f32 %v3421_v58, %v3422_v52  ;;  %v3430_v45 = vsub.f32 %v12264_v11, %v3429_v48 }
 0x375   :  { %8715 = vmatpush3.msra.mxu0 %v14214_v26  ;;  %8673 = vmatprep.subr.mxu1 %v14216_v24  ;;  %v2400_v31 = vsel %vm2397_vm3, %v2311_v55, %v2396_v20  ;;  %v3417_v10 = vand.u32 4294901760, %v3416_v8  ;;  %v3450_v26 = vand.u32 4294901760, %v12298_v40  ;;  %v3437_v39 = vsub.f32 %v12281_v15, %v3436_v21 }
 0x376   :  { %8716 = vmatprep.subr.mxu0 %v14217_v30  ;;  %8674 = vmatpush3.msra.mxu1 %v14219_v3  ;;  %v2441_v14 = vsel %vm2286_vm4, %v2400_v31, 0  ;;  %v3424_v60 = vand.u32 4294901760, %v3423_v61  ;;  %v3431_v24 = vand.u32 4294901760, %v3430_v45  ;;  %v3444_v20 = vsub.f32 %v3442_v22, %v3443_v13  ;;  %v12408_v45 = vld [vmem:[%s13581_s13] sm:$0xff] }
 0x377   :  { %8717 = vmatpush3.msra.mxu0 %v14220_v36  ;;  %8675 = vmatprep.subr.mxu1 %v14222_v17  ;;  %v12285_v35 = vand.u32 4294901760, %v2441_v14  ;;  %v3438_v30 = vand.u32 4294901760, %v3437_v39  ;;  %v3451_v19 = vsub.f32 %v12298_v40, %v3450_v26  ;;  %v3849_v36 = vld [vmem:[%s13572_s4 + $0x10] sm:$0xff] }
 0x378   :  { %8718 = vmatprep.subr.mxu0 %v14173_v7  ;;  %8676 = vmatpush3.msra.mxu1 %v14223_v6  ;;  %v14227_v7 = vmov 0.0   ;;  %v3445_v3 = vand.u32 4294901760, %v3444_v20 }
 0x379   :  { %8719 = vmatpush3.msra.mxu0 %v14224_v27  ;;  %8677 = vmatprep.subr.mxu1 %v14225_v49  ;;  %v12301_v38 = vsub.f32 %v2441_v14, %v12285_v35  ;;  %v3452_v44 = vand.u32 4294901760, %v3451_v19  ;;  %v14235_v19 = vmov 0  }
 0x37a   :  { %3300 = vmatmul.mubr.f32.vlgmr.msra.gmra.mxu0 %v14226_v32  ;;  %9141 = vmatprep.subr.mxu0 %v14227_v7 }
 0x37b   :  { %8678 = vmatpush3.msra.mxu1 %v14228_v5  ;;  %9142 = vmatpush3.msra.mxu0 %v12227_v53  ;;  %v3379_v37 = vand.u32 4294901760, %v12301_v38 }
 0x37c   :  { %8679 = vmatprep.subr.mxu1 %v14229_v59  ;;  %9143 = vmatprep.subr.mxu0 %v14227_v7 }
 0x37d   :  { %8680 = vmatpush3.msra.mxu1 %v14230_v23  ;;  %9144 = vmatpush3.msra.mxu0 %v12238_v51  ;;  %v3380_v56 = vsub.f32 %v12301_v38, %v3379_v37 }
 0x37e   :  { %8681 = vmatprep.subr.mxu1 %v14231_v50  ;;  %9145 = vmatprep.subr.mxu0 %v14227_v7 }
 0x37f   :  { %8682 = vmatpush3.msra.mxu1 %v14232_v41  ;;  %9146 = vmatpush3.msra.mxu0 %v3421_v58  ;;  %v3381_v16 = vand.u32 4294901760, %v3380_v56 }
 0x380   :  { %8683 = vmatprep.subr.mxu1 %v14233_v42  ;;  %9147 = vmatprep.subr.mxu0 %v14227_v7 }
 0x381   :  { %8684 = vmatpush3.msra.mxu1 %v14234_v54  ;;  %9148 = vmatpush3.msra.mxu0 %v12264_v11 }
 0x382   :  { %3196 = vmatmul.mubr.f32.vlgmr.msra.gmra.mxu1 %v14226_v32  ;;  %9107 = vmatprep.subr.mxu1 %v14227_v7 }
 0x383   :  { %9149 = vmatprep.subr.mxu0 %v14227_v7  ;;  %9108 = vmatpush3.msra.mxu1 %v12204_v34 }
 0x384   :  { %9150 = vmatpush3.msra.mxu0 %v12281_v15  ;;  %9109 = vmatprep.subr.mxu1 %v14227_v7 }
 0x385   :  { %9151 = vmatprep.subr.mxu0 %v14227_v7  ;;  %9110 = vmatpush3.msra.mxu1 %v12215_v47 }
 0x386   :  { %9152 = vmatpush3.msra.mxu0 %v3442_v22  ;;  %9111 = vmatprep.subr.mxu1 %v14227_v7 }
 0x387   :  { %9153 = vmatprep.subr.mxu0 %v14227_v7  ;;  %9112 = vmatpush3.msra.mxu1 %v12229_v28 }
 0x388   :  { %9154 = vmatpush3.msra.mxu0 %v12298_v40  ;;  %9155 = vmatprep.mubr.msk.f32.mxu0 %vm9944_vm1, %v14227_v7 }
 0x389   :  { %9113 = vmatprep.subr.mxu1 %v14227_v7  ;;  %9156 = vmatmul.mubr.f32.vlgmr.msra.gmra.mxu0 %v12301_v38 }
 0x38a   :  { %9175 = vmatprep.subr.mxu0 %v14227_v7  ;;  %9114 = vmatpush3.msra.mxu1 %v12240_v33 }
 0x38b   :  { %9176 = vmatpush3.msra.mxu0 %v3408_v12  ;;  %9115 = vmatprep.subr.mxu1 %v14227_v7 }
 0x38c   :  { %9177 = vmatprep.subr.mxu0 %v14227_v7  ;;  %9116 = vmatpush3.msra.mxu1 %v12258_v62 }
 0x38d   :  { %9178 = vmatpush3.msra.mxu0 %v3415_v57  ;;  %9117 = vmatprep.subr.mxu1 %v14227_v7 }
 0x38e   :  { %9179 = vmatprep.subr.mxu0 %v14227_v7  ;;  %9118 = vmatpush3.msra.mxu1 %v12273_v9 }
 0x38f   :  { %9180 = vmatpush3.msra.mxu0 %v3422_v52  ;;  %9119 = vmatprep.subr.mxu1 %v14227_v7 }
 0x390   :  { %9181 = vmatprep.subr.mxu0 %v14227_v7  ;;  %9120 = vmatpush3.msra.mxu1 %v12283_v43 }
 0x391   :  { %9121 = vmatprep.mubr.msk.f32.mxu1 %vm9944_vm1, %v14227_v7  ;;  %9182 = vmatpush3.msra.mxu0 %v3429_v48 }
 0x392   :  { %9122 = vmatmul.mubr.f32.vlgmr.msra.gmra.mxu1 %v3381_v16  ;;  %9124 = vmatprep.subr.mxu1 %v14227_v7 }
 0x393   :  { %9183 = vmatprep.subr.mxu0 %v14227_v7  ;;  %9125 = vmatpush3.msra.mxu1 %v3410_v18 }
 0x394   :  { %9184 = vmatpush3.msra.mxu0 %v3436_v21  ;;  %9126 = vmatprep.subr.mxu1 %v14227_v7 }
 0x395   :  { %9185 = vmatprep.subr.mxu0 %v14227_v7  ;;  %9127 = vmatpush3.msra.mxu1 %v3417_v10 }
 0x396   :  { %9186 = vmatpush3.msra.mxu0 %v3443_v13  ;;  %9128 = vmatprep.subr.mxu1 %v14227_v7 }
 0x397   :  { %9187 = vmatprep.subr.mxu0 %v14227_v7  ;;  %9129 = vmatpush3.msra.mxu1 %v3424_v60 }
 0x398   :  { %9188 = vmatpush3.msra.mxu0 %v3450_v26  ;;  %9189 = vmatprep.mubr.msk.f32.mxu0 %vm9944_vm1, %v14227_v7 }
 0x399   :  { %9130 = vmatprep.subr.mxu1 %v14227_v7  ;;  %9190 = vmatmul.mubr.f32.vlgmr.msra.gmra.mxu0 %v12285_v35 }
 0x39a   :  { %9131 = vmatpush3.msra.mxu1 %v3431_v24  ;;  %9138 = vmatprep.mubr.msk.f32.mxu1 %vm9944_vm1, %v14227_v7 }
 0x39b   :  { %9132 = vmatprep.subr.mxu1 %v14227_v7  ;;  %9209 = vmatprep.subr.mxu0 %v14227_v7 }
 0x39c   :  { %9133 = vmatpush3.msra.mxu1 %v3438_v30  ;;  %9211 = vmatprep.mubr.msk.f32.mxu0 %vm9944_vm1, %v14227_v7 }
 0x39d   :  { %9134 = vmatprep.subr.mxu1 %v14227_v7  ;;  %9210 = vmatpush3.msra.mxu0 %v3849_v36 }
 0x39e   :  { %9135 = vmatpush3.msra.mxu1 %v3445_v3  ;;  %v3995_v3 = vlaneseq }
 0x39f   :  { %9136 = vmatprep.subr.mxu1 %v14227_v7 }
 0x3a0   :  { %9137 = vmatpush3.msra.mxu1 %v3452_v44  ;;  %v12418_v44 = vshrl.u32 %v3995_v3, 7  ;;  %v14246_v3 = vld [vmem:[#allocation127_spill] sm:$0xff] }
 0x3a1   :  { %9139 = vmatmul.mubr.f32.vlgmr.msra.gmra.mxu1 %v12285_v35  ;;  %9158 = vmatprep.subr.mxu1 %v14227_v7 }
 0x3a2   :  { %9159 = vmatpush3.msra.mxu1 %v12204_v34  ;;  %9172 = vmatprep.mubr.msk.f32.mxu1 %vm9944_vm1, %v14227_v7 }
 0x3a3   :  { %9160 = vmatprep.subr.mxu1 %v14227_v7 }
 0x3a4   :  { %9161 = vmatpush3.msra.mxu1 %v12215_v47 }
 0x3a5   :  { %9162 = vmatprep.subr.mxu1 %v14227_v7 }
 0x3a6   :  { %9163 = vmatpush3.msra.mxu1 %v12229_v28 }
 0x3a7   :  { %9164 = vmatprep.subr.mxu1 %v14227_v7 }
 0x3a8   :  { %9165 = vmatpush3.msra.mxu1 %v12240_v33 }
 0x3a9   :  { %9166 = vmatprep.subr.mxu1 %v14227_v7 }
 0x3aa   :  { %9167 = vmatpush3.msra.mxu1 %v12258_v62 }
 0x3ab   :  { %9168 = vmatprep.subr.mxu1 %v14227_v7 }
 0x3ac   :  { %9169 = vmatpush3.msra.mxu1 %v12273_v9 }
 0x3ad   :  { %9170 = vmatprep.subr.mxu1 %v14227_v7 }
 0x3ae   :  { %9171 = vmatpush3.msra.mxu1 %v12283_v43 }
 0x3af   :  { %9173 = vmatmul.mubr.f32.vlgmr.msra.gmra.mxu1 %v3379_v37  ;;  %9192 = vmatprep.subr.mxu1 %v14227_v7 }
 0x3b0   :  { %9193 = vmatpush3.msra.mxu1 %v12204_v34  ;;  %9206 = vmatprep.mubr.msk.f32.mxu1 %vm9944_vm1, %v14227_v7  ;;  %v3848_v34 = vld [vmem:[%s13572_s4 + $0x8] sm:$0xff] }
 0x3b1   :  { %9194 = vmatprep.subr.mxu1 %v14227_v7 }
 0x3b2   :  { %9195 = vmatpush3.msra.mxu1 %v12215_v47  ;;  %v3847_v47 = vld [vmem:[%s13572_s4] sm:$0xff] }
 0x3b3   :  { %9196 = vmatprep.subr.mxu1 %v14227_v7 }
 0x3b4   :  { %9197 = vmatpush3.msra.mxu1 %v12229_v28 }
 0x3b5   :  { %9198 = vmatprep.subr.mxu1 %v14227_v7 }
 0x3b6   :  { %9199 = vmatpush3.msra.mxu1 %v12240_v33 }
 0x3b7   :  { %9200 = vmatprep.subr.mxu1 %v14227_v7 }
 0x3b8   :  { %9201 = vmatpush3.msra.mxu1 %v12258_v62 }
 0x3b9   :  { %9202 = vmatprep.subr.mxu1 %v14227_v7 }
 0x3ba   :  { %9203 = vmatpush3.msra.mxu1 %v12273_v9 }
 0x3bb   :  { %9204 = vmatprep.subr.mxu1 %v14227_v7 }
 0x3bc   :  { %9205 = vmatpush3.msra.mxu1 %v12283_v43 }
 0x3bd   :  { %9207 = vmatmul.mubr.f32.vlgmr.msra.gmra.mxu1 %v12285_v35  ;;  %3884 = vmatprep.subr.mxu1 %v3848_v34  ;;  %v12421_v34 = vsub.s32 0, %v12418_v44 }
 0x3be   :  { %3918 = vmatprep.mubr.f32.mxu1 %v14227_v7  ;;  %3885 = vmatpush1.msra.mxu1 %v3847_v47  ;;  %v12424_v47 = vsub.s32 1, %v12418_v44 }
 0x3bf   :  { %9214 = vmatprep.subr.bf16.mxu1 %v14227_v7 }
 0x3f7   :  { %v8580_v25 = vpop.f32.mrf.mxu0 }
 0x3f9   :  { %v8581_v17 = vpop.f32.mrf.mxu0 }
 0x3fa   :  { %v8582_v11 = vadd.f32 %v8581_v17, %v8580_v25 }
 0x3ff   :  { %v8545_v28 = vpop.f32.mrf.mxu1 }
 0x401   :  { %v8546_v27 = vpop.f32.mrf.mxu1 }
 0x402   :  { %v8547_v23 = vadd.f32 %v8546_v27, %v8545_v28 }
 0x404   :  { %v2784_v50 = vadd.f32 %v8582_v11, %v8547_v23 }
 0x418   :  { %v8650_v53 = vpop.f32.mrf.mxu0 }
 0x41a   :  { %v8651_v55 = vpop.f32.mrf.mxu0 }
 0x41b   :  { %v8652_v42 = vadd.f32 %v8651_v55, %v8650_v53 }
 0x420   :  { %v8615_v49 = vpop.f32.mrf.mxu1 }
 0x422   :  { %v8616_v4 = vpop.f32.mrf.mxu1 }
 0x423   :  { %v8617_v46 = vadd.f32 %v8616_v4, %v8615_v49 }
 0x425   :  { %v2922_v41 = vadd.f32 %v8617_v46, %v2784_v50 }
 0x427   :  { %v3030_v43 = vadd.f32 %v8652_v42, %v2922_v41  ;;  %v14241_v41 = vld [vmem:[#allocation130_spill] sm:$0xff] }
 0x43a   :  { %v8720_v6 = vpop.f32.mrf.mxu0 }
 0x43c   :  { %v8721_v51 = vpop.f32.mrf.mxu0 }
 0x43d   :  { %v8722_v54 = vadd.f32 %v8721_v51, %v8720_v6 }
 0x442   :  { %v8685_v31 = vpop.f32.mrf.mxu1 }
 0x444   :  { %v8686_v5 = vpop.f32.mrf.mxu1 }
 0x445   :  { %v8687_v15 = vadd.f32 %v8686_v5, %v8685_v31  ;;  %v14237_v5 = vld [vmem:[#allocation102_spill] sm:$0xff] }
 0x447   :  { %v3198_v35 = vadd.f32 %v8687_v15, %v3030_v43  ;;  %v14242_v15 = vld [vmem:[#allocation135_spill] sm:$0xff] }
 0x449   :  { %v3575_v33 = vpop.f32.mrf.mxu0  ;;  %v3302_v22 = vadd.f32 %v8722_v54, %v3198_v35 }
 0x44b   :  { %v9157_v32 = vpop.f32.mrf.mxu0 }
 0x44c   :  { %v14236_v32 = vld [vmem:[#allocation101_spill] sm:$0xff] }
 0x452   :  { %v3383_v58 = vpop.f32.mrf.mxu1 }
 0x453   :  { %v3384_v38 = vadd.f32 %v3383_v58, %v3302_v22 }
 0x454   :  { %v9123_v2 = vpop.f32.mrf.mxu1 }
 0x455   :  { %v14238_v2 = vld [vmem:[#allocation193_spill] sm:$0xff] }
 0x459   :  { %v3747_v59 = vpop.f32.mrf.mxu0 }
 0x45b   :  { %v9191_v62 = vpop.f32.mrf.mxu0 }
 0x461   :  { %v3489_v14 = vpop.f32.mrf.mxu1 }
 0x462   :  { %v3490_v37 = vadd.f32 %v3489_v14, %v3384_v38 }
 0x463   :  { %v9140_v9 = vpop.f32.mrf.mxu1 }
 0x464   :  { %v3576_v57 = vadd.f32 %v3575_v33, %v3490_v37 }
 0x46f   :  { %v3655_v40 = vpop.f32.mrf.mxu1 }
 0x470   :  { %v3656_v52 = vadd.f32 %v3655_v40, %v3576_v57 }
 0x471   :  { %v9174_v12 = vpop.f32.mrf.mxu1 }
 0x472   :  { %v3748_v29 = vadd.f32 %v3747_v59, %v3656_v52 }
 0x47d   :  { %v3825_v56 = vpop.f32.mrf.mxu1 }
 0x47e   :  { %v3826_v48 = vadd.f32 %v3825_v56, %v3748_v29 }
 0x47f   :  { %v9208_v8 = vpop.f32.mrf.mxu1 }
 0x480   :  { %v3829_v18 = vmul.f32 0.0003287311, %v3826_v48 }
 0x482   :  { %v3830_v61 = vmul.f32 %v3829_v18, %v3829_v18 }
 0x484   :  { %v3832_v16 = vrot.slane %v3830_v61, 7 }
 0x486   :  { %v3834_v21 = vsub.f32 %v3829_v18, %v3832_v16 }
 0x488   :  { %v3835_v10 = vadd.f32 1e-05, %v3834_v21 }
 0x48a   :  { %9839 = vrsqrt.f32 %v3835_v10  ;;  %v14243_v10 = vld [vmem:[#allocation99_spill] sm:$0xff] }
 0x497   :  { %v9840_v13 = vpop.eup %9839 }
 0x498   :  { %v3838_v60 = vrot.slane %v9840_v13, 1 }
 0x49a   :  { %v3840_v26 = vmul.f32 %v3838_v60, %v12408_v45  ;;  %v14244_v60 = vld [vmem:[#allocation100_spill] sm:$0xff] }
 0x49c   :  { %v3841_v39 = vmul.f32 %v3840_v26, %v3829_v18 }
 0x49e   :  { %v3843_v24 = vrot.slane %v3841_v39, 7 }
 0x4a0   :  { %v3845_v20 = vsub.f32 %v12408_v45, %v3843_v24 }
 0x4a2   :  { %v3846_v30 = vsel %vm2397_vm3, %v3840_v26, %v3845_v20  ;;  %v14245_v20 = vld [vmem:[#allocation125_spill] sm:$0xff] }
 0x4a3   :  { %8257 = vmatmul.mubr.msk.f32.vlgmr.msra.gmra.mxu1 %vm3850_vm5, %v3846_v30  ;;  %9212 = vmatmul.mubr.msk.f32.vlgmr.msra.gmra.mxu0 %vm3850_vm5, %v3846_v30 }
 0x4a4   :  { %9224 = vmatprep.mubr.msk.bf16.mxu1 %vm9944_vm1, %v14227_v7  ;;  %4206 = vmatprep.mubr.bf16.mxu0 %v14235_v19 }
 0x563   :  { %v3920_v36 = vpop.f32.mrf.mxu1  ;;  %v3991_v25 = vpop.f32.mrf.mxu0 }
 0x564   :  { %v12427_v17 = vrot.slane %v3920_v36, %v12421_v34  ;;  %v12430_v53 = vrot.slane %v3991_v25, %v12421_v34  ;;  %v12433_v28 = vrot.slane %v3920_v36, %v12424_v47  ;;  %v12436_v55 = vrot.slane %v3991_v25, %v12424_v47 }
 0x565   :  { %v3922_v6 = vpop.f32.mrf.mxu1  ;;  %v9213_v27 = vpop.f32.mrf.mxu0 }
 0x566   :  { %v12439_v49 = vrot.slane %v3922_v6, %v12421_v34  ;;  %v12442_v51 = vrot.slane %v3922_v6, %v12424_v47  ;;  %v4033_v33 = vmul.f32 %v12430_v53, %v14170_v63  ;;  %v4036_v4 = vmul.f32 %v12430_v53, %v14175_v0  ;;  %v14239_v63 = vld [vmem:[#allocation140_spill] sm:$0xff]  ;;  %v14247_v27 = vld [vmem:[#allocation189_spill] sm:$0xff] }
 0x567   :  { %v4031_v31 = vmul.f32 %v12427_v17, %v14236_v32  ;;  %v4034_v58 = vmul.f32 %v12427_v17, %v14237_v5  ;;  %v4027_v59 = vmul.f32 %v12430_v53, %v14238_v2  ;;  %v4030_v62 = vmul.f32 %v12430_v53, %v14165_v1  ;;  %v14240_v0 = vld [vmem:[#allocation144_spill] sm:$0xff]  ;;  %v14249_v2 = vld [vmem:[#allocation97_spill] sm:$0xff] }
 0x568   :  { %v4075_v23 = vadd.f32 %v12436_v55, %v4033_v33  ;;  %v4078_v11 = vadd.f32 %v12436_v55, %v4036_v4  ;;  %v4032_v46 = vmul.f32 %v12439_v49, %v14239_v63  ;;  %v4035_v14 = vmul.f32 %v12439_v49, %v14240_v0  ;;  %v14248_v4 = vld [vmem:[#allocation192_spill] sm:$0xff] }
 0x569   :  { %v4073_v50 = vadd.f32 %v12433_v28, %v4031_v31  ;;  %v4076_v9 = vadd.f32 %v12433_v28, %v4034_v58  ;;  %v4026_v42 = vmul.f32 %v12439_v49, %v14241_v41  ;;  %v4029_v1 = vmul.f32 %v12439_v49, %v14242_v15 }
 0x56a   :  { %v4105_v43 = vmax.f32 %v4075_v23, 0.0  ;;  %v4108_v35 = vmax.f32 %v4078_v11, 0.0  ;;  %v4074_v54 = vadd.f32 %v12442_v51, %v4032_v46  ;;  %v4077_v22 = vadd.f32 %v12442_v51, %v4035_v14  ;;  %v14250_v14 = vld [vmem:[#allocation98_spill] sm:$0xff] }
 0x56b   :  { %v4103_v40 = vmax.f32 %v4073_v50, 0.0  ;;  %v4106_v38 = vmax.f32 %v4076_v9, 0.0  ;;  %v4068_v12 = vadd.f32 %v12442_v51, %v4026_v42  ;;  %v4071_v37 = vadd.f32 %v12442_v51, %v4029_v1  ;;  %v14251_v1 = vld [vmem:[#allocation116_spill] sm:$0xff] }
 0x56c   :  { %v4133_v57 = vpack.c.bf16 %v4108_v35, %v4105_v43  ;;  %v4104_v52 = vmax.f32 %v4074_v54, 0.0  ;;  %v4107_v29 = vmax.f32 %v4077_v22, 0.0  ;;  %v4069_v56 = vadd.f32 %v12436_v55, %v4027_v59 }
 0x56d   :  { %v4131_v48 = vpack.c.bf16 %v4106_v38, %v4103_v40  ;;  %v4098_v8 = vmax.f32 %v4068_v12, 0.0  ;;  %v4101_v18 = vmax.f32 %v4071_v37, 0.0  ;;  %v4072_v61 = vadd.f32 %v12436_v55, %v4030_v62  ;;  %v14252_v40 = vld [vmem:[#allocation121_spill] sm:$0xff] }
 0x56e   :  { %9215 = vmatpush3.bf16.msra.mxu1 %v4133_v57  ;;  %v4132_v16 = vpack.c.bf16 %v4107_v29, %v4104_v52  ;;  %v4099_v21 = vmax.f32 %v4069_v56, 0.0  ;;  %v4025_v13 = vmul.f32 %v12427_v17, %v14243_v10  ;;  %v4028_v26 = vmul.f32 %v12427_v17, %v14244_v60  ;;  %v14253_v57 = vld [vmem:[#allocation180_spill] sm:$0xff]  ;;  %v14254_v29 = vld [vmem:[#allocation186_spill] sm:$0xff] }
 0x56f   :  { %9216 = vmatprep.subr.bf16.mxu1 %v14227_v7  ;;  %v4129_v39 = vpack.c.bf16 %v4101_v18, %v4098_v8  ;;  %v4102_v24 = vmax.f32 %v4072_v61, 0.0  ;;  %v4020_v30 = vmul.f32 %v12439_v49, %v14245_v20  ;;  %v4023_v36 = vmul.f32 %v12439_v49, %v14246_v3  ;;  %v14255_v18 = vld [vmem:[#allocation111_spill] sm:$0xff] }
 0x570   :  { %4180 = vmatprep.subr.bf16.mxu0 %v4132_v16  ;;  %v4067_v25 = vadd.f32 %v12433_v28, %v4025_v13  ;;  %v4070_v6 = vadd.f32 %v12433_v28, %v4028_v26  ;;  %v4021_v33 = vmul.f32 %v12430_v53, %v14247_v27  ;;  %v4024_v32 = vmul.f32 %v12430_v53, %v14248_v4  ;;  %v14256_v16 = vld [vmem:[#allocation96_spill] sm:$0xff]  ;;  %v14257_v26 = vld [vmem:[#allocation95_spill] sm:$0xff] }
 0x571   :  { %4181 = vmatpush1.bf16.msra.mxu0 %v4131_v48  ;;  %v4130_v31 = vpack.c.bf16 %v4102_v24, %v4099_v21  ;;  %v4062_v5 = vadd.f32 %v12442_v51, %v4020_v30  ;;  %v4065_v58 = vadd.f32 %v12442_v51, %v4023_v36  ;;  %v4019_v59 = vmul.f32 %v12427_v17, %v14249_v2 }
 0x572   :  { %4182 = vmatprep.subr.bf16.mxu0 %v4129_v39  ;;  %v4097_v62 = vmax.f32 %v4067_v25, 0.0  ;;  %v4100_v23 = vmax.f32 %v4070_v6, 0.0  ;;  %v4063_v11 = vadd.f32 %v12436_v55, %v4021_v33  ;;  %v4066_v63 = vadd.f32 %v12436_v55, %v4024_v32  ;;  %v14258_v6 = vld [vmem:[#allocation94_spill] sm:$0xff] }
 0x573   :  { %9217 = vmatpush3.bf16.msra.mxu1 %v4130_v31  ;;  %v4092_v46 = vmax.f32 %v4062_v5, 0.0  ;;  %v4095_v0 = vmax.f32 %v4065_v58, 0.0  ;;  %v4022_v50 = vmul.f32 %v12427_v17, %v14250_v14  ;;  %v4061_v9 = vadd.f32 %v12433_v28, %v4019_v59  ;;  %v14259_v5 = vld [vmem:[#allocation173_spill] sm:$0xff] }
 0x574   :  { %v4128_v41 = vpack.c.bf16 %v4100_v23, %v4097_v62  ;;  %9218 = vmatprep.subr.bf16.mxu1 %v14227_v7  ;;  %v4093_v42 = vmax.f32 %v4063_v11, 0.0  ;;  %v4096_v15 = vmax.f32 %v4066_v63, 0.0  ;;  %v4014_v43 = vmul.f32 %v12439_v49, %v14251_v1  ;;  %v14260_v23 = vld [vmem:[#allocation177_spill] sm:$0xff] }
 0x575   :  { %v4126_v35 = vpack.c.bf16 %v4095_v0, %v4092_v46  ;;  %v4064_v54 = vadd.f32 %v12433_v28, %v4022_v50  ;;  %v4091_v22 = vmax.f32 %v4061_v9, 0.0  ;;  %v4017_v38 = vmul.f32 %v12439_v49, %v14252_v40  ;;  %v14261_v46 = vld [vmem:[#allocation108_spill] sm:$0xff]  ;;  %v14262_v14 = vld [vmem:[#allocation93_spill] sm:$0xff]  ;;  %v9837_v40 = vld [vmem:[%s13573_s5 + $0x18] sm:$0xff]  }
 0x576   :  { %4183 = vmatpush1.bf16.msra.mxu0 %v4128_v41  ;;  %v4127_v12 = vpack.c.bf16 %v4096_v15, %v4093_v42  ;;  %v4056_v37 = vadd.f32 %v12442_v51, %v4014_v43  ;;  %v4015_v52 = vmul.f32 %v12430_v53, %v14253_v57  ;;  %v4018_v56 = vmul.f32 %v12430_v53, %v14254_v29 }
 0x577   :  { %4184 = vmatprep.subr.bf16.mxu0 %v4126_v35  ;;  %v4094_v48 = vmax.f32 %v4064_v54, 0.0  ;;  %v4059_v8 = vadd.f32 %v12442_v51, %v4017_v38  ;;  %v4013_v61 = vmul.f32 %v12427_v17, %v14255_v18  ;;  %v4016_v21 = vmul.f32 %v12427_v17, %v14256_v16  ;;  %v9838_v38 = vld [vmem:[%s13573_s5 + $0x20] sm:$0xff]  }
 0x578   :  { %9219 = vmatpush3.bf16.msra.mxu1 %v4127_v12  ;;  %v4086_v10 = vmax.f32 %v4056_v37, 0.0  ;;  %v4057_v13 = vadd.f32 %v12436_v55, %v4015_v52  ;;  %v4060_v60 = vadd.f32 %v12436_v55, %v4018_v56  ;;  %v4008_v39 = vmul.f32 %v12439_v49, %v14257_v26 }
 0x579   :  { %v4125_v24 = vpack.c.bf16 %v4094_v48, %v4091_v22  ;;  %9220 = vmatprep.subr.bf16.mxu1 %v14227_v7  ;;  %v4089_v20 = vmax.f32 %v4059_v8, 0.0  ;;  %v4055_v30 = vadd.f32 %v12433_v28, %v4013_v61  ;;  %v4058_v3 = vadd.f32 %v12433_v28, %v4016_v21 }
 0x57a   :  { %v4087_v36 = vmax.f32 %v4057_v13, 0.0  ;;  %v4090_v25 = vmax.f32 %v4060_v60, 0.0  ;;  %v4011_v27 = vmul.f32 %v12439_v49, %v14258_v6  ;;  %v4050_v33 = vadd.f32 %v12442_v51, %v4008_v39 }
 0x57b   :  { %4185 = vmatpush1.bf16.msra.mxu0 %v4125_v24  ;;  %v4123_v4 = vpack.c.bf16 %v4089_v20, %v4086_v10  ;;  %v4085_v32 = vmax.f32 %v4055_v30, 0.0  ;;  %v4088_v31 = vmax.f32 %v4058_v3, 0.0  ;;  %v4009_v58 = vmul.f32 %v12430_v53, %v14259_v5 }
 0x57c   :  { %v4124_v2 = vpack.c.bf16 %v4090_v25, %v4087_v36  ;;  %v4053_v59 = vadd.f32 %v12442_v51, %v4011_v27  ;;  %v4080_v62 = vmax.f32 %v4050_v33, 0.0  ;;  %v4012_v11 = vmul.f32 %v12430_v53, %v14260_v23 }
 0x57d   :  { %4186 = vmatprep.subr.bf16.mxu0 %v4123_v4  ;;  %v4122_v63 = vpack.c.bf16 %v4088_v31, %v4085_v32  ;;  %v4051_v49 = vadd.f32 %v12436_v55, %v4009_v58  ;;  %v4007_v0 = vmul.f32 %v12427_v17, %v14261_v46  ;;  %v4010_v50 = vmul.f32 %v12427_v17, %v14262_v14  ;;  %v9834_v17 = vld [vmem:[%s13573_s5] sm:$0xff]  }
 0x57e   :  { %9221 = vmatpush3.bf16.msra.mxu1 %v4124_v2  ;;  %v4083_v9 = vmax.f32 %v4053_v59, 0.0  ;;  %v4054_v41 = vadd.f32 %v12436_v55, %v4012_v11  ;;  %v9836_v55 = vld [vmem:[%s13573_s5 + $0x10] sm:$0xff]  }
 0x57f   :  { %4187 = vmatpush1.bf16.msra.mxu0 %v4122_v63  ;;  %9222 = vmatprep.subr.bf16.mxu1 %v14227_v7  ;;  %v4081_v51 = vmax.f32 %v4051_v49, 0.0  ;;  %v4049_v53 = vadd.f32 %v12433_v28, %v4007_v0  ;;  %v4052_v42 = vadd.f32 %v12433_v28, %v4010_v50  ;;  %v9835_v28 = vld [vmem:[%s13573_s5 + $0x8] sm:$0xff]  }
 0x580   :  { %v4120_v15 = vpack.c.bf16 %v4083_v9, %v4080_v62  ;;  %v4084_v1 = vmax.f32 %v4054_v41, 0.0 }
 0x581   :  { %v4079_v43 = vmax.f32 %v4049_v53, 0.0  ;;  %v4082_v35 = vmax.f32 %v4052_v42, 0.0 }
 0x582   :  { %4188 = vmatprep.subr.bf16.mxu0 %v4120_v15  ;;  %v4121_v54 = vpack.c.bf16 %v4084_v1, %v4081_v51 }
 0x583   :  { %v4119_v22 = vpack.c.bf16 %v4082_v35, %v4079_v43 }
 0x584   :  { %9223 = vmatpush3.bf16.msra.mxu1 %v4121_v54 }
 0x585   :  { %4189 = vmatpush1.bf16.msra.mxu0 %v4119_v22 }
 0x587   :  { %9225 = vmatmul.mubr.msk.bf16.vlgmr.msra.gmra.mxu1 %vm1219_vm2, %v9834_v17 }
 0x588   :  { %8264 = vmatmul.mubr.msk.bf16.vlgmr.msra.gmra.mxu0 %vm1219_vm2, %v9834_v17  ;;  %9228 = vmatprep.mubr.msk.bf16.mxu1 %vm9944_vm1, %v14227_v7 }
 0x589   :  { %4216 = vmatprep.mubr.bf16.mxu0 %v14235_v19 }
 0x58f   :  { %9229 = vmatmul.mubr.msk.bf16.gmra.mxu1 %vm1219_vm2, %v9835_v28 }
 0x590   :  { %8265 = vmatmul.mubr.msk.bf16.gmra.mxu0 %vm1219_vm2, %v9835_v28  ;;  %9232 = vmatprep.mubr.msk.bf16.mxu1 %vm9944_vm1, %v14227_v7 }
 0x591   :  { %4226 = vmatprep.mubr.bf16.mxu0 %v14235_v19 }
 0x597   :  { %9233 = vmatmul.mubr.msk.bf16.gmra.mxu1 %vm1219_vm2, %v9836_v55 }
 0x598   :  { %8266 = vmatmul.mubr.msk.bf16.gmra.mxu0 %vm1219_vm2, %v9836_v55  ;;  %9236 = vmatprep.mubr.msk.bf16.mxu1 %vm9944_vm1, %v14227_v7 }
 0x599   :  { %4236 = vmatprep.mubr.bf16.mxu0 %v14235_v19 }
 0x59f   :  { %9237 = vmatmul.mubr.msk.bf16.gmra.mxu1 %vm1219_vm2, %v9837_v40 }
 0x5a0   :  { %8267 = vmatmul.mubr.msk.bf16.gmra.mxu0 %vm1219_vm2, %v9837_v40  ;;  %9240 = vmatprep.mubr.msk.bf16.mxu1 %vm9944_vm1, %v14227_v7 }
 0x5a1   :  { %4246 = vmatprep.mubr.bf16.mxu0 %v14235_v19 }
 0x5a7   :  { %9241 = vmatmul.mubr.msk.bf16.gmra.mxu1 %vm1219_vm2, %v9838_v38 }
 0x5a8   :  { %8268 = vmatmul.mubr.msk.bf16.gmra.mxu0 %vm1219_vm2, %v9838_v38  ;;  %4702 = vmatprep.mubr.bf16.mxu1 %v14235_v19 }
 0x647   :  { %v4291_v12 = vpop.f32.mrf.mxu1 }
 0x648   :  { %v4208_v37 = vpop.f32.mrf.mxu0 }
 0x649   :  { %v9226_v57 = vpop.f32.mrf.mxu1 }
 0x64a   :  { %v4210_v52 = vpop.f32.mrf.mxu0 }
 0x64b   :  { %v4294_v29 = vpop.f32.mrf.mxu1 }
 0x64c   :  { %v4212_v56 = vpop.f32.mrf.mxu0 }
 0x64d   :  { %v9227_v48 = vpop.f32.mrf.mxu1 }
 0x64e   :  { %v4214_v8 = vpop.f32.mrf.mxu0  ;;  %v14263_v48 = vld [vmem:[#allocation30_spill] sm:$0xff] }
 0x64f   :  { %v4299_v18 = vpop.f32.mrf.mxu1 }
 0x650   :  { %v4218_v61 = vpop.f32.mrf.mxu0 }
 0x651   :  { %v9230_v16 = vpop.f32.mrf.mxu1 }
 0x652   :  { %v4220_v21 = vpop.f32.mrf.mxu0  ;;  %v14265_v16 = vld [vmem:[#allocation53_spill] sm:$0xff] }
 0x653   :  { %v4302_v10 = vpop.f32.mrf.mxu1 }
 0x654   :  { %v4222_v13 = vpop.f32.mrf.mxu0 }
 0x655   :  { %v9231_v60 = vpop.f32.mrf.mxu1 }
 0x656   :  { %v4224_v26 = vpop.f32.mrf.mxu0 }
 0x657   :  { %v4307_v39 = vpop.f32.mrf.mxu1 }
 0x658   :  { %v4228_v24 = vpop.f32.mrf.mxu0 }
 0x659   :  { %v9234_v20 = vpop.f32.mrf.mxu1 }
 0x65a   :  { %v4230_v30 = vpop.f32.mrf.mxu0 }
 0x65b   :  { %v4310_v3 = vpop.f32.mrf.mxu1 }
 0x65c   :  { %v4232_v36 = vpop.f32.mrf.mxu0  ;;  %v4332_v33 = vmax.f32 %v4291_v12, %v4310_v3 }
 0x65d   :  { %v9235_v25 = vpop.f32.mrf.mxu1  ;;  %v4330_v31 = vmax.f32 %v4208_v37, %v4232_v36 }
 0x65e   :  { %v4234_v6 = vpop.f32.mrf.mxu0 }
 0x65f   :  { %v4315_v27 = vpop.f32.mrf.mxu1  ;;  %v4331_v62 = vmax.f32 %v4210_v52, %v4234_v6 }
 0x660   :  { %v4335_v4 = vmax.f32 %v4294_v29, %v4315_v27  ;;  %v4238_v32 = vpop.f32.mrf.mxu0 }
 0x661   :  { %v9238_v5 = vpop.f32.mrf.mxu1  ;;  %v4333_v58 = vmax.f32 %v4212_v56, %v4238_v32 }
 0x662   :  { %v12575_v2 = vpack.c.bf16 %v4335_v4, %v4332_v33  ;;  %v4240_v59 = vpop.f32.mrf.mxu0 }
 0x663   :  { %v12577_v23 = vpack.c.bf16 %v4333_v58, %v4330_v31  ;;  %v4318_v11 = vpop.f32.mrf.mxu1  ;;  %v4334_v63 = vmax.f32 %v4214_v8, %v4240_v59  ;;  %v14264_v8 = vld [vmem:[#allocation29_spill] sm:$0xff] }
 0x664   :  { %v4242_v49 = vpop.f32.mrf.mxu0  ;;  %v4338_v9 = vmax.f32 %v4299_v18, %v4318_v11  ;;  %v8289_v18 = vcombine.high %v14264_v8, %v14263_v48 }
 0x665   :  { %v12579_v46 = vpack.c.bf16 %v4334_v63, %v4331_v62  ;;  %v9239_v0 = vpop.f32.mrf.mxu1  ;;  %v4336_v53 = vmax.f32 %v4218_v61, %v4242_v49  ;;  %v8288_v61 = vcombine.low %v14264_v8, %v14263_v48 }
 0x666   :  { %v4244_v14 = vpop.f32.mrf.mxu0 }
 0x667   :  { %v4323_v50 = vpop.f32.mrf.mxu1  ;;  %v4337_v35 = vmax.f32 %v4220_v21, %v4244_v14  ;;  %v8313_v21 = vcombine.high %v14265_v16, %v14265_v16  ;;  %4641 = vmatprep.mubr.bf16.mxu0 %v12579_v46 }
 0x668   :  { %v4341_v41 = vmax.f32 %v4302_v10, %v4323_v50  ;;  %v4248_v51 = vpop.f32.mrf.mxu0 }
 0x669   :  { %v9242_v42 = vpop.f32.mrf.mxu1  ;;  %v4339_v15 = vmax.f32 %v4222_v13, %v4248_v51 }
 0x66a   :  { %v12581_v1 = vpack.c.bf16 %v4341_v41, %v4338_v9  ;;  %v4250_v43 = vpop.f32.mrf.mxu0 }
 0x66b   :  { %v12583_v54 = vpack.c.bf16 %v4339_v15, %v4336_v53  ;;  %v4326_v22 = vpop.f32.mrf.mxu1  ;;  %v4340_v17 = vmax.f32 %v4224_v26, %v4250_v43 }
 0x66c   :  { %v4344_v28 = vmax.f32 %v4307_v39, %v4326_v22  ;;  %v4252_v55 = vpop.f32.mrf.mxu0 }
 0x66d   :  { %v12585_v40 = vpack.c.bf16 %v4340_v17, %v4337_v35  ;;  %v9243_v38 = vpop.f32.mrf.mxu1  ;;  %v4342_v12 = vmax.f32 %v4228_v24, %v4252_v55 }
 0x66e   :  { %v12587_v37 = vpack.c.bf16 %v4344_v28, %v4344_v28  ;;  %v4254_v57 = vpop.f32.mrf.mxu0 }
 0x66f   :  { %v12589_v52 = vpack.c.bf16 %v4342_v12, %v4342_v12  ;;  %v4343_v29 = vmax.f32 %v4230_v30, %v4254_v57 }
 0x671   :  { %v12591_v56 = vpack.c.bf16 %v4343_v29, %v4343_v29 }
 0x672   :  { %9934 = dma.done.wait [#allocation6], 9984 }
 0x673   :  { %9935 = vsyncadd [#allocation6], 4294957312  ;;  %v14266_v10 = vld [vmem:[#allocation28_spill] sm:$0xff]  ;;  %v14267_v13 = vld [vmem:[#allocation27_spill] sm:$0xff]  ;;  %v8312_v26 = vcombine.low %v14265_v16, %v14265_v16  ;;  %4609 = vmatprep.subr.bf16.mxu0 %v8289_v18  ;;  %8314 = vmatprep.subr.msk.bf16.mxu1 %vm4602_vm6, %v8313_v21 }
 0x674   :  { %v8287_v60 = vcombine.high %v14267_v13, %v14266_v10  ;;  %v14268_v39 = vld [vmem:[#allocation52_spill] sm:$0xff]  ;;  %v14269_v24 = vld [vmem:[#allocation51_spill] sm:$0xff]  ;;  %4610 = vmatpush1.bf16.msra.mxu0 %v8288_v61  ;;  %v8286_v3 = vcombine.low %v14267_v13, %v14266_v10  ;;  %v14270_v36 = vld [vmem:[#allocation26_spill] sm:$0xff] }
 0x675   :  { %v8311_v20 = vcombine.high %v14269_v24, %v14268_v39  ;;  %v4604_v30 = vsel %vm4602_vm6, %v8312_v26, 0  ;;  %v14271_v25 = vld [vmem:[#allocation25_spill] sm:$0xff]  ;;  %v8310_v27 = vcombine.low %v14269_v24, %v14268_v39  ;;  %v14272_v33 = vld [vmem:[#allocation50_spill] sm:$0xff]  ;;  %v14274_v5 = vld [vmem:[#allocation24_spill] sm:$0xff] }
 0x676   :  { %4611 = vmatprep.subr.bf16.mxu0 %v8287_v60  ;;  %4679 = vmatpush1.bf16.msra.mxu1 %v4604_v30  ;;  %v8285_v6 = vcombine.high %v14271_v25, %v14270_v36  ;;  %v14273_v4 = vld [vmem:[#allocation49_spill] sm:$0xff]  ;;  %v8284_v31 = vcombine.low %v14271_v25, %v14270_v36  ;;  %v14275_v58 = vld [vmem:[#allocation23_spill] sm:$0xff]  ;;  %v14276_v11 = vld [vmem:[#allocation48_spill] sm:$0xff] }
 0x677   :  { %4680 = vmatprep.subr.bf16.mxu1 %v8311_v20  ;;  %v8309_v32 = vcombine.high %v14273_v4, %v14272_v33  ;;  %v8283_v59 = vcombine.high %v14275_v58, %v14274_v5  ;;  %v8308_v62 = vcombine.low %v14273_v4, %v14272_v33  ;;  %v14277_v63 = vld [vmem:[#allocation47_spill] sm:$0xff]  ;;  %v8282_v0 = vcombine.low %v14275_v58, %v14274_v5  ;;  %v14278_v14 = vld [vmem:[#allocation22_spill] sm:$0xff]  ;;  %v14279_v50 = vld [vmem:[#allocation21_spill] sm:$0xff] }
 0x678   :  { %4612 = vmatpush1.bf16.msra.mxu0 %v8286_v3  ;;  %v8307_v49 = vcombine.high %v14277_v63, %v14276_v11  ;;  %v8281_v9 = vcombine.high %v14279_v50, %v14278_v14  ;;  %v8306_v41 = vcombine.low %v14277_v63, %v14276_v11  ;;  %v14280_v51 = vld [vmem:[#allocation69_spill] sm:$0xff]  ;;  %v14281_v53 = vld [vmem:[#allocation68_spill] sm:$0xff]  ;;  %v8280_v15 = vcombine.low %v14279_v50, %v14278_v14  ;;  %v14283_v35 = vld [vmem:[#allocation19_spill] sm:$0xff] }
 0x679   :  { %4613 = vmatprep.subr.bf16.mxu0 %v8285_v6  ;;  %v8333_v42 = vcombine.high %v14281_v53, %v14280_v51  ;;  %v14282_v43 = vld [vmem:[#allocation20_spill] sm:$0xff]  ;;  %v8332_v17 = vcombine.low %v14281_v53, %v14280_v51  ;;  %v14284_v28 = vld [vmem:[#allocation67_spill] sm:$0xff]  ;;  %v14285_v55 = vld [vmem:[#allocation66_spill] sm:$0xff] }
 0x67a   :  { %4681 = vmatpush1.bf16.msra.mxu1 %v8310_v27  ;;  %v8279_v22 = vcombine.high %v14283_v35, %v14282_v43  ;;  %v8331_v38 = vcombine.high %v14285_v55, %v14284_v28  ;;  %v8278_v12 = vcombine.low %v14283_v35, %v14282_v43  ;;  %v14286_v57 = vld [vmem:[#allocation18_spill] sm:$0xff]  ;;  %v14287_v29 = vld [vmem:[#allocation17_spill] sm:$0xff]  ;;  %v8330_v8 = vcombine.low %v14285_v55, %v14284_v28  ;;  %v14289_v61 = vld [vmem:[#allocation64_spill] sm:$0xff] }
 0x67b   :  { %4682 = vmatprep.subr.bf16.mxu1 %v8309_v32  ;;  %v8277_v48 = vcombine.high %v14287_v29, %v14286_v57  ;;  %v14288_v18 = vld [vmem:[#allocation65_spill] sm:$0xff]  ;;  %v8276_v21 = vcombine.low %v14287_v29, %v14286_v57  ;;  %v14290_v10 = vld [vmem:[#allocation16_spill] sm:$0xff]  ;;  %v14291_v13 = vld [vmem:[#allocation15_spill] sm:$0xff] }
 0x67c   :  { %4614 = vmatpush1.bf16.msra.mxu0 %v8284_v31  ;;  %v8329_v16 = vcombine.high %v14289_v61, %v14288_v18  ;;  %v8275_v60 = vcombine.high %v14291_v13, %v14290_v10  ;;  %v8328_v26 = vcombine.low %v14289_v61, %v14288_v18  ;;  %v14292_v39 = vld [vmem:[#allocation63_spill] sm:$0xff]  ;;  %v14293_v24 = vld [vmem:[#allocation62_spill] sm:$0xff]  ;;  %v8274_v30 = vcombine.low %v14291_v13, %v14290_v10  ;;  %v14295_v36 = vld [vmem:[#allocation45_spill] sm:$0xff] }
 0x67d   :  { %4615 = vmatprep.subr.bf16.mxu0 %v8283_v59  ;;  %v8327_v20 = vcombine.high %v14293_v24, %v14292_v39  ;;  %v14294_v3 = vld [vmem:[#allocation46_spill] sm:$0xff]  ;;  %v8326_v6 = vcombine.low %v14293_v24, %v14292_v39  ;;  %v14296_v27 = vld [vmem:[#allocation61_spill] sm:$0xff]  ;;  %v14297_v33 = vld [vmem:[#allocation60_spill] sm:$0xff] }
 0x67e   :  { %4683 = vmatpush1.bf16.msra.mxu1 %v8308_v62  ;;  %v8305_v25 = vcombine.high %v14295_v36, %v14294_v3  ;;  %v8325_v4 = vcombine.high %v14297_v33, %v14296_v27  ;;  %v8304_v32 = vcombine.low %v14295_v36, %v14294_v3  ;;  %v14298_v31 = vld [vmem:[#allocation44_spill] sm:$0xff]  ;;  %v14299_v5 = vld [vmem:[#allocation43_spill] sm:$0xff]  ;;  %v8324_v59 = vcombine.low %v14297_v33, %v14296_v27  ;;  %v14301_v11 = vld [vmem:[#allocation58_spill] sm:$0xff] }
 0x67f   :  { %4684 = vmatprep.subr.bf16.mxu1 %v8307_v49  ;;  %v8303_v58 = vcombine.high %v14299_v5, %v14298_v31  ;;  %v14300_v62 = vld [vmem:[#allocation59_spill] sm:$0xff]  ;;  %v8302_v49 = vcombine.low %v14299_v5, %v14298_v31  ;;  %v14303_v14 = vld [vmem:[#allocation41_spill] sm:$0xff]  ;;  %v14305_v51 = vld [vmem:[#allocation56_spill] sm:$0xff] }
 0x680   :  { %4616 = vmatpush1.bf16.msra.mxu0 %v8282_v0  ;;  %v8323_v63 = vcombine.high %v14301_v11, %v14300_v62  ;;  %v14302_v0 = vld [vmem:[#allocation42_spill] sm:$0xff]  ;;  %v14307_v43 = vld [vmem:[#allocation39_spill] sm:$0xff] }
 0x681   :  { %4617 = vmatprep.subr.bf16.mxu0 %v8281_v9  ;;  %v8301_v50 = vcombine.high %v14303_v14, %v14302_v0  ;;  %v8322_v9 = vcombine.low %v14301_v11, %v14300_v62  ;;  %v14309_v28 = vld [vmem:[#allocation54_spill] sm:$0xff] }
 0x682   :  { %4685 = vmatpush1.bf16.msra.mxu1 %v8306_v41  ;;  %v14304_v41 = vld [vmem:[#allocation57_spill] sm:$0xff] }
 0x683   :  { %4972 = vmatprep.subr.bf16.mxu1 %v8333_v42  ;;  %v8321_v53 = vcombine.high %v14305_v51, %v14304_v41  ;;  %v8300_v42 = vcombine.low %v14303_v14, %v14302_v0 }
 0x684   :  { %4618 = vmatpush1.bf16.msra.mxu0 %v8280_v15  ;;  %v14306_v15 = vld [vmem:[#allocation40_spill] sm:$0xff] }
 0x685   :  { %8315 = vmatmul.mubr.msk.bf16.vlgmr.msra.gmra.mxu1 %vm2286_vm4, %v12575_v2  ;;  %4619 = vmatprep.subr.bf16.mxu0 %v8279_v22  ;;  %v8299_v35 = vcombine.high %v14307_v43, %v14306_v15  ;;  %v8320_v22 = vcombine.low %v14305_v51, %v14304_v41 }
 0x686   :  { %4973 = vmatpush1.bf16.msra.mxu1 %v8332_v17  ;;  %4712 = vmatprep.mubr.bf16.mxu1 %v14235_v19  ;;  %v14308_v17 = vld [vmem:[#allocation55_spill] sm:$0xff] }
 0x687   :  { %4974 = vmatprep.subr.bf16.mxu1 %v8331_v38  ;;  %v8319_v55 = vcombine.high %v14309_v28, %v14308_v17  ;;  %v14310_v38 = vld [vmem:[#allocation38_spill] sm:$0xff]  ;;  %v8318_v29 = vcombine.low %v14309_v28, %v14308_v17 }
 0x688   :  { %4620 = vmatpush1.bf16.msra.mxu0 %v8278_v12  ;;  %v14311_v12 = vld [vmem:[#allocation37_spill] sm:$0xff] }
 0x689   :  { %4621 = vmatprep.subr.bf16.mxu0 %v8277_v48  ;;  %v8297_v57 = vcombine.high %v14311_v12, %v14310_v38  ;;  %v14312_v48 = vld [vmem:[#allocation85_spill] sm:$0xff]  ;;  %v8296_v61 = vcombine.low %v14311_v12, %v14310_v38  ;;  %v14334_v38 = vld [vmem:[#allocation88_spill] sm:$0xff] }
 0x68a   :  { %4975 = vmatpush1.bf16.msra.mxu1 %v8330_v8  ;;  %v14313_v8 = vld [vmem:[#allocation84_spill] sm:$0xff] }
 0x68b   :  { %4976 = vmatprep.subr.bf16.mxu1 %v8329_v16  ;;  %v8349_v18 = vcombine.high %v14313_v8, %v14312_v48  ;;  %v14314_v16 = vld [vmem:[#allocation36_spill] sm:$0xff]  ;;  %v8348_v13 = vcombine.low %v14313_v8, %v14312_v48 }
 0x68c   :  { %4622 = vmatpush1.bf16.msra.mxu0 %v8276_v21  ;;  %v14315_v21 = vld [vmem:[#allocation35_spill] sm:$0xff] }
 0x68d   :  { %8316 = vmatmul.mubr.msk.bf16.gmra.mxu1 %vm2286_vm4, %v12581_v1  ;;  %4623 = vmatprep.subr.bf16.mxu0 %v8275_v60  ;;  %v8295_v10 = vcombine.high %v14315_v21, %v14314_v16  ;;  %v14316_v60 = vld [vmem:[#allocation83_spill] sm:$0xff]  ;;  %v8294_v24 = vcombine.low %v14315_v21, %v14314_v16  ;;  %v14338_v16 = vld [vmem:[#allocation86_spill] sm:$0xff] }
 0x68e   :  { %4977 = vmatpush1.bf16.msra.mxu1 %v8328_v26  ;;  %4722 = vmatprep.mubr.bf16.mxu1 %v14235_v19  ;;  %v14317_v26 = vld [vmem:[#allocation82_spill] sm:$0xff] }
 0x68f   :  { %4978 = vmatprep.subr.bf16.mxu1 %v8327_v20  ;;  %v8347_v39 = vcombine.high %v14317_v26, %v14316_v60  ;;  %v14318_v20 = vld [vmem:[#allocation34_spill] sm:$0xff]  ;;  %v8346_v36 = vcombine.low %v14317_v26, %v14316_v60 }
 0x690   :  { %4624 = vmatpush1.bf16.msra.mxu0 %v8274_v30  ;;  %v14319_v30 = vld [vmem:[#allocation33_spill] sm:$0xff] }
 0x691   :  { %4625 = vmatprep.subr.bf16.mxu0 %v8305_v25  ;;  %v8293_v3 = vcombine.high %v14319_v30, %v14318_v20  ;;  %v14320_v25 = vld [vmem:[#allocation81_spill] sm:$0xff]  ;;  %v8292_v33 = vcombine.low %v14319_v30, %v14318_v20 }
 0x692   :  { %4979 = vmatpush1.bf16.msra.mxu1 %v8326_v6  ;;  %v14321_v6 = vld [vmem:[#allocation80_spill] sm:$0xff] }
 0x693   :  { %4980 = vmatprep.subr.bf16.mxu1 %v8325_v4  ;;  %v8345_v27 = vcombine.high %v14321_v6, %v14320_v25  ;;  %v14322_v4 = vld [vmem:[#allocation32_spill] sm:$0xff]  ;;  %v8344_v5 = vcombine.low %v14321_v6, %v14320_v25 }
 0x694   :  { %4626 = vmatpush2.bf16.msra.mxu0 %v8304_v32  ;;  %v14323_v32 = vld [vmem:[#allocation31_spill] sm:$0xff] }
 0x695   :  { %8317 = vmatmul.mubr.msk.bf16.gmra.mxu1 %vm2286_vm4, %v12587_v37  ;;  %4627 = vmatprep.subr.bf16.mxu0 %v8303_v58  ;;  %v8291_v31 = vcombine.high %v14323_v32, %v14322_v4  ;;  %v14324_v58 = vld [vmem:[#allocation79_spill] sm:$0xff]  ;;  %v8290_v11 = vcombine.low %v14323_v32, %v14322_v4 }
 0x696   :  { %4981 = vmatpush1.bf16.msra.mxu1 %v8324_v59  ;;  %5004 = vmatprep.mubr.bf16.mxu1 %v12579_v46  ;;  %v8298_v46 = vcombine.low %v14307_v43, %v14306_v15  ;;  %v14325_v59 = vld [vmem:[#allocation78_spill] sm:$0xff] }
 0x697   :  { %4982 = vmatprep.subr.bf16.mxu1 %v8323_v63  ;;  %v8343_v62 = vcombine.high %v14325_v59, %v14324_v58  ;;  %v8342_v63 = vcombine.low %v14325_v59, %v14324_v58  ;;  %v14330_v15 = vld [vmem:[#allocation90_spill] sm:$0xff] }
 0x698   :  { %4628 = vmatpush2.bf16.msra.mxu0 %v8302_v49  ;;  %v14326_v49 = vld [vmem:[#allocation92_spill] sm:$0xff] }
 0x699   :  { %4629 = vmatprep.subr.bf16.mxu0 %v8301_v50  ;;  %v8357_v0 = vcombine.high %v14326_v49, %v14326_v49  ;;  %v8356_v14 = vcombine.low %v14326_v49, %v14326_v49  ;;  %v14327_v50 = vld [vmem:[#allocation77_spill] sm:$0xff] }
 0x69a   :  { %4983 = vmatpush1.bf16.msra.mxu1 %v8322_v9  ;;  %v14328_v9 = vld [vmem:[#allocation76_spill] sm:$0xff] }
 0x69b   :  { %4984 = vmatprep.subr.bf16.mxu1 %v8321_v53  ;;  %v8341_v41 = vcombine.high %v14328_v9, %v14327_v50  ;;  %v4967_v51 = vsel %vm4602_vm6, %v8356_v14, 0  ;;  %v8340_v53 = vcombine.low %v14328_v9, %v14327_v50 }
 0x69c   :  { %4630 = vmatpush2.bf16.msra.mxu0 %v8300_v42  ;;  %v14329_v42 = vld [vmem:[#allocation91_spill] sm:$0xff] }
 0x69d   :  { %4631 = vmatprep.subr.bf16.mxu0 %v8299_v35  ;;  %v8355_v43 = vcombine.high %v14330_v15, %v14329_v42  ;;  %v14331_v35 = vld [vmem:[#allocation75_spill] sm:$0xff]  ;;  %v8354_v28 = vcombine.low %v14330_v15, %v14329_v42 }
 0x69e   :  { %4985 = vmatpush1.bf16.msra.mxu1 %v8320_v22  ;;  %v14332_v22 = vld [vmem:[#allocation74_spill] sm:$0xff] }
 0x69f   :  { %4986 = vmatprep.subr.bf16.mxu1 %v8319_v55  ;;  %v8339_v17 = vcombine.high %v14332_v22, %v14331_v35  ;;  %v8338_v55 = vcombine.low %v14332_v22, %v14331_v35 }
 0x6a0   :  { %4632 = vmatpush2.bf16.msra.mxu0 %v8298_v46  ;;  %v14333_v46 = vld [vmem:[#allocation89_spill] sm:$0xff] }
 0x6a1   :  { %4633 = vmatprep.subr.bf16.mxu0 %v8297_v57  ;;  %v8353_v12 = vcombine.high %v14334_v38, %v14333_v46  ;;  %v14335_v57 = vld [vmem:[#allocation73_spill] sm:$0xff]  ;;  %v8352_v8 = vcombine.low %v14334_v38, %v14333_v46 }
 0x6a2   :  { %4987 = vmatpush1.bf16.msra.mxu1 %v8318_v29  ;;  %v14336_v29 = vld [vmem:[#allocation72_spill] sm:$0xff] }
 0x6a3   :  { %4988 = vmatprep.subr.bf16.mxu1 %v8349_v18  ;;  %v8337_v48 = vcombine.high %v14336_v29, %v14335_v57  ;;  %v8336_v18 = vcombine.low %v14336_v29, %v14335_v57 }
 0x6a4   :  { %4634 = vmatpush2.bf16.msra.mxu0 %v8296_v61  ;;  %v14337_v61 = vld [vmem:[#allocation87_spill] sm:$0xff] }
 0x6a5   :  { %4635 = vmatprep.subr.bf16.mxu0 %v8295_v10  ;;  %v8351_v21 = vcombine.high %v14338_v16, %v14337_v61  ;;  %v14339_v10 = vld [vmem:[#allocation71_spill] sm:$0xff]  ;;  %v8350_v26 = vcombine.low %v14338_v16, %v14337_v61 }
 0x6a6   :  { %4989 = vmatpush2.bf16.msra.mxu1 %v8348_v13  ;;  %v14340_v13 = vld [vmem:[#allocation70_spill] sm:$0xff] }
 0x6a7   :  { %4990 = vmatprep.subr.bf16.mxu1 %v8347_v39  ;;  %v8335_v60 = vcombine.high %v14340_v13, %v14339_v10  ;;  %v8334_v39 = vcombine.low %v14340_v13, %v14339_v10 }
 0x6a8   :  { %4636 = vmatpush2.bf16.msra.mxu0 %v8294_v24 }
 0x6a9   :  { %4637 = vmatprep.subr.bf16.mxu0 %v8293_v3 }
 0x6aa   :  { %4991 = vmatpush2.bf16.msra.mxu1 %v8346_v36 }
 0x6ab   :  { %4992 = vmatprep.subr.bf16.mxu1 %v8345_v27 }
 0x6ac   :  { %4638 = vmatpush2.bf16.msra.mxu0 %v8292_v33 }
 0x6ad   :  { %4639 = vmatprep.subr.bf16.mxu0 %v8291_v31 }
 0x6ae   :  { %4993 = vmatpush2.bf16.msra.mxu1 %v8344_v5 }
 0x6af   :  { %4994 = vmatprep.subr.bf16.mxu1 %v8343_v62 }
 0x6b0   :  { %4640 = vmatpush2.bf16.msra.mxu0 %v8290_v11 }
 0x6b1   :  { %8358 = vmatprep.subr.msk.bf16.mxu0 %vm4602_vm6, %v8357_v0 }
 0x6b2   :  { %4995 = vmatpush2.bf16.msra.mxu1 %v8342_v63 }
 0x6b3   :  { %4996 = vmatprep.subr.bf16.mxu1 %v8341_v41  ;;  %4642 = vmatmul.mubr.bf16.vlgmr.msra.gmra.mxu0 %v12577_v23 }
 0x6b4   :  { %5042 = vmatpush1.bf16.msra.mxu0 %v4967_v51  ;;  %4651 = vmatprep.mubr.bf16.mxu0 %v12585_v40 }
 0x6b5   :  { %5043 = vmatprep.subr.bf16.mxu0 %v8355_v43 }
 0x6b6   :  { %4997 = vmatpush2.bf16.msra.mxu1 %v8340_v53 }
 0x6b7   :  { %4998 = vmatprep.subr.bf16.mxu1 %v8339_v17 }
 0x6b8   :  { %5044 = vmatpush1.bf16.msra.mxu0 %v8354_v28 }
 0x6b9   :  { %5045 = vmatprep.subr.bf16.mxu0 %v8353_v12 }
 0x6ba   :  { %4999 = vmatpush2.bf16.msra.mxu1 %v8338_v55 }
 0x6bb   :  { %5000 = vmatprep.subr.bf16.mxu1 %v8337_v48  ;;  %4652 = vmatmul.mubr.bf16.gmra.mxu0 %v12583_v54 }
 0x6bc   :  { %5046 = vmatpush1.bf16.msra.mxu0 %v8352_v8  ;;  %4661 = vmatprep.mubr.bf16.mxu0 %v12591_v56 }
 0x6bd   :  { %5047 = vmatprep.subr.bf16.mxu0 %v8351_v21 }
 0x6be   :  { %5001 = vmatpush2.bf16.msra.mxu1 %v8336_v18 }
 0x6bf   :  { %5002 = vmatprep.subr.bf16.mxu1 %v8335_v60 }
 0x6c0   :  { %5048 = vmatpush1.bf16.msra.mxu0 %v8350_v26 }
 0x6c2   :  { %5003 = vmatpush2.bf16.msra.mxu1 %v8334_v39 }
 0x6c3   :  { %4662 = vmatmul.mubr.bf16.gmra.mxu0 %v12589_v52 }
 0x6c4   :  { %5065 = vmatprep.mubr.bf16.mxu0 %v14235_v19 }
 0x6c5   :  { %5005 = vmatmul.mubr.bf16.vlgmr.msra.gmra.mxu1 %v12577_v23 }
 0x6c6   :  { %5014 = vmatprep.mubr.bf16.mxu1 %v12585_v40 }
 0x6cb   :  { %8359 = vmatmul.mubr.msk.bf16.vlgmr.msra.gmra.mxu0 %vm2286_vm4, %v12575_v2 }
 0x6cc   :  { %5075 = vmatprep.mubr.bf16.mxu0 %v14235_v19 }
 0x6cd   :  { %5015 = vmatmul.mubr.bf16.gmra.mxu1 %v12583_v54 }
 0x6ce   :  { %5024 = vmatprep.mubr.bf16.mxu1 %v12591_v56 }
 0x6d3   :  { %8360 = vmatmul.mubr.msk.bf16.gmra.mxu0 %vm2286_vm4, %v12581_v1 }
 0x6d4   :  { %5085 = vmatprep.mubr.bf16.mxu0 %v14235_v19 }
 0x6d5   :  { %5025 = vmatmul.mubr.bf16.gmra.mxu1 %v12589_v52 }
 0x6db   :  { %8361 = vmatmul.mubr.msk.bf16.gmra.mxu0 %vm2286_vm4, %v12587_v37 }
 0x745   :  { %v4704_v23 = vpop.f32.mrf.mxu1 }
 0x747   :  { %v4706_v40 = vpop.f32.mrf.mxu1 }
 0x749   :  { %v4708_v24 = vpop.f32.mrf.mxu1 }
 0x74b   :  { %v4710_v2 = vpop.f32.mrf.mxu1 }
 0x74d   :  { %v4714_v20 = vpop.f32.mrf.mxu1 }
 0x74f   :  { %v4716_v54 = vpop.f32.mrf.mxu1 }
 0x751   :  { %v4718_v30 = vpop.f32.mrf.mxu1 }
 0x753   :  { %v4720_v3 = vpop.f32.mrf.mxu1 }
 0x755   :  { %v4724_v36 = vpop.f32.mrf.mxu1 }
 0x757   :  { %v12787_v56 = vpop.f32.mrf.mxu1 }
 0x759   :  { %v4728_v25 = vpop.f32.mrf.mxu1 }
 0x75b   :  { %v4729_v1 = vpop.f32.mrf.mxu1 }
 0x773   :  { %v4643_v6 = vpop.f32.mrf.mxu0 }
 0x774   :  { %v12789_v50 = vadd.f32 %v4704_v23, %v4643_v6 }
 0x775   :  { %v4645_v52 = vpop.f32.mrf.mxu0 }
 0x776   :  { %v4707_v53 = vadd.f32 %v4706_v40, %v4645_v52 }
 0x777   :  { %v4647_v27 = vpop.f32.mrf.mxu0 }
 0x778   :  { %v4709_v22 = vadd.f32 %v4708_v24, %v4647_v27 }
 0x779   :  { %v4649_v33 = vpop.f32.mrf.mxu0 }
 0x77a   :  { %v4711_v38 = vadd.f32 %v4710_v2, %v4649_v33 }
 0x77b   :  { %v4653_v4 = vpop.f32.mrf.mxu0 }
 0x77c   :  { %v4715_v8 = vadd.f32 %v4714_v20, %v4653_v4 }
 0x77d   :  { %v4655_v32 = vpop.f32.mrf.mxu0 }
 0x77e   :  { %v4717_v10 = vadd.f32 %v4716_v54, %v4655_v32 }
 0x77f   :  { %v4657_v37 = vpop.f32.mrf.mxu0 }
 0x780   :  { %v4719_v23 = vadd.f32 %v4718_v30, %v4657_v37 }
 0x781   :  { %v4659_v31 = vpop.f32.mrf.mxu0 }
 0x782   :  { %v4721_v2 = vadd.f32 %v4720_v3, %v4659_v31 }
 0x783   :  { %v4663_v5 = vpop.f32.mrf.mxu0 }
 0x784   :  { %v4725_v20 = vadd.f32 %v4724_v36, %v4663_v5 }
 0x785   :  { %v5006_v58 = vpop.f32.mrf.mxu1  ;;  %v4665_v59 = vpop.f32.mrf.mxu0 }
 0x786   :  { %v4727_v54 = vadd.f32 %v12787_v56, %v4665_v59 }
 0x787   :  { %v5008_v62 = vpop.f32.mrf.mxu1  ;;  %v4667_v11 = vpop.f32.mrf.mxu0 }
 0x789   :  { %v5010_v63 = vpop.f32.mrf.mxu1  ;;  %v4668_v49 = vpop.f32.mrf.mxu0 }
 0x78b   :  { %v5012_v0 = vpop.f32.mrf.mxu1  ;;  %v5067_v14 = vpop.f32.mrf.mxu0 }
 0x78c   :  { %v12791_v9 = vadd.f32 %v5067_v14, %v5006_v58 }
 0x78d   :  { %v5016_v41 = vpop.f32.mrf.mxu1  ;;  %v5069_v51 = vpop.f32.mrf.mxu0 }
 0x78e   :  { %v5094_v42 = vmax.f32 %v12789_v50, %v12791_v9  ;;  %v5070_v15 = vadd.f32 %v5069_v51, %v5008_v62 }
 0x78f   :  { %v5018_v43 = vpop.f32.mrf.mxu1  ;;  %v5071_v35 = vpop.f32.mrf.mxu0 }
 0x790   :  { %v5095_v17 = vmax.f32 %v4707_v53, %v5070_v15  ;;  %v5072_v28 = vadd.f32 %v5071_v35, %v5010_v63 }
 0x791   :  { %v5020_v55 = vpop.f32.mrf.mxu1  ;;  %v5073_v46 = vpop.f32.mrf.mxu0 }
 0x792   :  { %v5096_v12 = vmax.f32 %v4709_v22, %v5072_v28  ;;  %v5074_v57 = vadd.f32 %v5073_v46, %v5012_v0 }
 0x793   :  { %v5022_v29 = vpop.f32.mrf.mxu1  ;;  %v5077_v48 = vpop.f32.mrf.mxu0 }
 0x794   :  { %v5097_v18 = vmax.f32 %v4711_v38, %v5074_v57  ;;  %v5078_v61 = vadd.f32 %v5077_v48, %v5016_v41 }
 0x795   :  { %v5026_v16 = vpop.f32.mrf.mxu1  ;;  %v5079_v21 = vpop.f32.mrf.mxu0 }
 0x796   :  { %v5098_v13 = vmax.f32 %v4715_v8, %v5078_v61  ;;  %v5080_v60 = vadd.f32 %v5079_v21, %v5018_v43 }
 0x797   :  { %v5028_v26 = vpop.f32.mrf.mxu1  ;;  %v5081_v39 = vpop.f32.mrf.mxu0 }
 0x798   :  { %v5099_v40 = vmax.f32 %v4717_v10, %v5080_v60  ;;  %v5082_v24 = vadd.f32 %v5081_v39, %v5020_v55 }
 0x799   :  { %v5030_v25 = vpop.f32.mrf.mxu1  ;;  %v5083_v1 = vpop.f32.mrf.mxu0 }
 0x79a   :  { %v5100_v6 = vmax.f32 %v4719_v23, %v5082_v24  ;;  %v5084_v52 = vadd.f32 %v5083_v1, %v5022_v29 }
 0x79b   :  { %v5031_v27 = vpop.f32.mrf.mxu1  ;;  %v5087_v33 = vpop.f32.mrf.mxu0 }
 0x79c   :  { %v5101_v4 = vmax.f32 %v4721_v2, %v5084_v52  ;;  %v5088_v58 = vadd.f32 %v5087_v33, %v5026_v16 }
 0x79d   :  { %v5089_v62 = vpop.f32.mrf.mxu0 }
 0x79e   :  { %v5102_v32 = vmax.f32 %v4725_v20, %v5088_v58  ;;  %v5090_v11 = vadd.f32 %v5089_v62, %v5028_v26 }
 0x79f   :  { %v5091_v63 = vpop.f32.mrf.mxu0 }
 0x7a0   :  { %v5103_v49 = vmax.f32 %v4727_v54, %v5090_v11  ;;  %v5121_v0 = vpack.c.bf16 %v5102_v32, %v5102_v32 }
 0x7a1   :  { %v5092_v30 = vpop.f32.mrf.mxu0 }
 0x7a2   :  { %v5122_v37 = vpack.c.bf16 %v5103_v49, %v5103_v49 }
 0x7a3   :  { %9936 = dma.done.wait [#allocation6 + $0x1], 4864 }
 0x7a4   :  { %9937 = vsyncadd [#allocation6 + $0x1], 4294962432  ;;  %v5120_v3 = vpack.c.bf16 %v5101_v4, %v5099_v40  ;;  %5194 = vmatprep.mubr.bf16.mxu0 %v14235_v19  ;;  %5342 = vmatprep.subr.bf16.mxu1 %v14235_v19  ;;  %v5157_v36 = vsel %vm4602_vm6, %v5121_v0, 0  ;;  %v5119_v56 = vpack.c.bf16 %v5100_v6, %v5098_v13  ;;  %v5118_v31 = vpack.c.bf16 %v5097_v18, %v5095_v17  ;;  %v9841_v59 = vld [vmem:[%s13574_s6] sm:$0xff]   ;;  %v9845_v14 = vld [vmem:[#allocation3 + $0x38] sm:$0xff]  }
 0x7a5   :  { %8366 = vmatprep.subr.msk.bf16.mxu0 %vm4602_vm6, %v5122_v37  ;;  %v5117_v5 = vpack.c.bf16 %v5096_v12, %v5094_v42  ;;  %vm5143_vm7 = vcmask 326656   ;;  %v9847_v50 = vld [vmem:[#allocation3 + $0x84] sm:$0xff]   ;;  %v9846_v9 = vld [vmem:[#allocation3 + $0x30] sm:$0xff]   ;;  %v9849_v41 = vld [vmem:[#allocation3 + $0x7c] sm:$0xff]   ;;  %vm5335_vm8 = vcmask 195584   ;;  %vm6443_vm9 = vcmask 130048  }
 0x7a6   :  { %5173 = vmatpush1.bf16.msra.mxu0 %v5157_v36  ;;  %5343 = vmatpush1.bf16.msra.mxu1 %v9847_v50  ;;  %v9842_v51 = vld [vmem:[%s13574_s6 + $0x8] sm:$0xff]   ;;  %v9851_v42 = vld [vmem:[#allocation3 + $0x74] sm:$0xff]   ;;  %v9850_v15 = vld [vmem:[#allocation3 + $0x20] sm:$0xff]  }
 0x7a7   :  { %5174 = vmatprep.subr.bf16.mxu0 %v5120_v3  ;;  %5344 = vmatprep.subr.bf16.mxu1 %v14235_v19  ;;  %v9848_v53 = vld [vmem:[#allocation3 + $0x28] sm:$0xff]   ;;  %v9843_v43 = vld [vmem:[%s13574_s6 + $0x10] sm:$0xff]   ;;  %v9852_v22 = vld [vmem:[#allocation3 + $0x18] sm:$0xff]  }
 0x7a8   :  { %v9853_v35 = vld [vmem:[#allocation3 + $0x6c] sm:$0xff]   ;;  %v9855_v17 = vld [vmem:[#allocation3 + $0x64] sm:$0xff]   ;;  %v9857_v55 = vld [vmem:[#allocation3 + $0x5c] sm:$0xff]  }
 0x7a9   :  { %v9854_v28 = vld [vmem:[#allocation3 + $0x10] sm:$0xff]   ;;  %v9844_v46 = vld [vmem:[%s13574_s6 + $0x18] sm:$0xff]   ;;  %v9856_v38 = vld [vmem:[#allocation3 + $0x8] sm:$0xff]  }
 0x7aa   :  { %5175 = vmatpush1.bf16.msra.mxu0 %v5119_v56  ;;  %5345 = vmatpush1.bf16.msra.mxu1 %v9849_v41  ;;  %v9858_v12 = vld [vmem:[#allocation3] sm:$0xff]   ;;  %v9860_v57 = vld [vmem:[#allocation3 + $0x48] ss:$0 sps:$4 sm:$0xff]   ;;  %v9859_v29 = vld [vmem:[#allocation3 + $0x54] sm:$0xff]  }
 0x7ab   :  { %5176 = vmatprep.subr.bf16.mxu0 %v5118_v31  ;;  %5346 = vmatprep.subr.bf16.mxu1 %v14235_v19  ;;  %v5444_v48 = vsel %vm4602_vm6, %v9860_v57, 0  ;;  %v9861_v8 = vld [vmem:[#allocation3 + $0x4c] sm:$0xff]   ;;  %v9862_v18 = vld [vmem:[#allocation3 + $0x40] sm:$0xff]   ;;  %v9863_v61 = vld [vmem:[#allocation3 + $0x94] ss:$0 sps:$4 sm:$0xff]  }
 0x7ac   :  { %v5340_v16 = vsel %vm4602_vm6, %v9863_v61, 0  ;;  %v9865_v21 = vld [vmem:[#allocation3 + $0x8c] sm:$0xff]   ;;  %v9864_v23 = vld [vmem:[#allocation3 + $0x11c] sm:$0xff]   ;;  %v9866_v1 = vld [vmem:[#allocation3 + $0x114] sm:$0xff]  }
 0x7ad   :  { %v9867_v27 = vld [vmem:[#allocation3 + $0xd0] sm:$0xff]   ;;  %v9869_v62 = vld [vmem:[#allocation3 + $0xc8] sm:$0xff]   ;;  %v9871_v63 = vld [vmem:[#allocation3 + $0xc0] sm:$0xff]  }
 0x7ae   :  { %5177 = vmatpush1.bf16.msra.mxu0 %v5117_v5  ;;  %5347 = vmatpush1.bf16.msra.mxu1 %v9851_v42  ;;  %v9868_v33 = vld [vmem:[#allocation3 + $0x10c] sm:$0xff]   ;;  %v9870_v54 = vld [vmem:[#allocation3 + $0x104] sm:$0xff]   ;;  %v9872_v49 = vld [vmem:[#allocation3 + $0xfc] sm:$0xff]  }
 0x7af   :  { %5446 = vmatprep.subr.bf16.mxu0 %v14235_v19  ;;  %5348 = vmatprep.subr.bf16.mxu1 %v14235_v19  ;;  %v9873_v3 = vld [vmem:[#allocation3 + $0xb8] sm:$0xff]   ;;  %v9875_v5 = vld [vmem:[#allocation3 + $0xb0] sm:$0xff]   ;;  %v9877_v50 = vld [vmem:[#allocation3 + $0xa8] sm:$0xff]  }
 0x7b0   :  { %v9874_v36 = vld [vmem:[#allocation3 + $0xf4] sm:$0xff]   ;;  %v9880_v41 = vld [vmem:[#allocation3 + $0x12c] ss:$0 sps:$4 sm:$0xff]  }
 0x7b1   :  { %8367 = vmatmul.mubr.msk.bf16.vlgmr.msra.gmra.mxu0 %vm5143_vm7, %v9841_v59  ;;  %v9876_v59 = vld [vmem:[#allocation3 + $0xec] sm:$0xff]   ;;  %v9881_v42 = vld [vmem:[#allocation3 + $0x98] sm:$0xff]  }
 0x7b2   :  { %5204 = vmatprep.mubr.bf16.mxu0 %v14235_v19  ;;  %5447 = vmatpush1.bf16.msra.mxu0 %v9845_v14  ;;  %v5773_v57 = vld [vmem:[%s13575_s7 + $0x68] sm:$0xff] }
 0x7b3   :  { %5448 = vmatprep.subr.bf16.mxu0 %v14235_v19  ;;  %5349 = vmatpush1.bf16.msra.mxu1 %v9853_v35 }
 0x7b4   :  { %5350 = vmatprep.subr.bf16.mxu1 %v14235_v19 }
 0x7b6   :  { %5449 = vmatpush1.bf16.msra.mxu0 %v9846_v9  ;;  %v9878_v9 = vld [vmem:[#allocation3 + $0xe4] sm:$0xff]  }
 0x7b7   :  { %5450 = vmatprep.subr.bf16.mxu0 %v14235_v19  ;;  %5351 = vmatpush1.bf16.msra.mxu1 %v9855_v17  ;;  %v9884_v17 = vld [vmem:[#allocation3 + $0xd8] sm:$0xff]  }
 0x7b8   :  { %5352 = vmatprep.subr.bf16.mxu1 %v14235_v19 }
 0x7b9   :  { %8368 = vmatmul.mubr.msk.bf16.gmra.mxu0 %vm5143_vm7, %v9842_v51  ;;  %v9879_v51 = vld [vmem:[#allocation3 + $0xa0] sm:$0xff]  }
 0x7ba   :  { %5214 = vmatprep.mubr.bf16.mxu0 %v14235_v19  ;;  %5451 = vmatpush1.bf16.msra.mxu0 %v9848_v53  ;;  %v5698_v53 = vsel %vm4602_vm6, %v9880_v41, 0 }
 0x7bb   :  { %5452 = vmatprep.subr.bf16.mxu0 %v14235_v19  ;;  %5353 = vmatpush1.bf16.msra.mxu1 %v9857_v55  ;;  %v5775_v55 = vld [vmem:[%s13575_s7 + $0x78] sm:$0xff] }
 0x7bc   :  { %5354 = vmatprep.subr.bf16.mxu1 %v14235_v19 }
 0x7be   :  { %5453 = vmatpush1.bf16.msra.mxu0 %v9850_v15  ;;  %v9882_v15 = vld [vmem:[#allocation3 + $0x124] sm:$0xff]  }
 0x7bf   :  { %5454 = vmatprep.subr.bf16.mxu0 %v14235_v19  ;;  %5355 = vmatpush1.bf16.msra.mxu1 %v9859_v29 }
 0x7c0   :  { %5356 = vmatprep.subr.bf16.mxu1 %v14235_v19 }
 0x7c1   :  { %8369 = vmatmul.mubr.msk.bf16.gmra.mxu0 %vm5143_vm7, %v9843_v43  ;;  %v9883_v43 = vld [vmem:[#allocation3 + $0xe0] ss:$0 sps:$4 sm:$0xff]  }
 0x7c2   :  { %5224 = vmatprep.mubr.bf16.mxu0 %v14235_v19  ;;  %5455 = vmatpush1.bf16.msra.mxu0 %v9852_v22  ;;  %v5570_v22 = vsel %vm4602_vm6, %v9883_v43, 0 }
 0x7c3   :  { %5456 = vmatprep.subr.bf16.mxu0 %v14235_v19  ;;  %5357 = vmatpush1.bf16.msra.mxu1 %v9861_v8  ;;  %v12897_v8 = vand.u32 4294901760, %v5773_v57 }
 0x7c4   :  { %5370 = vmatprep.subr.bf16.mxu1 %v14235_v19 }
 0x7c6   :  { %5457 = vmatpush1.bf16.msra.mxu0 %v9854_v28 }
 0x7c7   :  { %5458 = vmatprep.subr.bf16.mxu0 %v14235_v19  ;;  %5371 = vmatpush2.bf16.msra.mxu1 %v5340_v16 }
 0x7c8   :  { %5372 = vmatprep.subr.bf16.mxu1 %v14235_v19 }
 0x7c9   :  { %8370 = vmatmul.mubr.msk.bf16.gmra.mxu0 %vm5143_vm7, %v9844_v46  ;;  %v12878_v46 = vand.u32 4294901760, %v5775_v55 }
 0x7ca   :  { %5459 = vmatpush1.bf16.msra.mxu0 %v9856_v38  ;;  %v5774_v38 = vld [vmem:[%s13575_s7 + $0x70] sm:$0xff] }
 0x7cb   :  { %5460 = vmatprep.subr.bf16.mxu0 %v14235_v19  ;;  %5373 = vmatpush2.bf16.msra.mxu1 %v9865_v21  ;;  %v12909_v21 = vsub.f32 %v5773_v57, %v12897_v8 }
 0x7cc   :  { %5572 = vmatprep.subr.bf16.mxu1 %v14235_v19 }
 0x7ce   :  { %5461 = vmatpush1.bf16.msra.mxu0 %v9858_v12  ;;  %v12886_v12 = vand.u32 4294901760, %v5774_v38 }
 0x7cf   :  { %5474 = vmatprep.subr.bf16.mxu0 %v14235_v19 }
 0x7d2   :  { %5475 = vmatpush2.bf16.msra.mxu0 %v5444_v48  ;;  %v12895_v48 = vsub.f32 %v5774_v38, %v12886_v12 }
 0x7d3   :  { %5476 = vmatprep.subr.bf16.mxu0 %v14235_v19 }
 0x7d4   :  { %v5877_v16 = vand.u32 4294901760, %v12895_v48 }
 0x7d6   :  { %5477 = vmatpush2.bf16.msra.mxu0 %v9862_v18  ;;  %v5772_v18 = vld [vmem:[%s13575_s7 + $0x60] sm:$0xff] }
 0x7d7   :  { %5700 = vmatprep.subr.bf16.mxu0 %v14235_v19 }
 0x871   :  { %v5196_v10 = vpop.f32.mrf.mxu0 }
 0x873   :  { %v5198_v13 = vpop.f32.mrf.mxu0 }
 0x875   :  { %v5200_v60 = vpop.f32.mrf.mxu0 }
 0x876   :  { %v5235_v40 = vpack.c.bf16 %v5200_v60, %v5196_v10  ;;  %v12911_v10 = vand.u32 4294901760, %v5772_v18 }
 0x877   :  { %v5202_v26 = vpop.f32.mrf.mxu0 }
 0x878   :  { %v5236_v39 = vpack.c.bf16 %v5202_v26, %v5198_v13  ;;  %v5771_v13 = vld [vmem:[%s13575_s7 + $0x58] sm:$0xff]  ;;  %v5878_v26 = vsub.f32 %v12895_v48, %v5877_v16 }
 0x879   :  { %v5206_v24 = vpop.f32.mrf.mxu0 }
 0x87a   :  { %8392 = vmatprep.mubr.msk.bf16.mxu0 %vm5335_vm8, %v5236_v39  ;;  %v5884_v39 = vand.u32 4294901760, %v12909_v21 }
 0x87b   :  { %v5208_v25 = vpop.f32.mrf.mxu0  ;;  %5479 = vmatmul.mubr.bf16.vlgmr.msra.gmra.mxu0 %v5235_v40  ;;  %v12926_v40 = vand.u32 4294901760, %v5771_v13 }
 0x87c   :  { %5701 = vmatpush1.bf16.msra.mxu0 %v9864_v23  ;;  %v12923_v23 = vsub.f32 %v5772_v18, %v12911_v10  ;;  %v5763_v18 = vld [vmem:[%s13575_s7 + $0x18] sm:$0xff] }
 0x87d   :  { %v5210_v2 = vpop.f32.mrf.mxu0  ;;  %5702 = vmatprep.subr.bf16.mxu0 %v14235_v19 }
 0x87e   :  { %v5256_v20 = vpack.c.bf16 %v5210_v2, %v5206_v24  ;;  %v5770_v24 = vld [vmem:[%s13575_s7 + $0x50] sm:$0xff]  ;;  %v5891_v2 = vand.u32 4294901760, %v12923_v23 }
 0x87f   :  { %v5212_v6 = vpop.f32.mrf.mxu0 }
 0x880   :  { %v5257_v52 = vpack.c.bf16 %v5212_v6, %v5208_v25  ;;  %5703 = vmatpush1.bf16.msra.mxu0 %v9866_v1  ;;  %v5879_v25 = vand.u32 4294901760, %v5878_v26  ;;  %v5885_v1 = vsub.f32 %v12909_v21, %v5884_v39  ;;  %v12936_v6 = vand.u32 4294901760, %v5770_v24 }
 0x881   :  { %5704 = vmatprep.subr.bf16.mxu0 %v14235_v19  ;;  %v12845_v4 = vpop.f32.mrf.mxu0  ;;  %v13040_v26 = vand.u32 4294901760, %v5763_v18 }
 0x882   :  { %8381 = vmatprep.mubr.msk.bf16.mxu1 %vm5335_vm8, %v5257_v52  ;;  %v12940_v52 = vsub.f32 %v5771_v13, %v12926_v40 }
 0x883   :  { %5375 = vmatmul.mubr.bf16.vlgmr.msra.gmra.mxu1 %v5256_v20  ;;  %v5218_v58 = vpop.f32.mrf.mxu0  ;;  %v5892_v20 = vsub.f32 %v12923_v23, %v5891_v2 }
 0x884   :  { %5573 = vmatpush1.bf16.msra.mxu1 %v9867_v27  ;;  %5705 = vmatpush1.bf16.msra.mxu0 %v9868_v33  ;;  %v5769_v27 = vld [vmem:[%s13575_s7 + $0x48] sm:$0xff]  ;;  %v5886_v33 = vand.u32 4294901760, %v5885_v1 }
 0x885   :  { %5574 = vmatprep.subr.bf16.mxu1 %v14235_v19  ;;  %5706 = vmatprep.subr.bf16.mxu0 %v14235_v19  ;;  %v5220_v32 = vpop.f32.mrf.mxu0 }
 0x886   :  { %v5487_v28 = vpack.c.bf16 %v5220_v32, %v12845_v4  ;;  %v12950_v4 = vsub.f32 %v5770_v24, %v12936_v6  ;;  %v5893_v32 = vand.u32 4294901760, %v5892_v20 }
 0x887   :  { %v5222_v11 = vpop.f32.mrf.mxu0 }
 0x888   :  { %5575 = vmatpush1.bf16.msra.mxu1 %v9869_v62  ;;  %5707 = vmatpush1.bf16.msra.mxu0 %v9870_v54  ;;  %v5488_v30 = vpack.c.bf16 %v5222_v11, %v5218_v58  ;;  %v12952_v58 = vand.u32 4294901760, %v5769_v27  ;;  %v5898_v62 = vand.u32 4294901760, %v12940_v52  ;;  %v5768_v54 = vld [vmem:[%s13575_s7 + $0x40] sm:$0xff]  ;;  %v5905_v11 = vand.u32 4294901760, %v12950_v4 }
 0x889   :  { %5576 = vmatprep.subr.bf16.mxu1 %v14235_v19  ;;  %5708 = vmatprep.subr.bf16.mxu0 %v14235_v19  ;;  %v5226_v37 = vpop.f32.mrf.mxu0 }
 0x88a   :  { %8403 = vmatprep.mubr.msk.bf16.mxu1 %vm5335_vm8, %v5488_v30  ;;  %v5899_v30 = vsub.f32 %v12940_v52, %v5898_v62 }
 0x88b   :  { %v5228_v0 = vpop.f32.mrf.mxu0 }
 0x88c   :  { %5577 = vmatpush1.bf16.msra.mxu1 %v9871_v63  ;;  %5709 = vmatpush1.bf16.msra.mxu0 %v9872_v49  ;;  %v12963_v63 = vsub.f32 %v5769_v27, %v12952_v58  ;;  %v12965_v49 = vand.u32 4294901760, %v5768_v54 }
 0x88d   :  { %5578 = vmatprep.subr.bf16.mxu1 %v14235_v19  ;;  %5710 = vmatprep.subr.bf16.mxu0 %v14235_v19  ;;  %v5230_v56 = vpop.f32.mrf.mxu0 }
 0x88e   :  { %v5615_v35 = vpack.c.bf16 %v5230_v56, %v5226_v37  ;;  %v5767_v37 = vld [vmem:[%s13575_s7 + $0x38] sm:$0xff] }
 0x88f   :  { %v5232_v31 = vpop.f32.mrf.mxu0  ;;  %v12983_v56 = vand.u32 4294901760, %v5767_v37 }
 0x890   :  { %5579 = vmatpush1.bf16.msra.mxu1 %v9873_v3  ;;  %5711 = vmatpush1.bf16.msra.mxu0 %v9874_v36  ;;  %v5616_v14 = vpack.c.bf16 %v5232_v31, %v5228_v0  ;;  %v5906_v0 = vsub.f32 %v12950_v4, %v5905_v11  ;;  %v13858_v3 = vand.u32 4294901760, %v12963_v63  ;;  %v12981_v36 = vsub.f32 %v5768_v54, %v12965_v49 }
 0x891   :  { %5580 = vmatprep.subr.bf16.mxu1 %v14235_v19  ;;  %5712 = vmatprep.subr.bf16.mxu0 %v14235_v19  ;;  %v5900_v31 = vand.u32 4294901760, %v5899_v30 }
 0x892   :  { %8414 = vmatprep.mubr.msk.bf16.mxu0 %vm5335_vm8, %v5616_v14  ;;  %v5913_v14 = vsub.f32 %v12963_v63, %v13858_v3 }
 0x894   :  { %5581 = vmatpush1.bf16.msra.mxu1 %v9875_v5  ;;  %5713 = vmatpush1.bf16.msra.mxu0 %v9876_v59  ;;  %v5766_v5 = vld [vmem:[%s13575_s7 + $0x30] sm:$0xff]  ;;  %v5907_v59 = vand.u32 4294901760, %v5906_v0 }
 0x895   :  { %5582 = vmatprep.subr.bf16.mxu1 %v14235_v19  ;;  %5714 = vmatprep.subr.bf16.mxu0 %v14235_v19  ;;  %v12999_v41 = vand.u32 4294901760, %v5766_v5 }
 0x898   :  { %5583 = vmatpush1.bf16.msra.mxu1 %v9877_v50  ;;  %5715 = vmatpush1.bf16.msra.mxu0 %v9878_v9  ;;  %v13857_v50 = vand.u32 4294901760, %v12981_v36  ;;  %v12996_v9 = vsub.f32 %v5767_v37, %v12983_v56 }
 0x899   :  { %5584 = vmatprep.subr.bf16.mxu1 %v14235_v19  ;;  %5728 = vmatprep.subr.bf16.mxu0 %v14235_v19 }
 0x89c   :  { %5585 = vmatpush1.bf16.msra.mxu1 %v9879_v51  ;;  %5729 = vmatpush2.bf16.msra.mxu0 %v5698_v53  ;;  %v5765_v51 = vld [vmem:[%s13575_s7 + $0x28] sm:$0xff]  ;;  %v5914_v53 = vand.u32 4294901760, %v5913_v14 }
 0x89d   :  { %5586 = vmatprep.subr.bf16.mxu1 %v14235_v19  ;;  %5730 = vmatprep.subr.bf16.mxu0 %v14235_v19  ;;  %v13010_v43 = vand.u32 4294901760, %v5765_v51 }
 0x8a0   :  { %5587 = vmatpush1.bf16.msra.mxu1 %v9881_v42  ;;  %5731 = vmatpush2.bf16.msra.mxu0 %v9882_v15  ;;  %v5920_v42 = vsub.f32 %v12981_v36, %v13857_v50  ;;  %v13856_v15 = vand.u32 4294901760, %v12996_v9 }
 0x8a1   :  { %5600 = vmatprep.subr.bf16.mxu1 %v14235_v19  ;;  %9279 = vmatprep.subr.mxu0 %v14227_v7 }
 0x8a3   :  { %5733 = vmatmul.mubr.bf16.vlgmr.msra.gmra.mxu0 %v5615_v35  ;;  %v13014_v35 = vsub.f32 %v5766_v5, %v12999_v41 }
 0x8a4   :  { %5601 = vmatpush2.bf16.msra.mxu1 %v5570_v22  ;;  %9311 = vmatprep.mubr.msk.f32.mxu0 %vm9944_vm1, %v14227_v7  ;;  %v5764_v22 = vld [vmem:[%s13575_s7 + $0x20] sm:$0xff] }
 0x8a5   :  { %5602 = vmatprep.subr.bf16.mxu1 %v14235_v19  ;;  %v12884_v19 = vsub.f32 %v5775_v55, %v12878_v46  ;;  %v13025_v55 = vsub.f32 %v5765_v51, %v13010_v43  ;;  %v13027_v38 = vand.u32 4294901760, %v5764_v22  ;;  %v13855_v57 = vand.u32 4294901760, %v13014_v35 }
 0x8a7   :  { %v5870_v29 = vand.u32 4294901760, %v12884_v19  ;;  %v13854_v13 = vand.u32 4294901760, %v13025_v55  ;;  %v5934_v24 = vsub.f32 %v13014_v35, %v13855_v57 }
 0x8a8   :  { %5603 = vmatpush2.bf16.msra.mxu1 %v9884_v17  ;;  %v5921_v17 = vand.u32 4294901760, %v5920_v42 }
 0x8a9   :  { %9244 = vmatprep.subr.mxu1 %v14227_v7  ;;  %v5871_v61 = vsub.f32 %v12884_v19, %v5870_v29  ;;  %v5941_v1 = vsub.f32 %v13025_v55, %v13854_v13  ;;  %v5935_v54 = vand.u32 4294901760, %v5934_v24 }
 0x8ab   :  { %5605 = vmatmul.mubr.bf16.vlgmr.msra.gmra.mxu1 %v5487_v28  ;;  %v5872_v60 = vand.u32 4294901760, %v5871_v61  ;;  %v5927_v28 = vsub.f32 %v12996_v9, %v13856_v15  ;;  %v5942_v30 = vand.u32 4294901760, %v5941_v1 }
 0x8ac   :  { %9276 = vmatprep.mubr.msk.f32.mxu1 %vm9944_vm1, %v14227_v7  ;;  %9245 = vmatpush3.msra.mxu1 %v12878_v46 }
 0x8ad   :  { %9246 = vmatprep.subr.mxu1 %v14227_v7  ;;  %9280 = vmatpush3.msra.mxu0 %v5872_v60  ;;  %v5928_v61 = vand.u32 4294901760, %v5927_v28  ;;  %v13038_v60 = vsub.f32 %v5764_v22, %v13027_v38 }
 0x8ae   :  { %9247 = vmatpush3.msra.mxu1 %v12886_v12  ;;  %9281 = vmatprep.subr.mxu0 %v14227_v7 }
 0x8af   :  { %9248 = vmatprep.subr.mxu1 %v14227_v7  ;;  %9282 = vmatpush3.msra.mxu0 %v5879_v25  ;;  %v5762_v25 = vld [vmem:[%s13575_s7 + $0x10] sm:$0xff]  ;;  %v13853_v27 = vand.u32 4294901760, %v13038_v60 }
 0x8b0   :  { %9249 = vmatpush3.msra.mxu1 %v12897_v8  ;;  %9283 = vmatprep.subr.mxu0 %v14227_v7  ;;  %v13058_v20 = vand.u32 4294901760, %v5762_v25 }
 0x8b1   :  { %9250 = vmatprep.subr.mxu1 %v14227_v7  ;;  %9284 = vmatpush3.msra.mxu0 %v5886_v33  ;;  %v13056_v33 = vsub.f32 %v5763_v18, %v13040_v26  ;;  %v5948_v37 = vsub.f32 %v13038_v60, %v13853_v27 }
 0x8b2   :  { %9251 = vmatpush3.msra.mxu1 %v12911_v10  ;;  %9285 = vmatprep.subr.mxu0 %v14227_v7 }
 0x8b3   :  { %9252 = vmatprep.subr.mxu1 %v14227_v7  ;;  %9286 = vmatpush3.msra.mxu0 %v5893_v32  ;;  %v5761_v32 = vld [vmem:[%s13575_s7 + $0x8] sm:$0xff]  ;;  %v13852_v0 = vand.u32 4294901760, %v13056_v33  ;;  %v5949_v14 = vand.u32 4294901760, %v5948_v37 }
 0x8b4   :  { %9253 = vmatpush3.msra.mxu1 %v12926_v40  ;;  %9287 = vmatprep.subr.mxu0 %v14227_v7  ;;  %v13074_v5 = vand.u32 4294901760, %v5761_v32 }
 0x8b5   :  { %9254 = vmatprep.subr.mxu1 %v14227_v7  ;;  %9288 = vmatpush3.msra.mxu0 %v5900_v31  ;;  %v13071_v31 = vsub.f32 %v5762_v25, %v13058_v20  ;;  %v5955_v51 = vsub.f32 %v13056_v33, %v13852_v0 }
 0x8b6   :  { %9255 = vmatpush3.msra.mxu1 %v12936_v6  ;;  %9289 = vmatprep.subr.mxu0 %v14227_v7  ;;  %v13089_v22 = vsub.f32 %v5761_v32, %v13074_v5 }
 0x8b7   :  { %9256 = vmatprep.subr.mxu1 %v14227_v7  ;;  %9290 = vmatpush3.msra.mxu0 %v5907_v59  ;;  %v5760_v59 = vld [vmem:[%s13575_s7] sm:$0xff] }
 0x8b8   :  { %9257 = vmatpush3.msra.mxu1 %v12952_v58  ;;  %9291 = vmatprep.subr.mxu0 %v14227_v7  ;;  %v13085_v42 = vand.u32 4294901760, %v5760_v59 }
 0x8b9   :  { %9258 = vmatprep.subr.mxu1 %v14227_v7  ;;  %9292 = vmatpush3.msra.mxu0 %v5914_v53  ;;  %v13850_v53 = vand.u32 4294901760, %v13071_v31 }
 0x8ba   :  { %9259 = vmatpush3.msra.mxu1 %v12965_v49  ;;  %9293 = vmatprep.subr.mxu0 %v14227_v7  ;;  %v13097_v18 = vsub.f32 %v5760_v59, %v13085_v42 }
 0x8bb   :  { %9260 = vmatprep.subr.mxu1 %v14227_v7  ;;  %9294 = vmatpush3.msra.mxu0 %v5921_v17  ;;  %v5956_v17 = vand.u32 4294901760, %v5955_v51  ;;  %v5962_v28 = vsub.f32 %v13071_v31, %v13850_v53 }
 0x8bc   :  { %9261 = vmatpush3.msra.mxu1 %v12983_v56  ;;  %9295 = vmatprep.subr.mxu0 %v14227_v7  ;;  %v13851_v25 = vand.u32 4294901760, %v13097_v18 }
 0x8bd   :  { %9262 = vmatprep.subr.mxu1 %v14227_v7  ;;  %9296 = vmatpush3.msra.mxu0 %v5928_v61  ;;  %v13849_v61 = vand.u32 4294901760, %v13089_v22  ;;  %v5963_v24 = vand.u32 4294901760, %v5962_v28 }
 0x8be   :  { %9263 = vmatpush3.msra.mxu1 %v12999_v41  ;;  %9297 = vmatprep.subr.mxu0 %v14227_v7 }
 0x8bf   :  { %9264 = vmatprep.subr.mxu1 %v14227_v7  ;;  %9298 = vmatpush3.msra.mxu0 %v5935_v54  ;;  %v5969_v1 = vsub.f32 %v13089_v22, %v13849_v61  ;;  %v5976_v54 = vsub.f32 %v13097_v18, %v13851_v25 }
 0x8c0   :  { %9265 = vmatpush3.msra.mxu1 %v13010_v43  ;;  %9299 = vmatprep.subr.mxu0 %v14227_v7 }
 0x8c1   :  { %9266 = vmatprep.subr.mxu1 %v14227_v7  ;;  %9300 = vmatpush3.msra.mxu0 %v5942_v30  ;;  %v5970_v32 = vand.u32 4294901760, %v5969_v1  ;;  %v5977_v30 = vand.u32 4294901760, %v5976_v54 }
 0x8c2   :  { %9267 = vmatpush3.msra.mxu1 %v13027_v38  ;;  %9301 = vmatprep.subr.mxu0 %v14227_v7 }
 0x8c3   :  { %9268 = vmatprep.subr.mxu1 %v14227_v7  ;;  %9302 = vmatpush3.msra.mxu0 %v5949_v14 }
 0x8c4   :  { %9269 = vmatpush3.msra.mxu1 %v13040_v26  ;;  %9303 = vmatprep.subr.mxu0 %v14227_v7 }
 0x8c5   :  { %9270 = vmatprep.subr.mxu1 %v14227_v7  ;;  %9304 = vmatpush3.msra.mxu0 %v5956_v17 }
 0x8c6   :  { %9271 = vmatpush3.msra.mxu1 %v13058_v20  ;;  %9305 = vmatprep.subr.mxu0 %v14227_v7 }
 0x8c7   :  { %9272 = vmatprep.subr.mxu1 %v14227_v7  ;;  %9306 = vmatpush3.msra.mxu0 %v5963_v24 }
 0x8c8   :  { %9273 = vmatpush3.msra.mxu1 %v13074_v5  ;;  %9307 = vmatprep.subr.mxu0 %v14227_v7 }
 0x8c9   :  { %9274 = vmatprep.subr.mxu1 %v14227_v7  ;;  %9308 = vmatpush3.msra.mxu0 %v5970_v32 }
 0x8ca   :  { %9275 = vmatpush3.msra.mxu1 %v13085_v42  ;;  %9309 = vmatprep.subr.mxu0 %v14227_v7 }
 0x8cb   :  { %9314 = vmatprep.subr.mxu1 %v14227_v7  ;;  %9310 = vmatpush3.msra.mxu0 %v5977_v30 }
 0x8cc   :  { %9349 = vmatprep.subr.mxu0 %v14227_v7 }
 0x93b   :  { %v5480_v37 = vpop.f32.mrf.mxu0 }
 0x93d   :  { %v5482_v59 = vpop.f32.mrf.mxu0 }
 0x93f   :  { %v5483_v14 = vpop.f32.mrf.mxu0 }
 0x941   :  { %v5485_v51 = vpop.f32.mrf.mxu0 }
 0x943   :  { %v5376_v17 = vpop.f32.mrf.mxu1 }
 0x944   :  { %v5481_v27 = vadd.f32 %v5480_v37, %v5376_v17 }
 0x945   :  { %v5378_v28 = vpop.f32.mrf.mxu1 }
 0x947   :  { %v5379_v61 = vpop.f32.mrf.mxu1 }
 0x948   :  { %v5484_v57 = vadd.f32 %v5483_v14, %v5379_v61 }
 0x949   :  { %v5381_v53 = vpop.f32.mrf.mxu1 }
 0x963   :  { %v5734_v25 = vpop.f32.mrf.mxu0 }
 0x965   :  { %v5736_v24 = vpop.f32.mrf.mxu0 }
 0x967   :  { %v5737_v1 = vpop.f32.mrf.mxu0 }
 0x969   :  { %v5739_v0 = vpop.f32.mrf.mxu0 }
 0x96b   :  { %v5606_v54 = vpop.f32.mrf.mxu1 }
 0x96c   :  { %v5613_v32 = vadd.f32 %v5606_v54, %v5481_v27 }
 0x96d   :  { %v5608_v13 = vpop.f32.mrf.mxu1 }
 0x96e   :  { %v13115_v15 = vadd.f32 %v5734_v25, %v5613_v32 }
 0x96f   :  { %v5609_v30 = vpop.f32.mrf.mxu1 }
 0x970   :  { %v5614_v50 = vadd.f32 %v5609_v30, %v5484_v57  ;;  %v5750_v51 = vmul.f32 %v13115_v15, %v13115_v15 }
 0x971   :  { %v5611_v59 = vpop.f32.mrf.mxu1 }
 0x972   :  { %v13117_v3 = vadd.f32 %v5737_v1, %v5614_v50 }
 0x974   :  { %v5743_v53 = vadd.f32 %v13117_v3, %v13115_v15  ;;  %v5751_v0 = vmul.f32 %v13117_v3, %v13117_v3 }
 0x976   :  { %v5744_v37 = vrot.slane %v5743_v53, 4  ;;  %v5752_v27 = vadd.f32 %v5751_v0, %v5750_v51 }
 0x978   :  { %v5745_v13 = vadd.f32 %v5744_v37, %v5743_v53  ;;  %v5753_v61 = vrot.slane %v5752_v27, 4 }
 0x97a   :  { %v5746_v14 = vrot.slane %v5745_v13, 2  ;;  %v5754_v25 = vadd.f32 %v5753_v61, %v5752_v27 }
 0x97c   :  { %v5747_v17 = vadd.f32 %v5746_v14, %v5745_v13  ;;  %v5755_v57 = vrot.slane %v5754_v25, 2 }
 0x97e   :  { %v5748_v28 = vrot.slane %v5747_v17, 1  ;;  %v5756_v50 = vadd.f32 %v5755_v57, %v5754_v25 }
 0x980   :  { %v5757_v24 = vrot.slane %v5756_v50, 1  ;;  %v5749_v1 = vadd.f32 %v5748_v28, %v5747_v17 }
 0x982   :  { %v5758_v54 = vadd.f32 %v5757_v24, %v5756_v50 }
 0x984   :  { %v5759_v32 = vsel %vm2397_vm3, %v5749_v1, %v5758_v54 }
 0x985   :  { %v13126_v30 = vand.u32 4294901760, %v5759_v32 }
 0x987   :  { %v13129_v59 = vsub.f32 %v5759_v32, %v13126_v30  ;;  %9312 = vmatmul.mubr.f32.vlgmr.msra.gmra.mxu0 %v13126_v30 }
 0x988   :  { %9350 = vmatpush3.msra.mxu0 %v12878_v46  ;;  %9381 = vmatprep.mubr.msk.f32.mxu0 %vm9944_vm1, %v14227_v7 }
 0x989   :  { %9351 = vmatprep.subr.mxu0 %v14227_v7  ;;  %v5859_v51 = vand.u32 4294901760, %v13129_v59 }
 0x98a   :  { %9352 = vmatpush3.msra.mxu0 %v12886_v12 }
 0x98b   :  { %9353 = vmatprep.subr.mxu0 %v14227_v7  ;;  %v5860_v53 = vsub.f32 %v13129_v59, %v5859_v51 }
 0x98c   :  { %9354 = vmatpush3.msra.mxu0 %v12897_v8 }
 0x98d   :  { %9355 = vmatprep.subr.mxu0 %v14227_v7  ;;  %v5861_v0 = vand.u32 4294901760, %v5860_v53 }
 0x98e   :  { %9356 = vmatpush3.msra.mxu0 %v12911_v10 }
 0x98f   :  { %9357 = vmatprep.subr.mxu0 %v14227_v7  ;;  %9277 = vmatmul.mubr.f32.vlgmr.msra.gmra.mxu1 %v5861_v0 }
 0x990   :  { %9315 = vmatpush3.msra.mxu1 %v12884_v19  ;;  %9358 = vmatpush3.msra.mxu0 %v12926_v40  ;;  %v14342_v19 = vand.u32 4294901760, %v12981_v36 }
 0x991   :  { %9316 = vmatprep.subr.mxu1 %v14227_v7  ;;  %9359 = vmatprep.subr.mxu0 %v14227_v7 }
 0x992   :  { %9317 = vmatpush3.msra.mxu1 %v12895_v48  ;;  %9360 = vmatpush3.msra.mxu0 %v12936_v6  ;;  %v14345_v48 = vand.u32 4294901760, %v13025_v55 }
 0x993   :  { %9318 = vmatprep.subr.mxu1 %v14227_v7  ;;  %9361 = vmatprep.subr.mxu0 %v14227_v7 }
 0x994   :  { %9319 = vmatpush3.msra.mxu1 %v12909_v21  ;;  %9362 = vmatpush3.msra.mxu0 %v12952_v58  ;;  %v14348_v21 = vand.u32 4294901760, %v13071_v31 }
 0x995   :  { %9320 = vmatprep.subr.mxu1 %v14227_v7  ;;  %9363 = vmatprep.subr.mxu0 %v14227_v7 }
 0x996   :  { %9321 = vmatpush3.msra.mxu1 %v12923_v23  ;;  %9364 = vmatpush3.msra.mxu0 %v12965_v49  ;;  %v6442_v23 = vld [vmem:[%s13576_s8 + $0x8] sm:$0xff] }
 0x997   :  { %9322 = vmatprep.subr.mxu1 %v14227_v7  ;;  %9365 = vmatprep.subr.mxu0 %v14227_v7 }
 0x998   :  { %9323 = vmatpush3.msra.mxu1 %v12940_v52  ;;  %9366 = vmatpush3.msra.mxu0 %v12983_v56 }
 0x999   :  { %9324 = vmatprep.subr.mxu1 %v14227_v7  ;;  %9367 = vmatprep.subr.mxu0 %v14227_v7 }
 0x99a   :  { %9325 = vmatpush3.msra.mxu1 %v12950_v4  ;;  %9368 = vmatpush3.msra.mxu0 %v12999_v41 }
 0x99b   :  { %9326 = vmatprep.subr.mxu1 %v14227_v7  ;;  %9369 = vmatprep.subr.mxu0 %v14227_v7 }
 0x99c   :  { %9327 = vmatpush3.msra.mxu1 %v12963_v63  ;;  %9370 = vmatpush3.msra.mxu0 %v13010_v43 }
 0x99d   :  { %9328 = vmatprep.subr.mxu1 %v14227_v7  ;;  %9371 = vmatprep.subr.mxu0 %v14227_v7 }
 0x99e   :  { %9329 = vmatpush3.msra.mxu1 %v12981_v36  ;;  %9372 = vmatpush3.msra.mxu0 %v13027_v38 }
 0x99f   :  { %9330 = vmatprep.subr.mxu1 %v14227_v7  ;;  %9373 = vmatprep.subr.mxu0 %v14227_v7 }
 0x9a0   :  { %9331 = vmatpush3.msra.mxu1 %v12996_v9  ;;  %9374 = vmatpush3.msra.mxu0 %v13040_v26 }
 0x9a1   :  { %9332 = vmatprep.subr.mxu1 %v14227_v7  ;;  %9375 = vmatprep.subr.mxu0 %v14227_v7 }
 0x9a2   :  { %9333 = vmatpush3.msra.mxu1 %v13014_v35  ;;  %9376 = vmatpush3.msra.mxu0 %v13058_v20 }
 0x9a3   :  { %9334 = vmatprep.subr.mxu1 %v14227_v7  ;;  %9377 = vmatprep.subr.mxu0 %v14227_v7 }
 0x9a4   :  { %9335 = vmatpush3.msra.mxu1 %v13025_v55  ;;  %9378 = vmatpush3.msra.mxu0 %v13074_v5 }
 0x9a5   :  { %9336 = vmatprep.subr.mxu1 %v14227_v7  ;;  %9379 = vmatprep.subr.mxu0 %v14227_v7 }
 0x9a6   :  { %9337 = vmatpush3.msra.mxu1 %v13038_v60  ;;  %9380 = vmatpush3.msra.mxu0 %v13085_v42 }
 0x9a7   :  { %9338 = vmatprep.subr.mxu1 %v14227_v7  ;;  %9382 = vmatmul.mubr.f32.vlgmr.msra.gmra.mxu0 %v5859_v51 }
 0x9a8   :  { %9419 = vmatprep.subr.mxu0 %v14227_v7  ;;  %9339 = vmatpush3.msra.mxu1 %v13056_v33 }
 0x9a9   :  { %9420 = vmatpush3.msra.mxu0 %v12878_v46  ;;  %9340 = vmatprep.subr.mxu1 %v14227_v7  ;;  %v14341_v46 = vand.u32 4294901760, %v12963_v63 }
 0x9aa   :  { %9421 = vmatprep.subr.mxu0 %v14227_v7  ;;  %9341 = vmatpush3.msra.mxu1 %v13071_v31 }
 0x9ab   :  { %9422 = vmatpush3.msra.mxu0 %v12886_v12  ;;  %9342 = vmatprep.subr.mxu1 %v14227_v7  ;;  %v14343_v12 = vand.u32 4294901760, %v12996_v9 }
 0x9ac   :  { %9423 = vmatprep.subr.mxu0 %v14227_v7  ;;  %9343 = vmatpush3.msra.mxu1 %v13089_v22 }
 0x9ad   :  { %9424 = vmatpush3.msra.mxu0 %v12897_v8  ;;  %9344 = vmatprep.subr.mxu1 %v14227_v7  ;;  %v14346_v8 = vand.u32 4294901760, %v13038_v60 }
 0x9ae   :  { %9425 = vmatprep.subr.mxu0 %v14227_v7  ;;  %9345 = vmatpush3.msra.mxu1 %v13097_v18 }
 0x9af   :  { %9346 = vmatprep.mubr.msk.f32.mxu1 %vm9944_vm1, %v14227_v7  ;;  %9426 = vmatpush3.msra.mxu0 %v12911_v10  ;;  %v14349_v10 = vand.u32 4294901760, %v13089_v22 }
 0x9b0   :  { %9347 = vmatmul.mubr.f32.vlgmr.msra.gmra.mxu1 %v13129_v59  ;;  %9384 = vmatprep.subr.mxu1 %v14227_v7 }
 0x9b1   :  { %9427 = vmatprep.subr.mxu0 %v14227_v7  ;;  %9385 = vmatpush3.msra.mxu1 %v5870_v29  ;;  %v14344_v29 = vand.u32 4294901760, %v13014_v35 }
 0x9b2   :  { %9428 = vmatpush3.msra.mxu0 %v12926_v40  ;;  %9386 = vmatprep.subr.mxu1 %v14227_v7  ;;  %v6441_v40 = vld [vmem:[%s13576_s8] sm:$0xff] }
 0x9b3   :  { %9429 = vmatprep.subr.mxu0 %v14227_v7  ;;  %9387 = vmatpush3.msra.mxu1 %v5877_v16  ;;  %v14347_v16 = vand.u32 4294901760, %v13056_v33 }
 0x9b4   :  { %9430 = vmatpush3.msra.mxu0 %v12936_v6  ;;  %9388 = vmatprep.subr.mxu1 %v14227_v7 }
 0x9b5   :  { %9431 = vmatprep.subr.mxu0 %v14227_v7  ;;  %9389 = vmatpush3.msra.mxu1 %v5884_v39  ;;  %v14350_v39 = vand.u32 4294901760, %v13097_v18 }
 0x9b6   :  { %9432 = vmatpush3.msra.mxu0 %v12952_v58  ;;  %9390 = vmatprep.subr.mxu1 %v14227_v7 }
 0x9b7   :  { %9433 = vmatprep.subr.mxu0 %v14227_v7  ;;  %9391 = vmatpush3.msra.mxu1 %v5891_v2 }
 0x9b8   :  { %9434 = vmatpush3.msra.mxu0 %v12965_v49  ;;  %9392 = vmatprep.subr.mxu1 %v14227_v7 }
 0x9b9   :  { %9435 = vmatprep.subr.mxu0 %v14227_v7  ;;  %9393 = vmatpush3.msra.mxu1 %v5898_v62 }
 0x9ba   :  { %9436 = vmatpush3.msra.mxu0 %v12983_v56  ;;  %9394 = vmatprep.subr.mxu1 %v14227_v7 }
 0x9bb   :  { %9437 = vmatprep.subr.mxu0 %v14227_v7  ;;  %9395 = vmatpush3.msra.mxu1 %v5905_v11 }
 0x9bc   :  { %9438 = vmatpush3.msra.mxu0 %v12999_v41  ;;  %9396 = vmatprep.subr.mxu1 %v14227_v7 }
 0x9bd   :  { %9439 = vmatprep.subr.mxu0 %v14227_v7  ;;  %9397 = vmatpush3.msra.mxu1 %v14341_v46 }
 0x9be   :  { %9440 = vmatpush3.msra.mxu0 %v13010_v43  ;;  %9398 = vmatprep.subr.mxu1 %v14227_v7 }
 0x9bf   :  { %9441 = vmatprep.subr.mxu0 %v14227_v7  ;;  %9399 = vmatpush3.msra.mxu1 %v14342_v19 }
 0x9c0   :  { %9442 = vmatpush3.msra.mxu0 %v13027_v38  ;;  %9400 = vmatprep.subr.mxu1 %v14227_v7 }
 0x9c1   :  { %9443 = vmatprep.subr.mxu0 %v14227_v7  ;;  %9401 = vmatpush3.msra.mxu1 %v14343_v12 }
 0x9c2   :  { %9444 = vmatpush3.msra.mxu0 %v13040_v26  ;;  %9402 = vmatprep.subr.mxu1 %v14227_v7 }
 0x9c3   :  { %9445 = vmatprep.subr.mxu0 %v14227_v7  ;;  %9403 = vmatpush3.msra.mxu1 %v14344_v29 }
 0x9c4   :  { %9446 = vmatpush3.msra.mxu0 %v13058_v20  ;;  %9404 = vmatprep.subr.mxu1 %v14227_v7 }
 0x9c5   :  { %9447 = vmatprep.subr.mxu0 %v14227_v7  ;;  %9405 = vmatpush3.msra.mxu1 %v14345_v48 }
 0x9c6   :  { %9448 = vmatpush3.msra.mxu0 %v13074_v5  ;;  %9406 = vmatprep.subr.mxu1 %v14227_v7 }
 0x9c7   :  { %9449 = vmatprep.subr.mxu0 %v14227_v7  ;;  %9407 = vmatpush3.msra.mxu1 %v14346_v8 }
 0x9c8   :  { %9450 = vmatpush3.msra.mxu0 %v13085_v42  ;;  %9451 = vmatprep.mubr.msk.f32.mxu0 %vm9944_vm1, %v14227_v7 }
 0x9c9   :  { %9408 = vmatprep.subr.mxu1 %v14227_v7  ;;  %9452 = vmatmul.mubr.f32.vlgmr.msra.gmra.mxu0 %v13126_v30 }
 0x9ca   :  { %9409 = vmatpush3.msra.mxu1 %v14347_v16  ;;  %9416 = vmatprep.mubr.msk.f32.mxu1 %vm9944_vm1, %v14227_v7 }
 0x9cb   :  { %9410 = vmatprep.subr.mxu1 %v14227_v7 }
 0x9cc   :  { %9411 = vmatpush3.msra.mxu1 %v14348_v21 }
 0x9cd   :  { %9412 = vmatprep.subr.mxu1 %v14227_v7 }
 0x9ce   :  { %9413 = vmatpush3.msra.mxu1 %v14349_v10 }
 0x9cf   :  { %9414 = vmatprep.subr.mxu1 %v14227_v7 }
 0x9d0   :  { %9415 = vmatpush3.msra.mxu1 %v14350_v39 }
 0x9d1   :  { %9417 = vmatmul.mubr.f32.vlgmr.msra.gmra.mxu1 %v13126_v30  ;;  %9454 = vmatprep.subr.mxu1 %v14227_v7 }
 0x9d2   :  { %9458 = vmatprep.mubr.msk.f32.mxu1 %vm9944_vm1, %v14227_v7  ;;  %9455 = vmatpush3.msra.mxu1 %v6442_v23 }
 0x9d3   :  { %9456 = vmatprep.subr.mxu1 %v14227_v7 }
 0x9d4   :  { %9457 = vmatpush3.msra.mxu1 %v6441_v40 }
 0xa47   :  { %v6014_v2 = vpop.f32.mrf.mxu0 }
 0xa49   :  { %v9313_v6 = vpop.f32.mrf.mxu0 }
 0xa4f   :  { %v5863_v52 = vpop.f32.mrf.mxu1 }
 0xa50   :  { %v6015_v36 = vadd.f32 %v6014_v2, %v5863_v52 }
 0xa51   :  { %v9278_v4 = vpop.f32.mrf.mxu1 }
 0xa67   :  { %v6207_v58 = vpop.f32.mrf.mxu0 }
 0xa69   :  { %v9383_v62 = vpop.f32.mrf.mxu0 }
 0xa70   :  { %v6118_v11 = vpop.f32.mrf.mxu1 }
 0xa71   :  { %v6119_v9 = vadd.f32 %v6118_v11, %v6015_v36 }
 0xa72   :  { %v9348_v63 = vpop.f32.mrf.mxu1 }
 0xa73   :  { %v6208_v41 = vadd.f32 %v6207_v58, %v6119_v9 }
 0xa89   :  { %v6413_v49 = vpop.f32.mrf.mxu0 }
 0xa8b   :  { %v9453_v56 = vpop.f32.mrf.mxu0 }
 0xa91   :  { %v6326_v43 = vpop.f32.mrf.mxu1 }
 0xa92   :  { %v6327_v35 = vadd.f32 %v6326_v43, %v6208_v41 }
 0xa93   :  { %v9418_v55 = vpop.f32.mrf.mxu1 }
 0xa94   :  { %v6414_v38 = vadd.f32 %v6413_v49, %v6327_v35 }
 0xa96   :  { %v6417_v60 = vmul.f32 0.0078125, %v6414_v38 }
 0xa98   :  { %v6418_v26 = vmul.f32 %v6417_v60, %v6417_v60 }
 0xa9a   :  { %v6420_v33 = vrot.slane %v6418_v26, 7 }
 0xa9c   :  { %v6422_v20 = vsub.f32 %v6417_v60, %v6420_v33 }
 0xa9e   :  { %v6423_v31 = vadd.f32 1e-05, %v6422_v20 }
 0xaa0   :  { %9885 = vrsqrt.f32 %v6423_v31 }
 0xaad   :  { %v9886_v5 = vpop.eup %9885 }
 0xaae   :  { %v6426_v42 = vrot.slane %v9886_v5, 7 }
 0xab0   :  { %v6428_v22 = vmul.f32 %v6426_v42, %v12408_v45 }
 0xab2   :  { %v6430_v18 = vrot.slane %v6428_v22, 2 }
 0xab4   :  { %v6432_v37 = vmul.f32 %v6430_v18, %v6417_v60 }
 0xab6   :  { %v6434_v27 = vrot.slane %v6432_v37, 5 }
 0xab8   :  { %v6436_v13 = vsub.f32 %v12408_v45, %v6434_v27 }
 0xaba   :  { %v6438_v61 = vrot.slane %v6436_v13, 2 }
 0xabc   :  { %v6440_v14 = vsel %vm2397_vm3, %v6430_v18, %v6438_v61 }
 0xabd   :  { %9459 = vmatmul.mubr.msk.f32.vlgmr.msra.gmra.mxu1 %vm6443_vm9, %v6440_v14 }
 0xb7d   :  { %v6513_v25 = vpop.f32.mrf.mxu1 }
 0xb7e   :  { %v6520_v17 = vrot.slane %v6513_v25, %v12421_v34  ;;  %v6526_v24 = vrot.slane %v6513_v25, %v12424_v47 }
 0xb7f   :  { %v9460_v57 = vpop.f32.mrf.mxu1 }
 0xb80   :  { %v6521_v28 = vmul.f32 %v6520_v17, %v13115_v15  ;;  %v6522_v50 = vmul.f32 %v6520_v17, %v13117_v3 }
 0xb82   :  { %v6527_v1 = vadd.f32 %v6526_v24, %v6521_v28  ;;  %v6528_v54 = vadd.f32 %v6526_v24, %v6522_v50 }
 0xb84   :  { %v6529_v32 = vmax.f32 %v6527_v1, 0.0  ;;  %v6530_v30 = vmax.f32 %v6528_v54, 0.0 }
 0xb85   :  { %9938 = dma.done.wait [#allocation6 + $0x2], 4096 }
 0xb86   :  { %9939 = vsyncadd [#allocation6 + $0x2], 4294963200  ;;  %v6539_v59 = vpack.c.bf16 %v6530_v30, %v6529_v32  ;;  %9467 = vmatprep.subr.bf16.mxu0 %v14227_v7  ;;  %9483 = vmatprep.mubr.msk.bf16.mxu0 %vm9944_vm1, %v14227_v7  ;;  %v9887_v3 = vld [vmem:[%s13577_s9] sm:$0xff]   ;;  %v9888_v15 = vld [vmem:[%s13577_s9 + $0x8] sm:$0xff]   ;;  %vm7030_vm10 = vcmask 392192  }
 0xb87   :  { %9463 = vmatprep.mubr.msk.bf16.mxu1 %vm6443_vm9, %v9887_v3  ;;  %v9889_v51 = vld [vmem:[#allocation4 + $0x38] sm:$0xff]   ;;  %v9891_v0 = vld [vmem:[#allocation4 + $0x30] sm:$0xff]   ;;  %v9893_v19 = vld [vmem:[#allocation4 + $0x28] sm:$0xff]  }
 0xb88   :  { %9461 = vmatprep.subr.bf16.mxu1 %v6539_v59  ;;  %v9890_v53 = vld [vmem:[#allocation4 + $0x78] sm:$0xff]   ;;  %v9892_v46 = vld [vmem:[#allocation4 + $0x70] sm:$0xff]   ;;  %v9894_v12 = vld [vmem:[#allocation4 + $0x68] sm:$0xff]  }
 0xb89   :  { %9462 = vmatpush3.bf16.msra.mxu1 %v6539_v59  ;;  %9468 = vmatpush3.bf16.msra.mxu0 %v9890_v53  ;;  %v9895_v29 = vld [vmem:[#allocation4 + $0x20] sm:$0xff]   ;;  %v9897_v8 = vld [vmem:[#allocation4 + $0x18] sm:$0xff]   ;;  %v9899_v21 = vld [vmem:[#allocation4 + $0x10] sm:$0xff]  }
 0xb8a   :  { %9487 = vmatprep.subr.bf16.mxu1 %v14227_v7  ;;  %9469 = vmatprep.subr.bf16.mxu0 %v14227_v7  ;;  %v9896_v48 = vld [vmem:[#allocation4 + $0x60] sm:$0xff]   ;;  %v9898_v16 = vld [vmem:[#allocation4 + $0x58] sm:$0xff]   ;;  %v9900_v10 = vld [vmem:[#allocation4 + $0x50] sm:$0xff]  }
 0xb8b   :  { %v9901_v39 = vld [vmem:[#allocation4 + $0x8] sm:$0xff]   ;;  %v9903_v40 = vld [vmem:[#allocation4] sm:$0xff]   ;;  %v9905_v4 = vld [vmem:[#allocation4 + $0xf8] sm:$0xff]  }
 0xb8c   :  { %9464 = vmatmul.mubr.msk.bf16.vlgmr.msra.gmra.mxu1 %vm6443_vm9, %v9888_v15  ;;  %v9902_v23 = vld [vmem:[#allocation4 + $0x48] sm:$0xff]   ;;  %v9904_v2 = vld [vmem:[#allocation4 + $0x40] sm:$0xff]   ;;  %v9906_v63 = vld [vmem:[#allocation4 + $0xb8] sm:$0xff]  }
 0xb8d   :  { %9488 = vmatpush3.bf16.msra.mxu1 %v9889_v51  ;;  %9503 = vmatprep.mubr.msk.bf16.mxu1 %vm9944_vm1, %v14227_v7  ;;  %v9907_v49 = vld [vmem:[#allocation4 + $0xf0] sm:$0xff]   ;;  %v9909_v9 = vld [vmem:[#allocation4 + $0xe8] sm:$0xff]   ;;  %v9911_v43 = vld [vmem:[#allocation4 + $0xe0] sm:$0xff]  }
 0xb8e   :  { %9489 = vmatprep.subr.bf16.mxu1 %v14227_v7  ;;  %9470 = vmatpush3.bf16.msra.mxu0 %v9892_v46  ;;  %v9908_v56 = vld [vmem:[#allocation4 + $0xb0] sm:$0xff]   ;;  %v9910_v41 = vld [vmem:[#allocation4 + $0xa8] sm:$0xff]   ;;  %v9912_v35 = vld [vmem:[#allocation4 + $0xa0] sm:$0xff]  }
 0xb8f   :  { %9471 = vmatprep.subr.bf16.mxu0 %v14227_v7  ;;  %v9913_v55 = vld [vmem:[#allocation4 + $0xd8] sm:$0xff]   ;;  %v9915_v60 = vld [vmem:[#allocation4 + $0xd0] sm:$0xff]   ;;  %v9917_v33 = vld [vmem:[#allocation4 + $0xc8] sm:$0xff]  }
 0xb90   :  { %v9914_v38 = vld [vmem:[#allocation4 + $0x98] sm:$0xff]   ;;  %v9916_v26 = vld [vmem:[#allocation4 + $0x90] sm:$0xff]   ;;  %v9918_v20 = vld [vmem:[#allocation4 + $0x88] sm:$0xff]  }
 0xb91   :  { %9490 = vmatpush3.bf16.msra.mxu1 %v9891_v0  ;;  %v9919_v31 = vld [vmem:[#allocation4 + $0xc0] sm:$0xff]   ;;  %v7052_v18 = vld [vmem:[%s13578_s10 + $0x28] sm:$0xff]  ;;  %v7051_v27 = vld [vmem:[%s13578_s10 + $0x20] sm:$0xff] }
 0xb92   :  { %9491 = vmatprep.subr.bf16.mxu1 %v14227_v7  ;;  %9472 = vmatpush3.bf16.msra.mxu0 %v9894_v12  ;;  %v9920_v5 = vld [vmem:[#allocation4 + $0x80] sm:$0xff]   ;;  %v13362_v37 = vand.u32 4294901760, %v7052_v18  ;;  %v13370_v61 = vand.u32 4294901760, %v7051_v27  ;;  %v7050_v14 = vld [vmem:[%s13578_s10 + $0x18] sm:$0xff]  ;;  %v7048_v32 = vld [vmem:[%s13578_s10 + $0x8] sm:$0xff] }
 0xb93   :  { %9473 = vmatprep.subr.bf16.mxu0 %v14227_v7  ;;  %v13381_v57 = vand.u32 4294901760, %v7050_v14  ;;  %v7049_v28 = vld [vmem:[%s13578_s10 + $0x10] sm:$0xff]  ;;  %v13410_v51 = vand.u32 4294901760, %v7048_v32  ;;  %v7047_v53 = vld [vmem:[%s13578_s10] sm:$0xff] }
 0xb94   :  { %v13368_v13 = vsub.f32 %v7052_v18, %v13362_v37  ;;  %v13379_v17 = vsub.f32 %v7051_v27, %v13370_v61  ;;  %v13395_v54 = vand.u32 4294901760, %v7049_v28  ;;  %v13420_v12 = vand.u32 4294901760, %v7047_v53 }
 0xb95   :  { %9492 = vmatpush3.bf16.msra.mxu1 %v9893_v19  ;;  %v13393_v1 = vsub.f32 %v7050_v14, %v13381_v57 }
 0xb96   :  { %9493 = vmatprep.subr.bf16.mxu1 %v14227_v7  ;;  %9474 = vmatpush3.bf16.msra.mxu0 %v9896_v48  ;;  %v7160_v25 = vand.u32 4294901760, %v13368_v13  ;;  %v7167_v24 = vand.u32 4294901760, %v13379_v17  ;;  %v13407_v15 = vsub.f32 %v7049_v28, %v13395_v54 }
 0xb97   :  { %9475 = vmatprep.subr.bf16.mxu0 %v14227_v7  ;;  %v7174_v3 = vand.u32 4294901760, %v13393_v1 }
 0xb98   :  { %v7161_v50 = vsub.f32 %v13368_v13, %v7160_v25  ;;  %v7168_v59 = vsub.f32 %v13379_v17, %v7167_v24  ;;  %v7181_v19 = vand.u32 4294901760, %v13407_v15 }
 0xb99   :  { %9494 = vmatpush3.bf16.msra.mxu1 %v9895_v29  ;;  %v7175_v46 = vsub.f32 %v13393_v1, %v7174_v3  ;;  %v13424_v29 = vsub.f32 %v7048_v32, %v13410_v51 }
 0xb9a   :  { %9495 = vmatprep.subr.bf16.mxu1 %v14227_v7  ;;  %9476 = vmatpush3.bf16.msra.mxu0 %v9898_v16  ;;  %v7162_v30 = vand.u32 4294901760, %v7161_v50  ;;  %v7169_v0 = vand.u32 4294901760, %v7168_v59  ;;  %v13431_v16 = vsub.f32 %v7047_v53, %v13420_v12 }
 0xb9b   :  { %9477 = vmatprep.subr.bf16.mxu0 %v14227_v7  ;;  %v7176_v48 = vand.u32 4294901760, %v7175_v46 }
 0xb9d   :  { %9496 = vmatpush3.bf16.msra.mxu1 %v9897_v8  ;;  %v7182_v8 = vsub.f32 %v13407_v15, %v7181_v19 }
 0xb9e   :  { %9497 = vmatprep.subr.bf16.mxu1 %v14227_v7  ;;  %9478 = vmatpush3.bf16.msra.mxu0 %v9900_v10 }
 0xb9f   :  { %9479 = vmatprep.subr.bf16.mxu0 %v14227_v7  ;;  %v7183_v10 = vand.u32 4294901760, %v7182_v8 }
 0xba1   :  { %9498 = vmatpush3.bf16.msra.mxu1 %v9899_v21  ;;  %v7188_v21 = vand.u32 4294901760, %v13424_v29 }
 0xba2   :  { %9499 = vmatprep.subr.bf16.mxu1 %v14227_v7  ;;  %9480 = vmatpush3.bf16.msra.mxu0 %v9902_v23 }
 0xba3   :  { %9481 = vmatprep.subr.bf16.mxu0 %v14227_v7  ;;  %v7189_v23 = vsub.f32 %v13424_v29, %v7188_v21 }
 0xba5   :  { %9500 = vmatpush3.bf16.msra.mxu1 %v9901_v39  ;;  %v7195_v39 = vand.u32 4294901760, %v13431_v16 }
 0xba6   :  { %9501 = vmatprep.subr.bf16.mxu1 %v14227_v7  ;;  %9482 = vmatpush3.bf16.msra.mxu0 %v9904_v2  ;;  %v7190_v2 = vand.u32 4294901760, %v7189_v23 }
 0xba7   :  { %9507 = vmatprep.subr.bf16.mxu0 %v14227_v7 }
 0xba9   :  { %9502 = vmatpush3.bf16.msra.mxu1 %v9903_v40  ;;  %v7196_v40 = vsub.f32 %v13431_v16, %v7195_v39 }
 0xbaa   :  { %9527 = vmatprep.subr.bf16.mxu1 %v14227_v7 }
 0xc4c   :  { %v9465_v6 = vpop.f32.mrf.mxu1 }
 0xc4d   :  { %v6816_v22 = vpack.c.bf16 %v9465_v6, %v9465_v6  ;;  %v7197_v6 = vand.u32 4294901760, %v7196_v40 }
 0xc4e   :  { %v6590_v52 = vpop.f32.mrf.mxu1 }
 0xc4f   :  { %v6605_v58 = vpack.c.bf16 %v6590_v52, %v6590_v52 }
 0xc50   :  { %v9466_v62 = vpop.f32.mrf.mxu1 }
 0xc51   :  { %9504 = vmatmul.mubr.bf16.vlgmr.msra.gmra.mxu1 %v6605_v58  ;;  %v6923_v42 = vpack.c.bf16 %v9466_v62, %v9466_v62 }
 0xc52   :  { %9528 = vmatpush3.bf16.msra.mxu1 %v9905_v4  ;;  %v6593_v11 = vpop.f32.mrf.mxu1  ;;  %9543 = vmatprep.mubr.msk.bf16.mxu1 %vm9944_vm1, %v14227_v7 }
 0xc53   :  { %v6622_v36 = vpack.c.bf16 %v6593_v11, %v6593_v11  ;;  %9529 = vmatprep.subr.bf16.mxu1 %v14227_v7 }
 0xc55   :  { %9484 = vmatmul.mubr.bf16.vlgmr.msra.gmra.mxu0 %v6622_v36 }
 0xc56   :  { %9508 = vmatpush3.bf16.msra.mxu0 %v9906_v63  ;;  %9530 = vmatpush3.bf16.msra.mxu1 %v9907_v49 }
 0xc57   :  { %9509 = vmatprep.subr.bf16.mxu0 %v14227_v7  ;;  %9531 = vmatprep.subr.bf16.mxu1 %v14227_v7 }
 0xc58   :  { %9523 = vmatprep.mubr.msk.bf16.mxu0 %vm9944_vm1, %v14227_v7 }
 0xc5a   :  { %9510 = vmatpush3.bf16.msra.mxu0 %v9908_v56  ;;  %9532 = vmatpush3.bf16.msra.mxu1 %v9909_v9 }
 0xc5b   :  { %9511 = vmatprep.subr.bf16.mxu0 %v14227_v7  ;;  %9533 = vmatprep.subr.bf16.mxu1 %v14227_v7 }
 0xc5e   :  { %9512 = vmatpush3.bf16.msra.mxu0 %v9910_v41  ;;  %9534 = vmatpush3.bf16.msra.mxu1 %v9911_v43 }
 0xc5f   :  { %9513 = vmatprep.subr.bf16.mxu0 %v14227_v7  ;;  %9535 = vmatprep.subr.bf16.mxu1 %v14227_v7 }
 0xc62   :  { %9514 = vmatpush3.bf16.msra.mxu0 %v9912_v35  ;;  %9536 = vmatpush3.bf16.msra.mxu1 %v9913_v55 }
 0xc63   :  { %9515 = vmatprep.subr.bf16.mxu0 %v14227_v7  ;;  %9537 = vmatprep.subr.bf16.mxu1 %v14227_v7 }
 0xc66   :  { %9516 = vmatpush3.bf16.msra.mxu0 %v9914_v38  ;;  %9538 = vmatpush3.bf16.msra.mxu1 %v9915_v60 }
 0xc67   :  { %9517 = vmatprep.subr.bf16.mxu0 %v14227_v7  ;;  %9539 = vmatprep.subr.bf16.mxu1 %v14227_v7 }
 0xc6a   :  { %9518 = vmatpush3.bf16.msra.mxu0 %v9916_v26  ;;  %9540 = vmatpush3.bf16.msra.mxu1 %v9917_v33 }
 0xc6b   :  { %9519 = vmatprep.subr.bf16.mxu0 %v14227_v7  ;;  %9541 = vmatprep.subr.bf16.mxu1 %v14227_v7 }
 0xc6e   :  { %9520 = vmatpush3.bf16.msra.mxu0 %v9918_v20  ;;  %9542 = vmatpush3.bf16.msra.mxu1 %v9919_v31 }
 0xc6f   :  { %9521 = vmatprep.subr.bf16.mxu0 %v14227_v7  ;;  %9562 = vmatprep.subr.mxu1 %v14227_v7 }
 0xc71   :  { %9544 = vmatmul.mubr.bf16.vlgmr.msra.gmra.mxu1 %v6923_v42 }
 0xc72   :  { %9522 = vmatpush3.bf16.msra.mxu0 %v9920_v5  ;;  %9574 = vmatprep.mubr.msk.f32.mxu1 %vm9944_vm1, %v14227_v7 }
 0xc73   :  { %9547 = vmatprep.subr.mxu0 %v14227_v7  ;;  %9563 = vmatpush3.msra.mxu1 %v7162_v30 }
 0xc74   :  { %9564 = vmatprep.subr.mxu1 %v14227_v7 }
 0xc75   :  { %9524 = vmatmul.mubr.bf16.vlgmr.msra.gmra.mxu0 %v6816_v22  ;;  %9565 = vmatpush3.msra.mxu1 %v7169_v0 }
 0xc76   :  { %9559 = vmatprep.mubr.msk.f32.mxu0 %vm9944_vm1, %v14227_v7  ;;  %9548 = vmatpush3.msra.mxu0 %v13362_v37 }
 0xc77   :  { %9549 = vmatprep.subr.mxu0 %v14227_v7  ;;  %9566 = vmatprep.subr.mxu1 %v14227_v7 }
 0xc78   :  { %9550 = vmatpush3.msra.mxu0 %v13370_v61  ;;  %9567 = vmatpush3.msra.mxu1 %v7176_v48 }
 0xc79   :  { %9551 = vmatprep.subr.mxu0 %v14227_v7  ;;  %9568 = vmatprep.subr.mxu1 %v14227_v7 }
 0xc7a   :  { %9552 = vmatpush3.msra.mxu0 %v13381_v57  ;;  %9569 = vmatpush3.msra.mxu1 %v7183_v10 }
 0xc7b   :  { %9553 = vmatprep.subr.mxu0 %v14227_v7  ;;  %9570 = vmatprep.subr.mxu1 %v14227_v7 }
 0xc7c   :  { %9554 = vmatpush3.msra.mxu0 %v13395_v54  ;;  %9571 = vmatpush3.msra.mxu1 %v7190_v2 }
 0xc7d   :  { %9555 = vmatprep.subr.mxu0 %v14227_v7  ;;  %9572 = vmatprep.subr.mxu1 %v14227_v7 }
 0xc7e   :  { %9556 = vmatpush3.msra.mxu0 %v13410_v51  ;;  %9573 = vmatpush3.msra.mxu1 %v7197_v6 }
 0xc7f   :  { %9557 = vmatprep.subr.mxu0 %v14227_v7  ;;  %9592 = vmatprep.subr.mxu1 %v14227_v7 }
 0xc80   :  { %9558 = vmatpush3.msra.mxu0 %v13420_v12 }
 0xc81   :  { %9577 = vmatprep.subr.mxu0 %v14227_v7 }
 0xd11   :  { %v6810_v52 = vpop.f32.mrf.mxu1 }
 0xd13   :  { %v9505_v4 = vpop.f32.mrf.mxu1 }
 0xd15   :  { %v6722_v58 = vpop.f32.mrf.mxu0  ;;  %v6813_v62 = vpop.f32.mrf.mxu1 }
 0xd16   :  { %v6811_v41 = vadd.f32 %v6810_v52, %v6722_v58 }
 0xd17   :  { %v9485_v11 = vpop.f32.mrf.mxu0  ;;  %v9506_v63 = vpop.f32.mrf.mxu1 }
 0xd19   :  { %v6725_v49 = vpop.f32.mrf.mxu0 }
 0xd1b   :  { %v9486_v36 = vpop.f32.mrf.mxu0 }
 0xd31   :  { %v7023_v56 = vpop.f32.mrf.mxu1 }
 0xd33   :  { %v9545_v9 = vpop.f32.mrf.mxu1 }
 0xd35   :  { %v6916_v43 = vpop.f32.mrf.mxu0  ;;  %v7026_v35 = vpop.f32.mrf.mxu1 }
 0xd36   :  { %v6922_v55 = vadd.f32 %v6916_v43, %v6811_v41 }
 0xd37   :  { %v9525_v38 = vpop.f32.mrf.mxu0  ;;  %v9546_v60 = vpop.f32.mrf.mxu1 }
 0xd38   :  { %v13449_v26 = vadd.f32 %v7023_v56, %v6922_v55 }
 0xd39   :  { %v6919_v33 = vpop.f32.mrf.mxu0 }
 0xd3a   :  { %v7031_v20 = vsel %vm7030_vm10, %v13449_v26, 0.0  ;;  %v7038_v31 = vmul.f32 %v13449_v26, %v13449_v26 }
 0xd3b   :  { %v7032_v5 = vrot.slane %v7031_v20, 4  ;;  %v9526_v42 = vpop.f32.mrf.mxu0 }
 0xd3c   :  { %v7039_v22 = vsel %vm7030_vm10, %v7038_v31, 0.0 }
 0xd3d   :  { %v7033_v18 = vadd.f32 %v7032_v5, %v7031_v20  ;;  %v7040_v27 = vrot.slane %v7039_v22, 4 }
 0xd3f   :  { %v7034_v14 = vrot.slane %v7033_v18, 2  ;;  %v7041_v28 = vadd.f32 %v7040_v27, %v7039_v22 }
 0xd41   :  { %v7035_v50 = vadd.f32 %v7034_v14, %v7033_v18  ;;  %v7042_v32 = vrot.slane %v7041_v28, 2 }
 0xd43   :  { %v7036_v30 = vrot.slane %v7035_v50, 1  ;;  %v7043_v59 = vadd.f32 %v7042_v32, %v7041_v28 }
 0xd45   :  { %v7044_v53 = vrot.slane %v7043_v59, 1  ;;  %v7037_v0 = vadd.f32 %v7036_v30, %v7035_v50 }
 0xd47   :  { %v7045_v46 = vadd.f32 %v7044_v53, %v7043_v59 }
 0xd49   :  { %v7046_v48 = vsel %vm2397_vm3, %v7037_v0, %v7045_v46 }
 0xd4a   :  { %v7054_v8 = vsel %vm7030_vm10, %v7046_v48, 0 }
 0xd4b   :  { %v7127_v10 = vand.u32 4294901760, %v7054_v8 }
 0xd4d   :  { %v7128_v23 = vsub.f32 %v7054_v8, %v7127_v10  ;;  %9575 = vmatmul.mubr.f32.vlgmr.msra.gmra.mxu1 %v7127_v10 }
 0xd4e   :  { %9593 = vmatpush3.msra.mxu1 %v13362_v37  ;;  %9604 = vmatprep.mubr.msk.f32.mxu1 %vm9944_vm1, %v14227_v7 }
 0xd4f   :  { %9594 = vmatprep.subr.mxu1 %v14227_v7  ;;  %v7129_v40 = vand.u32 4294901760, %v7128_v23 }
 0xd50   :  { %9595 = vmatpush3.msra.mxu1 %v13370_v61 }
 0xd51   :  { %9596 = vmatprep.subr.mxu1 %v14227_v7  ;;  %v7130_v2 = vsub.f32 %v7128_v23, %v7129_v40 }
 0xd52   :  { %9597 = vmatpush3.msra.mxu1 %v13381_v57 }
 0xd53   :  { %9598 = vmatprep.subr.mxu1 %v14227_v7  ;;  %v7131_v6 = vand.u32 4294901760, %v7130_v2 }
 0xd54   :  { %9599 = vmatpush3.msra.mxu1 %v13395_v54 }
 0xd55   :  { %9600 = vmatprep.subr.mxu1 %v14227_v7  ;;  %9560 = vmatmul.mubr.f32.vlgmr.msra.gmra.mxu0 %v7131_v6 }
 0xd56   :  { %9578 = vmatpush3.msra.mxu0 %v13368_v13  ;;  %9601 = vmatpush3.msra.mxu1 %v13410_v51  ;;  %v7591_v13 = vld [vmem:[%s13579_s11] sm:$0xff] }
 0xd57   :  { %9579 = vmatprep.subr.mxu0 %v14227_v7  ;;  %9602 = vmatprep.subr.mxu1 %v14227_v7 }
 0xd58   :  { %9580 = vmatpush3.msra.mxu0 %v13379_v17  ;;  %9603 = vmatpush3.msra.mxu1 %v13420_v12 }
 0xd59   :  { %9581 = vmatprep.subr.mxu0 %v14227_v7  ;;  %9605 = vmatmul.mubr.f32.vlgmr.msra.gmra.mxu1 %v7129_v40 }
 0xd5a   :  { %9622 = vmatprep.subr.mxu1 %v14227_v7  ;;  %9582 = vmatpush3.msra.mxu0 %v13393_v1 }
 0xd5b   :  { %9623 = vmatpush3.msra.mxu1 %v13362_v37  ;;  %9583 = vmatprep.subr.mxu0 %v14227_v7  ;;  %v7592_v37 = vld [vmem:[%s13579_s11 + $0x8] sm:$0xff] }
 0xd5c   :  { %9624 = vmatprep.subr.mxu1 %v14227_v7  ;;  %9584 = vmatpush3.msra.mxu0 %v13407_v15 }
 0xd5d   :  { %9625 = vmatpush3.msra.mxu1 %v13370_v61  ;;  %9585 = vmatprep.subr.mxu0 %v14227_v7 }
 0xd5e   :  { %9626 = vmatprep.subr.mxu1 %v14227_v7  ;;  %9586 = vmatpush3.msra.mxu0 %v13424_v29 }
 0xd5f   :  { %9627 = vmatpush3.msra.mxu1 %v13381_v57  ;;  %9587 = vmatprep.subr.mxu0 %v14227_v7 }
 0xd60   :  { %9628 = vmatprep.subr.mxu1 %v14227_v7  ;;  %9588 = vmatpush3.msra.mxu0 %v13431_v16 }
 0xd61   :  { %9589 = vmatprep.mubr.msk.f32.mxu0 %vm9944_vm1, %v14227_v7  ;;  %9629 = vmatpush3.msra.mxu1 %v13395_v54 }
 0xd62   :  { %9590 = vmatmul.mubr.f32.vlgmr.msra.gmra.mxu0 %v7128_v23  ;;  %9607 = vmatprep.subr.mxu0 %v14227_v7 }
 0xd63   :  { %9630 = vmatprep.subr.mxu1 %v14227_v7  ;;  %9608 = vmatpush3.msra.mxu0 %v7160_v25 }
 0xd64   :  { %9631 = vmatpush3.msra.mxu1 %v13410_v51  ;;  %9609 = vmatprep.subr.mxu0 %v14227_v7 }
 0xd65   :  { %9632 = vmatprep.subr.mxu1 %v14227_v7  ;;  %9610 = vmatpush3.msra.mxu0 %v7167_v24 }
 0xd66   :  { %9633 = vmatpush3.msra.mxu1 %v13420_v12  ;;  %9634 = vmatprep.mubr.msk.f32.mxu1 %vm9944_vm1, %v14227_v7 }
 0xd67   :  { %9611 = vmatprep.subr.mxu0 %v14227_v7  ;;  %9635 = vmatmul.mubr.f32.vlgmr.msra.gmra.mxu1 %v7127_v10 }
 0xd68   :  { %9612 = vmatpush3.msra.mxu0 %v7174_v3  ;;  %9619 = vmatprep.mubr.msk.f32.mxu0 %vm9944_vm1, %v14227_v7 }
 0xd69   :  { %9613 = vmatprep.subr.mxu0 %v14227_v7 }
 0xd6a   :  { %9614 = vmatpush3.msra.mxu0 %v7181_v19 }
 0xd6b   :  { %9615 = vmatprep.subr.mxu0 %v14227_v7 }
 0xd6c   :  { %9616 = vmatpush3.msra.mxu0 %v7188_v21 }
 0xd6d   :  { %9617 = vmatprep.subr.mxu0 %v14227_v7 }
 0xd6e   :  { %9618 = vmatpush3.msra.mxu0 %v7195_v39 }
 0xd6f   :  { %9620 = vmatmul.mubr.f32.vlgmr.msra.gmra.mxu0 %v7127_v10  ;;  %9637 = vmatprep.subr.mxu0 %v14227_v7 }
 0xd70   :  { %9641 = vmatprep.mubr.msk.f32.mxu0 %vm9944_vm1, %v14227_v7  ;;  %9638 = vmatpush3.msra.mxu0 %v7592_v37 }
 0xd71   :  { %9639 = vmatprep.subr.mxu0 %v14227_v7 }
 0xd72   :  { %9640 = vmatpush3.msra.mxu0 %v7591_v13 }
 0xe0d   :  { %v7234_v61 = vpop.f32.mrf.mxu1 }
 0xe0f   :  { %v9576_v25 = vpop.f32.mrf.mxu1 }
 0xe15   :  { %v7133_v17 = vpop.f32.mrf.mxu0 }
 0xe16   :  { %v7235_v51 = vadd.f32 %v7234_v61, %v7133_v17 }
 0xe17   :  { %v9561_v57 = vpop.f32.mrf.mxu0 }
 0xe19   :  { %v7397_v24 = vpop.f32.mrf.mxu1 }
 0xe1b   :  { %v9606_v1 = vpop.f32.mrf.mxu1 }
 0xe22   :  { %v7318_v54 = vpop.f32.mrf.mxu0 }
 0xe23   :  { %v7319_v12 = vadd.f32 %v7318_v54, %v7235_v51 }
 0xe24   :  { %v9591_v3 = vpop.f32.mrf.mxu0 }
 0xe25   :  { %v7398_v29 = vadd.f32 %v7397_v24, %v7319_v12 }
 0xe27   :  { %v7563_v15 = vpop.f32.mrf.mxu1 }
 0xe29   :  { %v9636_v19 = vpop.f32.mrf.mxu1 }
 0xe2f   :  { %v7486_v16 = vpop.f32.mrf.mxu0 }
 0xe30   :  { %v7487_v21 = vadd.f32 %v7486_v16, %v7398_v29 }
 0xe31   :  { %v9621_v39 = vpop.f32.mrf.mxu0 }
 0xe32   :  { %v7564_v52 = vadd.f32 %v7563_v15, %v7487_v21 }
 0xe34   :  { %v7567_v4 = vmul.f32 0.055555556, %v7564_v52 }
 0xe36   :  { %v7568_v58 = vmul.f32 %v7567_v4, %v7567_v4 }
 0xe38   :  { %v7570_v62 = vrot.slane %v7568_v58, 7 }
 0xe3a   :  { %v7572_v11 = vsub.f32 %v7567_v4, %v7570_v62 }
 0xe3c   :  { %v7573_v63 = vadd.f32 1e-05, %v7572_v11 }
 0xe3e   :  { %9921 = vrsqrt.f32 %v7573_v63 }
 0xe4b   :  { %v9922_v49 = vpop.eup %9921 }
 0xe4c   :  { %v7576_v36 = vrot.slane %v9922_v49, 5 }
 0xe4e   :  { %v7578_v56 = vmul.f32 %v7576_v36, %v12408_v45 }
 0xe50   :  { %v7580_v9 = vrot.slane %v7578_v56, 4 }
 0xe52   :  { %v7582_v41 = vmul.f32 %v7580_v9, %v7567_v4 }
 0xe54   :  { %v7584_v43 = vrot.slane %v7582_v41, 3 }
 0xe56   :  { %v7586_v35 = vsub.f32 %v12408_v45, %v7584_v43 }
 0xe58   :  { %v7588_v55 = vrot.slane %v7586_v35, 4 }
 0xe5a   :  { %v7590_v38 = vsel %vm2397_vm3, %v7580_v9, %v7588_v55 }
 0xe5b   :  { %9642 = vmatmul.mubr.msk.f32.vlgmr.msra.gmra.mxu0 %vm6443_vm9, %v7590_v38 }
 0xf1b   :  { %v7662_v60 = vpop.f32.mrf.mxu0 }
 0xf1c   :  { %v7669_v33 = vrot.slane %v7662_v60, %v12421_v34  ;;  %v7674_v5 = vrot.slane %v7662_v60, %v12424_v47 }
 0xf1d   :  { %v9643_v20 = vpop.f32.mrf.mxu0 }
 0xf1e   :  { %v7670_v31 = vmul.f32 %v7669_v33, %v13449_v26 }
 0xf20   :  { %v7675_v42 = vadd.f32 %v7674_v5, %v7670_v31 }
 0xf22   :  { %v7676_v22 = vmax.f32 %v7675_v42, 0.0 }
 0xf23   :  { %9940 = dma.done.wait [#allocation6 + $0x3], 1152 }
 0xf24   :  { %9941 = vsyncadd [#allocation6 + $0x3], 4294966144  ;;  %v7685_v18 = vpack.c.bf16 %v7676_v22, %v7676_v22  ;;  %9650 = vmatprep.subr.bf16.mxu0 %v14227_v7  ;;  %9656 = vmatprep.mubr.msk.bf16.mxu0 %vm9944_vm1, %v14227_v7  ;;  %v9923_v34 = vld [vmem:[%s13580_s12] sm:$0xff]   ;;  %v9924_v47 = vld [vmem:[%s13580_s12 + $0x8] ss:$0 sps:$4 sm:$0xff]   ;;  %v7960_v1 = vsub.s32 6, %v12418_v44 }
 0xf25   :  { %9646 = vmatprep.mubr.msk.bf16.mxu1 %vm3850_vm5, %v9923_v34  ;;  %v9925_v26 = vld [vmem:[#allocation5 + $0x10] sm:$0xff]   ;;  %v9926_v14 = vld [vmem:[#allocation5 + $0x28] sm:$0xff]   ;;  %v9928_v50 = vld [vmem:[#allocation5 + $0x20] sm:$0xff]  }
 0xf26   :  { %9680 = vmatprep.subr.msk.bf16.mxu1 %vm4602_vm6, %v7685_v18  ;;  %v7701_v27 = vsel %vm4602_vm6, %v7685_v18, 0  ;;  %v9927_v28 = vld [vmem:[#allocation5 + $0x8] sm:$0xff]   ;;  %9651 = vmatpush3.bf16.msra.mxu0 %v9926_v14  ;;  %v9929_v32 = vld [vmem:[#allocation5] sm:$0xff]   ;;  %v9930_v30 = vld [vmem:[#allocation5 + $0x18] sm:$0xff]   ;;  %v7961_v3 = vrot.slane %v12408_v45, %v7960_v1 }
 0xf27   :  { %9645 = vmatpush3.bf16.msra.mxu1 %v7701_v27  ;;  %9652 = vmatprep.subr.bf16.mxu0 %v14227_v7  ;;  %v9931_v8 = vld [vmem:[#allocation5 + $0x40] sm:$0xff]   ;;  %v9932_v23 = vld [vmem:[#allocation5 + $0x38] sm:$0xff]   ;;  %v9933_v40 = vld [vmem:[#allocation5 + $0x30] sm:$0xff]  }
 0xf28   :  { %9660 = vmatprep.subr.bf16.mxu1 %v14227_v7 }
 0xf2a   :  { %9647 = vmatmul.mubr.msk.bf16.vlgmr.msra.gmra.mxu1 %vm3850_vm5, %v9924_v47  ;;  %9653 = vmatpush3.bf16.msra.mxu0 %v9928_v50 }
 0xf2b   :  { %9661 = vmatpush3.bf16.msra.mxu1 %v9925_v26  ;;  %9666 = vmatprep.mubr.msk.bf16.mxu1 %vm9944_vm1, %v14227_v7 }
 0xf2c   :  { %9662 = vmatprep.subr.bf16.mxu1 %v14227_v7  ;;  %9654 = vmatprep.subr.bf16.mxu0 %v14227_v7 }
 0xf2e   :  { %9655 = vmatpush3.bf16.msra.mxu0 %v9930_v30 }
 0xf2f   :  { %9663 = vmatpush3.bf16.msra.mxu1 %v9927_v28  ;;  %9670 = vmatprep.subr.bf16.mxu0 %v14227_v7 }
 0xf30   :  { %9664 = vmatprep.subr.bf16.mxu1 %v14227_v7 }
 0xf33   :  { %9665 = vmatpush3.bf16.msra.mxu1 %v9929_v32 }
 0xfea   :  { %v9648_v59 = vpop.f32.mrf.mxu1 }
 0xfeb   :  { %v7888_v2 = vpack.c.bf16 %v9648_v59, %v9648_v59 }
 0xfec   :  { %v7737_v53 = vpop.f32.mrf.mxu1 }
 0xfed   :  { %v7751_v0 = vpack.c.bf16 %v7737_v53, %v7737_v53 }
 0xfee   :  { %v9649_v46 = vpop.f32.mrf.mxu1 }
 0xfef   :  { %9667 = vmatmul.mubr.msk.bf16.vlgmr.msra.gmra.mxu1 %vm7030_vm10, %v7751_v0 }
 0xff0   :  { %v7740_v48 = vpop.f32.mrf.mxu1 }
 0xff1   :  { %v7758_v10 = vpack.c.bf16 %v7740_v48, %v7740_v48 }
 0xff3   :  { %9657 = vmatmul.mubr.msk.bf16.vlgmr.msra.gmra.mxu0 %vm7030_vm10, %v7758_v10 }
 0xff4   :  { %9671 = vmatpush3.bf16.msra.mxu0 %v9931_v8  ;;  %9676 = vmatprep.mubr.msk.bf16.mxu0 %vm9944_vm1, %v14227_v7 }
 0xff5   :  { %9672 = vmatprep.subr.bf16.mxu0 %v14227_v7 }
 0xff8   :  { %9673 = vmatpush3.bf16.msra.mxu0 %v9932_v23 }
 0xff9   :  { %9674 = vmatprep.subr.bf16.mxu0 %v14227_v7 }
 0xffc   :  { %9675 = vmatpush3.bf16.msra.mxu0 %v9933_v40 }
 0xfff   :  { %9677 = vmatmul.mubr.msk.bf16.vlgmr.msra.gmra.mxu0 %vm7030_vm10, %v7888_v2 }
0x10af   :  { %v7882_v6 = vpop.f32.mrf.mxu1 }
0x10b1   :  { %v9668_v37 = vpop.f32.mrf.mxu1 }
0x10b3   :  { %v7821_v13 = vpop.f32.mrf.mxu0  ;;  %v7885_v61 = vpop.f32.mrf.mxu1 }
0x10b4   :  { %v7883_v54 = vadd.f32 %v7882_v6, %v7821_v13 }
0x10b5   :  { %v9658_v25 = vpop.f32.mrf.mxu0  ;;  %v9669_v17 = vpop.f32.mrf.mxu1 }
0x10b7   :  { %v7824_v57 = vpop.f32.mrf.mxu0 }
0x10b9   :  { %v9659_v24 = vpop.f32.mrf.mxu0 }
0x10bf   :  { %v7951_v15 = vpop.f32.mrf.mxu0 }
0x10c0   :  { %v7957_v51 = vadd.f32 %v7951_v15, %v7883_v54 }
0x10c1   :  { %v9678_v7 = vpop.f32.mrf.mxu0 }
0x10c2   :  { %v7962_v19 = vadd.f32 %v7961_v3, %v7957_v51 }
0x10c3   :  { %v7954_v12 = vpop.f32.mrf.mxu0 }
0x10c4   :  { %7963 = vst [vmem:[%s13586_s18] sm:$0xff] %v7962_v19 }
0x10c5   :  { %v9679_v29 = vpop.f32.mrf.mxu0 }
0x10c6   :  { %7968 = vsyncmov [#allocation6] }
0x10c9   :  { %s7969_s7 = vpop.sfrf %7968 }
0x10ca   :  { %p8469_p0 = scmp.ne.s32.totalorder %s7969_s7, 0 }
0x10cc   :  { %7973 = shalt.err (%p8469_p0)  }
0x10cd   :  { %7975 = vsyncmov [#allocation6 + $0x1] }
0x10d0   :  { %s7976_s24 = vpop.sfrf %7975 }
0x10d1   :  { %p8470_p1 = scmp.ne.s32.totalorder %s7976_s24, 0 }
0x10d3   :  { %7980 = shalt.err (%p8470_p1)  }
0x10d4   :  { %7982 = vsyncmov [#allocation6 + $0x2] }
0x10d7   :  { %s7983_s25 = vpop.sfrf %7982 }
0x10d8   :  { %p8471_p2 = scmp.ne.s32.totalorder %s7983_s25, 0 }
0x10da   :  { %7987 = shalt.err (%p8471_p2)  }
0x10db   :  { %7989 = vsyncmov [#allocation6 + $0x3] }
0x10de   :  { %s7990_s14 = vpop.sfrf %7989 }
0x10df   :  { %p8472_p3 = scmp.ne.s32.totalorder %s7990_s14, 0 }
0x10e1   :  { %7994 = shalt.err (%p8472_p3)  }

</bundles_post_ra>
